<compile_context>
chip_gen: v6e
topology: v6e:2x2x1
jax: 0.10.0
libtpu: 0.0.40
codegen_flags: <defaults>
</compile_context>

<pallas_src>
import functools

import jax
import jax.numpy as jnp
from jax.experimental import pallas as pl
from jax.experimental.pallas import tpu as pltpu


def _round_up(x, m):
    return ((x + m - 1) // m) * m


def _pick_T(s, max_T=8):
    # largest divisor of s that is <= max_T (timesteps per grid step)
    for t in range(min(s, max_T), 0, -1):
        if s % t == 0:
            return t
    return 1


def _obs_kernel(y_ref, c_ref, a_ref, o_ref, mtm_ref, rhs_ref, abssum_ref,
                ocur_ref, absacc_ref):
    i = pl.program_id(0)
    T = y_ref.shape[0]

    @pl.when(i == 0)
    def _():
        ocur_ref[...] = c_ref[...]
        mtm_ref[...] = jnp.zeros_like(mtm_ref)
        rhs_ref[...] = jnp.zeros_like(rhs_ref)
        absacc_ref[...] = jnp.zeros_like(absacc_ref)

    a = a_ref[...]
    yblk = y_ref[...]                                        # (T, b_p, obs_p)

    # partial |y| accumulation: pure VPU elementwise, full cross-lane reduce at the end
    absacc_ref[...] += jnp.sum(jnp.abs(yblk), axis=0)        # (b_p, obs_p)

    mtm = mtm_ref[...]
    rhs = rhs_ref[...]
    oc = ocur_ref[...]                                       # (obs_p, hid_p) = C A^{iT}
    for t in range(T):                                       # static unroll over T steps
        o_ref[t] = oc
        # MtM += (C A^k)^T (C A^k)
        mtm = mtm + jax.lax.dot_general(
            oc, oc, dimension_numbers=(((0,), (0,)), ((), ())),
            preferred_element_type=jnp.float32)
        # rhs += y_k @ (C A^k)
        rhs = rhs + jnp.dot(yblk[t], oc, preferred_element_type=jnp.float32)
        # advance: C A^{k+1}
        oc = jnp.dot(oc, a, preferred_element_type=jnp.float32)
    ocur_ref[...] = oc                                       # carry to next grid step
    mtm_ref[...] = mtm
    rhs_ref[...] = rhs

    @pl.when(i == pl.num_programs(0) - 1)
    def _():
        abssum_ref[...] = jnp.sum(absacc_ref[...], keepdims=True)


def _recon_kernel(x0_ref, y_ref, ct_ref, at_ref, invlam_ref,
                  yhat_ref, w_ref, sqerr_ref, xcur_ref, sqacc_ref):
    i = pl.program_id(0)
    T = y_ref.shape[0]

    @pl.when(i == 0)
    def _():
        xcur_ref[...] = x0_ref[...]
        sqacc_ref[...] = jnp.zeros_like(sqacc_ref)

    inv_lam = invlam_ref[0]                                  # SMEM scalar
    at = at_ref[...]                                         # (hid_p, hid_p) = A^T
    ct = ct_ref[...]                                         # (hid_p, obs_p) = C^T
    yblk = y_ref[...]                                        # (T, b_p, obs_p)
    sq = sqacc_ref[...]
    xt = xcur_ref[...]                                       # (b_p, hid_p) = (A^k x0)^T
    for t in range(T):                                       # static unroll over T steps
        # yhat_k^T = x_k^T @ C^T  -> lane-dense (b_p, obs_p)
        yhat_t = jnp.dot(xt, ct, preferred_element_type=jnp.float32)
        yhat_ref[t] = yhat_t
        wv = (yblk[t] - yhat_t) * inv_lam
        w_ref[t] = wv
        sq = sq + wv * wv
        # advance: x_{k+1}^T = x_k^T @ A^T
        xt = jnp.dot(xt, at, preferred_element_type=jnp.float32)
    xcur_ref[...] = xt                                       # carry to next grid step
    sqacc_ref[...] = sq

    @pl.when(i == pl.num_programs(0) - 1)
    def _():
        sqerr_ref[...] = jnp.sum(sqacc_ref[...], keepdims=True)


def _build_A(hidden):
    # StableRealJordanForm with eig_alpha = eig_beta = 0.5 (constant init)
    half = hidden // 2
    eig_alpha = jnp.full((half,), 0.5, jnp.float32)
    eig_beta = jnp.full((half,), 0.5, jnp.float32)
    alpha = jnp.clip(1.0 - 1e-14 - jnp.abs(eig_alpha), 0.0, None)
    beta = jnp.clip(1.0 - jnp.abs(eig_beta), 0.0, None) * jnp.sqrt(1.0 - alpha ** 2)
    A = jnp.zeros((hidden, hidden), jnp.float32)
    idx = jnp.arange(half) * 2
    A = A.at[idx, idx].set(alpha)
    A = A.at[idx + 1, idx + 1].set(alpha)
    A = A.at[idx, idx + 1].set(beta)
    A = A.at[idx + 1, idx].set(-beta)
    return A


def _build_C(key, obs, hidden):
    # xavier_uniform then orthogonalize via SVD (C = U V^T), as in reset_parameters()
    bound = (6.0 / (obs + hidden)) ** 0.5
    c0 = jax.random.uniform(key, (obs, hidden), jnp.float32, -bound, bound)
    u, _, vt = jnp.linalg.svd(c0, full_matrices=False)
    return (u @ vt).astype(jnp.float32)


@functools.partial(jax.jit, static_argnames=("prediction_alpha",))
def frame_prediction_forward(x, C, A, prediction_alpha=1.0):
    b, s, c, h, w = x.shape
    obs = c * h * w
    hidden = C.shape[1]
    M = float(obs)

    # lane/sublane-friendly padded sizes (kernel-facing layout only)
    obs_p = _round_up(obs, 128)
    hid_p = _round_up(hidden, 128)
    b_p = _round_up(b, 8)
    T = _pick_T(s)
    n_steps = s // T

    # TODO(synk): ReversibleFlow / AffineFlowStep are external modules not provided here;
    # an identity flow is used (zcat = flattened frame, logdet = 0).
    zcat = x.reshape(b * s, obs).astype(jnp.float32)
    logdet = jnp.zeros((b * s,), jnp.float32)
    y = zcat.reshape(b, s, obs)
    Y = y.reshape(b, s * obs)

    # time-major, zero-padded stream; both kernels consume this single copy
    y_sbo = jnp.transpose(y, (1, 0, 2))                      # (s, b, obs)
    y_pad = jnp.zeros((s, b_p, obs_p), jnp.float32).at[:, :b, :obs].set(y_sbo)
    C_pad = jnp.zeros((obs_p, hid_p), jnp.float32).at[:obs, :hidden].set(C)
    A_pad = jnp.zeros((hid_p, hid_p), jnp.float32).at[:hidden, :hidden].set(A)
    # transposed copies for the reconstruction kernel (plain, non-transposed matmuls)
    C_T_pad = C_pad.T
    A_T_pad = A_pad.T

    # TODO(synk): at real frame sizes add a "parallel" obs-tile grid axis for v7x's
    # 2 TensorCores; at obs_p=128 there is only one tile so it is omitted here.
    O_pad, MtM_pad, rhs_pad, abssum = pl.pallas_call(
        _obs_kernel,
        out_shape=(
            jax.ShapeDtypeStruct((s, obs_p, hid_p), jnp.float32),
            jax.ShapeDtypeStruct((hid_p, hid_p), jnp.float32),
            jax.ShapeDtypeStruct((b_p, hid_p), jnp.float32),
            jax.ShapeDtypeStruct((1, 1), jnp.float32),
        ),
        grid_spec=pltpu.PrefetchScalarGridSpec(
            num_scalar_prefetch=0,
            grid=(n_steps,),
            in_specs=[
                pl.BlockSpec((T, b_p, obs_p), lambda i: (i, 0, 0)),
                pl.BlockSpec((obs_p, hid_p), lambda i: (0, 0)),
                pl.BlockSpec((hid_p, hid_p), lambda i: (0, 0)),
            ],
            out_specs=[
                pl.BlockSpec((T, obs_p, hid_p), lambda i: (i, 0, 0)),
                pl.BlockSpec((hid_p, hid_p), lambda i: (0, 0)),
                pl.BlockSpec((b_p, hid_p), lambda i: (0, 0)),
                pl.BlockSpec((1, 1), lambda i: (0, 0)),
            ],
            scratch_shapes=[
                pltpu.VMEM((obs_p, hid_p), jnp.float32),     # carried C A^k
                pltpu.VMEM((b_p, obs_p), jnp.float32),       # |y| partial sums
            ],
        ),
        compiler_params=pltpu.CompilerParams(
            dimension_semantics=("arbitrary",),
            vmem_limit_bytes=48 * 1024 * 1024),
    )(y_pad, C_pad, A_pad)

    scaling_lambda = abssum[0, 0] / (b * s * obs)

    # Small (hidden x hidden) normal-equations solve: plain JAX glue (no Pallas cholesky).
    # Padded MtM is singular, so slice back to true sizes first.
    MtM = MtM_pad[:hidden, :hidden]
    rhs = rhs_pad[:b, :hidden]
    L = jnp.linalg.cholesky(MtM)
    z = jax.scipy.linalg.solve_triangular(L, rhs.T, lower=True)
    x0 = jax.scipy.linalg.solve_triangular(L.T, z, lower=False)    # (hidden, b)

    x0_pad = jnp.zeros((b_p, hid_p), jnp.float32).at[:b, :hidden].set(x0.T)
    inv_lambda = (1.0 / scaling_lambda).reshape(1).astype(jnp.float32)

    Yhat_pad, W_pad, sqerr = pl.pallas_call(
        _recon_kernel,
        out_shape=(
            jax.ShapeDtypeStruct((s, b_p, obs_p), jnp.float32),
            jax.ShapeDtypeStruct((s, b_p, obs_p), jnp.float32),
            jax.ShapeDtypeStruct((1, 1), jnp.float32),
        ),
        grid_spec=pltpu.PrefetchScalarGridSpec(
            num_scalar_prefetch=0,
            grid=(n_steps,),
            in_specs=[
                pl.BlockSpec((b_p, hid_p), lambda i: (0, 0)),
                pl.BlockSpec((T, b_p, obs_p), lambda i: (i, 0, 0)),
                pl.BlockSpec((hid_p, obs_p), lambda i: (0, 0)),
                pl.BlockSpec((hid_p, hid_p), lambda i: (0, 0)),
                pl.BlockSpec(memory_space=pltpu.MemorySpace.SMEM),
            ],
            out_specs=[
                pl.BlockSpec((T, b_p, obs_p), lambda i: (i, 0, 0)),
                pl.BlockSpec((T, b_p, obs_p), lambda i: (i, 0, 0)),
                pl.BlockSpec((1, 1), lambda i: (0, 0)),
            ],
            scratch_shapes=[
                pltpu.VMEM((b_p, hid_p), jnp.float32),       # carried latent state
                pltpu.VMEM((b_p, obs_p), jnp.float32),       # w*w partial sums
            ],
        ),
        compiler_params=pltpu.CompilerParams(
            dimension_semantics=("arbitrary",),
            vmem_limit_bytes=48 * 1024 * 1024),
    )(x0_pad, y_pad, C_T_pad, A_T_pad, inv_lambda)

    prediction_error = sqerr[0, 0] / (s * obs * b)
    log_likelihood = jnp.mean(logdet / M) - jnp.log(scaling_lambda)
    loss = -log_likelihood + prediction_alpha * prediction_error

    # aux outputs restored to the PyTorch layout (padding sliced off; aux-only cost,
    # not on the loss path)
    O = O_pad[:, :obs, :hidden].reshape(s * obs, hidden)
    Yhat = jnp.transpose(Yhat_pad[:, :b, :obs], (0, 2, 1)).reshape(s * obs, b)
    W = jnp.transpose(W_pad[:, :b, :obs], (0, 2, 1)).reshape(s * obs, b)
    return loss, (W, Y, Yhat, y, x0, logdet / M, prediction_error, O, scaling_lambda)


def reference_forward(x, C, A, prediction_alpha=1.0):
    # Pure-JAX mirror of the PyTorch forward (identity flow), used for validation.
    b, s, c, h, w = x.shape
    obs = c * h * w
    M = float(obs)
    zcat = x.reshape(b * s, obs).astype(jnp.float32)
    logdet = jnp.zeros((b * s,), jnp.float32)
    y = zcat.reshape(b, s, obs)
    Y = y.reshape(b, -1)
    scaling_lambda = jnp.mean(jnp.abs(y))
    MtM = C.T @ C
    O = [C]
    for _ in range(s - 1):
        O.append(O[-1] @ A)
        MtM = MtM + O[-1].T @ O[-1]
    O = jnp.concatenate(O, axis=0)
    L = jnp.linalg.cholesky(MtM)
    rhs = Y @ O
    z = jax.scipy.linalg.solve_triangular(L, rhs.T, lower=True)
    x0 = jax.scipy.linalg.solve_triangular(L.T, z, lower=False)
    xtemp = x0
    yhat = [C @ xtemp]
    for _ in range(s - 1):
        xtemp = A @ xtemp
        yhat.append(C @ xtemp)
    Yhat = jnp.concatenate(yhat, axis=0)
    wres = (Y.T - Yhat) / scaling_lambda
    prediction_error = jnp.mean(wres * wres)
    log_likelihood = jnp.mean(logdet / M) - jnp.log(scaling_lambda)
    return -log_likelihood + prediction_alpha * prediction_error


if __name__ == "__main__":
    key = jax.random.PRNGKey(0)
    kx, kc = jax.random.split(key)

    # small shapes consistent with the module: x:(b, s, c, h, w)
    b, s, c, h, w = 2, 8, 1, 4, 4
    obs = c * h * w                                        # observation_dim = 16
    extra_hidden_dim, max_hidden_dim = 8, 128
    hidden = min(obs + extra_hidden_dim, max_hidden_dim)   # hidden_dim = 24 (even)
    assert hidden % 2 == 0

    x = jax.random.normal(kx, (b, s, c, h, w), jnp.float32)
    C = _build_C(kc, obs, hidden)
    A = _build_A(hidden)

    loss, aux = frame_prediction_forward(x, C, A)
    loss = jax.block_until_ready(loss)

    ref_loss = jax.block_until_ready(reference_forward(x, C, A))
    assert jnp.allclose(loss, ref_loss, rtol=1e-3, atol=1e-3), (loss, ref_loss)

    print("KERNEL_OK")
</pallas_src>

<mosaic_0001>
module attributes {stable_mosaic.version = 11 : i64} {
  func.func @_obs_kernel(%arg0: i32, %arg1: memref<8x8x128xf32, #tpu.memory_space<vmem>>, %arg2: memref<128x128xf32, #tpu.memory_space<vmem>>, %arg3: memref<128x128xf32, #tpu.memory_space<vmem>>, %arg4: memref<8x128x128xf32, #tpu.memory_space<vmem>>, %arg5: memref<128x128xf32, #tpu.memory_space<vmem>>, %arg6: memref<8x128xf32, #tpu.memory_space<vmem>>, %arg7: memref<1x1xf32, #tpu.memory_space<vmem>>, %arg8: memref<128x128xf32, #tpu.memory_space<vmem>>, %arg9: memref<8x128xf32, #tpu.memory_space<vmem>>) attributes {dimension_semantics = [#tpu.dimension_semantics<arbitrary>], iteration_bounds = array<i64: 1>, scalar_prefetch = 0 : i64, scratch_operands = 2 : i64, tpu.core_type = #tpu.core_type<tc>, window_params = [{transform_indices = @transform_0, window_bounds = array<i64: 8, 8, 128>}, {pipeline_mode = #tpu.pipeline_mode<synchronous>, transform_indices = @transform_1, window_bounds = array<i64: 128, 128>}, {pipeline_mode = #tpu.pipeline_mode<synchronous>, transform_indices = @transform_2, window_bounds = array<i64: 128, 128>}, {transform_indices = @transform_3, window_bounds = array<i64: 8, 128, 128>}, {pipeline_mode = #tpu.pipeline_mode<synchronous>, transform_indices = @transform_4, window_bounds = array<i64: 128, 128>}, {pipeline_mode = #tpu.pipeline_mode<synchronous>, transform_indices = @transform_5, window_bounds = array<i64: 8, 128>}, {pipeline_mode = #tpu.pipeline_mode<synchronous>, transform_indices = @transform_6, window_bounds = array<i64: 1, 1>}]} {
    %c0_i32 = arith.constant 0 : i32
    %0 = arith.cmpi eq, %arg0, %c0_i32 : i32
    %1 = arith.extui %0 : i1 to i32
    %c0_i32_0 = arith.constant 0 : i32
    %2 = arith.cmpi ne, %1, %c0_i32_0 : i32
    scf.if %2 {
      %c0_64 = arith.constant 0 : index
      %c0_65 = arith.constant 0 : index
      %99 = vector.load %arg2[%c0_64, %c0_65] : memref<128x128xf32, #tpu.memory_space<vmem>>, vector<128x128xf32>
      %c0_66 = arith.constant 0 : index
      %c0_67 = arith.constant 0 : index
      %100 = vector.load %arg8[%c0_66, %c0_67] : memref<128x128xf32, #tpu.memory_space<vmem>>, vector<128x128xf32>
      tpu.vector_store %arg8[%c0_66, %c0_67], %99 {strides = array<i32>} : memref<128x128xf32, #tpu.memory_space<vmem>>, vector<128x128xf32>,
      %cst_68 = arith.constant 0.000000e+00 : f32
      %101 = vector.broadcast %cst_68 : f32 to vector<128x128xf32>
      %c0_69 = arith.constant 0 : index
      %c0_70 = arith.constant 0 : index
      %102 = vector.load %arg5[%c0_69, %c0_70] : memref<128x128xf32, #tpu.memory_space<vmem>>, vector<128x128xf32>
      tpu.vector_store %arg5[%c0_69, %c0_70], %101 {strides = array<i32>} : memref<128x128xf32, #tpu.memory_space<vmem>>, vector<128x128xf32>,
      %cst_71 = arith.constant 0.000000e+00 : f32
      %103 = vector.broadcast %cst_71 : f32 to vector<8x128xf32>
      %c0_72 = arith.constant 0 : index
      %c0_73 = arith.constant 0 : index
      %104 = vector.load %arg6[%c0_72, %c0_73] : memref<8x128xf32, #tpu.memory_space<vmem>>, vector<8x128xf32>
      tpu.vector_store %arg6[%c0_72, %c0_73], %103 {strides = array<i32>} : memref<8x128xf32, #tpu.memory_space<vmem>>, vector<8x128xf32>,
      %cst_74 = arith.constant 0.000000e+00 : f32
      %105 = vector.broadcast %cst_74 : f32 to vector<8x128xf32>
      %c0_75 = arith.constant 0 : index
      %c0_76 = arith.constant 0 : index
      %106 = vector.load %arg9[%c0_75, %c0_76] : memref<8x128xf32, #tpu.memory_space<vmem>>, vector<8x128xf32>
      tpu.vector_store %arg9[%c0_75, %c0_76], %105 {strides = array<i32>} : memref<8x128xf32, #tpu.memory_space<vmem>>, vector<8x128xf32>,
    } else {
    }
    %c0 = arith.constant 0 : index
    %c0_1 = arith.constant 0 : index
    %3 = vector.load %arg3[%c0, %c0_1] : memref<128x128xf32, #tpu.memory_space<vmem>>, vector<128x128xf32>
    %c0_2 = arith.constant 0 : index
    %c0_3 = arith.constant 0 : index
    %c0_4 = arith.constant 0 : index
    %4 = vector.load %arg1[%c0_2, %c0_3, %c0_4] : memref<8x8x128xf32, #tpu.memory_space<vmem>>, vector<8x8x128xf32>
    %c0_5 = arith.constant 0 : index
    %c0_6 = arith.constant 0 : index
    %5 = vector.load %arg9[%c0_5, %c0_6] : memref<8x128xf32, #tpu.memory_space<vmem>>, vector<8x128xf32>
    %6 = math.absf %4 : vector<8x8x128xf32>
    %cst = arith.constant dense<0.000000e+00> : vector<8x128xf32>
    %7 = vector.multi_reduction <add>, %6, %cst [0] : vector<8x8x128xf32> to vector<8x128xf32>
    %8 = arith.addf %5, %7 : vector<8x128xf32>
    %c0_7 = arith.constant 0 : index
    %c0_8 = arith.constant 0 : index
    %9 = vector.load %arg9[%c0_7, %c0_8] : memref<8x128xf32, #tpu.memory_space<vmem>>, vector<8x128xf32>
    tpu.vector_store %arg9[%c0_7, %c0_8], %8 {strides = array<i32>} : memref<8x128xf32, #tpu.memory_space<vmem>>, vector<8x128xf32>,
    %c0_9 = arith.constant 0 : index
    %c0_10 = arith.constant 0 : index
    %10 = vector.load %arg5[%c0_9, %c0_10] : memref<128x128xf32, #tpu.memory_space<vmem>>, vector<128x128xf32>
    %c0_11 = arith.constant 0 : index
    %c0_12 = arith.constant 0 : index
    %11 = vector.load %arg6[%c0_11, %c0_12] : memref<8x128xf32, #tpu.memory_space<vmem>>, vector<8x128xf32>
    %c0_13 = arith.constant 0 : index
    %c0_14 = arith.constant 0 : index
    %12 = vector.load %arg8[%c0_13, %c0_14] : memref<128x128xf32, #tpu.memory_space<vmem>>, vector<128x128xf32>
    %c0_15 = arith.constant 0 : index
    %c0_16 = arith.constant 0 : index
    %c0_17 = arith.constant 0 : index
    %13 = vector.load %arg4[%c0_15, %c0_16, %c0_17] : memref<8x128x128xf32, #tpu.memory_space<vmem>>, vector<1x128x128xf32>
    %14 = vector.shape_cast %13 : vector<1x128x128xf32> to vector<128x128xf32>
    %15 = vector.shape_cast %12 : vector<128x128xf32> to vector<1x128x128xf32>
    tpu.vector_store %arg4[%c0_15, %c0_16, %c0_17], %15 {strides = array<i32>} : memref<8x128x128xf32, #tpu.memory_space<vmem>>, vector<1x128x128xf32>,
    %cst_18 = arith.constant dense<0.000000e+00> : vector<128x128xf32>
    %16 = tpu.matmul %12, %12, %cst_18 {dimension_numbers = #tpu.dot_dimension_numbers<[0], [0], [1], [1], [0, 1, 1, 1], [], []>} : vector<128x128xf32>, vector<128x128xf32>, vector<128x128xf32> -> vector<128x128xf32>
    %17 = arith.addf %10, %16 : vector<128x128xf32>
    %18 = vector.extract_strided_slice %4 {offsets = [0, 0, 0], sizes = [1, 8, 128], strides = [1, 1, 1]} : vector<8x8x128xf32> to vector<1x8x128xf32>
    %19 = vector.shape_cast %18 : vector<1x8x128xf32> to vector<8x128xf32>
    %cst_19 = arith.constant dense<0.000000e+00> : vector<8x128xf32>
    %20 = tpu.matmul %19, %12, %cst_19 {dimension_numbers = #tpu.dot_dimension_numbers<[1], [0], [0], [1], [0, 0, 1, 1], [], []>} : vector<8x128xf32>, vector<128x128xf32>, vector<8x128xf32> -> vector<8x128xf32>
    %21 = arith.addf %11, %20 : vector<8x128xf32>
    %cst_20 = arith.constant dense<0.000000e+00> : vector<128x128xf32>
    %22 = tpu.matmul %12, %3, %cst_20 {dimension_numbers = #tpu.dot_dimension_numbers<[1], [0], [0], [1], [0, 0, 1, 1], [], []>} : vector<128x128xf32>, vector<128x128xf32>, vector<128x128xf32> -> vector<128x128xf32>
    %c1 = arith.constant 1 : index
    %c0_21 = arith.constant 0 : index
    %c0_22 = arith.constant 0 : index
    %23 = vector.load %arg4[%c1, %c0_21, %c0_22] : memref<8x128x128xf32, #tpu.memory_space<vmem>>, vector<1x128x128xf32>
    %24 = vector.shape_cast %23 : vector<1x128x128xf32> to vector<128x128xf32>
    %25 = vector.shape_cast %22 : vector<128x128xf32> to vector<1x128x128xf32>
    tpu.vector_store %arg4[%c1, %c0_21, %c0_22], %25 {strides = array<i32>} : memref<8x128x128xf32, #tpu.memory_space<vmem>>, vector<1x128x128xf32>,
    %cst_23 = arith.constant dense<0.000000e+00> : vector<128x128xf32>
    %26 = tpu.matmul %22, %22, %cst_23 {dimension_numbers = #tpu.dot_dimension_numbers<[0], [0], [1], [1], [0, 1, 1, 1], [], []>} : vector<128x128xf32>, vector<128x128xf32>, vector<128x128xf32> -> vector<128x128xf32>
    %27 = arith.addf %17, %26 : vector<128x128xf32>
    %28 = vector.extract_strided_slice %4 {offsets = [1, 0, 0], sizes = [1, 8, 128], strides = [1, 1, 1]} : vector<8x8x128xf32> to vector<1x8x128xf32>
    %29 = vector.shape_cast %28 : vector<1x8x128xf32> to vector<8x128xf32>
    %cst_24 = arith.constant dense<0.000000e+00> : vector<8x128xf32>
    %30 = tpu.matmul %29, %22, %cst_24 {dimension_numbers = #tpu.dot_dimension_numbers<[1], [0], [0], [1], [0, 0, 1, 1], [], []>} : vector<8x128xf32>, vector<128x128xf32>, vector<8x128xf32> -> vector<8x128xf32>
    %31 = arith.addf %21, %30 : vector<8x128xf32>
    %cst_25 = arith.constant dense<0.000000e+00> : vector<128x128xf32>
    %32 = tpu.matmul %22, %3, %cst_25 {dimension_numbers = #tpu.dot_dimension_numbers<[1], [0], [0], [1], [0, 0, 1, 1], [], []>} : vector<128x128xf32>, vector<128x128xf32>, vector<128x128xf32> -> vector<128x128xf32>
    %c2 = arith.constant 2 : index
    %c0_26 = arith.constant 0 : index
    %c0_27 = arith.constant 0 : index
    %33 = vector.load %arg4[%c2, %c0_26, %c0_27] : memref<8x128x128xf32, #tpu.memory_space<vmem>>, vector<1x128x128xf32>
    %34 = vector.shape_cast %33 : vector<1x128x128xf32> to vector<128x128xf32>
    %35 = vector.shape_cast %32 : vector<128x128xf32> to vector<1x128x128xf32>
    tpu.vector_store %arg4[%c2, %c0_26, %c0_27], %35 {strides = array<i32>} : memref<8x128x128xf32, #tpu.memory_space<vmem>>, vector<1x128x128xf32>,
    %cst_28 = arith.constant dense<0.000000e+00> : vector<128x128xf32>
    %36 = tpu.matmul %32, %32, %cst_28 {dimension_numbers = #tpu.dot_dimension_numbers<[0], [0], [1], [1], [0, 1, 1, 1], [], []>} : vector<128x128xf32>, vector<128x128xf32>, vector<128x128xf32> -> vector<128x128xf32>
    %37 = arith.addf %27, %36 : vector<128x128xf32>
    %38 = vector.extract_strided_slice %4 {offsets = [2, 0, 0], sizes = [1, 8, 128], strides = [1, 1, 1]} : vector<8x8x128xf32> to vector<1x8x128xf32>
    %39 = vector.shape_cast %38 : vector<1x8x128xf32> to vector<8x128xf32>
    %cst_29 = arith.constant dense<0.000000e+00> : vector<8x128xf32>
    %40 = tpu.matmul %39, %32, %cst_29 {dimension_numbers = #tpu.dot_dimension_numbers<[1], [0], [0], [1], [0, 0, 1, 1], [], []>} : vector<8x128xf32>, vector<128x128xf32>, vector<8x128xf32> -> vector<8x128xf32>
    %41 = arith.addf %31, %40 : vector<8x128xf32>
    %cst_30 = arith.constant dense<0.000000e+00> : vector<128x128xf32>
    %42 = tpu.matmul %32, %3, %cst_30 {dimension_numbers = #tpu.dot_dimension_numbers<[1], [0], [0], [1], [0, 0, 1, 1], [], []>} : vector<128x128xf32>, vector<128x128xf32>, vector<128x128xf32> -> vector<128x128xf32>
    %c3 = arith.constant 3 : index
    %c0_31 = arith.constant 0 : index
    %c0_32 = arith.constant 0 : index
    %43 = vector.load %arg4[%c3, %c0_31, %c0_32] : memref<8x128x128xf32, #tpu.memory_space<vmem>>, vector<1x128x128xf32>
    %44 = vector.shape_cast %43 : vector<1x128x128xf32> to vector<128x128xf32>
    %45 = vector.shape_cast %42 : vector<128x128xf32> to vector<1x128x128xf32>
    tpu.vector_store %arg4[%c3, %c0_31, %c0_32], %45 {strides = array<i32>} : memref<8x128x128xf32, #tpu.memory_space<vmem>>, vector<1x128x128xf32>,
    %cst_33 = arith.constant dense<0.000000e+00> : vector<128x128xf32>
    %46 = tpu.matmul %42, %42, %cst_33 {dimension_numbers = #tpu.dot_dimension_numbers<[0], [0], [1], [1], [0, 1, 1, 1], [], []>} : vector<128x128xf32>, vector<128x128xf32>, vector<128x128xf32> -> vector<128x128xf32>
    %47 = arith.addf %37, %46 : vector<128x128xf32>
    %48 = vector.extract_strided_slice %4 {offsets = [3, 0, 0], sizes = [1, 8, 128], strides = [1, 1, 1]} : vector<8x8x128xf32> to vector<1x8x128xf32>
    %49 = vector.shape_cast %48 : vector<1x8x128xf32> to vector<8x128xf32>
    %cst_34 = arith.constant dense<0.000000e+00> : vector<8x128xf32>
    %50 = tpu.matmul %49, %42, %cst_34 {dimension_numbers = #tpu.dot_dimension_numbers<[1], [0], [0], [1], [0, 0, 1, 1], [], []>} : vector<8x128xf32>, vector<128x128xf32>, vector<8x128xf32> -> vector<8x128xf32>
    %51 = arith.addf %41, %50 : vector<8x128xf32>
    %cst_35 = arith.constant dense<0.000000e+00> : vector<128x128xf32>
    %52 = tpu.matmul %42, %3, %cst_35 {dimension_numbers = #tpu.dot_dimension_numbers<[1], [0], [0], [1], [0, 0, 1, 1], [], []>} : vector<128x128xf32>, vector<128x128xf32>, vector<128x128xf32> -> vector<128x128xf32>
    %c4 = arith.constant 4 : index
    %c0_36 = arith.constant 0 : index
    %c0_37 = arith.constant 0 : index
    %53 = vector.load %arg4[%c4, %c0_36, %c0_37] : memref<8x128x128xf32, #tpu.memory_space<vmem>>, vector<1x128x128xf32>
    %54 = vector.shape_cast %53 : vector<1x128x128xf32> to vector<128x128xf32>
    %55 = vector.shape_cast %52 : vector<128x128xf32> to vector<1x128x128xf32>
    tpu.vector_store %arg4[%c4, %c0_36, %c0_37], %55 {strides = array<i32>} : memref<8x128x128xf32, #tpu.memory_space<vmem>>, vector<1x128x128xf32>,
    %cst_38 = arith.constant dense<0.000000e+00> : vector<128x128xf32>
    %56 = tpu.matmul %52, %52, %cst_38 {dimension_numbers = #tpu.dot_dimension_numbers<[0], [0], [1], [1], [0, 1, 1, 1], [], []>} : vector<128x128xf32>, vector<128x128xf32>, vector<128x128xf32> -> vector<128x128xf32>
    %57 = arith.addf %47, %56 : vector<128x128xf32>
    %58 = vector.extract_strided_slice %4 {offsets = [4, 0, 0], sizes = [1, 8, 128], strides = [1, 1, 1]} : vector<8x8x128xf32> to vector<1x8x128xf32>
    %59 = vector.shape_cast %58 : vector<1x8x128xf32> to vector<8x128xf32>
    %cst_39 = arith.constant dense<0.000000e+00> : vector<8x128xf32>
    %60 = tpu.matmul %59, %52, %cst_39 {dimension_numbers = #tpu.dot_dimension_numbers<[1], [0], [0], [1], [0, 0, 1, 1], [], []>} : vector<8x128xf32>, vector<128x128xf32>, vector<8x128xf32> -> vector<8x128xf32>
    %61 = arith.addf %51, %60 : vector<8x128xf32>
    %cst_40 = arith.constant dense<0.000000e+00> : vector<128x128xf32>
    %62 = tpu.matmul %52, %3, %cst_40 {dimension_numbers = #tpu.dot_dimension_numbers<[1], [0], [0], [1], [0, 0, 1, 1], [], []>} : vector<128x128xf32>, vector<128x128xf32>, vector<128x128xf32> -> vector<128x128xf32>
    %c5 = arith.constant 5 : index
    %c0_41 = arith.constant 0 : index
    %c0_42 = arith.constant 0 : index
    %63 = vector.load %arg4[%c5, %c0_41, %c0_42] : memref<8x128x128xf32, #tpu.memory_space<vmem>>, vector<1x128x128xf32>
    %64 = vector.shape_cast %63 : vector<1x128x128xf32> to vector<128x128xf32>
    %65 = vector.shape_cast %62 : vector<128x128xf32> to vector<1x128x128xf32>
    tpu.vector_store %arg4[%c5, %c0_41, %c0_42], %65 {strides = array<i32>} : memref<8x128x128xf32, #tpu.memory_space<vmem>>, vector<1x128x128xf32>,
    %cst_43 = arith.constant dense<0.000000e+00> : vector<128x128xf32>
    %66 = tpu.matmul %62, %62, %cst_43 {dimension_numbers = #tpu.dot_dimension_numbers<[0], [0], [1], [1], [0, 1, 1, 1], [], []>} : vector<128x128xf32>, vector<128x128xf32>, vector<128x128xf32> -> vector<128x128xf32>
    %67 = arith.addf %57, %66 : vector<128x128xf32>
    %68 = vector.extract_strided_slice %4 {offsets = [5, 0, 0], sizes = [1, 8, 128], strides = [1, 1, 1]} : vector<8x8x128xf32> to vector<1x8x128xf32>
    %69 = vector.shape_cast %68 : vector<1x8x128xf32> to vector<8x128xf32>
    %cst_44 = arith.constant dense<0.000000e+00> : vector<8x128xf32>
    %70 = tpu.matmul %69, %62, %cst_44 {dimension_numbers = #tpu.dot_dimension_numbers<[1], [0], [0], [1], [0, 0, 1, 1], [], []>} : vector<8x128xf32>, vector<128x128xf32>, vector<8x128xf32> -> vector<8x128xf32>
    %71 = arith.addf %61, %70 : vector<8x128xf32>
    %cst_45 = arith.constant dense<0.000000e+00> : vector<128x128xf32>
    %72 = tpu.matmul %62, %3, %cst_45 {dimension_numbers = #tpu.dot_dimension_numbers<[1], [0], [0], [1], [0, 0, 1, 1], [], []>} : vector<128x128xf32>, vector<128x128xf32>, vector<128x128xf32> -> vector<128x128xf32>
    %c6 = arith.constant 6 : index
    %c0_46 = arith.constant 0 : index
    %c0_47 = arith.constant 0 : index
    %73 = vector.load %arg4[%c6, %c0_46, %c0_47] : memref<8x128x128xf32, #tpu.memory_space<vmem>>, vector<1x128x128xf32>
    %74 = vector.shape_cast %73 : vector<1x128x128xf32> to vector<128x128xf32>
    %75 = vector.shape_cast %72 : vector<128x128xf32> to vector<1x128x128xf32>
    tpu.vector_store %arg4[%c6, %c0_46, %c0_47], %75 {strides = array<i32>} : memref<8x128x128xf32, #tpu.memory_space<vmem>>, vector<1x128x128xf32>,
    %cst_48 = arith.constant dense<0.000000e+00> : vector<128x128xf32>
    %76 = tpu.matmul %72, %72, %cst_48 {dimension_numbers = #tpu.dot_dimension_numbers<[0], [0], [1], [1], [0, 1, 1, 1], [], []>} : vector<128x128xf32>, vector<128x128xf32>, vector<128x128xf32> -> vector<128x128xf32>
    %77 = arith.addf %67, %76 : vector<128x128xf32>
    %78 = vector.extract_strided_slice %4 {offsets = [6, 0, 0], sizes = [1, 8, 128], strides = [1, 1, 1]} : vector<8x8x128xf32> to vector<1x8x128xf32>
    %79 = vector.shape_cast %78 : vector<1x8x128xf32> to vector<8x128xf32>
    %cst_49 = arith.constant dense<0.000000e+00> : vector<8x128xf32>
    %80 = tpu.matmul %79, %72, %cst_49 {dimension_numbers = #tpu.dot_dimension_numbers<[1], [0], [0], [1], [0, 0, 1, 1], [], []>} : vector<8x128xf32>, vector<128x128xf32>, vector<8x128xf32> -> vector<8x128xf32>
    %81 = arith.addf %71, %80 : vector<8x128xf32>
    %cst_50 = arith.constant dense<0.000000e+00> : vector<128x128xf32>
    %82 = tpu.matmul %72, %3, %cst_50 {dimension_numbers = #tpu.dot_dimension_numbers<[1], [0], [0], [1], [0, 0, 1, 1], [], []>} : vector<128x128xf32>, vector<128x128xf32>, vector<128x128xf32> -> vector<128x128xf32>
    %c7 = arith.constant 7 : index
    %c0_51 = arith.constant 0 : index
    %c0_52 = arith.constant 0 : index
    %83 = vector.load %arg4[%c7, %c0_51, %c0_52] : memref<8x128x128xf32, #tpu.memory_space<vmem>>, vector<1x128x128xf32>
    %84 = vector.shape_cast %83 : vector<1x128x128xf32> to vector<128x128xf32>
    %85 = vector.shape_cast %82 : vector<128x128xf32> to vector<1x128x128xf32>
    tpu.vector_store %arg4[%c7, %c0_51, %c0_52], %85 {strides = array<i32>} : memref<8x128x128xf32, #tpu.memory_space<vmem>>, vector<1x128x128xf32>,
    %cst_53 = arith.constant dense<0.000000e+00> : vector<128x128xf32>
    %86 = tpu.matmul %82, %82, %cst_53 {dimension_numbers = #tpu.dot_dimension_numbers<[0], [0], [1], [1], [0, 1, 1, 1], [], []>} : vector<128x128xf32>, vector<128x128xf32>, vector<128x128xf32> -> vector<128x128xf32>
    %87 = arith.addf %77, %86 : vector<128x128xf32>
    %88 = vector.extract_strided_slice %4 {offsets = [7, 0, 0], sizes = [1, 8, 128], strides = [1, 1, 1]} : vector<8x8x128xf32> to vector<1x8x128xf32>
    %89 = vector.shape_cast %88 : vector<1x8x128xf32> to vector<8x128xf32>
    %cst_54 = arith.constant dense<0.000000e+00> : vector<8x128xf32>
    %90 = tpu.matmul %89, %82, %cst_54 {dimension_numbers = #tpu.dot_dimension_numbers<[1], [0], [0], [1], [0, 0, 1, 1], [], []>} : vector<8x128xf32>, vector<128x128xf32>, vector<8x128xf32> -> vector<8x128xf32>
    %91 = arith.addf %81, %90 : vector<8x128xf32>
    %cst_55 = arith.constant dense<0.000000e+00> : vector<128x128xf32>
    %92 = tpu.matmul %82, %3, %cst_55 {dimension_numbers = #tpu.dot_dimension_numbers<[1], [0], [0], [1], [0, 0, 1, 1], [], []>} : vector<128x128xf32>, vector<128x128xf32>, vector<128x128xf32> -> vector<128x128xf32>
    %c0_56 = arith.constant 0 : index
    %c0_57 = arith.constant 0 : index
    %93 = vector.load %arg8[%c0_56, %c0_57] : memref<128x128xf32, #tpu.memory_space<vmem>>, vector<128x128xf32>
    tpu.vector_store %arg8[%c0_56, %c0_57], %92 {strides = array<i32>} : memref<128x128xf32, #tpu.memory_space<vmem>>, vector<128x128xf32>,
    %c0_58 = arith.constant 0 : index
    %c0_59 = arith.constant 0 : index
    %94 = vector.load %arg5[%c0_58, %c0_59] : memref<128x128xf32, #tpu.memory_space<vmem>>, vector<128x128xf32>
    tpu.vector_store %arg5[%c0_58, %c0_59], %87 {strides = array<i32>} : memref<128x128xf32, #tpu.memory_space<vmem>>, vector<128x128xf32>,
    %c0_60 = arith.constant 0 : index
    %c0_61 = arith.constant 0 : index
    %95 = vector.load %arg6[%c0_60, %c0_61] : memref<8x128xf32, #tpu.memory_space<vmem>>, vector<8x128xf32>
    tpu.vector_store %arg6[%c0_60, %c0_61], %91 {strides = array<i32>} : memref<8x128xf32, #tpu.memory_space<vmem>>, vector<8x128xf32>,
    %c0_i32_62 = arith.constant 0 : i32
    %96 = arith.cmpi eq, %arg0, %c0_i32_62 : i32
    %97 = arith.extui %96 : i1 to i32
    %c0_i32_63 = arith.constant 0 : i32
    %98 = arith.cmpi ne, %97, %c0_i32_63 : i32
    scf.if %98 {
      %c0_64 = arith.constant 0 : index
      %c0_65 = arith.constant 0 : index
      %99 = vector.load %arg9[%c0_64, %c0_65] : memref<8x128xf32, #tpu.memory_space<vmem>>, vector<8x128xf32>
      %100 = vector.shape_cast %99 : vector<8x128xf32> to vector<1x8x128xf32>
      %cst_66 = arith.constant dense<0.000000e+00> : vector<1xf32>
      %101 = vector.multi_reduction <add>, %100, %cst_66 [1, 2] : vector<1x8x128xf32> to vector<1xf32>
      %102 = vector.shape_cast %101 : vector<1xf32> to vector<1x1x1xf32>
      %103 = vector.extract %102[0, 0, 0] : f32 from vector<1x1x1xf32>
      %104 = vector.broadcast %103 : f32 to vector<1x1xf32>
      %c0_67 = arith.constant 0 : index
      %c0_68 = arith.constant 0 : index
      %105 = vector.load %arg7[%c0_67, %c0_68] : memref<1x1xf32, #tpu.memory_space<vmem>>, vector<1x1xf32>
      tpu.vector_store %arg7[%c0_67, %c0_68], %104 {strides = array<i32>} : memref<1x1xf32, #tpu.memory_space<vmem>>, vector<1x1xf32>,
    } else {
    }
    return
  }
  func.func @transform_0(%arg0: i32) -> (i32, i32, i32) {
    %c0_i32 = arith.constant 0 : i32
    %c0_i32_0 = arith.constant 0 : i32
    %c0_i32_1 = arith.constant 0 : i32
    return %arg0, %c0_i32, %c0_i32_0 : i32, i32, i32
  }
  func.func @transform_1(%arg0: i32) -> (i32, i32) {
    %c0_i32 = arith.constant 0 : i32
    %c0_i32_0 = arith.constant 0 : i32
    %c0_i32_1 = arith.constant 0 : i32
    return %c0_i32, %c0_i32_0 : i32, i32
  }
  func.func @transform_2(%arg0: i32) -> (i32, i32) {
    %c0_i32 = arith.constant 0 : i32
    %c0_i32_0 = arith.constant 0 : i32
    %c0_i32_1 = arith.constant 0 : i32
    return %c0_i32, %c0_i32_0 : i32, i32
  }
  func.func @transform_3(%arg0: i32) -> (i32, i32, i32) {
    %c0_i32 = arith.constant 0 : i32
    %c0_i32_0 = arith.constant 0 : i32
    %c0_i32_1 = arith.constant 0 : i32
    return %arg0, %c0_i32, %c0_i32_0 : i32, i32, i32
  }
  func.func @transform_4(%arg0: i32) -> (i32, i32) {
    %c0_i32 = arith.constant 0 : i32
    %c0_i32_0 = arith.constant 0 : i32
    %c0_i32_1 = arith.constant 0 : i32
    return %c0_i32, %c0_i32_0 : i32, i32
  }
  func.func @transform_5(%arg0: i32) -> (i32, i32) {
    %c0_i32 = arith.constant 0 : i32
    %c0_i32_0 = arith.constant 0 : i32
    %c0_i32_1 = arith.constant 0 : i32
    return %c0_i32, %c0_i32_0 : i32, i32
  }
  func.func @transform_6(%arg0: i32) -> (i32, i32) {
    %c0_i32 = arith.constant 0 : i32
    %c0_i32_0 = arith.constant 0 : i32
    %c0_i32_1 = arith.constant 0 : i32
    return %c0_i32, %c0_i32_0 : i32, i32
  }
}

module attributes {stable_mosaic.version = 11 : i64} {
  func.func @_recon_kernel(%arg0: i32, %arg1: memref<8x128xf32, #tpu.memory_space<vmem>>, %arg2: memref<8x8x128xf32, #tpu.memory_space<vmem>>, %arg3: memref<128x128xf32, #tpu.memory_space<vmem>>, %arg4: memref<128x128xf32, #tpu.memory_space<vmem>>, %arg5: memref<1xf32, #tpu.memory_space<smem>>, %arg6: memref<8x8x128xf32, #tpu.memory_space<vmem>>, %arg7: memref<8x8x128xf32, #tpu.memory_space<vmem>>, %arg8: memref<1x1xf32, #tpu.memory_space<vmem>>, %arg9: memref<8x128xf32, #tpu.memory_space<vmem>>, %arg10: memref<8x128xf32, #tpu.memory_space<vmem>>) attributes {dimension_semantics = [#tpu.dimension_semantics<arbitrary>], iteration_bounds = array<i64: 1>, scalar_prefetch = 0 : i64, scratch_operands = 2 : i64, tpu.core_type = #tpu.core_type<tc>, window_params = [{pipeline_mode = #tpu.pipeline_mode<synchronous>, transform_indices = @transform_0, window_bounds = array<i64: 8, 128>}, {transform_indices = @transform_1, window_bounds = array<i64: 8, 8, 128>}, {pipeline_mode = #tpu.pipeline_mode<synchronous>, transform_indices = @transform_2, window_bounds = array<i64: 128, 128>}, {pipeline_mode = #tpu.pipeline_mode<synchronous>, transform_indices = @transform_3, window_bounds = array<i64: 128, 128>}, {transform_indices = @transform_4, window_bounds = array<i64: 1>}, {transform_indices = @transform_5, window_bounds = array<i64: 8, 8, 128>}, {transform_indices = @transform_6, window_bounds = array<i64: 8, 8, 128>}, {pipeline_mode = #tpu.pipeline_mode<synchronous>, transform_indices = @transform_7, window_bounds = array<i64: 1, 1>}]} {
    %c0_i32 = arith.constant 0 : i32
    %0 = arith.cmpi eq, %arg0, %c0_i32 : i32
    %1 = arith.extui %0 : i1 to i32
    %c0_i32_0 = arith.constant 0 : i32
    %2 = arith.cmpi ne, %1, %c0_i32_0 : i32
    scf.if %2 {
      %c0_74 = arith.constant 0 : index
      %c0_75 = arith.constant 0 : index
      %134 = vector.load %arg1[%c0_74, %c0_75] : memref<8x128xf32, #tpu.memory_space<vmem>>, vector<8x128xf32>
      %c0_76 = arith.constant 0 : index
      %c0_77 = arith.constant 0 : index
      %135 = vector.load %arg9[%c0_76, %c0_77] : memref<8x128xf32, #tpu.memory_space<vmem>>, vector<8x128xf32>
      tpu.vector_store %arg9[%c0_76, %c0_77], %134 {strides = array<i32>} : memref<8x128xf32, #tpu.memory_space<vmem>>, vector<8x128xf32>,
      %cst_78 = arith.constant 0.000000e+00 : f32
      %136 = vector.broadcast %cst_78 : f32 to vector<8x128xf32>
      %c0_79 = arith.constant 0 : index
      %c0_80 = arith.constant 0 : index
      %137 = vector.load %arg10[%c0_79, %c0_80] : memref<8x128xf32, #tpu.memory_space<vmem>>, vector<8x128xf32>
      tpu.vector_store %arg10[%c0_79, %c0_80], %136 {strides = array<i32>} : memref<8x128xf32, #tpu.memory_space<vmem>>, vector<8x128xf32>,
    } else {
    }
    %c0 = arith.constant 0 : index
    %3 = memref.load %arg5[%c0] : memref<1xf32, #tpu.memory_space<smem>>
    %c0_1 = arith.constant 0 : index
    %c0_2 = arith.constant 0 : index
    %4 = vector.load %arg4[%c0_1, %c0_2] : memref<128x128xf32, #tpu.memory_space<vmem>>, vector<128x128xf32>
    %c0_3 = arith.constant 0 : index
    %c0_4 = arith.constant 0 : index
    %5 = vector.load %arg3[%c0_3, %c0_4] : memref<128x128xf32, #tpu.memory_space<vmem>>, vector<128x128xf32>
    %c0_5 = arith.constant 0 : index
    %c0_6 = arith.constant 0 : index
    %c0_7 = arith.constant 0 : index
    %6 = vector.load %arg2[%c0_5, %c0_6, %c0_7] : memref<8x8x128xf32, #tpu.memory_space<vmem>>, vector<8x8x128xf32>
    %c0_8 = arith.constant 0 : index
    %c0_9 = arith.constant 0 : index
    %7 = vector.load %arg10[%c0_8, %c0_9] : memref<8x128xf32, #tpu.memory_space<vmem>>, vector<8x128xf32>
    %c0_10 = arith.constant 0 : index
    %c0_11 = arith.constant 0 : index
    %8 = vector.load %arg9[%c0_10, %c0_11] : memref<8x128xf32, #tpu.memory_space<vmem>>, vector<8x128xf32>
    %cst = arith.constant dense<0.000000e+00> : vector<8x128xf32>
    %9 = tpu.matmul %8, %5, %cst {dimension_numbers = #tpu.dot_dimension_numbers<[1], [0], [0], [1], [0, 0, 1, 1], [], []>} : vector<8x128xf32>, vector<128x128xf32>, vector<8x128xf32> -> vector<8x128xf32>
    %c0_12 = arith.constant 0 : index
    %c0_13 = arith.constant 0 : index
    %c0_14 = arith.constant 0 : index
    %10 = vector.load %arg6[%c0_12, %c0_13, %c0_14] : memref<8x8x128xf32, #tpu.memory_space<vmem>>, vector<1x8x128xf32>
    %11 = vector.shape_cast %10 : vector<1x8x128xf32> to vector<8x128xf32>
    %12 = vector.shape_cast %9 : vector<8x128xf32> to vector<1x8x128xf32>
    tpu.vector_store %arg6[%c0_12, %c0_13, %c0_14], %12 {strides = array<i32>} : memref<8x8x128xf32, #tpu.memory_space<vmem>>, vector<1x8x128xf32>,
    %13 = vector.extract_strided_slice %6 {offsets = [0, 0, 0], sizes = [1, 8, 128], strides = [1, 1, 1]} : vector<8x8x128xf32> to vector<1x8x128xf32>
    %14 = vector.shape_cast %13 : vector<1x8x128xf32> to vector<8x128xf32>
    %15 = arith.subf %14, %9 : vector<8x128xf32>
    %16 = vector.broadcast %3 : f32 to vector<8x128xf32>
    %17 = arith.mulf %15, %16 : vector<8x128xf32>
    %c0_15 = arith.constant 0 : index
    %c0_16 = arith.constant 0 : index
    %c0_17 = arith.constant 0 : index
    %18 = vector.load %arg7[%c0_15, %c0_16, %c0_17] : memref<8x8x128xf32, #tpu.memory_space<vmem>>, vector<1x8x128xf32>
    %19 = vector.shape_cast %18 : vector<1x8x128xf32> to vector<8x128xf32>
    %20 = vector.shape_cast %17 : vector<8x128xf32> to vector<1x8x128xf32>
    tpu.vector_store %arg7[%c0_15, %c0_16, %c0_17], %20 {strides = array<i32>} : memref<8x8x128xf32, #tpu.memory_space<vmem>>, vector<1x8x128xf32>,
    %21 = arith.mulf %17, %17 : vector<8x128xf32>
    %22 = arith.addf %7, %21 : vector<8x128xf32>
    %cst_18 = arith.constant dense<0.000000e+00> : vector<8x128xf32>
    %23 = tpu.matmul %8, %4, %cst_18 {dimension_numbers = #tpu.dot_dimension_numbers<[1], [0], [0], [1], [0, 0, 1, 1], [], []>} : vector<8x128xf32>, vector<128x128xf32>, vector<8x128xf32> -> vector<8x128xf32>
    %cst_19 = arith.constant dense<0.000000e+00> : vector<8x128xf32>
    %24 = tpu.matmul %23, %5, %cst_19 {dimension_numbers = #tpu.dot_dimension_numbers<[1], [0], [0], [1], [0, 0, 1, 1], [], []>} : vector<8x128xf32>, vector<128x128xf32>, vector<8x128xf32> -> vector<8x128xf32>
    %c1 = arith.constant 1 : index
    %c0_20 = arith.constant 0 : index
    %c0_21 = arith.constant 0 : index
    %25 = vector.load %arg6[%c1, %c0_20, %c0_21] : memref<8x8x128xf32, #tpu.memory_space<vmem>>, vector<1x8x128xf32>
    %26 = vector.shape_cast %25 : vector<1x8x128xf32> to vector<8x128xf32>
    %27 = vector.shape_cast %24 : vector<8x128xf32> to vector<1x8x128xf32>
    tpu.vector_store %arg6[%c1, %c0_20, %c0_21], %27 {strides = array<i32>} : memref<8x8x128xf32, #tpu.memory_space<vmem>>, vector<1x8x128xf32>,
    %28 = vector.extract_strided_slice %6 {offsets = [1, 0, 0], sizes = [1, 8, 128], strides = [1, 1, 1]} : vector<8x8x128xf32> to vector<1x8x128xf32>
    %29 = vector.shape_cast %28 : vector<1x8x128xf32> to vector<8x128xf32>
    %30 = arith.subf %29, %24 : vector<8x128xf32>
    %31 = vector.broadcast %3 : f32 to vector<8x128xf32>
    %32 = arith.mulf %30, %31 : vector<8x128xf32>
    %c1_22 = arith.constant 1 : index
    %c0_23 = arith.constant 0 : index
    %c0_24 = arith.constant 0 : index
    %33 = vector.load %arg7[%c1_22, %c0_23, %c0_24] : memref<8x8x128xf32, #tpu.memory_space<vmem>>, vector<1x8x128xf32>
    %34 = vector.shape_cast %33 : vector<1x8x128xf32> to vector<8x128xf32>
    %35 = vector.shape_cast %32 : vector<8x128xf32> to vector<1x8x128xf32>
    tpu.vector_store %arg7[%c1_22, %c0_23, %c0_24], %35 {strides = array<i32>} : memref<8x8x128xf32, #tpu.memory_space<vmem>>, vector<1x8x128xf32>,
    %36 = arith.mulf %32, %32 : vector<8x128xf32>
    %37 = arith.addf %22, %36 : vector<8x128xf32>
    %cst_25 = arith.constant dense<0.000000e+00> : vector<8x128xf32>
    %38 = tpu.matmul %23, %4, %cst_25 {dimension_numbers = #tpu.dot_dimension_numbers<[1], [0], [0], [1], [0, 0, 1, 1], [], []>} : vector<8x128xf32>, vector<128x128xf32>, vector<8x128xf32> -> vector<8x128xf32>
    %cst_26 = arith.constant dense<0.000000e+00> : vector<8x128xf32>
    %39 = tpu.matmul %38, %5, %cst_26 {dimension_numbers = #tpu.dot_dimension_numbers<[1], [0], [0], [1], [0, 0, 1, 1], [], []>} : vector<8x128xf32>, vector<128x128xf32>, vector<8x128xf32> -> vector<8x128xf32>
    %c2 = arith.constant 2 : index
    %c0_27 = arith.constant 0 : index
    %c0_28 = arith.constant 0 : index
    %40 = vector.load %arg6[%c2, %c0_27, %c0_28] : memref<8x8x128xf32, #tpu.memory_space<vmem>>, vector<1x8x128xf32>
    %41 = vector.shape_cast %40 : vector<1x8x128xf32> to vector<8x128xf32>
    %42 = vector.shape_cast %39 : vector<8x128xf32> to vector<1x8x128xf32>
    tpu.vector_store %arg6[%c2, %c0_27, %c0_28], %42 {strides = array<i32>} : memref<8x8x128xf32, #tpu.memory_space<vmem>>, vector<1x8x128xf32>,
    %43 = vector.extract_strided_slice %6 {offsets = [2, 0, 0], sizes = [1, 8, 128], strides = [1, 1, 1]} : vector<8x8x128xf32> to vector<1x8x128xf32>
    %44 = vector.shape_cast %43 : vector<1x8x128xf32> to vector<8x128xf32>
    %45 = arith.subf %44, %39 : vector<8x128xf32>
    %46 = vector.broadcast %3 : f32 to vector<8x128xf32>
    %47 = arith.mulf %45, %46 : vector<8x128xf32>
    %c2_29 = arith.constant 2 : index
    %c0_30 = arith.constant 0 : index
    %c0_31 = arith.constant 0 : index
    %48 = vector.load %arg7[%c2_29, %c0_30, %c0_31] : memref<8x8x128xf32, #tpu.memory_space<vmem>>, vector<1x8x128xf32>
    %49 = vector.shape_cast %48 : vector<1x8x128xf32> to vector<8x128xf32>
    %50 = vector.shape_cast %47 : vector<8x128xf32> to vector<1x8x128xf32>
    tpu.vector_store %arg7[%c2_29, %c0_30, %c0_31], %50 {strides = array<i32>} : memref<8x8x128xf32, #tpu.memory_space<vmem>>, vector<1x8x128xf32>,
    %51 = arith.mulf %47, %47 : vector<8x128xf32>
    %52 = arith.addf %37, %51 : vector<8x128xf32>
    %cst_32 = arith.constant dense<0.000000e+00> : vector<8x128xf32>
    %53 = tpu.matmul %38, %4, %cst_32 {dimension_numbers = #tpu.dot_dimension_numbers<[1], [0], [0], [1], [0, 0, 1, 1], [], []>} : vector<8x128xf32>, vector<128x128xf32>, vector<8x128xf32> -> vector<8x128xf32>
    %cst_33 = arith.constant dense<0.000000e+00> : vector<8x128xf32>
    %54 = tpu.matmul %53, %5, %cst_33 {dimension_numbers = #tpu.dot_dimension_numbers<[1], [0], [0], [1], [0, 0, 1, 1], [], []>} : vector<8x128xf32>, vector<128x128xf32>, vector<8x128xf32> -> vector<8x128xf32>
    %c3 = arith.constant 3 : index
    %c0_34 = arith.constant 0 : index
    %c0_35 = arith.constant 0 : index
    %55 = vector.load %arg6[%c3, %c0_34, %c0_35] : memref<8x8x128xf32, #tpu.memory_space<vmem>>, vector<1x8x128xf32>
    %56 = vector.shape_cast %55 : vector<1x8x128xf32> to vector<8x128xf32>
    %57 = vector.shape_cast %54 : vector<8x128xf32> to vector<1x8x128xf32>
    tpu.vector_store %arg6[%c3, %c0_34, %c0_35], %57 {strides = array<i32>} : memref<8x8x128xf32, #tpu.memory_space<vmem>>, vector<1x8x128xf32>,
    %58 = vector.extract_strided_slice %6 {offsets = [3, 0, 0], sizes = [1, 8, 128], strides = [1, 1, 1]} : vector<8x8x128xf32> to vector<1x8x128xf32>
    %59 = vector.shape_cast %58 : vector<1x8x128xf32> to vector<8x128xf32>
    %60 = arith.subf %59, %54 : vector<8x128xf32>
    %61 = vector.broadcast %3 : f32 to vector<8x128xf32>
    %62 = arith.mulf %60, %61 : vector<8x128xf32>
    %c3_36 = arith.constant 3 : index
    %c0_37 = arith.constant 0 : index
    %c0_38 = arith.constant 0 : index
    %63 = vector.load %arg7[%c3_36, %c0_37, %c0_38] : memref<8x8x128xf32, #tpu.memory_space<vmem>>, vector<1x8x128xf32>
    %64 = vector.shape_cast %63 : vector<1x8x128xf32> to vector<8x128xf32>
    %65 = vector.shape_cast %62 : vector<8x128xf32> to vector<1x8x128xf32>
    tpu.vector_store %arg7[%c3_36, %c0_37, %c0_38], %65 {strides = array<i32>} : memref<8x8x128xf32, #tpu.memory_space<vmem>>, vector<1x8x128xf32>,
    %66 = arith.mulf %62, %62 : vector<8x128xf32>
    %67 = arith.addf %52, %66 : vector<8x128xf32>
    %cst_39 = arith.constant dense<0.000000e+00> : vector<8x128xf32>
    %68 = tpu.matmul %53, %4, %cst_39 {dimension_numbers = #tpu.dot_dimension_numbers<[1], [0], [0], [1], [0, 0, 1, 1], [], []>} : vector<8x128xf32>, vector<128x128xf32>, vector<8x128xf32> -> vector<8x128xf32>
    %cst_40 = arith.constant dense<0.000000e+00> : vector<8x128xf32>
    %69 = tpu.matmul %68, %5, %cst_40 {dimension_numbers = #tpu.dot_dimension_numbers<[1], [0], [0], [1], [0, 0, 1, 1], [], []>} : vector<8x128xf32>, vector<128x128xf32>, vector<8x128xf32> -> vector<8x128xf32>
    %c4 = arith.constant 4 : index
    %c0_41 = arith.constant 0 : index
    %c0_42 = arith.constant 0 : index
    %70 = vector.load %arg6[%c4, %c0_41, %c0_42] : memref<8x8x128xf32, #tpu.memory_space<vmem>>, vector<1x8x128xf32>
    %71 = vector.shape_cast %70 : vector<1x8x128xf32> to vector<8x128xf32>
    %72 = vector.shape_cast %69 : vector<8x128xf32> to vector<1x8x128xf32>
    tpu.vector_store %arg6[%c4, %c0_41, %c0_42], %72 {strides = array<i32>} : memref<8x8x128xf32, #tpu.memory_space<vmem>>, vector<1x8x128xf32>,
    %73 = vector.extract_strided_slice %6 {offsets = [4, 0, 0], sizes = [1, 8, 128], strides = [1, 1, 1]} : vector<8x8x128xf32> to vector<1x8x128xf32>
    %74 = vector.shape_cast %73 : vector<1x8x128xf32> to vector<8x128xf32>
    %75 = arith.subf %74, %69 : vector<8x128xf32>
    %76 = vector.broadcast %3 : f32 to vector<8x128xf32>
    %77 = arith.mulf %75, %76 : vector<8x128xf32>
    %c4_43 = arith.constant 4 : index
    %c0_44 = arith.constant 0 : index
    %c0_45 = arith.constant 0 : index
    %78 = vector.load %arg7[%c4_43, %c0_44, %c0_45] : memref<8x8x128xf32, #tpu.memory_space<vmem>>, vector<1x8x128xf32>
    %79 = vector.shape_cast %78 : vector<1x8x128xf32> to vector<8x128xf32>
    %80 = vector.shape_cast %77 : vector<8x128xf32> to vector<1x8x128xf32>
    tpu.vector_store %arg7[%c4_43, %c0_44, %c0_45], %80 {strides = array<i32>} : memref<8x8x128xf32, #tpu.memory_space<vmem>>, vector<1x8x128xf32>,
    %81 = arith.mulf %77, %77 : vector<8x128xf32>
    %82 = arith.addf %67, %81 : vector<8x128xf32>
    %cst_46 = arith.constant dense<0.000000e+00> : vector<8x128xf32>
    %83 = tpu.matmul %68, %4, %cst_46 {dimension_numbers = #tpu.dot_dimension_numbers<[1], [0], [0], [1], [0, 0, 1, 1], [], []>} : vector<8x128xf32>, vector<128x128xf32>, vector<8x128xf32> -> vector<8x128xf32>
    %cst_47 = arith.constant dense<0.000000e+00> : vector<8x128xf32>
    %84 = tpu.matmul %83, %5, %cst_47 {dimension_numbers = #tpu.dot_dimension_numbers<[1], [0], [0], [1], [0, 0, 1, 1], [], []>} : vector<8x128xf32>, vector<128x128xf32>, vector<8x128xf32> -> vector<8x128xf32>
    %c5 = arith.constant 5 : index
    %c0_48 = arith.constant 0 : index
    %c0_49 = arith.constant 0 : index
    %85 = vector.load %arg6[%c5, %c0_48, %c0_49] : memref<8x8x128xf32, #tpu.memory_space<vmem>>, vector<1x8x128xf32>
    %86 = vector.shape_cast %85 : vector<1x8x128xf32> to vector<8x128xf32>
    %87 = vector.shape_cast %84 : vector<8x128xf32> to vector<1x8x128xf32>
    tpu.vector_store %arg6[%c5, %c0_48, %c0_49], %87 {strides = array<i32>} : memref<8x8x128xf32, #tpu.memory_space<vmem>>, vector<1x8x128xf32>,
    %88 = vector.extract_strided_slice %6 {offsets = [5, 0, 0], sizes = [1, 8, 128], strides = [1, 1, 1]} : vector<8x8x128xf32> to vector<1x8x128xf32>
    %89 = vector.shape_cast %88 : vector<1x8x128xf32> to vector<8x128xf32>
    %90 = arith.subf %89, %84 : vector<8x128xf32>
    %91 = vector.broadcast %3 : f32 to vector<8x128xf32>
    %92 = arith.mulf %90, %91 : vector<8x128xf32>
    %c5_50 = arith.constant 5 : index
    %c0_51 = arith.constant 0 : index
    %c0_52 = arith.constant 0 : index
    %93 = vector.load %arg7[%c5_50, %c0_51, %c0_52] : memref<8x8x128xf32, #tpu.memory_space<vmem>>, vector<1x8x128xf32>
    %94 = vector.shape_cast %93 : vector<1x8x128xf32> to vector<8x128xf32>
    %95 = vector.shape_cast %92 : vector<8x128xf32> to vector<1x8x128xf32>
    tpu.vector_store %arg7[%c5_50, %c0_51, %c0_52], %95 {strides = array<i32>} : memref<8x8x128xf32, #tpu.memory_space<vmem>>, vector<1x8x128xf32>,
    %96 = arith.mulf %92, %92 : vector<8x128xf32>
    %97 = arith.addf %82, %96 : vector<8x128xf32>
    %cst_53 = arith.constant dense<0.000000e+00> : vector<8x128xf32>
    %98 = tpu.matmul %83, %4, %cst_53 {dimension_numbers = #tpu.dot_dimension_numbers<[1], [0], [0], [1], [0, 0, 1, 1], [], []>} : vector<8x128xf32>, vector<128x128xf32>, vector<8x128xf32> -> vector<8x128xf32>
    %cst_54 = arith.constant dense<0.000000e+00> : vector<8x128xf32>
    %99 = tpu.matmul %98, %5, %cst_54 {dimension_numbers = #tpu.dot_dimension_numbers<[1], [0], [0], [1], [0, 0, 1, 1], [], []>} : vector<8x128xf32>, vector<128x128xf32>, vector<8x128xf32> -> vector<8x128xf32>
    %c6 = arith.constant 6 : index
    %c0_55 = arith.constant 0 : index
    %c0_56 = arith.constant 0 : index
    %100 = vector.load %arg6[%c6, %c0_55, %c0_56] : memref<8x8x128xf32, #tpu.memory_space<vmem>>, vector<1x8x128xf32>
    %101 = vector.shape_cast %100 : vector<1x8x128xf32> to vector<8x128xf32>
    %102 = vector.shape_cast %99 : vector<8x128xf32> to vector<1x8x128xf32>
    tpu.vector_store %arg6[%c6, %c0_55, %c0_56], %102 {strides = array<i32>} : memref<8x8x128xf32, #tpu.memory_space<vmem>>, vector<1x8x128xf32>,
    %103 = vector.extract_strided_slice %6 {offsets = [6, 0, 0], sizes = [1, 8, 128], strides = [1, 1, 1]} : vector<8x8x128xf32> to vector<1x8x128xf32>
    %104 = vector.shape_cast %103 : vector<1x8x128xf32> to vector<8x128xf32>
    %105 = arith.subf %104, %99 : vector<8x128xf32>
    %106 = vector.broadcast %3 : f32 to vector<8x128xf32>
    %107 = arith.mulf %105, %106 : vector<8x128xf32>
    %c6_57 = arith.constant 6 : index
    %c0_58 = arith.constant 0 : index
    %c0_59 = arith.constant 0 : index
    %108 = vector.load %arg7[%c6_57, %c0_58, %c0_59] : memref<8x8x128xf32, #tpu.memory_space<vmem>>, vector<1x8x128xf32>
    %109 = vector.shape_cast %108 : vector<1x8x128xf32> to vector<8x128xf32>
    %110 = vector.shape_cast %107 : vector<8x128xf32> to vector<1x8x128xf32>
    tpu.vector_store %arg7[%c6_57, %c0_58, %c0_59], %110 {strides = array<i32>} : memref<8x8x128xf32, #tpu.memory_space<vmem>>, vector<1x8x128xf32>,
    %111 = arith.mulf %107, %107 : vector<8x128xf32>
    %112 = arith.addf %97, %111 : vector<8x128xf32>
    %cst_60 = arith.constant dense<0.000000e+00> : vector<8x128xf32>
    %113 = tpu.matmul %98, %4, %cst_60 {dimension_numbers = #tpu.dot_dimension_numbers<[1], [0], [0], [1], [0, 0, 1, 1], [], []>} : vector<8x128xf32>, vector<128x128xf32>, vector<8x128xf32> -> vector<8x128xf32>
    %cst_61 = arith.constant dense<0.000000e+00> : vector<8x128xf32>
    %114 = tpu.matmul %113, %5, %cst_61 {dimension_numbers = #tpu.dot_dimension_numbers<[1], [0], [0], [1], [0, 0, 1, 1], [], []>} : vector<8x128xf32>, vector<128x128xf32>, vector<8x128xf32> -> vector<8x128xf32>
    %c7 = arith.constant 7 : index
    %c0_62 = arith.constant 0 : index
    %c0_63 = arith.constant 0 : index
    %115 = vector.load %arg6[%c7, %c0_62, %c0_63] : memref<8x8x128xf32, #tpu.memory_space<vmem>>, vector<1x8x128xf32>
    %116 = vector.shape_cast %115 : vector<1x8x128xf32> to vector<8x128xf32>
    %117 = vector.shape_cast %114 : vector<8x128xf32> to vector<1x8x128xf32>
    tpu.vector_store %arg6[%c7, %c0_62, %c0_63], %117 {strides = array<i32>} : memref<8x8x128xf32, #tpu.memory_space<vmem>>, vector<1x8x128xf32>,
    %118 = vector.extract_strided_slice %6 {offsets = [7, 0, 0], sizes = [1, 8, 128], strides = [1, 1, 1]} : vector<8x8x128xf32> to vector<1x8x128xf32>
    %119 = vector.shape_cast %118 : vector<1x8x128xf32> to vector<8x128xf32>
    %120 = arith.subf %119, %114 : vector<8x128xf32>
    %121 = vector.broadcast %3 : f32 to vector<8x128xf32>
    %122 = arith.mulf %120, %121 : vector<8x128xf32>
    %c7_64 = arith.constant 7 : index
    %c0_65 = arith.constant 0 : index
    %c0_66 = arith.constant 0 : index
    %123 = vector.load %arg7[%c7_64, %c0_65, %c0_66] : memref<8x8x128xf32, #tpu.memory_space<vmem>>, vector<1x8x128xf32>
    %124 = vector.shape_cast %123 : vector<1x8x128xf32> to vector<8x128xf32>
    %125 = vector.shape_cast %122 : vector<8x128xf32> to vector<1x8x128xf32>
    tpu.vector_store %arg7[%c7_64, %c0_65, %c0_66], %125 {strides = array<i32>} : memref<8x8x128xf32, #tpu.memory_space<vmem>>, vector<1x8x128xf32>,
    %126 = arith.mulf %122, %122 : vector<8x128xf32>
    %127 = arith.addf %112, %126 : vector<8x128xf32>
    %cst_67 = arith.constant dense<0.000000e+00> : vector<8x128xf32>
    %128 = tpu.matmul %113, %4, %cst_67 {dimension_numbers = #tpu.dot_dimension_numbers<[1], [0], [0], [1], [0, 0, 1, 1], [], []>} : vector<8x128xf32>, vector<128x128xf32>, vector<8x128xf32> -> vector<8x128xf32>
    %c0_68 = arith.constant 0 : index
    %c0_69 = arith.constant 0 : index
    %129 = vector.load %arg9[%c0_68, %c0_69] : memref<8x128xf32, #tpu.memory_space<vmem>>, vector<8x128xf32>
    tpu.vector_store %arg9[%c0_68, %c0_69], %128 {strides = array<i32>} : memref<8x128xf32, #tpu.memory_space<vmem>>, vector<8x128xf32>,
    %c0_70 = arith.constant 0 : index
    %c0_71 = arith.constant 0 : index
    %130 = vector.load %arg10[%c0_70, %c0_71] : memref<8x128xf32, #tpu.memory_space<vmem>>, vector<8x128xf32>
    tpu.vector_store %arg10[%c0_70, %c0_71], %127 {strides = array<i32>} : memref<8x128xf32, #tpu.memory_space<vmem>>, vector<8x128xf32>,
    %c0_i32_72 = arith.constant 0 : i32
    %131 = arith.cmpi eq, %arg0, %c0_i32_72 : i32
    %132 = arith.extui %131 : i1 to i32
    %c0_i32_73 = arith.constant 0 : i32
    %133 = arith.cmpi ne, %132, %c0_i32_73 : i32
    scf.if %133 {
      %c0_74 = arith.constant 0 : index
      %c0_75 = arith.constant 0 : index
      %134 = vector.load %arg10[%c0_74, %c0_75] : memref<8x128xf32, #tpu.memory_space<vmem>>, vector<8x128xf32>
      %135 = vector.shape_cast %134 : vector<8x128xf32> to vector<1x8x128xf32>
      %cst_76 = arith.constant dense<0.000000e+00> : vector<1xf32>
      %136 = vector.multi_reduction <add>, %135, %cst_76 [1, 2] : vector<1x8x128xf32> to vector<1xf32>
      %137 = vector.shape_cast %136 : vector<1xf32> to vector<1x1x1xf32>
      %138 = vector.extract %137[0, 0, 0] : f32 from vector<1x1x1xf32>
      %139 = vector.broadcast %138 : f32 to vector<1x1xf32>
      %c0_77 = arith.constant 0 : index
      %c0_78 = arith.constant 0 : index
      %140 = vector.load %arg8[%c0_77, %c0_78] : memref<1x1xf32, #tpu.memory_space<vmem>>, vector<1x1xf32>
      tpu.vector_store %arg8[%c0_77, %c0_78], %139 {strides = array<i32>} : memref<1x1xf32, #tpu.memory_space<vmem>>, vector<1x1xf32>,
    } else {
    }
    return
  }
  func.func @transform_0(%arg0: i32) -> (i32, i32) {
    %c0_i32 = arith.constant 0 : i32
    %c0_i32_0 = arith.constant 0 : i32
    %c0_i32_1 = arith.constant 0 : i32
    return %c0_i32, %c0_i32_0 : i32, i32
  }
  func.func @transform_1(%arg0: i32) -> (i32, i32, i32) {
    %c0_i32 = arith.constant 0 : i32
    %c0_i32_0 = arith.constant 0 : i32
    %c0_i32_1 = arith.constant 0 : i32
    return %arg0, %c0_i32, %c0_i32_0 : i32, i32, i32
  }
  func.func @transform_2(%arg0: i32) -> (i32, i32) {
    %c0_i32 = arith.constant 0 : i32
    %c0_i32_0 = arith.constant 0 : i32
    %c0_i32_1 = arith.constant 0 : i32
    return %c0_i32, %c0_i32_0 : i32, i32
  }
  func.func @transform_3(%arg0: i32) -> (i32, i32) {
    %c0_i32 = arith.constant 0 : i32
    %c0_i32_0 = arith.constant 0 : i32
    %c0_i32_1 = arith.constant 0 : i32
    return %c0_i32, %c0_i32_0 : i32, i32
  }
  func.func @transform_4(%arg0: i32) -> i32 {
    %c0_i32 = arith.constant 0 : i32
    %c0_i32_0 = arith.constant 0 : i32
    return %c0_i32 : i32
  }
  func.func @transform_5(%arg0: i32) -> (i32, i32, i32) {
    %c0_i32 = arith.constant 0 : i32
    %c0_i32_0 = arith.constant 0 : i32
    %c0_i32_1 = arith.constant 0 : i32
    return %arg0, %c0_i32, %c0_i32_0 : i32, i32, i32
  }
  func.func @transform_6(%arg0: i32) -> (i32, i32, i32) {
    %c0_i32 = arith.constant 0 : i32
    %c0_i32_0 = arith.constant 0 : i32
    %c0_i32_1 = arith.constant 0 : i32
    return %arg0, %c0_i32, %c0_i32_0 : i32, i32, i32
  }
  func.func @transform_7(%arg0: i32) -> (i32, i32) {
    %c0_i32 = arith.constant 0 : i32
    %c0_i32_0 = arith.constant 0 : i32
    %c0_i32_1 = arith.constant 0 : i32
    return %c0_i32, %c0_i32_0 : i32, i32
  }
}

</mosaic_0001>

<bundles_post_ra>
// kernel: custom-call.6
= control target key start
LH: loop header
LB: loop body
LE: loop exit
PB: predicated region body
PF: predicated region fallthrough
CT: control target
= control target key end

     0   :  { %v1026_v0 = vmov 0.0   ;;  %vm48_vm0 = vcmask 7168   ;;  %vm92_vm1 = vcmask 15368   ;;  %vm109_vm2 = vcmask 1047553   ;;  %s1203_s0 = inlined_call_operand.vmem [shape: f32[24,24], index: 0, kind: input, shape index: {}]   ;;  %s1204_s1 = inlined_call_operand.vmem [shape: f32[24,24], index: 1, kind: output, shape index: {}]  }
   0x1   :  { %43 = vst [vmem:[#allocation1] sm:$0xff] %v1026_v0  ;;  %v1040_v4 = vld [vmem:[%s1203_s0] sm:$0xff]  ;;  %v1048_v16 = vld [vmem:[%s1203_s0 + $0x8] sm:$0xff]  ;;  %vm110_vm3 = vmand %vm92_vm1, %vm109_vm2  ;;  %vm140_vm4 = vcmask 23568   ;;  %vm157_vm5 = vcmask 1047554   ;;  %vm188_vm7 = vcmask 31768  }
   0x2   :  { %35 = vst [vmem:[#allocation0] sm:$0xff] %v1040_v4  ;;  %37 = vst [vmem:[#allocation0 + $0x8] sm:$0xff] %v1048_v16  ;;  %v1059_v34 = vld [vmem:[%s1203_s0 + $0x10] sm:$0xff]  ;;  %vm205_vm8 = vcmask 1047555   ;;  %vm236_vm10 = vcmask 39968   ;;  %vm253_vm11 = vcmask 1047556  }
   0x3   :  { %39 = vst [vmem:[#allocation0 + $0x10] sm:$0xff] %v1059_v34  ;;  %vm158_vm6 = vmand %vm140_vm4, %vm157_vm5  ;;  %vm284_vm13 = vcmask 48168   ;;  %vm301_vm14 = vcmask 1047557  }
   0x4   :  { %vm206_vm9 = vmand %vm188_vm7, %vm205_vm8 }
   0x5   :  { %vm254_vm12 = vmand %vm236_vm10, %vm253_vm11 }
   0x6   :  { %vm302_vm15 = vmand %vm284_vm13, %vm301_vm14 }
   0x8   :  { %v49_v1 = vld [vmem:[#allocation1] ss:$0 sm:$0xff] }
   0x9   :  { %v51_v2 = vmul.f32 %v49_v1, %v49_v1  ;;  %v58_v3 = vmul.f32 0.0, %v49_v1  ;;  %v50_v5 = vld [vmem:[#allocation0] ss:$0 sm:$0xff]  ;;  %v96_v17 = vld [vmem:[#allocation0 + $0x1] ss:$0 sm:$0xff] }
   0xa   :  { %v144_v41 = vld [vmem:[#allocation0 + $0x2] ss:$0 sm:$0xff] }
   0xb   :  { %52 = vadd.xlane.f32.xlu0 %v51_v2 }
   0xf   :  { %59 = vadd.xlane.f32.xlu0 %v58_v3 }
  0x94   :  { %v53_v6 = vpop.xlane.xlu0 %52 }
  0x95   :  { %v54_v7 = vsub.f32 %v50_v5, %v53_v6 }
  0x97   :  { %978 = vrsqrt.f32 %v54_v7  ;;  %v192_v7 = vld [vmem:[#allocation0 + $0x3] ss:$0 sm:$0xff] }
  0x98   :  { %v60_v8 = vpop.xlane.xlu0 %59 }
  0x99   :  { %v61_v9 = vsub.f32 %v1040_v4, %v60_v8 }
  0xa4   :  { %v979_v10 = vpop.eup %978 }
  0xa5   :  { %v62_v11 = vmul.f32 %v979_v10, %v61_v9 }
  0xa7   :  { %v63_v12 = vsel %vm48_vm0, %v62_v11, 0.0 }
  0xa8   :  { %65 = vst [vmem:[#allocation1] sm:$0xff] %v63_v12 }
  0xaf   :  { %v94_v13 = vld [vmem:[#allocation1 + $0x1] ss:$0 sm:$0xff] }
  0xb0   :  { %v104_v14 = vmul.f32 %v94_v13, %v63_v12  ;;  %v97_v15 = vmul.f32 %v94_v13, %v94_v13 }
  0xb2   :  { %105 = vadd.xlane.f32.xlu0 %v104_v14  ;;  %98 = vadd.xlane.f32.xlu1 %v97_v15 }
  0xb6   :  { %71 = vadd.xlane.f32.xlu1 %v58_v3 }
 0x13b   :  { %v99_v18 = vpop.xlane.xlu1 %98  ;;  %v106_v24 = vpop.xlane.xlu0 %105 }
 0x13c   :  { %v100_v19 = vsub.f32 %v96_v17, %v99_v18  ;;  %v107_v26 = vsub.f32 %v1040_v4, %v106_v24 }
 0x13e   :  { %980 = vrsqrt.f32 %v100_v19 }
 0x13f   :  { %v72_v20 = vpop.xlane.xlu1 %71 }
 0x140   :  { %v73_v21 = vsub.f32 %v1048_v16, %v72_v20 }
 0x142   :  { %v74_v22 = vmul.f32 %v979_v10, %v73_v21 }
 0x144   :  { %v75_v23 = vsel %vm48_vm0, %v74_v22, 0.0 }
 0x145   :  { %v118_v25 = vmul.f32 %v94_v13, %v75_v23 }
 0x147   :  { %119 = vadd.xlane.f32.xlu1 %v118_v25 }
 0x14b   :  { %v981_v27 = vpop.eup %980 }
 0x14c   :  { %v108_v28 = vmul.f32 %v981_v27, %v107_v26 }
 0x14e   :  { %v111_v29 = vsel %vm110_vm3, %v108_v28, 0.0 }
 0x14f   :  { %v112_v30 = vadd.f32 %v111_v29, %v63_v12 }
 0x151   :  { %113 = vst [vmem:[#allocation1] sm:$0xff] %v112_v30 }
 0x158   :  { %v142_v31 = vld [vmem:[#allocation1 + $0x2] ss:$0 sm:$0xff] }
 0x159   :  { %v145_v32 = vmul.f32 %v142_v31, %v142_v31  ;;  %v152_v33 = vmul.f32 %v142_v31, %v112_v30 }
 0x15b   :  { %146 = vadd.xlane.f32.xlu0 %v145_v32  ;;  %153 = vadd.xlane.f32.xlu1 %v152_v33  ;;  %v240_v32 = vld [vmem:[#allocation0 + $0x4] ss:$0 sm:$0xff] }
 0x15f   :  { %84 = vadd.xlane.f32.xlu0 %v58_v3 }
 0x1d0   :  { %v120_v35 = vpop.xlane.xlu1 %119 }
 0x1d1   :  { %v121_v36 = vsub.f32 %v1048_v16, %v120_v35 }
 0x1d3   :  { %v122_v37 = vmul.f32 %v981_v27, %v121_v36 }
 0x1d5   :  { %v123_v38 = vsel %vm92_vm1, %v122_v37, 0.0 }
 0x1d6   :  { %v124_v39 = vadd.f32 %v123_v38, %v75_v23 }
 0x1d8   :  { %v166_v40 = vmul.f32 %v142_v31, %v124_v39 }
 0x1da   :  { %167 = vadd.xlane.f32.xlu1 %v166_v40 }
 0x1e4   :  { %v147_v42 = vpop.xlane.xlu0 %146  ;;  %v154_v48 = vpop.xlane.xlu1 %153 }
 0x1e5   :  { %v148_v43 = vsub.f32 %v144_v41, %v147_v42  ;;  %v155_v50 = vsub.f32 %v1040_v4, %v154_v48 }
 0x1e7   :  { %982 = vrsqrt.f32 %v148_v43 }
 0x1e8   :  { %v85_v44 = vpop.xlane.xlu0 %84 }
 0x1e9   :  { %v86_v45 = vsub.f32 %v1059_v34, %v85_v44 }
 0x1eb   :  { %v87_v46 = vmul.f32 %v979_v10, %v86_v45 }
 0x1ed   :  { %v88_v47 = vsel %vm48_vm0, %v87_v46, 0.0  ;;  %vm332_vm0 = vcmask 56368  }
 0x1ee   :  { %v131_v49 = vmul.f32 %v94_v13, %v88_v47 }
 0x1f0   :  { %132 = vadd.xlane.f32.xlu1 %v131_v49 }
 0x1f4   :  { %v983_v51 = vpop.eup %982 }
 0x1f5   :  { %v156_v52 = vmul.f32 %v983_v51, %v155_v50 }
 0x1f7   :  { %v159_v53 = vsel %vm158_vm6, %v156_v52, 0.0  ;;  %vm428_vm6 = vcmask 72768  }
 0x1f8   :  { %v160_v54 = vadd.f32 %v159_v53, %v112_v30 }
 0x1fa   :  { %161 = vst [vmem:[#allocation1] sm:$0xff] %v160_v54 }
 0x201   :  { %v190_v55 = vld [vmem:[#allocation1 + $0x3] ss:$0 sm:$0xff] }
 0x202   :  { %v193_v56 = vmul.f32 %v190_v55, %v190_v55  ;;  %v200_v57 = vmul.f32 %v190_v55, %v160_v54 }
 0x204   :  { %194 = vadd.xlane.f32.xlu0 %v193_v56 }
 0x208   :  { %201 = vadd.xlane.f32.xlu0 %v200_v57  ;;  %v288_v57 = vld [vmem:[#allocation0 + $0x5] ss:$0 sm:$0xff] }
 0x263   :  { %v168_v58 = vpop.xlane.xlu1 %167 }
 0x264   :  { %v169_v59 = vsub.f32 %v1048_v16, %v168_v58 }
 0x266   :  { %v170_v60 = vmul.f32 %v983_v51, %v169_v59 }
 0x268   :  { %v171_v61 = vsel %vm140_vm4, %v170_v60, 0.0 }
 0x269   :  { %v172_v62 = vadd.f32 %v171_v61, %v124_v39 }
 0x26b   :  { %v214_v63 = vmul.f32 %v190_v55, %v172_v62 }
 0x26d   :  { %215 = vadd.xlane.f32.xlu1 %v214_v63 }
 0x279   :  { %v133_v0 = vpop.xlane.xlu1 %132 }
 0x27a   :  { %v134_v1 = vsub.f32 %v1059_v34, %v133_v0 }
 0x27c   :  { %v135_v2 = vmul.f32 %v981_v27, %v134_v1 }
 0x27e   :  { %v136_v3 = vsel %vm92_vm1, %v135_v2, 0.0  ;;  %vm349_vm1 = vcmask 1047558  }
 0x27f   :  { %v137_v5 = vadd.f32 %v136_v3, %v88_v47  ;;  %vm350_vm3 = vmand %vm332_vm0, %vm349_vm1 }
 0x281   :  { %v179_v6 = vmul.f32 %v142_v31, %v137_v5 }
 0x283   :  { %180 = vadd.xlane.f32.xlu0 %v179_v6 }
 0x28d   :  { %v195_v8 = vpop.xlane.xlu0 %194 }
 0x28e   :  { %v196_v9 = vsub.f32 %v192_v7, %v195_v8 }
 0x290   :  { %984 = vrsqrt.f32 %v196_v9 }
 0x291   :  { %v202_v10 = vpop.xlane.xlu0 %201 }
 0x292   :  { %v203_v11 = vsub.f32 %v1040_v4, %v202_v10 }
 0x29d   :  { %v985_v12 = vpop.eup %984 }
 0x29e   :  { %v204_v13 = vmul.f32 %v985_v12, %v203_v11 }
 0x2a0   :  { %v207_v14 = vsel %vm206_vm9, %v204_v13, 0.0 }
 0x2a1   :  { %v208_v15 = vadd.f32 %v207_v14, %v160_v54 }
 0x2a3   :  { %209 = vst [vmem:[#allocation1] sm:$0xff] %v208_v15 }
 0x2aa   :  { %v238_v17 = vld [vmem:[#allocation1 + $0x4] ss:$0 sm:$0xff] }
 0x2ab   :  { %v241_v18 = vmul.f32 %v238_v17, %v238_v17  ;;  %v248_v19 = vmul.f32 %v238_v17, %v208_v15 }
 0x2ad   :  { %242 = vadd.xlane.f32.xlu1 %v241_v18  ;;  %249 = vadd.xlane.f32.xlu0 %v248_v19  ;;  %v336_v19 = vld [vmem:[#allocation0 + $0x6] ss:$0 sm:$0xff] }
 0x2f6   :  { %v216_v20 = vpop.xlane.xlu1 %215 }
 0x2f7   :  { %v217_v21 = vsub.f32 %v1048_v16, %v216_v20 }
 0x2f9   :  { %v218_v22 = vmul.f32 %v985_v12, %v217_v21 }
 0x2fb   :  { %v219_v23 = vsel %vm188_vm7, %v218_v22, 0.0 }
 0x2fc   :  { %v220_v24 = vadd.f32 %v219_v23, %v172_v62 }
 0x2fe   :  { %v262_v25 = vmul.f32 %v238_v17, %v220_v24 }
 0x300   :  { %263 = vadd.xlane.f32.xlu1 %v262_v25 }
 0x30c   :  { %v181_v26 = vpop.xlane.xlu0 %180 }
 0x30d   :  { %v182_v27 = vsub.f32 %v1059_v34, %v181_v26 }
 0x30f   :  { %v183_v28 = vmul.f32 %v983_v51, %v182_v27 }
 0x311   :  { %v184_v29 = vsel %vm140_vm4, %v183_v28, 0.0  ;;  %vm380_vm4 = vcmask 64568  }
 0x312   :  { %v185_v30 = vadd.f32 %v184_v29, %v137_v5 }
 0x314   :  { %v227_v31 = vmul.f32 %v190_v55, %v185_v30 }
 0x316   :  { %228 = vadd.xlane.f32.xlu0 %v227_v31 }
 0x336   :  { %v243_v33 = vpop.xlane.xlu1 %242  ;;  %v250_v36 = vpop.xlane.xlu0 %249 }
 0x337   :  { %v244_v35 = vsub.f32 %v240_v32, %v243_v33  ;;  %v251_v37 = vsub.f32 %v1040_v4, %v250_v36 }
 0x339   :  { %986 = vrsqrt.f32 %v244_v35 }
 0x346   :  { %v987_v38 = vpop.eup %986 }
 0x347   :  { %v252_v39 = vmul.f32 %v987_v38, %v251_v37 }
 0x349   :  { %v255_v40 = vsel %vm254_vm12, %v252_v39, 0.0 }
 0x34a   :  { %v256_v41 = vadd.f32 %v255_v40, %v208_v15 }
 0x34c   :  { %257 = vst [vmem:[#allocation1] sm:$0xff] %v256_v41 }
 0x353   :  { %v286_v42 = vld [vmem:[#allocation1 + $0x5] ss:$0 sm:$0xff] }
 0x354   :  { %v296_v43 = vmul.f32 %v286_v42, %v256_v41  ;;  %v289_v44 = vmul.f32 %v286_v42, %v286_v42 }
 0x356   :  { %297 = vadd.xlane.f32.xlu0 %v296_v43  ;;  %290 = vadd.xlane.f32.xlu1 %v289_v44 }
 0x389   :  { %v264_v45 = vpop.xlane.xlu1 %263 }
 0x38a   :  { %v265_v46 = vsub.f32 %v1048_v16, %v264_v45 }
 0x38c   :  { %v266_v47 = vmul.f32 %v987_v38, %v265_v46 }
 0x38e   :  { %v267_v48 = vsel %vm236_vm10, %v266_v47, 0.0 }
 0x38f   :  { %v268_v49 = vadd.f32 %v267_v48, %v220_v24 }
 0x391   :  { %v310_v50 = vmul.f32 %v286_v42, %v268_v49 }
 0x393   :  { %311 = vadd.xlane.f32.xlu1 %v310_v50 }
 0x39f   :  { %v229_v51 = vpop.xlane.xlu0 %228 }
 0x3a0   :  { %v230_v52 = vsub.f32 %v1059_v34, %v229_v51 }
 0x3a2   :  { %v231_v53 = vmul.f32 %v985_v12, %v230_v52 }
 0x3a4   :  { %v232_v54 = vsel %vm188_vm7, %v231_v53, 0.0  ;;  %vm464_vm7 = vcmask 80968  }
 0x3a5   :  { %v233_v55 = vadd.f32 %v232_v54, %v185_v30  ;;  %vm484_vm9 = vmand %vm464_vm7, %vm109_vm2 }
 0x3a7   :  { %v275_v56 = vmul.f32 %v238_v17, %v233_v55 }
 0x3a9   :  { %276 = vadd.xlane.f32.xlu0 %v275_v56 }
 0x3df   :  { %v291_v58 = vpop.xlane.xlu1 %290  ;;  %v298_v60 = vpop.xlane.xlu0 %297 }
 0x3e0   :  { %v292_v59 = vsub.f32 %v288_v57, %v291_v58  ;;  %v299_v61 = vsub.f32 %v1040_v4, %v298_v60  ;;  %v432_v60 = vld [vmem:[#allocation0 + $0x8] ss:$0 sm:$0xff] }
 0x3e2   :  { %988 = vrsqrt.f32 %v292_v59 }
 0x3ef   :  { %v989_v62 = vpop.eup %988 }
 0x3f0   :  { %v300_v63 = vmul.f32 %v989_v62, %v299_v61 }
 0x3f2   :  { %v303_v0 = vsel %vm302_vm15, %v300_v63, 0.0 }
 0x3f3   :  { %v304_v1 = vadd.f32 %v303_v0, %v256_v41 }
 0x3f5   :  { %305 = vst [vmem:[#allocation1] sm:$0xff] %v304_v1 }
 0x3fc   :  { %v334_v2 = vld [vmem:[#allocation1 + $0x6] ss:$0 sm:$0xff] }
 0x3fd   :  { %v344_v3 = vmul.f32 %v334_v2, %v304_v1  ;;  %v337_v5 = vmul.f32 %v334_v2, %v334_v2 }
 0x3ff   :  { %345 = vadd.xlane.f32.xlu0 %v344_v3  ;;  %338 = vadd.xlane.f32.xlu1 %v337_v5 }
 0x41c   :  { %v312_v6 = vpop.xlane.xlu1 %311 }
 0x41d   :  { %v313_v7 = vsub.f32 %v1048_v16, %v312_v6 }
 0x41f   :  { %v314_v8 = vmul.f32 %v989_v62, %v313_v7 }
 0x421   :  { %v315_v9 = vsel %vm284_vm13, %v314_v8, 0.0 }
 0x422   :  { %v316_v10 = vadd.f32 %v315_v9, %v268_v49 }
 0x424   :  { %v358_v11 = vmul.f32 %v334_v2, %v316_v10 }
 0x426   :  { %359 = vadd.xlane.f32.xlu1 %v358_v11 }
 0x432   :  { %v277_v12 = vpop.xlane.xlu0 %276 }
 0x433   :  { %v278_v13 = vsub.f32 %v1059_v34, %v277_v12 }
 0x435   :  { %v279_v14 = vmul.f32 %v987_v38, %v278_v13 }
 0x437   :  { %v280_v15 = vsel %vm236_vm10, %v279_v14, 0.0  ;;  %vm502_vm10 = vcmask 89168  }
 0x438   :  { %v281_v17 = vadd.f32 %v280_v15, %v233_v55  ;;  %vm522_vm12 = vmand %vm502_vm10, %vm157_vm5 }
 0x43a   :  { %v323_v18 = vmul.f32 %v286_v42, %v281_v17  ;;  %v384_v42 = vld [vmem:[#allocation0 + $0x7] ss:$0 sm:$0xff] }
 0x43c   :  { %324 = vadd.xlane.f32.xlu0 %v323_v18 }
 0x488   :  { %v339_v20 = vpop.xlane.xlu1 %338  ;;  %v346_v22 = vpop.xlane.xlu0 %345 }
 0x489   :  { %v340_v21 = vsub.f32 %v336_v19, %v339_v20  ;;  %v347_v23 = vsub.f32 %v1040_v4, %v346_v22 }
 0x48b   :  { %990 = vrsqrt.f32 %v340_v21  ;;  %v468_v21 = vld [vmem:[#allocation0 + $0x9] ss:$0 sm:$0xff] }
 0x498   :  { %v991_v24 = vpop.eup %990 }
 0x499   :  { %v348_v25 = vmul.f32 %v991_v24, %v347_v23 }
 0x49b   :  { %v351_v26 = vsel %vm350_vm3, %v348_v25, 0.0 }
 0x49c   :  { %v1097_v27 = vadd.f32 %v351_v26, %v304_v1 }
 0x49e   :  { %353 = vst [vmem:[#allocation1] sm:$0xff] %v1097_v27 }
 0x4a5   :  { %v1100_v28 = vld [vmem:[#allocation1 + $0x7] ss:$0 sm:$0xff] }
 0x4a6   :  { %v385_v29 = vmul.f32 %v1100_v28, %v1100_v28 }
 0x4a8   :  { %386 = vadd.xlane.f32.xlu1 %v385_v29 }
 0x4af   :  { %v360_v30 = vpop.xlane.xlu1 %359 }
 0x4b0   :  { %v361_v31 = vsub.f32 %v1048_v16, %v360_v30 }
 0x4b2   :  { %v362_v4 = vmul.f32 %v991_v24, %v361_v31 }
 0x4b4   :  { %v363_v32 = vsel %vm332_vm0, %v362_v4, 0.0 }
 0x4b5   :  { %v364_v33 = vadd.f32 %v363_v32, %v316_v10 }
 0x4b7   :  { %v406_v35 = vmul.f32 %v1100_v28, %v364_v33 }
 0x4b9   :  { %407 = vadd.xlane.f32.xlu0 %v406_v35 }
 0x4c5   :  { %v325_v36 = vpop.xlane.xlu0 %324 }
 0x4c6   :  { %v326_v37 = vsub.f32 %v1059_v34, %v325_v36 }
 0x4c8   :  { %v327_v38 = vmul.f32 %v989_v62, %v326_v37 }
 0x4ca   :  { %v328_v39 = vsel %vm284_vm13, %v327_v38, 0.0  ;;  %vm540_vm13 = vcmask 97368  }
 0x4cb   :  { %v329_v40 = vadd.f32 %v328_v39, %v281_v17  ;;  %vm560_vm15 = vmand %vm540_vm13, %vm205_vm8 }
 0x4cd   :  { %v371_v41 = vmul.f32 %v334_v2, %v329_v40 }
 0x4cf   :  { %372 = vadd.xlane.f32.xlu1 %v371_v41 }
 0x531   :  { %v387_v43 = vpop.xlane.xlu1 %386 }
 0x532   :  { %v388_v44 = vsub.f32 %v384_v42, %v387_v43  ;;  %v506_v42 = vld [vmem:[#allocation0 + $0xa] ss:$0 sm:$0xff] }
 0x534   :  { %992 = vrsqrt.f32 %v388_v44 }
 0x541   :  { %v1110_v47 = vpop.eup %992 }
 0x542   :  { %v408_v45 = vpop.xlane.xlu0 %407 }
 0x543   :  { %v409_v46 = vsub.f32 %v1048_v16, %v408_v45 }
 0x545   :  { %v410_v48 = vmul.f32 %v1110_v47, %v409_v46 }
 0x547   :  { %v411_v49 = vsel %vm380_vm4, %v410_v48, 0.0 }
 0x548   :  { %v412_v50 = vadd.f32 %v411_v49, %v364_v33 }
 0x54a   :  { %414 = vst [vmem:[#allocation1 + $0x8] sm:$0xff] %v412_v50 }
 0x551   :  { %v430_v51 = vld [vmem:[#allocation1 + $0x8] ss:$0 sm:$0xff] }
 0x552   :  { %v442_v52 = vmul.f32 %v430_v51, %v412_v50  ;;  %v433_v53 = vmul.f32 %v430_v51, %v430_v51 }
 0x554   :  { %443 = vadd.xlane.f32.xlu1 %v442_v52  ;;  %434 = vadd.xlane.f32.xlu0 %v433_v53 }
 0x558   :  { %v373_v54 = vpop.xlane.xlu1 %372 }
 0x559   :  { %v374_v55 = vsub.f32 %v1059_v34, %v373_v54 }
 0x55b   :  { %v375_v56 = vmul.f32 %v991_v24, %v374_v55 }
 0x55d   :  { %v376_v57 = vsel %vm332_vm0, %v375_v56, 0.0  ;;  %vm578_vm0 = vcmask 105568  }
 0x55e   :  { %v377_v58 = vadd.f32 %v376_v57, %v329_v40  ;;  %vm598_vm3 = vmand %vm578_vm0, %vm253_vm11 }
 0x560   :  { %v419_v59 = vmul.f32 %v1100_v28, %v377_v58 }
 0x562   :  { %420 = vadd.xlane.f32.xlu0 %v419_v59 }
 0x5dd   :  { %v435_v61 = vpop.xlane.xlu0 %434  ;;  %v444_v63 = vpop.xlane.xlu1 %443 }
 0x5de   :  { %v436_v62 = vsub.f32 %v432_v60, %v435_v61  ;;  %v445_v1 = vsub.f32 %v1048_v16, %v444_v63  ;;  %v544_v61 = vld [vmem:[#allocation0 + $0xb] ss:$0 sm:$0xff] }
 0x5e0   :  { %994 = vrsqrt.f32 %v436_v62 }
 0x5eb   :  { %v421_v0 = vpop.xlane.xlu0 %420 }
 0x5ec   :  { %v422_v2 = vsub.f32 %v1059_v34, %v421_v0 }
 0x5ed   :  { %v995_v3 = vpop.eup %994 }
 0x5ee   :  { %v446_v5 = vmul.f32 %v995_v3, %v445_v1  ;;  %v423_v6 = vmul.f32 %v1110_v47, %v422_v2 }
 0x5f0   :  { %v447_v7 = vsel %vm428_vm6, %v446_v5, 0.0  ;;  %v424_v8 = vsel %vm380_vm4, %v423_v6, 0.0 }
 0x5f1   :  { %v448_v9 = vadd.f32 %v447_v7, %v412_v50  ;;  %v425_v10 = vadd.f32 %v424_v8, %v377_v58 }
 0x5f3   :  { %450 = vst [vmem:[#allocation1 + $0x8] sm:$0xff] %v448_v9  ;;  %v455_v11 = vmul.f32 %v430_v51, %v425_v10 }
 0x5f5   :  { %456 = vadd.xlane.f32.xlu0 %v455_v11 }
 0x5fa   :  { %v466_v12 = vld [vmem:[#allocation1 + $0x9] ss:$0 sm:$0xff] }
 0x5fb   :  { %v469_v13 = vmul.f32 %v466_v12, %v466_v12  ;;  %v478_v14 = vmul.f32 %v466_v12, %v448_v9 }
 0x5fd   :  { %470 = vadd.xlane.f32.xlu1 %v469_v13 }
 0x601   :  { %479 = vadd.xlane.f32.xlu1 %v478_v14 }
 0x67e   :  { %v457_v15 = vpop.xlane.xlu0 %456 }
 0x67f   :  { %v458_v17 = vsub.f32 %v1059_v34, %v457_v15 }
 0x681   :  { %v459_v18 = vmul.f32 %v995_v3, %v458_v17  ;;  %v582_v17 = vld [vmem:[#allocation0 + $0xc] ss:$0 sm:$0xff] }
 0x683   :  { %v460_v19 = vsel %vm428_vm6, %v459_v18, 0.0  ;;  %vm616_vm6 = vcmask 113768  }
 0x684   :  { %v461_v20 = vadd.f32 %v460_v19, %v425_v10 }
 0x686   :  { %v471_v22 = vpop.xlane.xlu1 %470  ;;  %v493_v23 = vmul.f32 %v466_v12, %v461_v20 }
 0x687   :  { %v472_v24 = vsub.f32 %v468_v21, %v471_v22 }
 0x688   :  { %494 = vadd.xlane.f32.xlu0 %v493_v23 }
 0x689   :  { %996 = vrsqrt.f32 %v472_v24 }
 0x68a   :  { %v480_v25 = vpop.xlane.xlu1 %479 }
 0x68b   :  { %v481_v26 = vsub.f32 %v1048_v16, %v480_v25 }
 0x696   :  { %v997_v29 = vpop.eup %996 }
 0x697   :  { %v482_v30 = vmul.f32 %v997_v29, %v481_v26 }
 0x699   :  { %v485_v31 = vsel %vm484_vm9, %v482_v30, 0.0  ;;  %vm654_vm9 = vcmask 121968  }
 0x69a   :  { %v486_v4 = vadd.f32 %v485_v31, %v448_v9 }
 0x69c   :  { %488 = vst [vmem:[#allocation1 + $0x8] sm:$0xff] %v486_v4 }
 0x6a3   :  { %v504_v32 = vld [vmem:[#allocation1 + $0xa] ss:$0 sm:$0xff] }
 0x6a4   :  { %v516_v33 = vmul.f32 %v504_v32, %v486_v4  ;;  %v507_v35 = vmul.f32 %v504_v32, %v504_v32 }
 0x6a6   :  { %517 = vadd.xlane.f32.xlu0 %v516_v33  ;;  %508 = vadd.xlane.f32.xlu1 %v507_v35 }
 0x711   :  { %v495_v36 = vpop.xlane.xlu0 %494 }
 0x712   :  { %v496_v37 = vsub.f32 %v1059_v34, %v495_v36 }
 0x714   :  { %v497_v38 = vmul.f32 %v997_v29, %v496_v37  ;;  %v620_v37 = vld [vmem:[#allocation0 + $0xd] ss:$0 sm:$0xff] }
 0x716   :  { %v498_v39 = vsel %vm464_vm7, %v497_v38, 0.0  ;;  %vm636_vm7 = vmand %vm616_vm6, %vm301_vm14 }
 0x717   :  { %v499_v40 = vadd.f32 %v498_v39, %v461_v20 }
 0x719   :  { %v531_v41 = vmul.f32 %v504_v32, %v499_v40 }
 0x71b   :  { %532 = vadd.xlane.f32.xlu1 %v531_v41 }
 0x72f   :  { %v509_v43 = vpop.xlane.xlu1 %508  ;;  %v518_v45 = vpop.xlane.xlu0 %517 }
 0x730   :  { %v510_v44 = vsub.f32 %v506_v42, %v509_v43  ;;  %v519_v46 = vsub.f32 %v1048_v16, %v518_v45 }
 0x732   :  { %998 = vrsqrt.f32 %v510_v44 }
 0x73f   :  { %v999_v48 = vpop.eup %998 }
 0x740   :  { %v520_v49 = vmul.f32 %v999_v48, %v519_v46 }
 0x742   :  { %v523_v50 = vsel %vm522_vm12, %v520_v49, 0.0  ;;  %vm692_vm12 = vcmask 130168  }
 0x743   :  { %v524_v51 = vadd.f32 %v523_v50, %v486_v4 }
 0x745   :  { %526 = vst [vmem:[#allocation1 + $0x8] sm:$0xff] %v524_v51 }
 0x74c   :  { %v542_v52 = vld [vmem:[#allocation1 + $0xb] ss:$0 sm:$0xff] }
 0x74d   :  { %v554_v53 = vmul.f32 %v542_v52, %v524_v51  ;;  %v545_v54 = vmul.f32 %v542_v52, %v542_v52 }
 0x74f   :  { %555 = vadd.xlane.f32.xlu1 %v554_v53  ;;  %546 = vadd.xlane.f32.xlu0 %v545_v54 }
 0x7a4   :  { %v533_v55 = vpop.xlane.xlu1 %532 }
 0x7a5   :  { %v534_v56 = vsub.f32 %v1059_v34, %v533_v55 }
 0x7a7   :  { %v535_v57 = vmul.f32 %v999_v48, %v534_v56  ;;  %v658_v56 = vld [vmem:[#allocation0 + $0xe] ss:$0 sm:$0xff] }
 0x7a9   :  { %v536_v58 = vsel %vm502_vm10, %v535_v57, 0.0  ;;  %vm674_vm10 = vmand %vm654_vm9, %vm349_vm1 }
 0x7aa   :  { %v537_v59 = vadd.f32 %v536_v58, %v499_v40 }
 0x7ac   :  { %v569_v60 = vmul.f32 %v542_v52, %v537_v59 }
 0x7ae   :  { %570 = vadd.xlane.f32.xlu0 %v569_v60 }
 0x7d8   :  { %v547_v62 = vpop.xlane.xlu0 %546  ;;  %v556_v0 = vpop.xlane.xlu1 %555 }
 0x7d9   :  { %v548_v63 = vsub.f32 %v544_v61, %v547_v62  ;;  %v557_v1 = vsub.f32 %v1048_v16, %v556_v0 }
 0x7db   :  { %1000 = vrsqrt.f32 %v548_v63 }
 0x7e8   :  { %v1001_v2 = vpop.eup %1000 }
 0x7e9   :  { %v558_v3 = vmul.f32 %v1001_v2, %v557_v1 }
 0x7eb   :  { %v561_v5 = vsel %vm560_vm15, %v558_v3, 0.0  ;;  %vm753_vm15 = vcmask 146568  }
 0x7ec   :  { %v562_v6 = vadd.f32 %v561_v5, %v524_v51 }
 0x7ee   :  { %564 = vst [vmem:[#allocation1 + $0x8] sm:$0xff] %v562_v6 }
 0x7f5   :  { %v580_v7 = vld [vmem:[#allocation1 + $0xc] ss:$0 sm:$0xff] }
 0x7f6   :  { %v592_v8 = vmul.f32 %v580_v7, %v562_v6  ;;  %v583_v9 = vmul.f32 %v580_v7, %v580_v7 }
 0x7f8   :  { %593 = vadd.xlane.f32.xlu0 %v592_v8  ;;  %584 = vadd.xlane.f32.xlu1 %v583_v9  ;;  %v696_v9 = vld [vmem:[#allocation0 + $0xf] ss:$0 sm:$0xff] }
 0x837   :  { %v571_v10 = vpop.xlane.xlu0 %570 }
 0x838   :  { %v572_v11 = vsub.f32 %v1059_v34, %v571_v10 }
 0x83a   :  { %v573_v12 = vmul.f32 %v1001_v2, %v572_v11 }
 0x83c   :  { %v574_v13 = vsel %vm540_vm13, %v573_v12, 0.0  ;;  %vm730_vm13 = vcmask 138368  }
 0x83d   :  { %v575_v14 = vadd.f32 %v574_v13, %v537_v59 }
 0x83f   :  { %v607_v15 = vmul.f32 %v580_v7, %v575_v14 }
 0x841   :  { %608 = vadd.xlane.f32.xlu1 %v607_v15 }
 0x881   :  { %v585_v18 = vpop.xlane.xlu1 %584  ;;  %v594_v20 = vpop.xlane.xlu0 %593 }
 0x882   :  { %v586_v19 = vsub.f32 %v582_v17, %v585_v18  ;;  %v595_v21 = vsub.f32 %v1048_v16, %v594_v20 }
 0x884   :  { %1002 = vrsqrt.f32 %v586_v19 }
 0x891   :  { %v1003_v22 = vpop.eup %1002 }
 0x892   :  { %v596_v23 = vmul.f32 %v1003_v22, %v595_v21 }
 0x894   :  { %v599_v24 = vsel %vm598_vm3, %v596_v23, 0.0  ;;  %vm778_vm3 = vcmask 154768  }
 0x895   :  { %v600_v25 = vadd.f32 %v599_v24, %v562_v6 }
 0x897   :  { %602 = vst [vmem:[#allocation1 + $0x8] sm:$0xff] %v600_v25 }
 0x89e   :  { %v618_v26 = vld [vmem:[#allocation1 + $0xd] ss:$0 sm:$0xff] }
 0x89f   :  { %v630_v29 = vmul.f32 %v618_v26, %v600_v25  ;;  %v621_v30 = vmul.f32 %v618_v26, %v618_v26 }
 0x8a1   :  { %631 = vadd.xlane.f32.xlu1 %v630_v29  ;;  %622 = vadd.xlane.f32.xlu0 %v621_v30 }
 0x8ca   :  { %v609_v31 = vpop.xlane.xlu1 %608 }
 0x8cb   :  { %v610_v4 = vsub.f32 %v1059_v34, %v609_v31 }
 0x8cd   :  { %v611_v32 = vmul.f32 %v1003_v22, %v610_v4  ;;  %v734_v22 = vld [vmem:[#allocation0 + $0x10] ss:$0 sm:$0xff] }
 0x8cf   :  { %v612_v33 = vsel %vm578_vm0, %v611_v32, 0.0  ;;  %vm773_vm0 = vmand %vm753_vm15, %vm109_vm2 }
 0x8d0   :  { %v613_v35 = vadd.f32 %v612_v33, %v575_v14  ;;  %vm798_vm2 = vmand %vm778_vm3, %vm157_vm5 }
 0x8d2   :  { %v645_v36 = vmul.f32 %v618_v26, %v613_v35 }
 0x8d4   :  { %646 = vadd.xlane.f32.xlu0 %v645_v36  ;;  %v757_v36 = vld [vmem:[#allocation0 + $0x11] ss:$0 sm:$0xff] }
 0x92a   :  { %v623_v38 = vpop.xlane.xlu0 %622  ;;  %v632_v40 = vpop.xlane.xlu1 %631 }
 0x92b   :  { %v624_v39 = vsub.f32 %v620_v37, %v623_v38  ;;  %v633_v41 = vsub.f32 %v1048_v16, %v632_v40 }
 0x92d   :  { %1004 = vrsqrt.f32 %v624_v39 }
 0x93a   :  { %v1005_v42 = vpop.eup %1004 }
 0x93b   :  { %v634_v43 = vmul.f32 %v1005_v42, %v633_v41 }
 0x93d   :  { %v637_v44 = vsel %vm636_vm7, %v634_v43, 0.0  ;;  %vm828_vm7 = vcmask 171168  }
 0x93e   :  { %v638_v45 = vadd.f32 %v637_v44, %v600_v25 }
 0x940   :  { %640 = vst [vmem:[#allocation1 + $0x8] sm:$0xff] %v638_v45 }
 0x947   :  { %v656_v46 = vld [vmem:[#allocation1 + $0xe] ss:$0 sm:$0xff] }
 0x948   :  { %v668_v48 = vmul.f32 %v656_v46, %v638_v45  ;;  %v659_v49 = vmul.f32 %v656_v46, %v656_v46 }
 0x94a   :  { %669 = vadd.xlane.f32.xlu0 %v668_v48  ;;  %660 = vadd.xlane.f32.xlu1 %v659_v49  ;;  %v782_v49 = vld [vmem:[#allocation0 + $0x12] ss:$0 sm:$0xff] }
 0x95d   :  { %v647_v50 = vpop.xlane.xlu0 %646 }
 0x95e   :  { %v648_v51 = vsub.f32 %v1059_v34, %v647_v50 }
 0x960   :  { %v649_v52 = vmul.f32 %v1005_v42, %v648_v51 }
 0x962   :  { %v650_v53 = vsel %vm616_vm6, %v649_v52, 0.0  ;;  %vm803_vm6 = vcmask 162968  }
 0x963   :  { %v651_v54 = vadd.f32 %v650_v53, %v613_v35  ;;  %vm823_vm5 = vmand %vm803_vm6, %vm205_vm8 }
 0x964   :  { %vm848_vm8 = vmand %vm828_vm7, %vm253_vm11 }
 0x965   :  { %v683_v55 = vmul.f32 %v656_v46, %v651_v54 }
 0x967   :  { %684 = vadd.xlane.f32.xlu1 %v683_v55 }
 0x9d3   :  { %v661_v57 = vpop.xlane.xlu1 %660  ;;  %v670_v59 = vpop.xlane.xlu0 %669 }
 0x9d4   :  { %v662_v58 = vsub.f32 %v658_v56, %v661_v57  ;;  %v671_v60 = vsub.f32 %v1048_v16, %v670_v59 }
 0x9d6   :  { %1006 = vrsqrt.f32 %v662_v58 }
 0x9e3   :  { %v1007_v61 = vpop.eup %1006 }
 0x9e4   :  { %v672_v62 = vmul.f32 %v1007_v61, %v671_v60 }
 0x9e6   :  { %v675_v63 = vsel %vm674_vm10, %v672_v62, 0.0 }
 0x9e7   :  { %v1151_v0 = vadd.f32 %v675_v63, %v638_v45 }
 0x9e9   :  { %678 = vst [vmem:[#allocation1 + $0x8] sm:$0xff] %v1151_v0 }
 0x9f0   :  { %v1154_v1 = vld [vmem:[#allocation1 + $0xf] ss:$0 sm:$0xff]  ;;  %v685_v2 = vpop.xlane.xlu1 %684 }
 0x9f1   :  { %v697_v3 = vmul.f32 %v1154_v1, %v1154_v1  ;;  %v686_v5 = vsub.f32 %v1059_v34, %v685_v2 }
 0x9f3   :  { %698 = vadd.xlane.f32.xlu0 %v697_v3  ;;  %v687_v6 = vmul.f32 %v1007_v61, %v686_v5  ;;  %v807_v61 = vld [vmem:[#allocation0 + $0x13] ss:$0 sm:$0xff] }
 0x9f5   :  { %v688_v16 = vsel %vm654_vm9, %v687_v6, 0.0  ;;  %vm853_vm9 = vcmask 179368  }
 0x9f6   :  { %v689_v7 = vadd.f32 %v688_v16, %v651_v54  ;;  %vm873_vm11 = vmand %vm853_vm9, %vm301_vm14  ;;  %vm397_vm14 = vcmask 1047559  }
 0x9f7   :  { %vm398_vm10 = vmand %vm380_vm4, %vm397_vm14  ;;  %vm903_vm4 = vcmask 195768  }
 0x9f8   :  { %v721_v8 = vmul.f32 %v1154_v1, %v689_v7 }
 0x9fa   :  { %722 = vadd.xlane.f32.xlu1 %v721_v8 }
 0xa7c   :  { %v699_v10 = vpop.xlane.xlu0 %698 }
 0xa7d   :  { %v700_v11 = vsub.f32 %v696_v9, %v699_v10 }
 0xa7f   :  { %1008 = vrsqrt.f32 %v700_v11  ;;  %v832_v11 = vld [vmem:[#allocation0 + $0x14] ss:$0 sm:$0xff] }
 0xa83   :  { %v723_v12 = vpop.xlane.xlu1 %722 }
 0xa84   :  { %v724_v13 = vsub.f32 %v1059_v34, %v723_v12 }
 0xa8c   :  { %v1161_v14 = vpop.eup %1008 }
 0xa8d   :  { %v725_v15 = vmul.f32 %v1161_v14, %v724_v13 }
 0xa8f   :  { %v726_v17 = vsel %vm692_vm12, %v725_v15, 0.0  ;;  %v1172_v15 = vld [vmem:[#allocation0 + $0x10] sm:$0xff] }
 0xa90   :  { %v727_v18 = vadd.f32 %v726_v17, %v689_v7 }
 0xa92   :  { %729 = vst [vmem:[#allocation1 + $0x10] sm:$0xff] %v727_v18 }
 0xa99   :  { %v732_v19 = vld [vmem:[#allocation1 + $0x10] ss:$0 sm:$0xff] }
 0xa9a   :  { %v744_v20 = vmul.f32 %v732_v19, %v727_v18  ;;  %v735_v21 = vmul.f32 %v732_v19, %v732_v19 }
 0xa9c   :  { %745 = vadd.xlane.f32.xlu1 %v744_v20  ;;  %736 = vadd.xlane.f32.xlu0 %v735_v21 }
 0xb25   :  { %v737_v23 = vpop.xlane.xlu0 %736  ;;  %v746_v25 = vpop.xlane.xlu1 %745 }
 0xb26   :  { %v738_v24 = vsub.f32 %v734_v22, %v737_v23  ;;  %v747_v26 = vsub.f32 %v1059_v34, %v746_v25  ;;  %v857_v25 = vld [vmem:[#allocation0 + $0x15] ss:$0 sm:$0xff] }
 0xb28   :  { %1010 = vrsqrt.f32 %v738_v24 }
 0xb35   :  { %v1011_v29 = vpop.eup %1010 }
 0xb36   :  { %v748_v30 = vmul.f32 %v1011_v29, %v747_v26 }
 0xb38   :  { %v749_v31 = vsel %vm730_vm13, %v748_v30, 0.0  ;;  %vm878_vm13 = vcmask 187568  }
 0xb39   :  { %v750_v4 = vadd.f32 %v749_v31, %v727_v18  ;;  %vm898_vm15 = vmand %vm878_vm13, %vm349_vm1 }
 0xb3a   :  { %vm712_vm1 = vmand %vm692_vm12, %vm397_vm14 }
 0xb3b   :  { %752 = vst [vmem:[#allocation1 + $0x10] sm:$0xff] %v750_v4 }
 0xb42   :  { %v755_v32 = vld [vmem:[#allocation1 + $0x11] ss:$0 sm:$0xff] }
 0xb43   :  { %v767_v33 = vmul.f32 %v755_v32, %v750_v4  ;;  %v758_v35 = vmul.f32 %v755_v32, %v755_v32 }
 0xb45   :  { %768 = vadd.xlane.f32.xlu1 %v767_v33  ;;  %759 = vadd.xlane.f32.xlu0 %v758_v35 }
 0xbce   :  { %v760_v37 = vpop.xlane.xlu0 %759  ;;  %v769_v39 = vpop.xlane.xlu1 %768 }
 0xbcf   :  { %v761_v38 = vsub.f32 %v757_v36, %v760_v37  ;;  %v770_v40 = vsub.f32 %v1059_v34, %v769_v39  ;;  %v392_v39 = vmul.f32 %v1100_v28, %v1097_v27 }
 0xbd1   :  { %1012 = vrsqrt.f32 %v761_v38 }
 0xbde   :  { %v1013_v41 = vpop.eup %1012 }
 0xbdf   :  { %v771_v42 = vmul.f32 %v1013_v41, %v770_v40  ;;  %v882_v40 = vld [vmem:[#allocation0 + $0x16] ss:$0 sm:$0xff] }
 0xbe1   :  { %v774_v43 = vsel %vm773_vm0, %v771_v42, 0.0  ;;  %vm923_vm0 = vmand %vm903_vm4, %vm397_vm14 }
 0xbe2   :  { %v775_v44 = vadd.f32 %v774_v43, %v750_v4 }
 0xbe4   :  { %777 = vst [vmem:[#allocation1 + $0x10] sm:$0xff] %v775_v44 }
 0xbeb   :  { %v780_v45 = vld [vmem:[#allocation1 + $0x12] ss:$0 sm:$0xff] }
 0xbec   :  { %v792_v46 = vmul.f32 %v780_v45, %v775_v44  ;;  %v783_v48 = vmul.f32 %v780_v45, %v780_v45 }
 0xbee   :  { %793 = vadd.xlane.f32.xlu1 %v792_v46  ;;  %784 = vadd.xlane.f32.xlu0 %v783_v48 }
 0xc77   :  { %v785_v50 = vpop.xlane.xlu0 %784  ;;  %v794_v52 = vpop.xlane.xlu1 %793 }
 0xc78   :  { %v786_v51 = vsub.f32 %v782_v49, %v785_v50  ;;  %v795_v53 = vsub.f32 %v1059_v34, %v794_v52 }
 0xc7a   :  { %1014 = vrsqrt.f32 %v786_v51 }
 0xc87   :  { %v1015_v54 = vpop.eup %1014 }
 0xc88   :  { %v796_v55 = vmul.f32 %v1015_v54, %v795_v53 }
 0xc8a   :  { %v799_v56 = vsel %vm798_vm2, %v796_v55, 0.0 }
 0xc8b   :  { %v800_v57 = vadd.f32 %v799_v56, %v775_v44  ;;  %v390_v44 = vld [vmem:[#allocation0] sm:$0xff] }
 0xc8d   :  { %802 = vst [vmem:[#allocation1 + $0x10] sm:$0xff] %v800_v57 }
 0xc94   :  { %v805_v58 = vld [vmem:[#allocation1 + $0x13] ss:$0 sm:$0xff] }
 0xc95   :  { %v817_v59 = vmul.f32 %v805_v58, %v800_v57  ;;  %v808_v60 = vmul.f32 %v805_v58, %v805_v58 }
 0xc97   :  { %818 = vadd.xlane.f32.xlu1 %v817_v59  ;;  %809 = vadd.xlane.f32.xlu0 %v808_v60  ;;  %v703_v60 = vld [vmem:[#allocation0 + $0x8] sm:$0xff] }
 0xd20   :  { %v810_v62 = vpop.xlane.xlu0 %809  ;;  %v819_v2 = vpop.xlane.xlu1 %818 }
 0xd21   :  { %v811_v63 = vsub.f32 %v807_v61, %v810_v62  ;;  %v820_v3 = vsub.f32 %v1059_v34, %v819_v2 }
 0xd23   :  { %1016 = vrsqrt.f32 %v811_v63 }
 0xd30   :  { %v1017_v5 = vpop.eup %1016 }
 0xd31   :  { %v821_v6 = vmul.f32 %v1017_v5, %v820_v3 }
 0xd33   :  { %v824_v16 = vsel %vm823_vm5, %v821_v6, 0.0 }
 0xd34   :  { %v825_v7 = vadd.f32 %v824_v16, %v800_v57  ;;  %v907_v57 = vld [vmem:[#allocation0 + $0x17] ss:$0 sm:$0xff] }
 0xd36   :  { %827 = vst [vmem:[#allocation1 + $0x10] sm:$0xff] %v825_v7 }
 0xd3d   :  { %v830_v8 = vld [vmem:[#allocation1 + $0x14] ss:$0 sm:$0xff] }
 0xd3e   :  { %v842_v9 = vmul.f32 %v830_v8, %v825_v7  ;;  %v833_v10 = vmul.f32 %v830_v8, %v830_v8 }
 0xd40   :  { %843 = vadd.xlane.f32.xlu1 %v842_v9  ;;  %834 = vadd.xlane.f32.xlu0 %v833_v10 }
 0xdc9   :  { %v835_v12 = vpop.xlane.xlu0 %834  ;;  %v844_v17 = vpop.xlane.xlu1 %843 }
 0xdca   :  { %v836_v13 = vsub.f32 %v832_v11, %v835_v12  ;;  %v845_v34 = vsub.f32 %v1172_v15, %v844_v17 }
 0xdcc   :  { %1018 = vrsqrt.f32 %v836_v13 }
 0xdd9   :  { %v1019_v18 = vpop.eup %1018 }
 0xdda   :  { %v846_v19 = vmul.f32 %v1019_v18, %v845_v34 }
 0xddc   :  { %v849_v20 = vsel %vm848_vm8, %v846_v19, 0.0 }
 0xddd   :  { %v850_v21 = vadd.f32 %v849_v20, %v825_v7 }
 0xddf   :  { %852 = vst [vmem:[#allocation1 + $0x10] sm:$0xff] %v850_v21 }
 0xde6   :  { %v855_v22 = vld [vmem:[#allocation1 + $0x15] ss:$0 sm:$0xff] }
 0xde7   :  { %v867_v23 = vmul.f32 %v855_v22, %v850_v21  ;;  %v858_v24 = vmul.f32 %v855_v22, %v855_v22 }
 0xde9   :  { %868 = vadd.xlane.f32.xlu1 %v867_v23  ;;  %859 = vadd.xlane.f32.xlu0 %v858_v24 }
 0xe72   :  { %v860_v26 = vpop.xlane.xlu0 %859  ;;  %v869_v30 = vpop.xlane.xlu1 %868 }
 0xe73   :  { %v861_v29 = vsub.f32 %v857_v25, %v860_v26  ;;  %v870_v31 = vsub.f32 %v1172_v15, %v869_v30 }
 0xe75   :  { %1020 = vrsqrt.f32 %v861_v29 }
 0xe82   :  { %v1021_v4 = vpop.eup %1020 }
 0xe83   :  { %v871_v32 = vmul.f32 %v1021_v4, %v870_v31 }
 0xe85   :  { %v874_v33 = vsel %vm873_vm11, %v871_v32, 0.0 }
 0xe86   :  { %v875_v35 = vadd.f32 %v874_v33, %v850_v21 }
 0xe88   :  { %877 = vst [vmem:[#allocation1 + $0x10] sm:$0xff] %v875_v35 }
 0xe8f   :  { %v880_v36 = vld [vmem:[#allocation1 + $0x16] ss:$0 sm:$0xff] }
 0xe90   :  { %v892_v37 = vmul.f32 %v880_v36, %v875_v35  ;;  %v883_v38 = vmul.f32 %v880_v36, %v880_v36 }
 0xe92   :  { %893 = vadd.xlane.f32.xlu1 %v892_v37  ;;  %884 = vadd.xlane.f32.xlu0 %v883_v38 }
 0xe96   :  { %393 = vadd.xlane.f32.xlu1 %v392_v39 }
 0xf1b   :  { %v894_v41 = vpop.xlane.xlu1 %893  ;;  %v885_v42 = vpop.xlane.xlu0 %884 }
 0xf1c   :  { %v886_v43 = vsub.f32 %v882_v40, %v885_v42  ;;  %v895_v28 = vsub.f32 %v1172_v15, %v894_v41 }
 0xf1e   :  { %1022 = vrsqrt.f32 %v886_v43 }
 0xf1f   :  { %v394_v45 = vpop.xlane.xlu1 %393 }
 0xf20   :  { %v395_v46 = vsub.f32 %v390_v44, %v394_v45 }
 0xf22   :  { %v396_v48 = vmul.f32 %v1110_v47, %v395_v46 }
 0xf24   :  { %v399_v49 = vsel %vm398_vm10, %v396_v48, 0.0 }
 0xf25   :  { %v400_v50 = vadd.f32 %v399_v49, %v1097_v27  ;;  %v706_v27 = vmul.f32 %v1154_v1, %v1151_v0 }
 0xf27   :  { %401 = vst [vmem:[#allocation1] sm:$0xff] %v400_v50  ;;  %961 = vst [vmem:[%s1204_s1] sm:$0xff] %v400_v50 }
 0xf2b   :  { %v1023_v51 = vpop.eup %1022 }
 0xf2c   :  { %v896_v52 = vmul.f32 %v1023_v51, %v895_v28 }
 0xf2e   :  { %v899_v53 = vsel %vm898_vm15, %v896_v52, 0.0 }
 0xf2f   :  { %v900_v54 = vadd.f32 %v899_v53, %v875_v35 }
 0xf31   :  { %902 = vst [vmem:[#allocation1 + $0x10] sm:$0xff] %v900_v54 }
 0xf38   :  { %v905_v55 = vld [vmem:[#allocation1 + $0x17] ss:$0 sm:$0xff] }
 0xf39   :  { %v917_v47 = vmul.f32 %v905_v55, %v900_v54  ;;  %v908_v56 = vmul.f32 %v905_v55, %v905_v55 }
 0xf3b   :  { %918 = vadd.xlane.f32.xlu1 %v917_v47  ;;  %909 = vadd.xlane.f32.xlu0 %v908_v56 }
 0xf3f   :  { %707 = vadd.xlane.f32.xlu0 %v706_v27 }
 0xfc4   :  { %v910_v58 = vpop.xlane.xlu0 %909  ;;  %v919_v5 = vpop.xlane.xlu1 %918 }
 0xfc5   :  { %v911_v59 = vsub.f32 %v907_v57, %v910_v58  ;;  %v920_v1 = vsub.f32 %v1172_v15, %v919_v5 }
 0xfc7   :  { %1024 = vrsqrt.f32 %v911_v59 }
 0xfc8   :  { %v708_v61 = vpop.xlane.xlu0 %707 }
 0xfc9   :  { %v709_v62 = vsub.f32 %v703_v60, %v708_v61 }
 0xfcb   :  { %v710_v63 = vmul.f32 %v1161_v14, %v709_v62 }
 0xfcd   :  { %v713_v2 = vsel %vm712_vm1, %v710_v63, 0.0 }
 0xfce   :  { %v714_v3 = vadd.f32 %v713_v2, %v1151_v0 }
 0xfd0   :  { %716 = vst [vmem:[#allocation1 + $0x8] sm:$0xff] %v714_v3  ;;  %963 = vst [vmem:[%s1204_s1 + $0x8] sm:$0xff] %v714_v3 }
 0xfd4   :  { %v1025_v6 = vpop.eup %1024 }
 0xfd5   :  { %v921_v16 = vmul.f32 %v1025_v6, %v920_v1 }
 0xfd7   :  { %v924_v7 = vsel %vm923_vm0, %v921_v16, 0.0 }
 0xfd8   :  { %v925_v8 = vadd.f32 %v924_v7, %v900_v54 }
 0xfda   :  { %927 = vst [vmem:[#allocation1 + $0x10] sm:$0xff] %v925_v8  ;;  %965 = vst [vmem:[%s1204_s1 + $0x10] sm:$0xff] %v925_v8 }

// kernel: custom-call.7
= control target key start
LH: loop header
LB: loop body
LE: loop exit
PB: predicated region body
PF: predicated region fallthrough
CT: control target
= control target key end

     0   :  { %v43_v0 = vlaneseq  ;;  %v517_v9 = vmov -1.0   ;;  %v518_v53 = vmov 0.0   ;;  %s622_s0 = inlined_call_operand.vmem [shape: f32[1,24,24], index: 0, kind: input, shape index: {}]   ;;  %s623_s1 = inlined_call_operand.vmem [shape: f32[1,24,24], index: 1, kind: output, shape index: {}]  }
   0x1   :  { %v34_v1 = vld [vmem:[%s622_s0] sm:$0xff]  ;;  %v36_v36 = vld [vmem:[%s622_s0 + $0x8] sm:$0xff] }
   0x2   :  { %v532_v2 = vand.u32 127, %v43_v0  ;;  %v534_v3 = vshrl.u32 %v43_v0, 7 }
   0x4   :  { %vm49_vm0 = vcmp.eq.s32.totalorder %v534_v3, %v532_v2  ;;  %vm45_vm1 = vcmp.lt.s32.totalorder %v532_v2, 24  ;;  %vm54_vm2 = vcmp.ge.s32.totalorder %v534_v3, %v532_v2  ;;  %vm100_vm4 = vcmp.eq.s32.totalorder %v532_v2, 0 }
   0x5   :  { %v51_v4 = vsel %vm49_vm0, %v34_v1, 0.0  ;;  %vm55_vm3 = vmand %vm54_vm2, %vm45_vm1  ;;  %vm97_vm5 = vcmp.eq.s32.totalorder %v532_v2, %v534_v3  ;;  %v101_v10 = vsel %vm100_vm4, 1.0, %v517_v9  ;;  %vm122_vm6 = vcmp.eq.s32.totalorder %v532_v2, 1 }
   0x6   :  { %52 = vadd.xlane.f32.xlu0 %v51_v4  ;;  %v56_v6 = vsel %vm55_vm3, %v34_v1, 0.0  ;;  %v102_v11 = vsel %vm97_vm5, %v101_v10, 0.0  ;;  %vm132_vm7 = vcmp.eq.s32.totalorder %v532_v2, 2  ;;  %vm142_vm8 = vcmp.eq.s32.totalorder %v532_v2, 3 }
   0x7   :  { %vm152_vm9 = vcmp.eq.s32.totalorder %v532_v2, 4  ;;  %v64_v31 = vadd.s32 8, %v534_v3  ;;  %vm162_vm11 = vcmp.eq.s32.totalorder %v532_v2, 5  ;;  %vm172_vm14 = vcmp.eq.s32.totalorder %v532_v2, 6 }
   0x8   :  { %vm182_vm0 = vcmp.eq.s32.totalorder %v532_v2, 7  ;;  %vm192_vm2 = vcmp.eq.s32.totalorder %v532_v2, 8  ;;  %vm206_vm3 = vcmp.eq.s32.totalorder %v532_v2, 9  ;;  %vm220_vm4 = vcmp.eq.s32.totalorder %v532_v2, 10 }
   0x9   :  { %vm65_vm10 = vcmp.eq.s32.totalorder %v64_v31, %v532_v2  ;;  %vm70_vm12 = vcmp.ge.s32.totalorder %v64_v31, %v532_v2  ;;  %vm108_vm15 = vcmp.eq.s32.totalorder %v532_v2, %v64_v31  ;;  %vm234_vm5 = vcmp.eq.s32.totalorder %v532_v2, 11 }
   0xa   :  { %v67_v37 = vsel %vm65_vm10, %v36_v36, 0.0  ;;  %vm71_vm13 = vmand %vm70_vm12, %vm45_vm1  ;;  %v109_v54 = vsel %vm108_vm15, -1.0, %v518_v53  ;;  %vm290_vm12 = vcmp.eq.s32.totalorder %v532_v2, 15  ;;  %vm340_vm15 = vcmp.eq.s32.totalorder %v532_v2, 18 }
   0xb   :  { %v72_v44 = vsel %vm71_vm13, %v36_v36, 0.0 }
  0x8f   :  { %v538_v5 = vpop.xlane.xlu0 %52 }
  0x90   :  { %511 = vrcp.f32 %v538_v5 }
  0x9d   :  { %v546_v7 = vpop.eup %511 }
  0x9e   :  { %v58_v8 = vmul.f32 %v546_v7, %v56_v6 }
  0xa0   :  { %59 = vst [vmem:[#allocation2] sm:$0xff] %v58_v8 }
  0xa7   :  { %v118_v12 = vld [vmem:[#allocation2 + $0x1] ss:$0 sm:$0xff]  ;;  %v128_v15 = vld [vmem:[#allocation2 + $0x2] ss:$0 sm:$0xff]  ;;  %v138_v20 = vld [vmem:[#allocation2 + $0x3] ss:$0 sm:$0xff] }
  0xa8   :  { %v119_v13 = vxor.u32 2147483648, %v118_v12  ;;  %v129_v17 = vxor.u32 2147483648, %v128_v15  ;;  %v139_v22 = vxor.u32 2147483648, %v138_v20  ;;  %v148_v25 = vld [vmem:[#allocation2 + $0x4] ss:$0 sm:$0xff] }
  0xa9   :  { %v149_v27 = vxor.u32 2147483648, %v148_v25  ;;  %v158_v30 = vld [vmem:[#allocation2 + $0x5] ss:$0 sm:$0xff]  ;;  %v168_v38 = vld [vmem:[#allocation2 + $0x6] ss:$0 sm:$0xff] }
  0xaa   :  { %v123_v14 = vmul.f32 %v119_v13, %v102_v11  ;;  %v159_v33 = vxor.u32 2147483648, %v158_v30  ;;  %v169_v40 = vxor.u32 2147483648, %v168_v38  ;;  %v178_v47 = vld [vmem:[#allocation2 + $0x7] ss:$0 sm:$0xff] }
  0xab   :  { %v179_v50 = vxor.u32 2147483648, %v178_v47  ;;  %v80_v47 = vadd.s32 16, %v534_v3 }
  0xac   :  { %124 = vadd.xlane.f32.xlu0 %v123_v14 }
  0xad   :  { %vm86_vm10 = vcmp.ge.s32.totalorder %v80_v47, %v532_v2  ;;  %vm115_vm13 = vcmp.eq.s32.totalorder %v532_v2, %v80_v47 }
 0x135   :  { %v125_v16 = vpop.xlane.xlu0 %124 }
 0x136   :  { %v126_v18 = vsel %vm122_vm6, %v125_v16, %v102_v11  ;;  %vm248_vm6 = vcmp.eq.s32.totalorder %v532_v2, 12 }
 0x137   :  { %v133_v19 = vmul.f32 %v129_v17, %v126_v18 }
 0x139   :  { %134 = vadd.xlane.f32.xlu1 %v133_v19 }
 0x1c2   :  { %v135_v21 = vpop.xlane.xlu1 %134 }
 0x1c3   :  { %v136_v23 = vsel %vm132_vm7, %v135_v21, %v126_v18  ;;  %vm262_vm7 = vcmp.eq.s32.totalorder %v532_v2, 13 }
 0x1c4   :  { %v143_v24 = vmul.f32 %v139_v22, %v136_v23 }
 0x1c6   :  { %144 = vadd.xlane.f32.xlu1 %v143_v24 }
 0x24f   :  { %v145_v26 = vpop.xlane.xlu1 %144 }
 0x250   :  { %v146_v28 = vsel %vm142_vm8, %v145_v26, %v136_v23  ;;  %vm81_vm8 = vcmp.eq.s32.totalorder %v80_v47, %v532_v2 }
 0x251   :  { %v153_v29 = vmul.f32 %v149_v27, %v146_v28 }
 0x253   :  { %154 = vadd.xlane.f32.xlu0 %v153_v29 }
 0x2dc   :  { %v155_v32 = vpop.xlane.xlu0 %154 }
 0x2dd   :  { %v156_v34 = vsel %vm152_vm9, %v155_v32, %v146_v28  ;;  %vm276_vm9 = vcmp.eq.s32.totalorder %v532_v2, 14 }
 0x2de   :  { %v163_v35 = vmul.f32 %v159_v33, %v156_v34 }
 0x2e0   :  { %164 = vadd.xlane.f32.xlu1 %v163_v35 }
 0x2e4   :  { %68 = vadd.xlane.f32.xlu1 %v67_v37 }
 0x369   :  { %v165_v39 = vpop.xlane.xlu1 %164 }
 0x36a   :  { %v166_v41 = vsel %vm162_vm11, %v165_v39, %v156_v34  ;;  %vm87_vm11 = vmand %vm86_vm10, %vm45_vm1  ;;  %vm304_vm1 = vcmp.eq.s32.totalorder %v532_v2, 16 }
 0x36b   :  { %v173_v42 = vmul.f32 %v169_v40, %v166_v41 }
 0x36d   :  { %174 = vadd.xlane.f32.xlu0 %v173_v42  ;;  %v562_v43 = vpop.xlane.xlu1 %68 }
 0x36e   :  { %513 = vrcp.f32 %v562_v43 }
 0x37b   :  { %v568_v45 = vpop.eup %513 }
 0x37c   :  { %v74_v46 = vmul.f32 %v568_v45, %v72_v44 }
 0x37e   :  { %75 = vst [vmem:[#allocation2 + $0x8] sm:$0xff] %v74_v46 }
 0x385   :  { %v188_v48 = vld [vmem:[#allocation2 + $0x8] ss:$0 sm:$0xff]  ;;  %v202_v59 = vld [vmem:[#allocation2 + $0x9] ss:$0 sm:$0xff]  ;;  %v216_v6 = vld [vmem:[#allocation2 + $0xa] ss:$0 sm:$0xff] }
 0x386   :  { %v189_v51 = vxor.u32 2147483648, %v188_v48  ;;  %v203_v62 = vxor.u32 2147483648, %v202_v59  ;;  %v217_v10 = vxor.u32 2147483648, %v216_v6  ;;  %v230_v15 = vld [vmem:[#allocation2 + $0xb] ss:$0 sm:$0xff] }
 0x387   :  { %v231_v18 = vxor.u32 2147483648, %v230_v15  ;;  %v244_v23 = vld [vmem:[#allocation2 + $0xc] ss:$0 sm:$0xff]  ;;  %v258_v31 = vld [vmem:[#allocation2 + $0xd] ss:$0 sm:$0xff] }
 0x388   :  { %v197_v56 = vmul.f32 %v189_v51, %v109_v54  ;;  %v245_v26 = vxor.u32 2147483648, %v244_v23  ;;  %v259_v34 = vxor.u32 2147483648, %v258_v31  ;;  %v272_v39 = vld [vmem:[#allocation2 + $0xe] ss:$0 sm:$0xff] }
 0x389   :  { %v273_v42 = vxor.u32 2147483648, %v272_v39 }
 0x3f6   :  { %v175_v49 = vpop.xlane.xlu0 %174 }
 0x3f7   :  { %v176_v52 = vsel %vm172_vm14, %v175_v49, %v166_v41  ;;  %vm322_vm14 = vcmp.eq.s32.totalorder %v532_v2, 17 }
 0x3f8   :  { %v183_v55 = vmul.f32 %v179_v50, %v176_v52 }
 0x3fa   :  { %184 = vadd.xlane.f32.xlu0 %v183_v55  ;;  %v286_v55 = vld [vmem:[#allocation2 + $0xf] ss:$0 sm:$0xff] }
 0x3fe   :  { %198 = vadd.xlane.f32.xlu0 %v197_v56 }
 0x483   :  { %v185_v57 = vpop.xlane.xlu0 %184 }
 0x484   :  { %v186_v58 = vsel %vm182_vm0, %v185_v57, %v176_v52  ;;  %v287_v57 = vxor.u32 2147483648, %v286_v55  ;;  %vm358_vm0 = vcmp.eq.s32.totalorder %v532_v2, 19 }
 0x485   :  { %v193_v60 = vmul.f32 %v189_v51, %v186_v58  ;;  %v38_v51 = vld [vmem:[%s622_s0 + $0x10] sm:$0xff] }
 0x487   :  { %v199_v61 = vpop.xlane.xlu0 %198  ;;  %194 = vadd.xlane.f32.xlu1 %v193_v60 }
 0x488   :  { %v200_v63 = vsel %vm192_vm2, %v199_v61, %v109_v54  ;;  %v83_v54 = vsel %vm81_vm8, %v38_v51, 0.0 }
 0x489   :  { %v211_v0 = vmul.f32 %v203_v62, %v200_v63 }
 0x48b   :  { %212 = vadd.xlane.f32.xlu0 %v211_v0 }
 0x510   :  { %v195_v1 = vpop.xlane.xlu1 %194 }
 0x511   :  { %v196_v4 = vsel %vm192_vm2, %v195_v1, %v186_v58  ;;  %vm376_vm2 = vcmp.eq.s32.totalorder %v532_v2, 20 }
 0x512   :  { %v207_v8 = vmul.f32 %v203_v62, %v196_v4  ;;  %v88_v62 = vsel %vm87_vm11, %v38_v51, 0.0 }
 0x514   :  { %v213_v9 = vpop.xlane.xlu0 %212  ;;  %208 = vadd.xlane.f32.xlu1 %v207_v8 }
 0x515   :  { %v214_v11 = vsel %vm206_vm3, %v213_v9, %v200_v63 }
 0x516   :  { %v225_v12 = vmul.f32 %v217_v10, %v214_v11 }
 0x518   :  { %226 = vadd.xlane.f32.xlu0 %v225_v12 }
 0x59d   :  { %v209_v13 = vpop.xlane.xlu1 %208 }
 0x59e   :  { %v210_v14 = vsel %vm206_vm3, %v209_v13, %v196_v4  ;;  %v116_v13 = vsel %vm115_vm13, -1.0, %v518_v53  ;;  %vm394_vm3 = vcmp.eq.s32.totalorder %v532_v2, 21 }
 0x59f   :  { %v221_v16 = vmul.f32 %v217_v10, %v210_v14 }
 0x5a1   :  { %v227_v17 = vpop.xlane.xlu0 %226  ;;  %222 = vadd.xlane.f32.xlu1 %v221_v16 }
 0x5a2   :  { %v228_v19 = vsel %vm220_vm4, %v227_v17, %v214_v11 }
 0x5a3   :  { %v239_v20 = vmul.f32 %v231_v18, %v228_v19 }
 0x5a5   :  { %240 = vadd.xlane.f32.xlu0 %v239_v20 }
 0x62a   :  { %v223_v21 = vpop.xlane.xlu1 %222 }
 0x62b   :  { %v224_v22 = vsel %vm220_vm4, %v223_v21, %v210_v14  ;;  %vm412_vm4 = vcmp.eq.s32.totalorder %v532_v2, 22 }
 0x62c   :  { %v235_v24 = vmul.f32 %v231_v18, %v224_v22 }
 0x62e   :  { %v241_v25 = vpop.xlane.xlu0 %240  ;;  %236 = vadd.xlane.f32.xlu1 %v235_v24 }
 0x62f   :  { %v242_v27 = vsel %vm234_vm5, %v241_v25, %v228_v19 }
 0x630   :  { %v253_v28 = vmul.f32 %v245_v26, %v242_v27 }
 0x632   :  { %254 = vadd.xlane.f32.xlu0 %v253_v28 }
 0x6b7   :  { %v237_v29 = vpop.xlane.xlu1 %236 }
 0x6b8   :  { %v238_v30 = vsel %vm234_vm5, %v237_v29, %v224_v22  ;;  %vm430_vm5 = vcmp.eq.s32.totalorder %v532_v2, 23 }
 0x6b9   :  { %v249_v32 = vmul.f32 %v245_v26, %v238_v30 }
 0x6bb   :  { %v255_v33 = vpop.xlane.xlu0 %254  ;;  %250 = vadd.xlane.f32.xlu1 %v249_v32 }
 0x6bc   :  { %v256_v35 = vsel %vm248_vm6, %v255_v33, %v242_v27 }
 0x6bd   :  { %v267_v36 = vmul.f32 %v259_v34, %v256_v35 }
 0x6bf   :  { %268 = vadd.xlane.f32.xlu0 %v267_v36 }
 0x744   :  { %v251_v37 = vpop.xlane.xlu1 %250 }
 0x745   :  { %v252_v38 = vsel %vm248_vm6, %v251_v37, %v238_v30  ;;  %vm450_vm6 = vweird.f32 %v562_v43 }
 0x746   :  { %v263_v40 = vmul.f32 %v259_v34, %v252_v38 }
 0x748   :  { %v269_v41 = vpop.xlane.xlu0 %268  ;;  %264 = vadd.xlane.f32.xlu1 %v263_v40 }
 0x749   :  { %v270_v44 = vsel %vm262_vm7, %v269_v41, %v256_v35 }
 0x74a   :  { %v281_v46 = vmul.f32 %v273_v42, %v270_v44 }
 0x74c   :  { %282 = vadd.xlane.f32.xlu0 %v281_v46 }
 0x7d1   :  { %v265_v48 = vpop.xlane.xlu1 %264 }
 0x7d2   :  { %v266_v49 = vsel %vm262_vm7, %v265_v48, %v252_v38  ;;  %vm445_vm7 = vweird.f32 %v538_v5 }
 0x7d3   :  { %v277_v50 = vmul.f32 %v273_v42, %v266_v49 }
 0x7d5   :  { %v283_v52 = vpop.xlane.xlu0 %282  ;;  %278 = vadd.xlane.f32.xlu1 %v277_v50 }
 0x7d6   :  { %v284_v56 = vsel %vm276_vm9, %v283_v52, %v270_v44 }
 0x7d7   :  { %v295_v58 = vmul.f32 %v287_v57, %v284_v56 }
 0x7d9   :  { %84 = vadd.xlane.f32.xlu1 %v83_v54 }
 0x7dd   :  { %296 = vadd.xlane.f32.xlu1 %v295_v58 }
 0x85e   :  { %v279_v3 = vpop.xlane.xlu1 %278 }
 0x85f   :  { %v280_v59 = vsel %vm276_vm9, %v279_v3, %v266_v49 }
 0x860   :  { %v291_v60 = vmul.f32 %v287_v57, %v280_v59 }
 0x862   :  { %292 = vadd.xlane.f32.xlu0 %v291_v60  ;;  %v587_v61 = vpop.xlane.xlu1 %84 }
 0x863   :  { %515 = vrcp.f32 %v587_v61  ;;  %vm456_vm8 = vweird.f32 %v587_v61 }
 0x866   :  { %v297_v1 = vpop.xlane.xlu1 %296 }
 0x867   :  { %v298_v8 = vsel %vm290_vm12, %v297_v1, %v284_v56 }
 0x870   :  { %v593_v63 = vpop.eup %515 }
 0x871   :  { %v90_v0 = vmul.f32 %v593_v63, %v88_v62 }
 0x873   :  { %91 = vst [vmem:[#allocation2 + $0x10] sm:$0xff] %v90_v0 }
 0x87a   :  { %v300_v4 = vld [vmem:[#allocation2 + $0x10] ss:$0 sm:$0xff]  ;;  %v318_v15 = vld [vmem:[#allocation2 + $0x11] ss:$0 sm:$0xff]  ;;  %v336_v53 = vld [vmem:[#allocation2 + $0x12] ss:$0 sm:$0xff] }
 0x87b   :  { %v301_v6 = vxor.u32 2147483648, %v300_v4  ;;  %v319_v17 = vxor.u32 2147483648, %v318_v15  ;;  %v337_v27 = vxor.u32 2147483648, %v336_v53  ;;  %v354_v36 = vld [vmem:[#allocation2 + $0x13] ss:$0 sm:$0xff] }
 0x87c   :  { %v355_v38 = vxor.u32 2147483648, %v354_v36  ;;  %v372_v49 = vld [vmem:[#allocation2 + $0x14] ss:$0 sm:$0xff]  ;;  %v390_v60 = vld [vmem:[#allocation2 + $0x15] ss:$0 sm:$0xff] }
 0x87d   :  { %v309_v9 = vmul.f32 %v301_v6, %v298_v8  ;;  %v313_v14 = vmul.f32 %v301_v6, %v116_v13  ;;  %v373_v51 = vxor.u32 2147483648, %v372_v49  ;;  %v391_v0 = vxor.u32 2147483648, %v390_v60 }
 0x87f   :  { %310 = vadd.xlane.f32.xlu1 %v309_v9 }
 0x8eb   :  { %v293_v10 = vpop.xlane.xlu0 %292 }
 0x8ec   :  { %v294_v11 = vsel %vm290_vm12, %v293_v10, %v280_v59 }
 0x8ed   :  { %v305_v12 = vmul.f32 %v301_v6, %v294_v11 }
 0x8ef   :  { %306 = vadd.xlane.f32.xlu0 %v305_v12 }
 0x8f3   :  { %314 = vadd.xlane.f32.xlu0 %v313_v14 }
 0x908   :  { %v311_v16 = vpop.xlane.xlu1 %310 }
 0x909   :  { %v312_v18 = vsel %vm304_vm1, %v311_v16, %v298_v8 }
 0x90a   :  { %v327_v19 = vmul.f32 %v319_v17, %v312_v18 }
 0x90c   :  { %328 = vadd.xlane.f32.xlu0 %v327_v19 }
 0x978   :  { %v307_v20 = vpop.xlane.xlu0 %306 }
 0x979   :  { %v308_v21 = vsel %vm304_vm1, %v307_v20, %v294_v11 }
 0x97a   :  { %v323_v22 = vmul.f32 %v319_v17, %v308_v21 }
 0x97c   :  { %v315_v23 = vpop.xlane.xlu0 %314  ;;  %324 = vadd.xlane.f32.xlu1 %v323_v22 }
 0x97d   :  { %v316_v24 = vsel %vm304_vm1, %v315_v23, %v116_v13  ;;  %v408_v13 = vld [vmem:[#allocation2 + $0x16] ss:$0 sm:$0xff] }
 0x97e   :  { %v331_v25 = vmul.f32 %v319_v17, %v316_v24  ;;  %v409_v15 = vxor.u32 2147483648, %v408_v13 }
 0x980   :  { %332 = vadd.xlane.f32.xlu1 %v331_v25 }
 0x995   :  { %v329_v26 = vpop.xlane.xlu0 %328 }
 0x996   :  { %v330_v28 = vsel %vm322_vm14, %v329_v26, %v312_v18 }
 0x997   :  { %v345_v29 = vmul.f32 %v337_v27, %v330_v28 }
 0x999   :  { %346 = vadd.xlane.f32.xlu1 %v345_v29 }
 0xa05   :  { %v325_v30 = vpop.xlane.xlu1 %324 }
 0xa06   :  { %v326_v31 = vsel %vm322_vm14, %v325_v30, %v308_v21 }
 0xa07   :  { %v341_v32 = vmul.f32 %v337_v27, %v326_v31 }
 0xa09   :  { %342 = vadd.xlane.f32.xlu0 %v341_v32  ;;  %v333_v33 = vpop.xlane.xlu1 %332 }
 0xa0a   :  { %v334_v34 = vsel %vm322_vm14, %v333_v33, %v316_v24  ;;  %v426_v24 = vld [vmem:[#allocation2 + $0x17] ss:$0 sm:$0xff] }
 0xa0b   :  { %v349_v35 = vmul.f32 %v337_v27, %v334_v34  ;;  %v427_v53 = vxor.u32 2147483648, %v426_v24 }
 0xa0d   :  { %350 = vadd.xlane.f32.xlu0 %v349_v35 }
 0xa22   :  { %v347_v37 = vpop.xlane.xlu1 %346 }
 0xa23   :  { %v348_v39 = vsel %vm340_vm15, %v347_v37, %v330_v28 }
 0xa24   :  { %v363_v40 = vmul.f32 %v355_v38, %v348_v39 }
 0xa26   :  { %364 = vadd.xlane.f32.xlu0 %v363_v40 }
 0xa92   :  { %v343_v41 = vpop.xlane.xlu0 %342 }
 0xa93   :  { %v344_v42 = vsel %vm340_vm15, %v343_v41, %v326_v31 }
 0xa94   :  { %v359_v44 = vmul.f32 %v355_v38, %v344_v42 }
 0xa96   :  { %360 = vadd.xlane.f32.xlu1 %v359_v44  ;;  %v351_v46 = vpop.xlane.xlu0 %350 }
 0xa97   :  { %v352_v47 = vsel %vm340_vm15, %v351_v46, %v334_v34 }
 0xa98   :  { %v367_v48 = vmul.f32 %v355_v38, %v352_v47 }
 0xa9a   :  { %368 = vadd.xlane.f32.xlu1 %v367_v48 }
 0xaaf   :  { %v365_v50 = vpop.xlane.xlu0 %364 }
 0xab0   :  { %v366_v52 = vsel %vm358_vm0, %v365_v50, %v348_v39 }
 0xab1   :  { %v381_v54 = vmul.f32 %v373_v51, %v366_v52 }
 0xab3   :  { %382 = vadd.xlane.f32.xlu1 %v381_v54 }
 0xb1f   :  { %v361_v55 = vpop.xlane.xlu1 %360 }
 0xb20   :  { %v362_v56 = vsel %vm358_vm0, %v361_v55, %v344_v42 }
 0xb21   :  { %v377_v57 = vmul.f32 %v373_v51, %v362_v56 }
 0xb23   :  { %378 = vadd.xlane.f32.xlu0 %v377_v57  ;;  %v369_v58 = vpop.xlane.xlu1 %368 }
 0xb24   :  { %v370_v3 = vsel %vm358_vm0, %v369_v58, %v352_v47 }
 0xb25   :  { %v385_v59 = vmul.f32 %v373_v51, %v370_v3 }
 0xb27   :  { %386 = vadd.xlane.f32.xlu0 %v385_v59 }
 0xb3c   :  { %v383_v62 = vpop.xlane.xlu1 %382 }
 0xb3d   :  { %v384_v1 = vsel %vm376_vm2, %v383_v62, %v366_v52 }
 0xb3e   :  { %v399_v4 = vmul.f32 %v391_v0, %v384_v1 }
 0xb40   :  { %400 = vadd.xlane.f32.xlu0 %v399_v4 }
 0xbac   :  { %v379_v6 = vpop.xlane.xlu0 %378 }
 0xbad   :  { %v380_v8 = vsel %vm376_vm2, %v379_v6, %v362_v56 }
 0xbae   :  { %v395_v9 = vmul.f32 %v391_v0, %v380_v8 }
 0xbb0   :  { %396 = vadd.xlane.f32.xlu1 %v395_v9  ;;  %v387_v10 = vpop.xlane.xlu0 %386 }
 0xbb1   :  { %v388_v11 = vsel %vm376_vm2, %v387_v10, %v370_v3 }
 0xbb2   :  { %v403_v12 = vmul.f32 %v391_v0, %v388_v11 }
 0xbb4   :  { %404 = vadd.xlane.f32.xlu1 %v403_v12 }
 0xbc9   :  { %v401_v14 = vpop.xlane.xlu0 %400 }
 0xbca   :  { %v402_v16 = vsel %vm394_vm3, %v401_v14, %v384_v1 }
 0xbcb   :  { %v417_v17 = vmul.f32 %v409_v15, %v402_v16 }
 0xbcd   :  { %418 = vadd.xlane.f32.xlu1 %v417_v17 }
 0xc39   :  { %v397_v18 = vpop.xlane.xlu1 %396 }
 0xc3a   :  { %v398_v19 = vsel %vm394_vm3, %v397_v18, %v380_v8 }
 0xc3b   :  { %v413_v20 = vmul.f32 %v409_v15, %v398_v19 }
 0xc3d   :  { %414 = vadd.xlane.f32.xlu0 %v413_v20  ;;  %v405_v21 = vpop.xlane.xlu1 %404 }
 0xc3e   :  { %v406_v22 = vsel %vm394_vm3, %v405_v21, %v388_v11 }
 0xc3f   :  { %v421_v23 = vmul.f32 %v409_v15, %v406_v22 }
 0xc41   :  { %422 = vadd.xlane.f32.xlu0 %v421_v23 }
 0xc56   :  { %v419_v25 = vpop.xlane.xlu1 %418 }
 0xc57   :  { %v420_v26 = vsel %vm412_vm4, %v419_v25, %v402_v16 }
 0xc58   :  { %v435_v27 = vmul.f32 %v427_v53, %v420_v26 }
 0xc5a   :  { %436 = vadd.xlane.f32.xlu0 %v435_v27 }
 0xcc6   :  { %v415_v28 = vpop.xlane.xlu0 %414 }
 0xcc7   :  { %v416_v29 = vsel %vm412_vm4, %v415_v28, %v398_v19 }
 0xcc8   :  { %v431_v30 = vmul.f32 %v427_v53, %v416_v29 }
 0xcca   :  { %432 = vadd.xlane.f32.xlu1 %v431_v30  ;;  %v423_v31 = vpop.xlane.xlu0 %422 }
 0xccb   :  { %v424_v32 = vsel %vm412_vm4, %v423_v31, %v406_v22 }
 0xccc   :  { %v439_v33 = vmul.f32 %v427_v53, %v424_v32 }
 0xcce   :  { %440 = vadd.xlane.f32.xlu1 %v439_v33 }
 0xce3   :  { %v437_v34 = vpop.xlane.xlu0 %436 }
 0xce4   :  { %v438_v35 = vsel %vm430_vm5, %v437_v34, %v420_v26 }
 0xce5   :  { %v449_v36 = vmul.f32 %v568_v45, %v438_v35 }
 0xce7   :  { %v451_v37 = vsel %vm450_vm6, %v438_v35, %v449_v36 }
 0xce8   :  { %495 = vst [vmem:[%s623_s1 + $0x8] sm:$0xff] %v451_v37 }
 0xd53   :  { %v433_v38 = vpop.xlane.xlu1 %432 }
 0xd54   :  { %v434_v39 = vsel %vm430_vm5, %v433_v38, %v416_v29 }
 0xd55   :  { %v444_v40 = vmul.f32 %v546_v7, %v434_v39 }
 0xd57   :  { %v446_v41 = vsel %vm445_vm7, %v434_v39, %v444_v40  ;;  %v441_v42 = vpop.xlane.xlu1 %440 }
 0xd58   :  { %493 = vst [vmem:[%s623_s1] sm:$0xff] %v446_v41  ;;  %v442_v2 = vsel %vm430_vm5, %v441_v42, %v424_v32 }
 0xd59   :  { %v455_v43 = vmul.f32 %v593_v63, %v442_v2 }
 0xd5b   :  { %v457_v45 = vsel %vm456_vm8, %v442_v2, %v455_v43 }
 0xd5c   :  { %497 = vst [vmem:[%s623_s1 + $0x10] sm:$0xff] %v457_v45 }

// kernel: custom-call.8
= control target key start
LH: loop header
LB: loop body
LE: loop exit
PB: predicated region body
PF: predicated region fallthrough
CT: control target
= control target key end

     0   :  { %v43_v0 = vlaneseq  ;;  %v516_v10 = vmov -1.0   ;;  %v517_v48 = vmov 0.0   ;;  %s697_s0 = inlined_call_operand.vmem [shape: f32[1,24,24], index: 0, kind: input, shape index: {}]   ;;  %s698_s1 = inlined_call_operand.vmem [shape: f32[1,24,24], index: 1, kind: output, shape index: {}]  }
   0x1   :  { %v38_v3 = vld [vmem:[%s697_s0 + $0x10] sm:$0xff]  ;;  %v36_v37 = vld [vmem:[%s697_s0 + $0x8] sm:$0xff] }
   0x2   :  { %v528_v1 = vand.u32 127, %v43_v0  ;;  %v530_v2 = vshrl.u32 %v43_v0, 7 }
   0x4   :  { %vm45_vm0 = vcmp.lt.s32.totalorder %v528_v1, 24  ;;  %v80_v4 = vadd.s32 16, %v530_v2  ;;  %vm114_vm4 = vcmp.eq.s32.totalorder %v528_v1, 23  ;;  %vm122_vm6 = vcmp.eq.s32.totalorder %v528_v1, 22 }
   0x5   :  { %v115_v11 = vsel %vm114_vm4, 1.0, %v516_v10  ;;  %vm132_vm7 = vcmp.eq.s32.totalorder %v528_v1, 21  ;;  %vm142_vm8 = vcmp.eq.s32.totalorder %v528_v1, 20  ;;  %vm152_vm9 = vcmp.eq.s32.totalorder %v528_v1, 19 }
   0x6   :  { %vm81_vm1 = vcmp.eq.s32.totalorder %v80_v4, %v528_v1  ;;  %vm86_vm2 = vcmp.le.s32.totalorder %v80_v4, %v528_v1  ;;  %vm111_vm5 = vcmp.eq.s32.totalorder %v528_v1, %v80_v4  ;;  %v64_v32 = vadd.s32 8, %v530_v2 }
   0x7   :  { %v83_v5 = vsel %vm81_vm1, %v38_v3, 0.0  ;;  %vm87_vm3 = vmand %vm86_vm2, %vm45_vm0  ;;  %v116_v12 = vsel %vm111_vm5, %v115_v11, 0.0  ;;  %vm162_vm11 = vcmp.eq.s32.totalorder %v528_v1, 18  ;;  %vm172_vm15 = vcmp.eq.s32.totalorder %v528_v1, 17 }
   0x8   :  { %v88_v6 = vsel %vm87_vm3, %v38_v3, 0.0  ;;  %84 = vadd.xlane.f32.xlu0 %v83_v5  ;;  %vm65_vm10 = vcmp.eq.s32.totalorder %v64_v32, %v528_v1  ;;  %vm70_vm12 = vcmp.le.s32.totalorder %v64_v32, %v528_v1  ;;  %vm104_vm14 = vcmp.eq.s32.totalorder %v528_v1, %v64_v32 }
   0x9   :  { %v67_v38 = vsel %vm65_vm10, %v36_v37, 0.0  ;;  %vm71_vm13 = vmand %vm70_vm12, %vm45_vm0  ;;  %v105_v49 = vsel %vm104_vm14, -1.0, %v517_v48  ;;  %vm192_vm1 = vcmp.eq.s32.totalorder %v528_v1, 15  ;;  %vm182_vm2 = vcmp.eq.s32.totalorder %v528_v1, 16 }
   0xa   :  { %v72_v45 = vsel %vm71_vm13, %v36_v37, 0.0  ;;  %vm206_vm3 = vcmp.eq.s32.totalorder %v528_v1, 14  ;;  %vm220_vm4 = vcmp.eq.s32.totalorder %v528_v1, 13  ;;  %vm234_vm5 = vcmp.eq.s32.totalorder %v528_v1, 12 }
   0xb   :  { %vm97_vm12 = vcmp.eq.s32.totalorder %v528_v1, %v530_v2  ;;  %vm304_vm13 = vcmp.eq.s32.totalorder %v528_v1, 7  ;;  %vm322_vm14 = vcmp.eq.s32.totalorder %v528_v1, 6 }
  0x91   :  { %v541_v7 = vpop.xlane.xlu0 %84 }
  0x92   :  { %510 = vrcp.f32 %v541_v7 }
  0x9f   :  { %v544_v8 = vpop.eup %510 }
  0xa0   :  { %v90_v9 = vmul.f32 %v544_v8, %v88_v6 }
  0xa2   :  { %91 = vst [vmem:[#allocation2 + $0x10] sm:$0xff] %v90_v9 }
  0xa9   :  { %v118_v13 = vld [vmem:[#allocation2 + $0x16] ss:$0 sm:$0xff]  ;;  %v128_v16 = vld [vmem:[#allocation2 + $0x15] ss:$0 sm:$0xff]  ;;  %v138_v21 = vld [vmem:[#allocation2 + $0x14] ss:$0 sm:$0xff] }
  0xaa   :  { %v119_v14 = vxor.u32 2147483648, %v118_v13  ;;  %v129_v18 = vxor.u32 2147483648, %v128_v16  ;;  %v139_v23 = vxor.u32 2147483648, %v138_v21  ;;  %v148_v26 = vld [vmem:[#allocation2 + $0x13] ss:$0 sm:$0xff] }
  0xab   :  { %v149_v28 = vxor.u32 2147483648, %v148_v26  ;;  %v158_v31 = vld [vmem:[#allocation2 + $0x12] ss:$0 sm:$0xff]  ;;  %v168_v39 = vld [vmem:[#allocation2 + $0x11] ss:$0 sm:$0xff] }
  0xac   :  { %v123_v15 = vmul.f32 %v119_v14, %v116_v12  ;;  %v159_v34 = vxor.u32 2147483648, %v158_v31  ;;  %v169_v41 = vxor.u32 2147483648, %v168_v39  ;;  %v178_v53 = vld [vmem:[#allocation2 + $0x10] ss:$0 sm:$0xff] }
  0xad   :  { %v179_v55 = vxor.u32 2147483648, %v178_v53 }
  0xae   :  { %124 = vadd.xlane.f32.xlu0 %v123_v15 }
 0x137   :  { %v125_v17 = vpop.xlane.xlu0 %124 }
 0x138   :  { %v126_v19 = vsel %vm122_vm6, %v125_v17, %v116_v12  ;;  %vm248_vm6 = vcmp.eq.s32.totalorder %v528_v1, 11 }
 0x139   :  { %v133_v20 = vmul.f32 %v129_v18, %v126_v19 }
 0x13b   :  { %134 = vadd.xlane.f32.xlu1 %v133_v20 }
 0x1c4   :  { %v135_v22 = vpop.xlane.xlu1 %134 }
 0x1c5   :  { %v136_v24 = vsel %vm132_vm7, %v135_v22, %v126_v19  ;;  %vm262_vm7 = vcmp.eq.s32.totalorder %v528_v1, 10 }
 0x1c6   :  { %v143_v25 = vmul.f32 %v139_v23, %v136_v24 }
 0x1c8   :  { %144 = vadd.xlane.f32.xlu1 %v143_v25 }
 0x251   :  { %v145_v27 = vpop.xlane.xlu1 %144 }
 0x252   :  { %v146_v29 = vsel %vm142_vm8, %v145_v27, %v136_v24  ;;  %vm49_vm8 = vcmp.eq.s32.totalorder %v530_v2, %v528_v1 }
 0x253   :  { %v153_v30 = vmul.f32 %v149_v28, %v146_v29 }
 0x255   :  { %154 = vadd.xlane.f32.xlu0 %v153_v30 }
 0x2de   :  { %v155_v33 = vpop.xlane.xlu0 %154 }
 0x2df   :  { %v156_v35 = vsel %vm152_vm9, %v155_v33, %v146_v29  ;;  %vm54_vm9 = vcmp.le.s32.totalorder %v530_v2, %v528_v1 }
 0x2e0   :  { %v163_v36 = vmul.f32 %v159_v34, %v156_v35  ;;  %vm55_vm10 = vmand %vm54_vm9, %vm45_vm0  ;;  %vm290_vm0 = vcmp.eq.s32.totalorder %v528_v1, 8 }
 0x2e2   :  { %164 = vadd.xlane.f32.xlu1 %v163_v36 }
 0x2e6   :  { %68 = vadd.xlane.f32.xlu1 %v67_v38 }
 0x36b   :  { %v165_v40 = vpop.xlane.xlu1 %164 }
 0x36c   :  { %v166_v42 = vsel %vm162_vm11, %v165_v40, %v156_v35  ;;  %vm276_vm11 = vcmp.eq.s32.totalorder %v528_v1, 9 }
 0x36d   :  { %v173_v43 = vmul.f32 %v169_v41, %v166_v42 }
 0x36f   :  { %174 = vadd.xlane.f32.xlu0 %v173_v43  ;;  %v559_v44 = vpop.xlane.xlu1 %68  ;;  %v34_v43 = vld [vmem:[%s697_s0] sm:$0xff] }
 0x370   :  { %512 = vrcp.f32 %v559_v44  ;;  %v56_v53 = vsel %vm55_vm10, %v34_v43, 0.0 }
 0x37d   :  { %v565_v46 = vpop.eup %512 }
 0x37e   :  { %v74_v47 = vmul.f32 %v565_v46, %v72_v45  ;;  %v51_v45 = vsel %vm49_vm8, %v34_v43, 0.0  ;;  %vm455_vm8 = vweird.f32 %v541_v7 }
 0x380   :  { %75 = vst [vmem:[#allocation2 + $0x8] sm:$0xff] %v74_v47 }
 0x387   :  { %v188_v50 = vld [vmem:[#allocation2 + $0xf] ss:$0 sm:$0xff]  ;;  %v202_v58 = vld [vmem:[#allocation2 + $0xe] ss:$0 sm:$0xff]  ;;  %v216_v4 = vld [vmem:[#allocation2 + $0xd] ss:$0 sm:$0xff] }
 0x388   :  { %v189_v51 = vxor.u32 2147483648, %v188_v50  ;;  %v203_v59 = vxor.u32 2147483648, %v202_v58  ;;  %v217_v6 = vxor.u32 2147483648, %v216_v4  ;;  %v230_v14 = vld [vmem:[#allocation2 + $0xc] ss:$0 sm:$0xff] }
 0x389   :  { %v231_v16 = vxor.u32 2147483648, %v230_v14  ;;  %v244_v22 = vld [vmem:[#allocation2 + $0xb] ss:$0 sm:$0xff]  ;;  %v258_v30 = vld [vmem:[#allocation2 + $0xa] ss:$0 sm:$0xff] }
 0x38a   :  { %v193_v52 = vmul.f32 %v189_v51, %v105_v49  ;;  %v245_v24 = vxor.u32 2147483648, %v244_v22  ;;  %v259_v32 = vxor.u32 2147483648, %v258_v30  ;;  %v272_v38 = vld [vmem:[#allocation2 + $0x9] ss:$0 sm:$0xff]  ;;  %v286_v58 = vld [vmem:[#allocation2 + $0x8] ss:$0 sm:$0xff] }
 0x38b   :  { %v273_v40 = vxor.u32 2147483648, %v272_v38 }
 0x38c   :  { %194 = vadd.xlane.f32.xlu1 %v193_v52 }
 0x3f8   :  { %v175_v54 = vpop.xlane.xlu0 %174 }
 0x3f9   :  { %v176_v56 = vsel %vm172_vm15, %v175_v54, %v166_v42  ;;  %vm340_vm15 = vcmp.eq.s32.totalorder %v528_v1, 5 }
 0x3fa   :  { %v183_v57 = vmul.f32 %v179_v55, %v176_v56 }
 0x3fc   :  { %184 = vadd.xlane.f32.xlu0 %v183_v57 }
 0x415   :  { %v195_v60 = vpop.xlane.xlu1 %194 }
 0x416   :  { %v196_v61 = vsel %vm192_vm1, %v195_v60, %v105_v49 }
 0x417   :  { %v207_v62 = vmul.f32 %v203_v59, %v196_v61 }
 0x419   :  { %208 = vadd.xlane.f32.xlu1 %v207_v62  ;;  %v287_v62 = vxor.u32 2147483648, %v286_v58 }
 0x485   :  { %v185_v63 = vpop.xlane.xlu0 %184 }
 0x486   :  { %v186_v0 = vsel %vm182_vm2, %v185_v63, %v176_v56  ;;  %vm376_vm2 = vcmp.eq.s32.totalorder %v528_v1, 3 }
 0x487   :  { %v197_v3 = vmul.f32 %v189_v51, %v186_v0 }
 0x489   :  { %198 = vadd.xlane.f32.xlu0 %v197_v3 }
 0x4a2   :  { %v209_v5 = vpop.xlane.xlu1 %208 }
 0x4a3   :  { %v210_v9 = vsel %vm206_vm3, %v209_v5, %v196_v61 }
 0x4a4   :  { %v221_v10 = vmul.f32 %v217_v6, %v210_v9 }
 0x4a6   :  { %222 = vadd.xlane.f32.xlu1 %v221_v10 }
 0x512   :  { %v199_v11 = vpop.xlane.xlu0 %198 }
 0x513   :  { %v200_v12 = vsel %vm192_vm1, %v199_v11, %v186_v0  ;;  %v98_v0 = vsel %vm97_vm12, -1.0, %v517_v48  ;;  %vm358_vm1 = vcmp.eq.s32.totalorder %v528_v1, 4 }
 0x514   :  { %v211_v13 = vmul.f32 %v203_v59, %v200_v12 }
 0x516   :  { %212 = vadd.xlane.f32.xlu0 %v211_v13 }
 0x52f   :  { %v223_v15 = vpop.xlane.xlu1 %222 }
 0x530   :  { %v224_v17 = vsel %vm220_vm4, %v223_v15, %v210_v9 }
 0x531   :  { %v235_v18 = vmul.f32 %v231_v16, %v224_v17 }
 0x533   :  { %236 = vadd.xlane.f32.xlu1 %v235_v18 }
 0x59f   :  { %v213_v19 = vpop.xlane.xlu0 %212 }
 0x5a0   :  { %v214_v20 = vsel %vm206_vm3, %v213_v19, %v200_v12  ;;  %vm394_vm3 = vcmp.eq.s32.totalorder %v528_v1, 2 }
 0x5a1   :  { %v225_v21 = vmul.f32 %v217_v6, %v214_v20 }
 0x5a3   :  { %226 = vadd.xlane.f32.xlu0 %v225_v21 }
 0x5bc   :  { %v237_v23 = vpop.xlane.xlu1 %236 }
 0x5bd   :  { %v238_v25 = vsel %vm234_vm5, %v237_v23, %v224_v17 }
 0x5be   :  { %v249_v26 = vmul.f32 %v245_v24, %v238_v25 }
 0x5c0   :  { %250 = vadd.xlane.f32.xlu1 %v249_v26 }
 0x62c   :  { %v227_v27 = vpop.xlane.xlu0 %226 }
 0x62d   :  { %v228_v28 = vsel %vm220_vm4, %v227_v27, %v214_v20  ;;  %vm412_vm4 = vcmp.eq.s32.totalorder %v528_v1, 1 }
 0x62e   :  { %v239_v29 = vmul.f32 %v231_v16, %v228_v28 }
 0x630   :  { %240 = vadd.xlane.f32.xlu0 %v239_v29 }
 0x649   :  { %v251_v31 = vpop.xlane.xlu1 %250 }
 0x64a   :  { %v252_v33 = vsel %vm248_vm6, %v251_v31, %v238_v25 }
 0x64b   :  { %v263_v34 = vmul.f32 %v259_v32, %v252_v33 }
 0x64d   :  { %264 = vadd.xlane.f32.xlu1 %v263_v34 }
 0x6b9   :  { %v241_v35 = vpop.xlane.xlu0 %240 }
 0x6ba   :  { %v242_v36 = vsel %vm234_vm5, %v241_v35, %v228_v28  ;;  %vm429_vm5 = vcmp.eq.s32.totalorder %v528_v1, 0 }
 0x6bb   :  { %v253_v37 = vmul.f32 %v245_v24, %v242_v36 }
 0x6bd   :  { %254 = vadd.xlane.f32.xlu0 %v253_v37 }
 0x6d6   :  { %v265_v39 = vpop.xlane.xlu1 %264 }
 0x6d7   :  { %v266_v41 = vsel %vm262_vm7, %v265_v39, %v252_v33 }
 0x6d8   :  { %v277_v42 = vmul.f32 %v273_v40, %v266_v41 }
 0x6da   :  { %278 = vadd.xlane.f32.xlu1 %v277_v42 }
 0x6de   :  { %52 = vadd.xlane.f32.xlu1 %v51_v45 }
 0x746   :  { %v255_v47 = vpop.xlane.xlu0 %254 }
 0x747   :  { %v256_v49 = vsel %vm248_vm6, %v255_v47, %v242_v36 }
 0x748   :  { %v267_v50 = vmul.f32 %v259_v32, %v256_v49 }
 0x74a   :  { %268 = vadd.xlane.f32.xlu0 %v267_v50 }
 0x763   :  { %v279_v51 = vpop.xlane.xlu1 %278 }
 0x764   :  { %v280_v61 = vsel %vm276_vm11, %v279_v51, %v266_v41 }
 0x765   :  { %v291_v3 = vmul.f32 %v287_v62, %v280_v61 }
 0x767   :  { %v605_v52 = vpop.xlane.xlu1 %52 }
 0x768   :  { %514 = vrcp.f32 %v605_v52  ;;  %vm444_vm6 = vweird.f32 %v605_v52 }
 0x775   :  { %v612_v54 = vpop.eup %514 }
 0x776   :  { %v58_v55 = vmul.f32 %v612_v54, %v56_v53 }
 0x778   :  { %59 = vst [vmem:[#allocation2] sm:$0xff] %v58_v55 }
 0x77f   :  { %v300_v59 = vld [vmem:[#allocation2 + $0x7] ss:$0 sm:$0xff]  ;;  %v318_v2 = vld [vmem:[#allocation2 + $0x6] ss:$0 sm:$0xff]  ;;  %v336_v21 = vld [vmem:[#allocation2 + $0x5] ss:$0 sm:$0xff] }
 0x780   :  { %v301_v63 = vxor.u32 2147483648, %v300_v59  ;;  %v319_v13 = vxor.u32 2147483648, %v318_v2  ;;  %v337_v24 = vxor.u32 2147483648, %v336_v21  ;;  %v354_v32 = vld [vmem:[#allocation2 + $0x4] ss:$0 sm:$0xff] }
 0x781   :  { %v355_v35 = vxor.u32 2147483648, %v354_v32  ;;  %v372_v43 = vld [vmem:[#allocation2 + $0x3] ss:$0 sm:$0xff]  ;;  %v390_v59 = vld [vmem:[#allocation2 + $0x2] ss:$0 sm:$0xff] }
 0x782   :  { %v305_v4 = vmul.f32 %v301_v63, %v98_v0  ;;  %v408_v2 = vld [vmem:[#allocation2 + $0x1] ss:$0 sm:$0xff] }
 0x7d3   :  { %v269_v56 = vpop.xlane.xlu0 %268 }
 0x7d4   :  { %v270_v57 = vsel %vm262_vm7, %v269_v56, %v256_v49  ;;  %v373_v49 = vxor.u32 2147483648, %v372_v43  ;;  %vm449_vm7 = vweird.f32 %v559_v44 }
 0x7d5   :  { %v281_v60 = vmul.f32 %v273_v40, %v270_v57 }
 0x7d7   :  { %282 = vadd.xlane.f32.xlu0 %v281_v60 }
 0x7db   :  { %292 = vadd.xlane.f32.xlu0 %v291_v3 }
 0x7df   :  { %306 = vadd.xlane.f32.xlu0 %v305_v4 }
 0x860   :  { %v283_v5 = vpop.xlane.xlu0 %282 }
 0x861   :  { %v284_v6 = vsel %vm276_vm11, %v283_v5, %v270_v57 }
 0x862   :  { %v295_v9 = vmul.f32 %v287_v62, %v284_v6  ;;  %v391_v62 = vxor.u32 2147483648, %v390_v59 }
 0x864   :  { %v293_v10 = vpop.xlane.xlu0 %292  ;;  %296 = vadd.xlane.f32.xlu1 %v295_v9 }
 0x865   :  { %v294_v11 = vsel %vm290_vm0, %v293_v10, %v280_v61 }
 0x866   :  { %v309_v12 = vmul.f32 %v301_v63, %v294_v11 }
 0x868   :  { %310 = vadd.xlane.f32.xlu1 %v309_v12  ;;  %v307_v48 = vpop.xlane.xlu0 %306  ;;  %v409_v12 = vxor.u32 2147483648, %v408_v2 }
 0x869   :  { %v308_v14 = vsel %vm304_vm13, %v307_v48, %v98_v0 }
 0x86a   :  { %v323_v15 = vmul.f32 %v319_v13, %v308_v14 }
 0x86c   :  { %324 = vadd.xlane.f32.xlu1 %v323_v15 }
 0x8ed   :  { %v297_v16 = vpop.xlane.xlu1 %296 }
 0x8ee   :  { %v298_v17 = vsel %vm290_vm0, %v297_v16, %v284_v6 }
 0x8ef   :  { %v313_v18 = vmul.f32 %v301_v63, %v298_v17 }
 0x8f1   :  { %314 = vadd.xlane.f32.xlu0 %v313_v18  ;;  %v311_v19 = vpop.xlane.xlu1 %310 }
 0x8f2   :  { %v312_v20 = vsel %vm304_vm13, %v311_v19, %v294_v11  ;;  %v425_v19 = vld [vmem:[#allocation2] ss:$0 sm:$0xff] }
 0x8f3   :  { %v327_v22 = vmul.f32 %v319_v13, %v312_v20 }
 0x8f5   :  { %328 = vadd.xlane.f32.xlu0 %v327_v22  ;;  %v325_v23 = vpop.xlane.xlu1 %324  ;;  %v426_v22 = vxor.u32 2147483648, %v425_v19 }
 0x8f6   :  { %v326_v25 = vsel %vm322_vm14, %v325_v23, %v308_v14 }
 0x8f7   :  { %v341_v26 = vmul.f32 %v337_v24, %v326_v25 }
 0x8f9   :  { %342 = vadd.xlane.f32.xlu0 %v341_v26 }
 0x97a   :  { %v315_v27 = vpop.xlane.xlu0 %314 }
 0x97b   :  { %v316_v28 = vsel %vm304_vm13, %v315_v27, %v298_v17 }
 0x97c   :  { %v331_v29 = vmul.f32 %v319_v13, %v316_v28 }
 0x97e   :  { %332 = vadd.xlane.f32.xlu1 %v331_v29  ;;  %v329_v30 = vpop.xlane.xlu0 %328 }
 0x97f   :  { %v330_v31 = vsel %vm322_vm14, %v329_v30, %v312_v20 }
 0x980   :  { %v345_v33 = vmul.f32 %v337_v24, %v330_v31 }
 0x982   :  { %346 = vadd.xlane.f32.xlu1 %v345_v33  ;;  %v343_v34 = vpop.xlane.xlu0 %342 }
 0x983   :  { %v344_v36 = vsel %vm340_vm15, %v343_v34, %v326_v25 }
 0x984   :  { %v359_v37 = vmul.f32 %v355_v35, %v344_v36 }
 0x986   :  { %360 = vadd.xlane.f32.xlu1 %v359_v37 }
 0xa07   :  { %v333_v38 = vpop.xlane.xlu1 %332 }
 0xa08   :  { %v334_v39 = vsel %vm322_vm14, %v333_v38, %v316_v28 }
 0xa09   :  { %v349_v40 = vmul.f32 %v337_v24, %v334_v39 }
 0xa0b   :  { %350 = vadd.xlane.f32.xlu0 %v349_v40  ;;  %v347_v41 = vpop.xlane.xlu1 %346 }
 0xa0c   :  { %v348_v42 = vsel %vm340_vm15, %v347_v41, %v330_v31 }
 0xa0d   :  { %v363_v45 = vmul.f32 %v355_v35, %v348_v42 }
 0xa0f   :  { %364 = vadd.xlane.f32.xlu0 %v363_v45  ;;  %v361_v47 = vpop.xlane.xlu1 %360 }
 0xa10   :  { %v362_v50 = vsel %vm358_vm1, %v361_v47, %v344_v36 }
 0xa11   :  { %v377_v51 = vmul.f32 %v373_v49, %v362_v50 }
 0xa13   :  { %378 = vadd.xlane.f32.xlu0 %v377_v51 }
 0xa94   :  { %v351_v53 = vpop.xlane.xlu0 %350 }
 0xa95   :  { %v352_v55 = vsel %vm340_vm15, %v351_v53, %v334_v39 }
 0xa96   :  { %v367_v56 = vmul.f32 %v355_v35, %v352_v55 }
 0xa98   :  { %368 = vadd.xlane.f32.xlu1 %v367_v56  ;;  %v365_v57 = vpop.xlane.xlu0 %364 }
 0xa99   :  { %v366_v58 = vsel %vm358_vm1, %v365_v57, %v348_v42 }
 0xa9a   :  { %v381_v60 = vmul.f32 %v373_v49, %v366_v58 }
 0xa9c   :  { %382 = vadd.xlane.f32.xlu1 %v381_v60  ;;  %v379_v61 = vpop.xlane.xlu0 %378 }
 0xa9d   :  { %v380_v63 = vsel %vm376_vm2, %v379_v61, %v362_v50 }
 0xa9e   :  { %v395_v0 = vmul.f32 %v391_v62, %v380_v63 }
 0xaa0   :  { %396 = vadd.xlane.f32.xlu1 %v395_v0 }
 0xb21   :  { %v369_v3 = vpop.xlane.xlu1 %368 }
 0xb22   :  { %v370_v4 = vsel %vm358_vm1, %v369_v3, %v352_v55 }
 0xb23   :  { %v385_v5 = vmul.f32 %v373_v49, %v370_v4 }
 0xb25   :  { %386 = vadd.xlane.f32.xlu0 %v385_v5  ;;  %v383_v6 = vpop.xlane.xlu1 %382 }
 0xb26   :  { %v384_v9 = vsel %vm376_vm2, %v383_v6, %v366_v58 }
 0xb27   :  { %v399_v10 = vmul.f32 %v391_v62, %v384_v9 }
 0xb29   :  { %400 = vadd.xlane.f32.xlu0 %v399_v10  ;;  %v397_v11 = vpop.xlane.xlu1 %396 }
 0xb2a   :  { %v398_v13 = vsel %vm394_vm3, %v397_v11, %v380_v63 }
 0xb2b   :  { %v413_v48 = vmul.f32 %v409_v12, %v398_v13 }
 0xb2d   :  { %414 = vadd.xlane.f32.xlu0 %v413_v48 }
 0xbae   :  { %v387_v14 = vpop.xlane.xlu0 %386 }
 0xbaf   :  { %v388_v15 = vsel %vm376_vm2, %v387_v14, %v370_v4 }
 0xbb0   :  { %v403_v16 = vmul.f32 %v391_v62, %v388_v15 }
 0xbb2   :  { %404 = vadd.xlane.f32.xlu1 %v403_v16  ;;  %v401_v17 = vpop.xlane.xlu0 %400 }
 0xbb3   :  { %v402_v18 = vsel %vm394_vm3, %v401_v17, %v384_v9 }
 0xbb4   :  { %v417_v20 = vmul.f32 %v409_v12, %v402_v18 }
 0xbb6   :  { %418 = vadd.xlane.f32.xlu1 %v417_v20  ;;  %v415_v21 = vpop.xlane.xlu0 %414 }
 0xbb7   :  { %v416_v23 = vsel %vm412_vm4, %v415_v21, %v398_v13 }
 0xbb8   :  { %v430_v24 = vmul.f32 %v426_v22, %v416_v23 }
 0xbba   :  { %431 = vadd.xlane.f32.xlu1 %v430_v24 }
 0xc3b   :  { %v405_v25 = vpop.xlane.xlu1 %404 }
 0xc3c   :  { %v406_v26 = vsel %vm394_vm3, %v405_v25, %v388_v15 }
 0xc3d   :  { %v421_v27 = vmul.f32 %v409_v12, %v406_v26 }
 0xc3f   :  { %422 = vadd.xlane.f32.xlu0 %v421_v27  ;;  %v419_v28 = vpop.xlane.xlu1 %418 }
 0xc40   :  { %v420_v29 = vsel %vm412_vm4, %v419_v28, %v402_v18 }
 0xc41   :  { %v434_v30 = vmul.f32 %v426_v22, %v420_v29 }
 0xc43   :  { %435 = vadd.xlane.f32.xlu0 %v434_v30  ;;  %v432_v31 = vpop.xlane.xlu1 %431 }
 0xc44   :  { %v433_v32 = vsel %vm429_vm5, %v432_v31, %v416_v23 }
 0xc45   :  { %v443_v33 = vmul.f32 %v612_v54, %v433_v32 }
 0xc47   :  { %v445_v34 = vsel %vm444_vm6, %v433_v32, %v443_v33 }
 0xc48   :  { %492 = vst [vmem:[%s698_s1] sm:$0xff] %v445_v34 }
 0xcc8   :  { %v423_v35 = vpop.xlane.xlu0 %422 }
 0xcc9   :  { %v424_v36 = vsel %vm412_vm4, %v423_v35, %v406_v26 }
 0xcca   :  { %v438_v37 = vmul.f32 %v426_v22, %v424_v36 }
 0xccc   :  { %439 = vadd.xlane.f32.xlu1 %v438_v37  ;;  %v436_v38 = vpop.xlane.xlu0 %435 }
 0xccd   :  { %v437_v39 = vsel %vm429_vm5, %v436_v38, %v420_v29 }
 0xcce   :  { %v448_v40 = vmul.f32 %v565_v46, %v437_v39 }
 0xcd0   :  { %v450_v52 = vsel %vm449_vm7, %v437_v39, %v448_v40 }
 0xcd1   :  { %494 = vst [vmem:[%s698_s1 + $0x8] sm:$0xff] %v450_v52 }
 0xd55   :  { %v440_v54 = vpop.xlane.xlu1 %439 }
 0xd56   :  { %v441_v41 = vsel %vm429_vm5, %v440_v54, %v424_v36 }
 0xd57   :  { %v454_v42 = vmul.f32 %v544_v8, %v441_v41 }
 0xd59   :  { %v456_v43 = vsel %vm455_vm8, %v441_v41, %v454_v42 }
 0xd5a   :  { %496 = vst [vmem:[%s698_s1 + $0x10] sm:$0xff] %v456_v43 }

// kernel: frame_prediction_forward.3
= control target key start
LH: loop header
LB: loop body
LE: loop exit
PB: predicated region body
PF: predicated region fallthrough
CT: control target
= control target key end

     0   :  { %v2203_v1 = vmov 0.0   ;;  %vm2204_vm0 = vmmov 0   ;;  %s3125_s0 = inlined_call_operand.vmem [shape: f32[8,128], index: 0, kind: input, shape index: {}]   ;;  %s3126_s1 = inlined_call_operand.vmem [shape: f32[8,8,128], index: 1, kind: input, shape index: {}]   ;;  %s3127_s2 = inlined_call_operand.vmem [shape: f32[128,128], index: 2, kind: input, shape index: {}]   ;;  %s3128_s3 = inlined_call_operand.vmem [shape: f32[128,128], index: 3, kind: input, shape index: {}]   ;;  %s3129_s4 = inlined_call_operand.<no memory space> [shape: f32[1], index: 4, kind: input, shape index: {}]   ;;  %s3130_s5 = inlined_call_operand.vmem [shape: f32[8,8,128], index: 5, kind: output, shape index: {0}]   ;;  %s3131_s6 = inlined_call_operand.vmem [shape: f32[8,8,128], index: 6, kind: output, shape index: {1}]   ;;  %s3132_s7 = inlined_call_operand.hbm [shape: f32[1,1], index: 7, kind: output, shape index: {2}]  }
   0x1   :  { %v2249_v0 = vld [vmem:[%s3128_s3 + $0x78] sm:$0xff]  ;;  %1619 = vmatprep.subr.mxu1 %v2203_v1  ;;  %v2255_v2 = vld [vmem:[%s3128_s3 + $0x70] sm:$0xff]  ;;  %1651 = vmatprep.mubr.msk.f32.mxu1 %vm2204_vm0, %v2203_v1  ;;  %v2265_v3 = vld [vmem:[%s3128_s3 + $0x68] sm:$0xff] }
   0x2   :  { %1620 = vmatpush3.msra.mxu1 %v2249_v0  ;;  %1584 = vmatprep.subr.mxu0 %v2203_v1  ;;  %v2274_v4 = vld [vmem:[%s3128_s3 + $0x60] sm:$0xff]  ;;  %v2279_v5 = vld [vmem:[%s3127_s2 + $0x78] sm:$0xff]  ;;  %v2286_v6 = vld [vmem:[%s3127_s2 + $0x70] sm:$0xff] }
   0x3   :  { %1621 = vmatprep.subr.mxu1 %v2203_v1  ;;  %1616 = vmatprep.mubr.msk.f32.mxu0 %vm2204_vm0, %v2203_v1  ;;  %v2292_v7 = vld [vmem:[%s3128_s3 + $0x58] sm:$0xff]  ;;  %v2298_v8 = vld [vmem:[%s3127_s2 + $0x68] sm:$0xff]  ;;  %v2306_v9 = vld [vmem:[%s3128_s3 + $0x50] sm:$0xff] }
   0x4   :  { %1622 = vmatpush3.msra.mxu1 %v2255_v2  ;;  %1585 = vmatpush3.msra.mxu0 %v2279_v5  ;;  %v2312_v10 = vld [vmem:[%s3127_s2 + $0x60] sm:$0xff]  ;;  %v2320_v11 = vld [vmem:[%s3128_s3 + $0x48] sm:$0xff]  ;;  %v2326_v12 = vld [vmem:[%s3127_s2 + $0x58] sm:$0xff] }
   0x5   :  { %1623 = vmatprep.subr.mxu1 %v2203_v1  ;;  %1586 = vmatprep.subr.mxu0 %v2203_v1 }
   0x6   :  { %1624 = vmatpush3.msra.mxu1 %v2265_v3  ;;  %1587 = vmatpush3.msra.mxu0 %v2286_v6 }
   0x7   :  { %1625 = vmatprep.subr.mxu1 %v2203_v1  ;;  %1588 = vmatprep.subr.mxu0 %v2203_v1 }
   0x8   :  { %1626 = vmatpush3.msra.mxu1 %v2274_v4  ;;  %1589 = vmatpush3.msra.mxu0 %v2298_v8 }
   0x9   :  { %1627 = vmatprep.subr.mxu1 %v2203_v1  ;;  %1590 = vmatprep.subr.mxu0 %v2203_v1 }
   0xa   :  { %1628 = vmatpush3.msra.mxu1 %v2292_v7 }
   0xb   :  { %1629 = vmatprep.subr.mxu1 %v2203_v1 }
   0xc   :  { %14 = vsyncpa [#allocation6], 0  ;;  %1630 = vmatpush3.msra.mxu1 %v2306_v9  ;;  %1591 = vmatpush3.msra.mxu0 %v2312_v10  ;;  %v2334_v13 = vld [vmem:[%s3128_s3 + $0x40] sm:$0xff]  ;;  %v2340_v14 = vld [vmem:[%s3127_s2 + $0x50] sm:$0xff]  ;;  %v2559_v38 = vstv %s3129_s4  ;;  %vm1274_vm1 = vcmask 0  }
   0xd   :  { %1631 = vmatprep.subr.mxu1 %v2203_v1  ;;  %1592 = vmatprep.subr.mxu0 %v2203_v1  ;;  %v2348_v15 = vld [vmem:[%s3128_s3 + $0x38] sm:$0xff]  ;;  %v2354_v16 = vld [vmem:[%s3127_s2 + $0x48] sm:$0xff]  ;;  %v2362_v17 = vld [vmem:[%s3128_s3 + $0x30] sm:$0xff] }
   0xe   :  { %1632 = vmatpush3.msra.mxu1 %v2320_v11  ;;  %1593 = vmatpush3.msra.mxu0 %v2326_v12  ;;  %v2368_v18 = vld [vmem:[%s3127_s2 + $0x40] sm:$0xff]  ;;  %v2376_v19 = vld [vmem:[%s3128_s3 + $0x28] sm:$0xff]  ;;  %v2382_v20 = vld [vmem:[%s3127_s2 + $0x38] sm:$0xff] }
   0xf   :  { %1633 = vmatprep.subr.mxu1 %v2203_v1  ;;  %1594 = vmatprep.subr.mxu0 %v2203_v1  ;;  %v2390_v21 = vld [vmem:[%s3128_s3 + $0x20] sm:$0xff]  ;;  %v2396_v22 = vld [vmem:[%s3127_s2 + $0x30] sm:$0xff]  ;;  %v2404_v23 = vld [vmem:[%s3128_s3 + $0x18] sm:$0xff] }
  0x10   :  { %1634 = vmatpush3.msra.mxu1 %v2334_v13  ;;  %1595 = vmatpush3.msra.mxu0 %v2340_v14  ;;  %v2410_v24 = vld [vmem:[%s3127_s2 + $0x28] sm:$0xff]  ;;  %v2418_v25 = vld [vmem:[%s3128_s3 + $0x10] sm:$0xff]  ;;  %v2424_v26 = vld [vmem:[%s3127_s2 + $0x20] sm:$0xff] }
  0x11   :  { %1635 = vmatprep.subr.mxu1 %v2203_v1  ;;  %1596 = vmatprep.subr.mxu0 %v2203_v1  ;;  %v2432_v27 = vld [vmem:[%s3128_s3 + $0x8] sm:$0xff]  ;;  %v2438_v28 = vld [vmem:[%s3127_s2 + $0x18] sm:$0xff]  ;;  %v2446_v29 = vld [vmem:[%s3128_s3] sm:$0xff] }
  0x12   :  { %1636 = vmatpush3.msra.mxu1 %v2348_v15  ;;  %1597 = vmatpush3.msra.mxu0 %v2354_v16  ;;  %v2452_v30 = vld [vmem:[%s3127_s2 + $0x10] sm:$0xff]  ;;  %v29_v31 = vld [vmem:[%s3125_s0] sm:$0xff]  ;;  %v2464_v32 = vld [vmem:[%s3127_s2 + $0x8] sm:$0xff] }
  0x13   :  { %1637 = vmatprep.subr.mxu1 %v2203_v1  ;;  %1598 = vmatprep.subr.mxu0 %v2203_v1  ;;  %v2472_v33 = vld [vmem:[%s3127_s2] sm:$0xff]  ;;  %v66_v42 = vld [vmem:[%s3126_s1 + $0x8] sm:$0xff]  ;;  %v67_v52 = vld [vmem:[%s3126_s1 + $0x10] sm:$0xff] }
  0x14   :  { %1638 = vmatpush3.msra.mxu1 %v2362_v17  ;;  %1599 = vmatpush3.msra.mxu0 %v2368_v18  ;;  %v65_v36 = vld [vmem:[%s3126_s1] sm:$0xff]  ;;  %v68_v61 = vld [vmem:[%s3126_s1 + $0x18] sm:$0xff] }
  0x15   :  { %1639 = vmatprep.subr.mxu1 %v2203_v1  ;;  %1600 = vmatprep.subr.mxu0 %v2203_v1 }
  0x16   :  { %1640 = vmatpush3.msra.mxu1 %v2376_v19  ;;  %1601 = vmatpush3.msra.mxu0 %v2382_v20 }
  0x17   :  { %1641 = vmatprep.subr.mxu1 %v2203_v1  ;;  %1602 = vmatprep.subr.mxu0 %v2203_v1 }
  0x18   :  { %1642 = vmatpush3.msra.mxu1 %v2390_v21  ;;  %1603 = vmatpush3.msra.mxu0 %v2396_v22 }
  0x19   :  { %1643 = vmatprep.subr.mxu1 %v2203_v1  ;;  %1604 = vmatprep.subr.mxu0 %v2203_v1 }
  0x1a   :  { %1644 = vmatpush3.msra.mxu1 %v2404_v23  ;;  %1605 = vmatpush3.msra.mxu0 %v2410_v24 }
  0x1b   :  { %1645 = vmatprep.subr.mxu1 %v2203_v1  ;;  %1606 = vmatprep.subr.mxu0 %v2203_v1 }
  0x1c   :  { %1646 = vmatpush3.msra.mxu1 %v2418_v25  ;;  %1607 = vmatpush3.msra.mxu0 %v2424_v26 }
  0x1d   :  { %1647 = vmatprep.subr.mxu1 %v2203_v1  ;;  %1608 = vmatprep.subr.mxu0 %v2203_v1 }
  0x1e   :  { %1648 = vmatpush3.msra.mxu1 %v2432_v27  ;;  %1609 = vmatpush3.msra.mxu0 %v2438_v28 }
  0x1f   :  { %1649 = vmatprep.subr.mxu1 %v2203_v1  ;;  %1610 = vmatprep.subr.mxu0 %v2203_v1 }
  0x20   :  { %1650 = vmatpush3.msra.mxu1 %v2446_v29  ;;  %1611 = vmatpush3.msra.mxu0 %v2452_v30 }
  0x21   :  { %1652 = vmatmul.mubr.f32.vlgmr.msra.gmra.mxu1 %v29_v31  ;;  %1612 = vmatprep.subr.mxu0 %v2203_v1 }
  0x22   :  { %1613 = vmatpush3.msra.mxu0 %v2464_v32  ;;  %1689 = vmatprep.subr.mxu1 %v2203_v1 }
  0x23   :  { %1614 = vmatprep.subr.mxu0 %v2203_v1  ;;  %1690 = vmatpush3.msra.mxu1 %v2249_v0 }
  0x24   :  { %1615 = vmatpush3.msra.mxu0 %v2472_v33  ;;  %1691 = vmatprep.subr.mxu1 %v2203_v1 }
  0x25   :  { %1654 = vmatprep.subr.mxu0 %v2203_v1  ;;  %1617 = vmatmul.mubr.f32.vlgmr.msra.gmra.mxu0 %v29_v31 }
  0x26   :  { %1655 = vmatpush3.msra.mxu0 %v2279_v5  ;;  %1692 = vmatpush3.msra.mxu1 %v2255_v2 }
  0x27   :  { %1656 = vmatprep.subr.mxu0 %v2203_v1  ;;  %1693 = vmatprep.subr.mxu1 %v2203_v1 }
  0x28   :  { %1657 = vmatpush3.msra.mxu0 %v2286_v6  ;;  %1694 = vmatpush3.msra.mxu1 %v2265_v3 }
  0x29   :  { %1658 = vmatprep.subr.mxu0 %v2203_v1  ;;  %1695 = vmatprep.subr.mxu1 %v2203_v1 }
  0x2a   :  { %1659 = vmatpush3.msra.mxu0 %v2298_v8  ;;  %1696 = vmatpush3.msra.mxu1 %v2274_v4 }
  0x2b   :  { %1660 = vmatprep.subr.mxu0 %v2203_v1  ;;  %1697 = vmatprep.subr.mxu1 %v2203_v1 }
  0x2c   :  { %1661 = vmatpush3.msra.mxu0 %v2312_v10  ;;  %1698 = vmatpush3.msra.mxu1 %v2292_v7 }
  0x2d   :  { %1662 = vmatprep.subr.mxu0 %v2203_v1  ;;  %1699 = vmatprep.subr.mxu1 %v2203_v1 }
  0x2e   :  { %1663 = vmatpush3.msra.mxu0 %v2326_v12  ;;  %1700 = vmatpush3.msra.mxu1 %v2306_v9 }
  0x2f   :  { %1664 = vmatprep.subr.mxu0 %v2203_v1  ;;  %1701 = vmatprep.subr.mxu1 %v2203_v1 }
  0x30   :  { %1665 = vmatpush3.msra.mxu0 %v2340_v14  ;;  %1702 = vmatpush3.msra.mxu1 %v2320_v11 }
  0x31   :  { %1666 = vmatprep.subr.mxu0 %v2203_v1  ;;  %1703 = vmatprep.subr.mxu1 %v2203_v1 }
  0x32   :  { %1667 = vmatpush3.msra.mxu0 %v2354_v16  ;;  %1704 = vmatpush3.msra.mxu1 %v2334_v13 }
  0x33   :  { %1668 = vmatprep.subr.mxu0 %v2203_v1  ;;  %1705 = vmatprep.subr.mxu1 %v2203_v1 }
  0x34   :  { %1669 = vmatpush3.msra.mxu0 %v2368_v18  ;;  %1706 = vmatpush3.msra.mxu1 %v2348_v15 }
  0x35   :  { %1670 = vmatprep.subr.mxu0 %v2203_v1  ;;  %1707 = vmatprep.subr.mxu1 %v2203_v1 }
  0x36   :  { %1671 = vmatpush3.msra.mxu0 %v2382_v20  ;;  %1708 = vmatpush3.msra.mxu1 %v2362_v17 }
  0x37   :  { %1672 = vmatprep.subr.mxu0 %v2203_v1  ;;  %1709 = vmatprep.subr.mxu1 %v2203_v1 }
  0x38   :  { %1673 = vmatpush3.msra.mxu0 %v2396_v22  ;;  %1710 = vmatpush3.msra.mxu1 %v2376_v19 }
  0x39   :  { %1674 = vmatprep.subr.mxu0 %v2203_v1  ;;  %1711 = vmatprep.subr.mxu1 %v2203_v1 }
  0x3a   :  { %1675 = vmatpush3.msra.mxu0 %v2410_v24  ;;  %1712 = vmatpush3.msra.mxu1 %v2390_v21 }
  0x3b   :  { %1676 = vmatprep.subr.mxu0 %v2203_v1  ;;  %1713 = vmatprep.subr.mxu1 %v2203_v1 }
  0x3c   :  { %1677 = vmatpush3.msra.mxu0 %v2424_v26  ;;  %1714 = vmatpush3.msra.mxu1 %v2404_v23 }
  0x3d   :  { %1678 = vmatprep.subr.mxu0 %v2203_v1  ;;  %1715 = vmatprep.subr.mxu1 %v2203_v1 }
  0x3e   :  { %1679 = vmatpush3.msra.mxu0 %v2438_v28  ;;  %1716 = vmatpush3.msra.mxu1 %v2418_v25 }
  0x3f   :  { %1680 = vmatprep.subr.mxu0 %v2203_v1  ;;  %1717 = vmatprep.subr.mxu1 %v2203_v1 }
  0x40   :  { %1681 = vmatpush3.msra.mxu0 %v2452_v30  ;;  %1718 = vmatpush3.msra.mxu1 %v2432_v27 }
  0x41   :  { %1682 = vmatprep.subr.mxu0 %v2203_v1  ;;  %1719 = vmatprep.subr.mxu1 %v2203_v1 }
  0x42   :  { %1683 = vmatpush3.msra.mxu0 %v2464_v32  ;;  %1686 = vmatprep.mubr.msk.f32.mxu0 %vm2204_vm0, %v2203_v1 }
  0x43   :  { %1684 = vmatprep.subr.mxu0 %v2203_v1  ;;  %1720 = vmatpush3.msra.mxu1 %v2446_v29 }
  0x44   :  { %1685 = vmatpush3.msra.mxu0 %v2472_v33  ;;  %1721 = vmatprep.mubr.msk.f32.mxu1 %vm2204_vm0, %v2203_v1 }
  0x45   :  { %1724 = vmatprep.subr.mxu0 %v2203_v1  ;;  %1759 = vmatprep.subr.mxu1 %v2203_v1 }
  0xe1   :  { %v218_v34 = vpop.f32.mrf.mxu1 }
  0xe2   :  { %1687 = vmatmul.mubr.f32.vlgmr.msra.gmra.mxu0 %v218_v34  ;;  %1722 = vmatmul.mubr.f32.vlgmr.msra.gmra.mxu1 %v218_v34 }
  0xe3   :  { %v1653_v35 = vpop.f32.mrf.mxu1  ;;  %1725 = vmatpush3.msra.mxu0 %v2279_v5  ;;  %1760 = vmatpush3.msra.mxu1 %v2249_v0 }
  0xe4   :  { %1726 = vmatprep.subr.mxu0 %v2203_v1  ;;  %1761 = vmatprep.subr.mxu1 %v2203_v1 }
  0xe5   :  { %1727 = vmatpush3.msra.mxu0 %v2286_v6  ;;  %1762 = vmatpush3.msra.mxu1 %v2255_v2  ;;  %v141_v37 = vpop.f32.mrf.mxu0 }
  0xe6   :  { %1728 = vmatprep.subr.mxu0 %v2203_v1  ;;  %1763 = vmatprep.subr.mxu1 %v2203_v1  ;;  %145 = vst [vmem:[%s3130_s5] sm:$0xff] %v141_v37  ;;  %v146_v39 = vsub.f32 %v65_v36, %v141_v37 }
  0xe7   :  { %1729 = vmatpush3.msra.mxu0 %v2298_v8  ;;  %1764 = vmatpush3.msra.mxu1 %v2265_v3  ;;  %v1618_v40 = vpop.f32.mrf.mxu0 }
  0xe8   :  { %1730 = vmatprep.subr.mxu0 %v2203_v1  ;;  %1765 = vmatprep.subr.mxu1 %v2203_v1  ;;  %v2571_v41 = vmul.f32 %v2559_v38, %v146_v39  ;;  %v69_v40 = vld [vmem:[%s3126_s1 + $0x20] sm:$0xff] }
  0xe9   :  { %1731 = vmatpush3.msra.mxu0 %v2312_v10  ;;  %1766 = vmatpush3.msra.mxu1 %v2274_v4 }
  0xea   :  { %1732 = vmatprep.subr.mxu0 %v2203_v1  ;;  %1767 = vmatprep.subr.mxu1 %v2203_v1  ;;  %149 = vst [vmem:[%s3131_s6] sm:$0xff] %v2571_v41  ;;  %v150_v48 = vmul.f32 %v2571_v41, %v2571_v41 }
  0xeb   :  { %1733 = vmatpush3.msra.mxu0 %v2326_v12  ;;  %1768 = vmatpush3.msra.mxu1 %v2292_v7 }
  0xec   :  { %1734 = vmatprep.subr.mxu0 %v2203_v1  ;;  %1769 = vmatprep.subr.mxu1 %v2203_v1 }
  0xed   :  { %1735 = vmatpush3.msra.mxu0 %v2340_v14  ;;  %1770 = vmatpush3.msra.mxu1 %v2306_v9 }
  0xee   :  { %1736 = vmatprep.subr.mxu0 %v2203_v1  ;;  %1771 = vmatprep.subr.mxu1 %v2203_v1 }
  0xef   :  { %1737 = vmatpush3.msra.mxu0 %v2354_v16  ;;  %1772 = vmatpush3.msra.mxu1 %v2320_v11 }
  0xf0   :  { %1738 = vmatprep.subr.mxu0 %v2203_v1  ;;  %1773 = vmatprep.subr.mxu1 %v2203_v1 }
  0xf1   :  { %1739 = vmatpush3.msra.mxu0 %v2368_v18  ;;  %1774 = vmatpush3.msra.mxu1 %v2334_v13 }
  0xf2   :  { %1740 = vmatprep.subr.mxu0 %v2203_v1  ;;  %1775 = vmatprep.subr.mxu1 %v2203_v1 }
  0xf3   :  { %1741 = vmatpush3.msra.mxu0 %v2382_v20  ;;  %1776 = vmatpush3.msra.mxu1 %v2348_v15 }
  0xf4   :  { %1742 = vmatprep.subr.mxu0 %v2203_v1  ;;  %1777 = vmatprep.subr.mxu1 %v2203_v1 }
  0xf5   :  { %1743 = vmatpush3.msra.mxu0 %v2396_v22  ;;  %1778 = vmatpush3.msra.mxu1 %v2362_v17 }
  0xf6   :  { %1744 = vmatprep.subr.mxu0 %v2203_v1  ;;  %1779 = vmatprep.subr.mxu1 %v2203_v1 }
  0xf7   :  { %1745 = vmatpush3.msra.mxu0 %v2410_v24  ;;  %1780 = vmatpush3.msra.mxu1 %v2376_v19 }
  0xf8   :  { %1746 = vmatprep.subr.mxu0 %v2203_v1  ;;  %1781 = vmatprep.subr.mxu1 %v2203_v1 }
  0xf9   :  { %1747 = vmatpush3.msra.mxu0 %v2424_v26  ;;  %1782 = vmatpush3.msra.mxu1 %v2390_v21 }
  0xfa   :  { %1748 = vmatprep.subr.mxu0 %v2203_v1  ;;  %1783 = vmatprep.subr.mxu1 %v2203_v1 }
  0xfb   :  { %1749 = vmatpush3.msra.mxu0 %v2438_v28  ;;  %1784 = vmatpush3.msra.mxu1 %v2404_v23 }
  0xfc   :  { %1750 = vmatprep.subr.mxu0 %v2203_v1  ;;  %1785 = vmatprep.subr.mxu1 %v2203_v1 }
  0xfd   :  { %1751 = vmatpush3.msra.mxu0 %v2452_v30  ;;  %1786 = vmatpush3.msra.mxu1 %v2418_v25 }
  0xfe   :  { %1752 = vmatprep.subr.mxu0 %v2203_v1  ;;  %1787 = vmatprep.subr.mxu1 %v2203_v1 }
  0xff   :  { %1753 = vmatpush3.msra.mxu0 %v2464_v32  ;;  %1788 = vmatpush3.msra.mxu1 %v2432_v27 }
 0x100   :  { %1754 = vmatprep.subr.mxu0 %v2203_v1  ;;  %1789 = vmatprep.subr.mxu1 %v2203_v1 }
 0x101   :  { %1755 = vmatpush3.msra.mxu0 %v2472_v33  ;;  %1756 = vmatprep.mubr.msk.f32.mxu0 %vm2204_vm0, %v2203_v1 }
 0x102   :  { %1790 = vmatpush3.msra.mxu1 %v2446_v29  ;;  %1791 = vmatprep.mubr.msk.f32.mxu1 %vm2204_vm0, %v2203_v1 }
 0x103   :  { %1794 = vmatprep.subr.mxu0 %v2203_v1  ;;  %1829 = vmatprep.subr.mxu1 %v2203_v1 }
 0x1a2   :  { %v288_v43 = vpop.f32.mrf.mxu0  ;;  %v366_v44 = vpop.f32.mrf.mxu1 }
 0x1a3   :  { %1298 = vst [vmem:[%s3130_s5 + $0x8] sm:$0xff] %v288_v43  ;;  %v294_v45 = vsub.f32 %v66_v42, %v288_v43  ;;  %1757 = vmatmul.mubr.f32.vlgmr.msra.gmra.mxu0 %v366_v44  ;;  %1792 = vmatmul.mubr.f32.vlgmr.msra.gmra.mxu1 %v366_v44 }
 0x1a4   :  { %v1688_v46 = vpop.f32.mrf.mxu0  ;;  %v1723_v47 = vpop.f32.mrf.mxu1  ;;  %1795 = vmatpush3.msra.mxu0 %v2279_v5  ;;  %1830 = vmatpush3.msra.mxu1 %v2249_v0 }
 0x1a5   :  { %v295_v49 = vmul.f32 %v294_v45, %v2559_v38  ;;  %1796 = vmatprep.subr.mxu0 %v2203_v1  ;;  %1831 = vmatprep.subr.mxu1 %v2203_v1 }
 0x1a6   :  { %1797 = vmatpush3.msra.mxu0 %v2286_v6  ;;  %1832 = vmatpush3.msra.mxu1 %v2255_v2 }
 0x1a7   :  { %1299 = vst [vmem:[%s3131_s6 + $0x8] sm:$0xff] %v295_v49  ;;  %v298_v50 = vmul.f32 %v295_v49, %v295_v49  ;;  %1798 = vmatprep.subr.mxu0 %v2203_v1  ;;  %1833 = vmatprep.subr.mxu1 %v2203_v1  ;;  %v2172_v49 = vld [vmem:[%s3128_s3 + $0x20] sm:$0xff] }
 0x1a8   :  { %1799 = vmatpush3.msra.mxu0 %v2298_v8  ;;  %1834 = vmatpush3.msra.mxu1 %v2265_v3 }
 0x1a9   :  { %v2655_v51 = vadd.f32 %v298_v50, %v150_v48  ;;  %1800 = vmatprep.subr.mxu0 %v2203_v1  ;;  %1835 = vmatprep.subr.mxu1 %v2203_v1  ;;  %v2171_v48 = vld [vmem:[%s3127_s2 + $0x20] sm:$0xff]  ;;  %v2173_v50 = vld [vmem:[%s3127_s2 + $0x18] sm:$0xff] }
 0x1aa   :  { %1801 = vmatpush3.msra.mxu0 %v2312_v10  ;;  %1836 = vmatpush3.msra.mxu1 %v2274_v4 }
 0x1ab   :  { %1802 = vmatprep.subr.mxu0 %v2203_v1  ;;  %1837 = vmatprep.subr.mxu1 %v2203_v1 }
 0x1ac   :  { %1803 = vmatpush3.msra.mxu0 %v2326_v12  ;;  %1838 = vmatpush3.msra.mxu1 %v2292_v7 }
 0x1ad   :  { %1804 = vmatprep.subr.mxu0 %v2203_v1  ;;  %1839 = vmatprep.subr.mxu1 %v2203_v1 }
 0x1ae   :  { %1805 = vmatpush3.msra.mxu0 %v2340_v14  ;;  %1840 = vmatpush3.msra.mxu1 %v2306_v9 }
 0x1af   :  { %1806 = vmatprep.subr.mxu0 %v2203_v1  ;;  %1841 = vmatprep.subr.mxu1 %v2203_v1 }
 0x1b0   :  { %1807 = vmatpush3.msra.mxu0 %v2354_v16  ;;  %1842 = vmatpush3.msra.mxu1 %v2320_v11 }
 0x1b1   :  { %1808 = vmatprep.subr.mxu0 %v2203_v1  ;;  %1843 = vmatprep.subr.mxu1 %v2203_v1 }
 0x1b2   :  { %1809 = vmatpush3.msra.mxu0 %v2368_v18  ;;  %1844 = vmatpush3.msra.mxu1 %v2334_v13 }
 0x1b3   :  { %1810 = vmatprep.subr.mxu0 %v2203_v1  ;;  %1845 = vmatprep.subr.mxu1 %v2203_v1 }
 0x1b4   :  { %1811 = vmatpush3.msra.mxu0 %v2382_v20  ;;  %1846 = vmatpush3.msra.mxu1 %v2348_v15 }
 0x1b5   :  { %1812 = vmatprep.subr.mxu0 %v2203_v1  ;;  %1847 = vmatprep.subr.mxu1 %v2203_v1 }
 0x1b6   :  { %1813 = vmatpush3.msra.mxu0 %v2396_v22  ;;  %1848 = vmatpush3.msra.mxu1 %v2362_v17 }
 0x1b7   :  { %1814 = vmatprep.subr.mxu0 %v2203_v1  ;;  %1849 = vmatprep.subr.mxu1 %v2203_v1 }
 0x1b8   :  { %1815 = vmatpush3.msra.mxu0 %v2410_v24  ;;  %1850 = vmatpush3.msra.mxu1 %v2376_v19 }
 0x1b9   :  { %1816 = vmatprep.subr.mxu0 %v2203_v1  ;;  %1851 = vmatprep.subr.mxu1 %v2203_v1 }
 0x1ba   :  { %1817 = vmatpush3.msra.mxu0 %v2424_v26  ;;  %1852 = vmatpush3.msra.mxu1 %v2390_v21 }
 0x1bb   :  { %1818 = vmatprep.subr.mxu0 %v2203_v1  ;;  %1853 = vmatprep.subr.mxu1 %v2203_v1 }
 0x1bc   :  { %1819 = vmatpush3.msra.mxu0 %v2438_v28  ;;  %1854 = vmatpush3.msra.mxu1 %v2404_v23 }
 0x1bd   :  { %1820 = vmatprep.subr.mxu0 %v2203_v1  ;;  %1855 = vmatprep.subr.mxu1 %v2203_v1 }
 0x1be   :  { %1821 = vmatpush3.msra.mxu0 %v2452_v30  ;;  %1856 = vmatpush3.msra.mxu1 %v2418_v25 }
 0x1bf   :  { %1822 = vmatprep.subr.mxu0 %v2203_v1  ;;  %1857 = vmatprep.subr.mxu1 %v2203_v1 }
 0x1c0   :  { %1823 = vmatpush3.msra.mxu0 %v2464_v32  ;;  %1858 = vmatpush3.msra.mxu1 %v2432_v27 }
 0x1c1   :  { %1824 = vmatprep.subr.mxu0 %v2203_v1  ;;  %1859 = vmatprep.subr.mxu1 %v2203_v1 }
 0x1c2   :  { %1825 = vmatpush3.msra.mxu0 %v2472_v33  ;;  %1826 = vmatprep.mubr.msk.f32.mxu0 %vm2204_vm0, %v2203_v1 }
 0x1c3   :  { %1860 = vmatpush3.msra.mxu1 %v2446_v29  ;;  %1861 = vmatprep.mubr.msk.f32.mxu1 %vm2204_vm0, %v2203_v1 }
 0x1c4   :  { %1864 = vmatprep.subr.mxu0 %v2203_v1  ;;  %1899 = vmatprep.subr.mxu1 %v2203_v1 }
 0x263   :  { %v436_v53 = vpop.f32.mrf.mxu0  ;;  %v514_v54 = vpop.f32.mrf.mxu1 }
 0x264   :  { %1300 = vst [vmem:[%s3130_s5 + $0x10] sm:$0xff] %v436_v53  ;;  %v442_v55 = vsub.f32 %v67_v52, %v436_v53  ;;  %1827 = vmatmul.mubr.f32.vlgmr.msra.gmra.mxu0 %v514_v54  ;;  %1862 = vmatmul.mubr.f32.vlgmr.msra.gmra.mxu1 %v514_v54  ;;  %v2175_v52 = vld [vmem:[%s3127_s2 + $0x10] sm:$0xff]  ;;  %v2177_v54 = vld [vmem:[%s3127_s2 + $0x8] sm:$0xff] }
 0x265   :  { %v1758_v56 = vpop.f32.mrf.mxu0  ;;  %v1793_v57 = vpop.f32.mrf.mxu1  ;;  %1865 = vmatpush3.msra.mxu0 %v2279_v5  ;;  %1900 = vmatpush3.msra.mxu1 %v2249_v0  ;;  %v2176_v53 = vld [vmem:[%s3128_s3 + $0x10] sm:$0xff] }
 0x266   :  { %v443_v58 = vmul.f32 %v442_v55, %v2559_v38  ;;  %1866 = vmatprep.subr.mxu0 %v2203_v1  ;;  %1901 = vmatprep.subr.mxu1 %v2203_v1  ;;  %v2178_v55 = vld [vmem:[%s3128_s3 + $0x8] sm:$0xff]  ;;  %v2179_v56 = vld [vmem:[%s3127_s2] sm:$0xff] }
 0x267   :  { %1867 = vmatpush3.msra.mxu0 %v2286_v6  ;;  %1902 = vmatpush3.msra.mxu1 %v2255_v2  ;;  %v2180_v57 = vld [vmem:[%s3128_s3] sm:$0xff] }
 0x268   :  { %1301 = vst [vmem:[%s3131_s6 + $0x10] sm:$0xff] %v443_v58  ;;  %v446_v59 = vmul.f32 %v443_v58, %v443_v58  ;;  %1868 = vmatprep.subr.mxu0 %v2203_v1  ;;  %1903 = vmatprep.subr.mxu1 %v2203_v1  ;;  %v71_v58 = vld [vmem:[%s3126_s1 + $0x30] sm:$0xff] }
 0x269   :  { %1869 = vmatpush3.msra.mxu0 %v2298_v8  ;;  %1904 = vmatpush3.msra.mxu1 %v2265_v3 }
 0x26a   :  { %v2736_v60 = vadd.f32 %v446_v59, %v2655_v51  ;;  %1870 = vmatprep.subr.mxu0 %v2203_v1  ;;  %1905 = vmatprep.subr.mxu1 %v2203_v1  ;;  %v2174_v51 = vld [vmem:[%s3128_s3 + $0x18] sm:$0xff] }
 0x26b   :  { %1871 = vmatpush3.msra.mxu0 %v2312_v10  ;;  %1906 = vmatpush3.msra.mxu1 %v2274_v4 }
 0x26c   :  { %1872 = vmatprep.subr.mxu0 %v2203_v1  ;;  %1907 = vmatprep.subr.mxu1 %v2203_v1 }
 0x26d   :  { %1873 = vmatpush3.msra.mxu0 %v2326_v12  ;;  %1908 = vmatpush3.msra.mxu1 %v2292_v7 }
 0x26e   :  { %1874 = vmatprep.subr.mxu0 %v2203_v1  ;;  %1909 = vmatprep.subr.mxu1 %v2203_v1 }
 0x26f   :  { %1875 = vmatpush3.msra.mxu0 %v2340_v14  ;;  %1910 = vmatpush3.msra.mxu1 %v2306_v9 }
 0x270   :  { %1876 = vmatprep.subr.mxu0 %v2203_v1  ;;  %1911 = vmatprep.subr.mxu1 %v2203_v1 }
 0x271   :  { %1877 = vmatpush3.msra.mxu0 %v2354_v16  ;;  %1912 = vmatpush3.msra.mxu1 %v2320_v11 }
 0x272   :  { %1878 = vmatprep.subr.mxu0 %v2203_v1  ;;  %1913 = vmatprep.subr.mxu1 %v2203_v1 }
 0x273   :  { %1879 = vmatpush3.msra.mxu0 %v2368_v18  ;;  %1914 = vmatpush3.msra.mxu1 %v2334_v13 }
 0x274   :  { %1880 = vmatprep.subr.mxu0 %v2203_v1  ;;  %1915 = vmatprep.subr.mxu1 %v2203_v1 }
 0x275   :  { %1881 = vmatpush3.msra.mxu0 %v2382_v20  ;;  %1916 = vmatpush3.msra.mxu1 %v2348_v15 }
 0x276   :  { %1882 = vmatprep.subr.mxu0 %v2203_v1  ;;  %1917 = vmatprep.subr.mxu1 %v2203_v1 }
 0x277   :  { %1883 = vmatpush3.msra.mxu0 %v2396_v22  ;;  %1918 = vmatpush3.msra.mxu1 %v2362_v17 }
 0x278   :  { %1884 = vmatprep.subr.mxu0 %v2203_v1  ;;  %1919 = vmatprep.subr.mxu1 %v2203_v1 }
 0x279   :  { %1885 = vmatpush3.msra.mxu0 %v2410_v24  ;;  %1920 = vmatpush3.msra.mxu1 %v2376_v19 }
 0x27a   :  { %1886 = vmatprep.subr.mxu0 %v2203_v1  ;;  %1921 = vmatprep.subr.mxu1 %v2203_v1 }
 0x27b   :  { %1887 = vmatpush3.msra.mxu0 %v2424_v26  ;;  %1922 = vmatpush3.msra.mxu1 %v2390_v21 }
 0x27c   :  { %1888 = vmatprep.subr.mxu0 %v2203_v1  ;;  %1923 = vmatprep.subr.mxu1 %v2203_v1 }
 0x27d   :  { %1889 = vmatpush3.msra.mxu0 %v2438_v28  ;;  %1924 = vmatpush3.msra.mxu1 %v2404_v23 }
 0x27e   :  { %1890 = vmatprep.subr.mxu0 %v2203_v1  ;;  %1925 = vmatprep.subr.mxu1 %v2203_v1 }
 0x27f   :  { %1891 = vmatpush3.msra.mxu0 %v2452_v30  ;;  %1926 = vmatpush3.msra.mxu1 %v2418_v25 }
 0x280   :  { %1892 = vmatprep.subr.mxu0 %v2203_v1  ;;  %1927 = vmatprep.subr.mxu1 %v2203_v1 }
 0x281   :  { %1893 = vmatpush3.msra.mxu0 %v2464_v32  ;;  %1928 = vmatpush3.msra.mxu1 %v2432_v27 }
 0x282   :  { %1894 = vmatprep.subr.mxu0 %v2203_v1  ;;  %1929 = vmatprep.subr.mxu1 %v2203_v1 }
 0x283   :  { %1895 = vmatpush3.msra.mxu0 %v2472_v33  ;;  %1896 = vmatprep.mubr.msk.f32.mxu0 %vm2204_vm0, %v2203_v1 }
 0x284   :  { %1930 = vmatpush3.msra.mxu1 %v2446_v29  ;;  %1931 = vmatprep.mubr.msk.f32.mxu1 %vm2204_vm0, %v2203_v1 }
 0x285   :  { %1934 = vmatprep.subr.mxu0 %v2203_v1  ;;  %1969 = vmatprep.subr.mxu1 %v2203_v1 }
 0x324   :  { %v584_v62 = vpop.f32.mrf.mxu0  ;;  %v662_v63 = vpop.f32.mrf.mxu1 }
 0x325   :  { %1302 = vst [vmem:[%s3130_s5 + $0x18] sm:$0xff] %v584_v62  ;;  %v590_v31 = vsub.f32 %v68_v61, %v584_v62  ;;  %1897 = vmatmul.mubr.f32.vlgmr.msra.gmra.mxu0 %v662_v63  ;;  %1932 = vmatmul.mubr.f32.vlgmr.msra.gmra.mxu1 %v662_v63 }
 0x326   :  { %v1828_v34 = vpop.f32.mrf.mxu0  ;;  %v1863_v35 = vpop.f32.mrf.mxu1  ;;  %1935 = vmatpush3.msra.mxu0 %v2279_v5  ;;  %1970 = vmatpush3.msra.mxu1 %v2249_v0 }
 0x327   :  { %v591_v36 = vmul.f32 %v590_v31, %v2559_v38  ;;  %1936 = vmatprep.subr.mxu0 %v2203_v1  ;;  %1971 = vmatprep.subr.mxu1 %v2203_v1  ;;  %v72_v35 = vld [vmem:[%s3126_s1 + $0x38] sm:$0xff] }
 0x328   :  { %1937 = vmatpush3.msra.mxu0 %v2286_v6  ;;  %1972 = vmatpush3.msra.mxu1 %v2255_v2 }
 0x329   :  { %1303 = vst [vmem:[%s3131_s6 + $0x18] sm:$0xff] %v591_v36  ;;  %v594_v37 = vmul.f32 %v591_v36, %v591_v36  ;;  %1938 = vmatprep.subr.mxu0 %v2203_v1  ;;  %1973 = vmatprep.subr.mxu1 %v2203_v1 }
 0x32a   :  { %1939 = vmatpush3.msra.mxu0 %v2298_v8  ;;  %1974 = vmatpush3.msra.mxu1 %v2265_v3 }
 0x32b   :  { %v2817_v39 = vadd.f32 %v594_v37, %v2736_v60  ;;  %1940 = vmatprep.subr.mxu0 %v2203_v1  ;;  %1975 = vmatprep.subr.mxu1 %v2203_v1 }
 0x32c   :  { %1941 = vmatpush3.msra.mxu0 %v2312_v10  ;;  %1976 = vmatpush3.msra.mxu1 %v2274_v4 }
 0x32d   :  { %1942 = vmatprep.subr.mxu0 %v2203_v1  ;;  %1977 = vmatprep.subr.mxu1 %v2203_v1 }
 0x32e   :  { %1943 = vmatpush3.msra.mxu0 %v2326_v12  ;;  %1978 = vmatpush3.msra.mxu1 %v2292_v7 }
 0x32f   :  { %1944 = vmatprep.subr.mxu0 %v2203_v1  ;;  %1979 = vmatprep.subr.mxu1 %v2203_v1 }
 0x330   :  { %1945 = vmatpush3.msra.mxu0 %v2340_v14  ;;  %1980 = vmatpush3.msra.mxu1 %v2306_v9 }
 0x331   :  { %1946 = vmatprep.subr.mxu0 %v2203_v1  ;;  %1981 = vmatprep.subr.mxu1 %v2203_v1 }
 0x332   :  { %1947 = vmatpush3.msra.mxu0 %v2354_v16  ;;  %1982 = vmatpush3.msra.mxu1 %v2320_v11 }
 0x333   :  { %1948 = vmatprep.subr.mxu0 %v2203_v1  ;;  %1983 = vmatprep.subr.mxu1 %v2203_v1 }
 0x334   :  { %1949 = vmatpush3.msra.mxu0 %v2368_v18  ;;  %1984 = vmatpush3.msra.mxu1 %v2334_v13 }
 0x335   :  { %1950 = vmatprep.subr.mxu0 %v2203_v1  ;;  %1985 = vmatprep.subr.mxu1 %v2203_v1 }
 0x336   :  { %1951 = vmatpush3.msra.mxu0 %v2382_v20  ;;  %1986 = vmatpush3.msra.mxu1 %v2348_v15 }
 0x337   :  { %1952 = vmatprep.subr.mxu0 %v2203_v1  ;;  %1987 = vmatprep.subr.mxu1 %v2203_v1 }
 0x338   :  { %1953 = vmatpush3.msra.mxu0 %v2396_v22  ;;  %1988 = vmatpush3.msra.mxu1 %v2362_v17 }
 0x339   :  { %1954 = vmatprep.subr.mxu0 %v2203_v1  ;;  %1989 = vmatprep.subr.mxu1 %v2203_v1 }
 0x33a   :  { %1955 = vmatpush3.msra.mxu0 %v2410_v24  ;;  %1990 = vmatpush3.msra.mxu1 %v2376_v19 }
 0x33b   :  { %1956 = vmatprep.subr.mxu0 %v2203_v1  ;;  %1991 = vmatprep.subr.mxu1 %v2203_v1 }
 0x33c   :  { %1957 = vmatpush3.msra.mxu0 %v2424_v26  ;;  %1992 = vmatpush3.msra.mxu1 %v2390_v21 }
 0x33d   :  { %1958 = vmatprep.subr.mxu0 %v2203_v1  ;;  %1993 = vmatprep.subr.mxu1 %v2203_v1 }
 0x33e   :  { %1959 = vmatpush3.msra.mxu0 %v2438_v28  ;;  %1994 = vmatpush3.msra.mxu1 %v2404_v23 }
 0x33f   :  { %1960 = vmatprep.subr.mxu0 %v2203_v1  ;;  %1995 = vmatprep.subr.mxu1 %v2203_v1 }
 0x340   :  { %1961 = vmatpush3.msra.mxu0 %v2452_v30  ;;  %1996 = vmatpush3.msra.mxu1 %v2418_v25 }
 0x341   :  { %1962 = vmatprep.subr.mxu0 %v2203_v1  ;;  %1997 = vmatprep.subr.mxu1 %v2203_v1 }
 0x342   :  { %1963 = vmatpush3.msra.mxu0 %v2464_v32  ;;  %1998 = vmatpush3.msra.mxu1 %v2432_v27 }
 0x343   :  { %1964 = vmatprep.subr.mxu0 %v2203_v1  ;;  %1999 = vmatprep.subr.mxu1 %v2203_v1 }
 0x344   :  { %1965 = vmatpush3.msra.mxu0 %v2472_v33  ;;  %1966 = vmatprep.mubr.msk.f32.mxu0 %vm2204_vm0, %v2203_v1 }
 0x345   :  { %2000 = vmatpush3.msra.mxu1 %v2446_v29  ;;  %2001 = vmatprep.mubr.msk.f32.mxu1 %vm2204_vm0, %v2203_v1 }
 0x346   :  { %2004 = vmatprep.subr.mxu0 %v2203_v1  ;;  %2039 = vmatprep.subr.mxu1 %v2203_v1 }
 0x3e5   :  { %v732_v41 = vpop.f32.mrf.mxu0  ;;  %v810_v42 = vpop.f32.mrf.mxu1 }
 0x3e6   :  { %1304 = vst [vmem:[%s3130_s5 + $0x20] sm:$0xff] %v732_v41  ;;  %v738_v43 = vsub.f32 %v69_v40, %v732_v41  ;;  %1967 = vmatmul.mubr.f32.vlgmr.msra.gmra.mxu0 %v810_v42  ;;  %2002 = vmatmul.mubr.f32.vlgmr.msra.gmra.mxu1 %v810_v42 }
 0x3e7   :  { %v1898_v44 = vpop.f32.mrf.mxu0  ;;  %v1933_v45 = vpop.f32.mrf.mxu1  ;;  %2005 = vmatpush3.msra.mxu0 %v2279_v5  ;;  %2040 = vmatpush3.msra.mxu1 %v2249_v0 }
 0x3e8   :  { %v739_v46 = vmul.f32 %v738_v43, %v2559_v38  ;;  %2006 = vmatprep.subr.mxu0 %v2203_v1  ;;  %2041 = vmatprep.subr.mxu1 %v2203_v1 }
 0x3e9   :  { %2007 = vmatpush3.msra.mxu0 %v2286_v6  ;;  %2042 = vmatpush3.msra.mxu1 %v2255_v2  ;;  %v70_v2 = vld [vmem:[%s3126_s1 + $0x28] sm:$0xff]  ;;  %s2205_s1 = smov [#allocation5]  }
 0x3ea   :  { %1305 = vst [vmem:[%s3131_s6 + $0x20] sm:$0xff] %v739_v46  ;;  %v742_v47 = vmul.f32 %v739_v46, %v739_v46  ;;  %2008 = vmatprep.subr.mxu0 %v2203_v1  ;;  %2043 = vmatprep.subr.mxu1 %v2203_v1 }
 0x3eb   :  { %2009 = vmatpush3.msra.mxu0 %v2298_v8  ;;  %2044 = vmatpush3.msra.mxu1 %v2265_v3  ;;  %v2149_v8 = vld [vmem:[%s3127_s2 + $0x78] sm:$0xff] }
 0x3ec   :  { %2010 = vmatprep.subr.mxu0 %v2203_v1  ;;  %2045 = vmatprep.subr.mxu1 %v2203_v1  ;;  %v2900_v0 = vadd.f32 %v742_v47, %v2817_v39 }
 0x3ed   :  { %2011 = vmatpush3.msra.mxu0 %v2312_v10  ;;  %2046 = vmatpush3.msra.mxu1 %v2274_v4 }
 0x3ee   :  { %2012 = vmatprep.subr.mxu0 %v2203_v1  ;;  %2047 = vmatprep.subr.mxu1 %v2203_v1 }
 0x3ef   :  { %2013 = vmatpush3.msra.mxu0 %v2326_v12  ;;  %2048 = vmatpush3.msra.mxu1 %v2292_v7  ;;  %v2152_v12 = vld [vmem:[%s3128_s3 + $0x70] sm:$0xff] }
 0x3f0   :  { %2014 = vmatprep.subr.mxu0 %v2203_v1  ;;  %2049 = vmatprep.subr.mxu1 %v2203_v1 }
 0x3f1   :  { %2015 = vmatpush3.msra.mxu0 %v2340_v14  ;;  %2050 = vmatpush3.msra.mxu1 %v2306_v9  ;;  %v2150_v9 = vld [vmem:[%s3128_s3 + $0x78] sm:$0xff]  ;;  %v2153_v14 = vld [vmem:[%s3127_s2 + $0x68] sm:$0xff] }
 0x3f2   :  { %2016 = vmatprep.subr.mxu0 %v2203_v1  ;;  %2051 = vmatprep.subr.mxu1 %v2203_v1 }
 0x3f3   :  { %2017 = vmatpush3.msra.mxu0 %v2354_v16  ;;  %2052 = vmatpush3.msra.mxu1 %v2320_v11  ;;  %v2151_v11 = vld [vmem:[%s3127_s2 + $0x70] sm:$0xff] }
 0x3f4   :  { %2018 = vmatprep.subr.mxu0 %v2203_v1  ;;  %2053 = vmatprep.subr.mxu1 %v2203_v1 }
 0x3f5   :  { %2019 = vmatpush3.msra.mxu0 %v2368_v18  ;;  %2054 = vmatpush3.msra.mxu1 %v2334_v13  ;;  %v2156_v18 = vld [vmem:[%s3128_s3 + $0x60] sm:$0xff] }
 0x3f6   :  { %2020 = vmatprep.subr.mxu0 %v2203_v1  ;;  %2055 = vmatprep.subr.mxu1 %v2203_v1 }
 0x3f7   :  { %2021 = vmatpush3.msra.mxu0 %v2382_v20  ;;  %2056 = vmatpush3.msra.mxu1 %v2348_v15  ;;  %v2154_v15 = vld [vmem:[%s3128_s3 + $0x68] sm:$0xff]  ;;  %v2158_v20 = vld [vmem:[%s3128_s3 + $0x58] sm:$0xff] }
 0x3f8   :  { %2022 = vmatprep.subr.mxu0 %v2203_v1  ;;  %2057 = vmatprep.subr.mxu1 %v2203_v1 }
 0x3f9   :  { %2023 = vmatpush3.msra.mxu0 %v2396_v22  ;;  %2058 = vmatpush3.msra.mxu1 %v2362_v17  ;;  %v2155_v17 = vld [vmem:[%s3127_s2 + $0x60] sm:$0xff]  ;;  %v2160_v22 = vld [vmem:[%s3128_s3 + $0x50] sm:$0xff] }
 0x3fa   :  { %2024 = vmatprep.subr.mxu0 %v2203_v1  ;;  %2059 = vmatprep.subr.mxu1 %v2203_v1 }
 0x3fb   :  { %2025 = vmatpush3.msra.mxu0 %v2410_v24  ;;  %2060 = vmatpush3.msra.mxu1 %v2376_v19  ;;  %v2157_v19 = vld [vmem:[%s3127_s2 + $0x58] sm:$0xff]  ;;  %v2162_v24 = vld [vmem:[%s3128_s3 + $0x48] sm:$0xff] }
 0x3fc   :  { %2026 = vmatprep.subr.mxu0 %v2203_v1  ;;  %2061 = vmatprep.subr.mxu1 %v2203_v1 }
 0x3fd   :  { %2027 = vmatpush3.msra.mxu0 %v2424_v26  ;;  %2062 = vmatpush3.msra.mxu1 %v2390_v21  ;;  %v2159_v21 = vld [vmem:[%s3127_s2 + $0x50] sm:$0xff]  ;;  %v2164_v26 = vld [vmem:[%s3128_s3 + $0x40] sm:$0xff] }
 0x3fe   :  { %2028 = vmatprep.subr.mxu0 %v2203_v1  ;;  %2063 = vmatprep.subr.mxu1 %v2203_v1 }
 0x3ff   :  { %2029 = vmatpush3.msra.mxu0 %v2438_v28  ;;  %2064 = vmatpush3.msra.mxu1 %v2404_v23  ;;  %v2161_v23 = vld [vmem:[%s3127_s2 + $0x48] sm:$0xff]  ;;  %v2166_v28 = vld [vmem:[%s3128_s3 + $0x38] sm:$0xff] }
 0x400   :  { %2030 = vmatprep.subr.mxu0 %v2203_v1  ;;  %2065 = vmatprep.subr.mxu1 %v2203_v1 }
 0x401   :  { %2031 = vmatpush3.msra.mxu0 %v2452_v30  ;;  %2066 = vmatpush3.msra.mxu1 %v2418_v25  ;;  %v2163_v25 = vld [vmem:[%s3127_s2 + $0x40] sm:$0xff]  ;;  %v2168_v30 = vld [vmem:[%s3128_s3 + $0x30] sm:$0xff] }
 0x402   :  { %2032 = vmatprep.subr.mxu0 %v2203_v1  ;;  %2067 = vmatprep.subr.mxu1 %v2203_v1 }
 0x403   :  { %2033 = vmatpush3.msra.mxu0 %v2464_v32  ;;  %2068 = vmatpush3.msra.mxu1 %v2432_v27  ;;  %v2165_v27 = vld [vmem:[%s3127_s2 + $0x38] sm:$0xff]  ;;  %v2169_v32 = vld [vmem:[%s3127_s2 + $0x28] sm:$0xff] }
 0x404   :  { %2034 = vmatprep.subr.mxu0 %v2203_v1  ;;  %2069 = vmatprep.subr.mxu1 %v2203_v1 }
 0x405   :  { %2035 = vmatpush3.msra.mxu0 %v2472_v33  ;;  %2036 = vmatprep.mubr.msk.f32.mxu0 %vm2204_vm0, %v2203_v1  ;;  %v2170_v33 = vld [vmem:[%s3128_s3 + $0x28] sm:$0xff] }
 0x406   :  { %2070 = vmatpush3.msra.mxu1 %v2446_v29  ;;  %2071 = vmatprep.mubr.msk.f32.mxu1 %vm2204_vm0, %v2203_v1  ;;  %v2167_v29 = vld [vmem:[%s3127_s2 + $0x30] sm:$0xff] }
 0x407   :  { %2074 = vmatprep.subr.mxu0 %v2203_v1  ;;  %2109 = vmatprep.subr.mxu1 %v2203_v1 }
 0x4a6   :  { %v880_v3 = vpop.f32.mrf.mxu0  ;;  %v958_v4 = vpop.f32.mrf.mxu1 }
 0x4a7   :  { %1306 = vst [vmem:[%s3130_s5 + $0x28] sm:$0xff] %v880_v3  ;;  %v886_v5 = vsub.f32 %v70_v2, %v880_v3  ;;  %2037 = vmatmul.mubr.f32.vlgmr.msra.gmra.mxu0 %v958_v4  ;;  %2072 = vmatmul.mubr.f32.vlgmr.msra.gmra.mxu1 %v958_v4 }
 0x4a8   :  { %v1968_v6 = vpop.f32.mrf.mxu0  ;;  %v2003_v7 = vpop.f32.mrf.mxu1  ;;  %2075 = vmatpush3.msra.mxu0 %v2149_v8  ;;  %2110 = vmatpush3.msra.mxu1 %v2150_v9 }
 0x4a9   :  { %v887_v10 = vmul.f32 %v886_v5, %v2559_v38  ;;  %2076 = vmatprep.subr.mxu0 %v2203_v1  ;;  %2111 = vmatprep.subr.mxu1 %v2203_v1 }
 0x4aa   :  { %2077 = vmatpush3.msra.mxu0 %v2151_v11  ;;  %2112 = vmatpush3.msra.mxu1 %v2152_v12 }
 0x4ab   :  { %1307 = vst [vmem:[%s3131_s6 + $0x28] sm:$0xff] %v887_v10  ;;  %v890_v13 = vmul.f32 %v887_v10, %v887_v10  ;;  %2078 = vmatprep.subr.mxu0 %v2203_v1  ;;  %2113 = vmatprep.subr.mxu1 %v2203_v1 }
 0x4ac   :  { %2079 = vmatpush3.msra.mxu0 %v2153_v14  ;;  %2114 = vmatpush3.msra.mxu1 %v2154_v15 }
 0x4ad   :  { %2080 = vmatprep.subr.mxu0 %v2203_v1  ;;  %2115 = vmatprep.subr.mxu1 %v2203_v1  ;;  %v2993_v16 = vadd.f32 %v890_v13, %v2900_v0 }
 0x4ae   :  { %2081 = vmatpush3.msra.mxu0 %v2155_v17  ;;  %2116 = vmatpush3.msra.mxu1 %v2156_v18 }
 0x4af   :  { %2082 = vmatprep.subr.mxu0 %v2203_v1  ;;  %2117 = vmatprep.subr.mxu1 %v2203_v1 }
 0x4b0   :  { %2083 = vmatpush3.msra.mxu0 %v2157_v19  ;;  %2118 = vmatpush3.msra.mxu1 %v2158_v20 }
 0x4b1   :  { %2084 = vmatprep.subr.mxu0 %v2203_v1  ;;  %2119 = vmatprep.subr.mxu1 %v2203_v1 }
 0x4b2   :  { %2085 = vmatpush3.msra.mxu0 %v2159_v21  ;;  %2120 = vmatpush3.msra.mxu1 %v2160_v22 }
 0x4b3   :  { %2086 = vmatprep.subr.mxu0 %v2203_v1  ;;  %2121 = vmatprep.subr.mxu1 %v2203_v1 }
 0x4b4   :  { %2087 = vmatpush3.msra.mxu0 %v2161_v23  ;;  %2122 = vmatpush3.msra.mxu1 %v2162_v24 }
 0x4b5   :  { %2088 = vmatprep.subr.mxu0 %v2203_v1  ;;  %2123 = vmatprep.subr.mxu1 %v2203_v1 }
 0x4b6   :  { %2089 = vmatpush3.msra.mxu0 %v2163_v25  ;;  %2124 = vmatpush3.msra.mxu1 %v2164_v26 }
 0x4b7   :  { %2090 = vmatprep.subr.mxu0 %v2203_v1  ;;  %2125 = vmatprep.subr.mxu1 %v2203_v1 }
 0x4b8   :  { %2091 = vmatpush3.msra.mxu0 %v2165_v27  ;;  %2126 = vmatpush3.msra.mxu1 %v2166_v28 }
 0x4b9   :  { %2092 = vmatprep.subr.mxu0 %v2203_v1  ;;  %2127 = vmatprep.subr.mxu1 %v2203_v1 }
 0x4ba   :  { %2093 = vmatpush3.msra.mxu0 %v2167_v29  ;;  %2128 = vmatpush3.msra.mxu1 %v2168_v30 }
 0x4bb   :  { %2094 = vmatprep.subr.mxu0 %v2203_v1  ;;  %2129 = vmatprep.subr.mxu1 %v2203_v1 }
 0x4bc   :  { %2095 = vmatpush3.msra.mxu0 %v2169_v32  ;;  %2130 = vmatpush3.msra.mxu1 %v2170_v33 }
 0x4bd   :  { %2096 = vmatprep.subr.mxu0 %v2203_v1  ;;  %2131 = vmatprep.subr.mxu1 %v2203_v1 }
 0x4be   :  { %2097 = vmatpush3.msra.mxu0 %v2171_v48  ;;  %2132 = vmatpush3.msra.mxu1 %v2172_v49 }
 0x4bf   :  { %2098 = vmatprep.subr.mxu0 %v2203_v1  ;;  %2133 = vmatprep.subr.mxu1 %v2203_v1 }
 0x4c0   :  { %2099 = vmatpush3.msra.mxu0 %v2173_v50  ;;  %2134 = vmatpush3.msra.mxu1 %v2174_v51 }
 0x4c1   :  { %2100 = vmatprep.subr.mxu0 %v2203_v1  ;;  %2135 = vmatprep.subr.mxu1 %v2203_v1 }
 0x4c2   :  { %2101 = vmatpush3.msra.mxu0 %v2175_v52  ;;  %2136 = vmatpush3.msra.mxu1 %v2176_v53 }
 0x4c3   :  { %2102 = vmatprep.subr.mxu0 %v2203_v1  ;;  %2137 = vmatprep.subr.mxu1 %v2203_v1 }
 0x4c4   :  { %2103 = vmatpush3.msra.mxu0 %v2177_v54  ;;  %2138 = vmatpush3.msra.mxu1 %v2178_v55 }
 0x4c5   :  { %2104 = vmatprep.subr.mxu0 %v2203_v1  ;;  %2139 = vmatprep.subr.mxu1 %v2203_v1 }
 0x4c6   :  { %2105 = vmatpush3.msra.mxu0 %v2179_v56  ;;  %2106 = vmatprep.mubr.msk.f32.mxu0 %vm2204_vm0, %v2203_v1 }
 0x4c7   :  { %2140 = vmatpush3.msra.mxu1 %v2180_v57  ;;  %2141 = vmatprep.mubr.msk.f32.mxu1 %vm2204_vm0, %v2203_v1 }
 0x567   :  { %v1028_v59 = vpop.f32.mrf.mxu0  ;;  %v1106_v60 = vpop.f32.mrf.mxu1 }
 0x568   :  { %1308 = vst [vmem:[%s3130_s5 + $0x30] sm:$0xff] %v1028_v59  ;;  %v1034_v61 = vsub.f32 %v71_v58, %v1028_v59  ;;  %2107 = vmatmul.mubr.f32.vlgmr.msra.gmra.mxu0 %v1106_v60  ;;  %2142 = vmatmul.mubr.f32.vlgmr.msra.gmra.mxu1 %v1106_v60 }
 0x569   :  { %v2038_v62 = vpop.f32.mrf.mxu0  ;;  %v2073_v63 = vpop.f32.mrf.mxu1 }
 0x56a   :  { %v1035_v31 = vmul.f32 %v1034_v61, %v2559_v38 }
 0x56c   :  { %1309 = vst [vmem:[%s3131_s6 + $0x30] sm:$0xff] %v1035_v31  ;;  %v1038_v1 = vmul.f32 %v1035_v31, %v1035_v31 }
 0x56e   :  { %v1039_v34 = vadd.f32 %v1038_v1, %v2993_v16 }
 0x628   :  { %v1176_v36 = vpop.f32.mrf.mxu0  ;;  %v1254_v37 = vpop.f32.mrf.mxu1 }
 0x629   :  { %1310 = vst [vmem:[%s3130_s5 + $0x38] sm:$0xff] %v1176_v36  ;;  %v1182_v39 = vsub.f32 %v72_v35, %v1176_v36  ;;  %s1286_s5 = sshll.u32 %s2205_s1, 4  ;;  %s1287_s5 = int_to_ptr.vmem [resolvable:$true] %s1286_s5 }
 0x62a   :  { %v2108_v40 = vpop.f32.mrf.mxu0  ;;  %v2143_v41 = vpop.f32.mrf.mxu1  ;;  %s2181_s9 = scalar_lea.vmem %s1287_s5, 16  ;;  %p2186_p1 = scmp.lt.s32.totalorder %s1287_s5, %s1287_s5 }
 0x62b   :  { %v1183_v42 = vmul.f32 %v1182_v39, %v2559_v38  ;;  %p2182_p0 = scmp.ne.s32.totalorder %s1287_s5, %s2181_s9 }
 0x62d   :  { %1311 = vst [vmem:[%s3131_s6 + $0x38] sm:$0xff] %v1183_v42  ;;  %v1186_v43 = vmul.f32 %v1183_v42, %v1183_v42  ;;  %s2185_s6 = scalar_lea.vmem %s1287_s5, 32 }
 0x62e   :  { %p2187_p2 = scmp.lt.s32.totalorder %s2185_s6, %s2181_s9 }
 0x62f   :  { %v1187_v44 = vadd.f32 %v1186_v43, %v1039_v34 }
 0x630   :  { %p2188_p3 = por %p2187_p2, %p2186_p1 }
 0x631   :  { %1264 = vadd.xlane.f32.xlu0 %v1187_v44 }
 0x632   :  { %p2189_p4 = pnand %p2188_p3, %p2182_p0 }
 0x6ba   :  { %v1265_v45 = vpop.xlane.xlu0 %1264 }
 0x6bb   :  { %v1266_v46 = vrot.slane %v1265_v45, 4 }
 0x6bd   :  { %v1267_v47 = vadd.f32 %v1266_v46, %v1265_v45 }
 0x6bf   :  { %v1268_v0 = vrot.slane %v1267_v47, 2 }
 0x6c1   :  { %v1269_v2 = vadd.f32 %v1268_v0, %v1267_v47 }
 0x6c3   :  { %v1270_v3 = vrot.slane %v1269_v2, 1 }
 0x6c5   :  { %v1271_v4 = vadd.f32 %v1270_v3, %v1269_v2 }
 0x6c7   :  { %2144 = vpush %v1271_v4 }
 0x6f8   :  { %s2145_s8 = spop %2144 }
 0x6f9   :  { %v1273_v38 = vstv %s2145_s8 }
 0x6fa   :  { %1275 = vst.msk [vmem:[#allocation5] sm:$0x1] %vm1274_vm1, %v1273_v38 }
 0x6fb   :  { %2192 = shalt.err (!%p2189_p4)
}
 0x6fc   :  { %1289 = dma.vmem_to_hbm [thread:$0]  %s1287_s5, 16, %s3132_s7, [#allocation6]  }
 0x6fd   :  { %2201 = dma.done.wait [#allocation6], 16  }
 0x6fe   :  { %2202 = vsyncadd [#allocation6], 4294967280 }
 0x6ff   :  { %1297 = vsyncpa [#allocation6], 1 }

// kernel: frame_prediction_forward.2
= control target key start
LH: loop header
LB: loop body
LE: loop exit
PB: predicated region body
PF: predicated region fallthrough
CT: control target
= control target key end

     0   :  { %s8222_s0 = inlined_call_operand.vmem [shape: f32[8,8,128], index: 0, kind: input, shape index: {}]   ;;  %s8223_s1 = inlined_call_operand.vmem [shape: f32[128,128], index: 1, kind: input, shape index: {}]   ;;  %s8224_s2 = inlined_call_operand.vmem [shape: f32[128,128], index: 2, kind: input, shape index: {}]   ;;  %s8225_s3 = inlined_call_operand.vmem [shape: f32[8,128,128], index: 3, kind: output, shape index: {0}]   ;;  %s8226_s4 = inlined_call_operand.vmem [shape: f32[128,128], index: 4, kind: output, shape index: {1}]   ;;  %s8227_s5 = inlined_call_operand.vmem [shape: f32[8,128], index: 5, kind: output, shape index: {2}]   ;;  %s8228_s6 = inlined_call_operand.hbm [shape: f32[1,1], index: 6, kind: output, shape index: {3}]  }
   0x1   :  { %v5671_v0 = vld [vmem:[%s8223_s1] sm:$0xff]  ;;  %v5676_v1 = vld [vmem:[%s8223_s1 + $0x8] sm:$0xff]  ;;  %v5681_v2 = vld [vmem:[%s8223_s1 + $0x10] sm:$0xff] }
   0x2   :  { %164 = vxpose.xlu0.b32.start [1/16] %v5671_v0, 128  ;;  %148 = vst [vmem:[%s8225_s3] sm:$0xff] %v5671_v0  ;;  %149 = vst [vmem:[%s8225_s3 + $0x8] sm:$0xff] %v5676_v1  ;;  %v5699_v3 = vld [vmem:[%s8223_s1 + $0x18] sm:$0xff]  ;;  %v5704_v4 = vld [vmem:[%s8223_s1 + $0x20] sm:$0xff] }
   0x3   :  { %150 = vst [vmem:[%s8225_s3 + $0x10] sm:$0xff] %v5681_v2  ;;  %v5709_v5 = vld [vmem:[%s8223_s1 + $0x28] sm:$0xff]  ;;  %151 = vst [vmem:[%s8225_s3 + $0x18] sm:$0xff] %v5699_v3  ;;  %v5726_v6 = vld [vmem:[%s8223_s1 + $0x30] sm:$0xff] }
   0x4   :  { %152 = vst [vmem:[%s8225_s3 + $0x20] sm:$0xff] %v5704_v4  ;;  %153 = vst [vmem:[%s8225_s3 + $0x28] sm:$0xff] %v5709_v5  ;;  %v5731_v7 = vld [vmem:[%s8223_s1 + $0x38] sm:$0xff]  ;;  %v5736_v8 = vld [vmem:[%s8223_s1 + $0x40] sm:$0xff] }
   0x5   :  { %154 = vst [vmem:[%s8225_s3 + $0x30] sm:$0xff] %v5726_v6  ;;  %155 = vst [vmem:[%s8225_s3 + $0x38] sm:$0xff] %v5731_v7  ;;  %v5753_v9 = vld [vmem:[%s8223_s1 + $0x48] sm:$0xff]  ;;  %v5758_v10 = vld [vmem:[%s8223_s1 + $0x50] sm:$0xff] }
   0x6   :  { %156 = vst [vmem:[%s8225_s3 + $0x40] sm:$0xff] %v5736_v8  ;;  %v5763_v11 = vld [vmem:[%s8223_s1 + $0x58] sm:$0xff]  ;;  %157 = vst [vmem:[%s8225_s3 + $0x48] sm:$0xff] %v5753_v9  ;;  %v5780_v12 = vld [vmem:[%s8223_s1 + $0x60] sm:$0xff]  ;;  %165 = vxpose.xlu0.b32.cont [2/16] %v5676_v1, 128 }
   0x7   :  { %158 = vst [vmem:[%s8225_s3 + $0x50] sm:$0xff] %v5758_v10  ;;  %159 = vst [vmem:[%s8225_s3 + $0x58] sm:$0xff] %v5763_v11  ;;  %v5785_v13 = vld [vmem:[%s8223_s1 + $0x68] sm:$0xff]  ;;  %v5790_v14 = vld [vmem:[%s8223_s1 + $0x70] sm:$0xff] }
   0x8   :  { %160 = vst [vmem:[%s8225_s3 + $0x60] sm:$0xff] %v5780_v12  ;;  %161 = vst [vmem:[%s8225_s3 + $0x68] sm:$0xff] %v5785_v13  ;;  %v5808_v15 = vld [vmem:[%s8223_s1 + $0x78] sm:$0xff] }
   0x9   :  { %162 = vst [vmem:[%s8225_s3 + $0x70] sm:$0xff] %v5790_v14 }
   0xa   :  { %12 = vsyncpa [#allocation5], 0  ;;  %163 = vst [vmem:[%s8225_s3 + $0x78] sm:$0xff] %v5808_v15  ;;  %4390 = vmatprep.subr.mxu0 %v5808_v15  ;;  %166 = vxpose.xlu0.b32.cont [3/16] %v5681_v2, 128  ;;  %v5854_v16 = vld [vmem:[%s8224_s2 + $0x78] sm:$0xff]  ;;  %v8229_v17 = vmov 0.0   ;;  %v5901_v20 = vld [vmem:[%s8224_s2 + $0x70] sm:$0xff] }
   0xb   :  { %4391 = vmatpush3.msra.mxu0 %v5808_v15  ;;  %4446 = vmatprep.subr.mxu1 %v8229_v17  ;;  %v5907_v21 = vld [vmem:[%s8224_s2 + $0x68] sm:$0xff]  ;;  %v5914_v23 = vld [vmem:[%s8224_s2 + $0x60] sm:$0xff]  ;;  %v5921_v24 = vld [vmem:[%s8224_s2 + $0x58] sm:$0xff]  ;;  %vm5631_vm0 = vmmov 0   ;;  %vm3602_vm1 = vcmask 0   ;;  %s5632_s8 = smov [#allocation4]  }
   0xc   :  { %4392 = vmatprep.subr.mxu0 %v5790_v14  ;;  %4447 = vmatpush3.msra.mxu1 %v5808_v15  ;;  %v5928_v26 = vld [vmem:[%s8224_s2 + $0x50] sm:$0xff]  ;;  %v5935_v27 = vld [vmem:[%s8224_s2 + $0x48] sm:$0xff]  ;;  %v5942_v29 = vld [vmem:[%s8224_s2 + $0x40] sm:$0xff]  ;;  %s3616_s9 = sshll.u32 %s5632_s8, 4  ;;  %s3617_s9 = int_to_ptr.vmem [resolvable:$true] %s3616_s9 }
   0xd   :  { %4393 = vmatpush3.msra.mxu0 %v5790_v14  ;;  %4448 = vmatprep.subr.mxu1 %v8229_v17  ;;  %v5949_v30 = vld [vmem:[%s8224_s2 + $0x38] sm:$0xff]  ;;  %v5956_v32 = vld [vmem:[%s8224_s2 + $0x30] sm:$0xff]  ;;  %v5963_v33 = vld [vmem:[%s8224_s2 + $0x28] sm:$0xff]  ;;  %s5608_s10 = scalar_lea.vmem %s3617_s9, 16  ;;  %s5612_s11 = scalar_lea.vmem %s3617_s9, 32 }
   0xe   :  { %4394 = vmatprep.subr.mxu0 %v5785_v13  ;;  %167 = vxpose.xlu0.b32.cont [4/16] %v5699_v3, 128  ;;  %v5970_v35 = vld [vmem:[%s8224_s2 + $0x20] sm:$0xff]  ;;  %v5977_v36 = vld [vmem:[%s8224_s2 + $0x18] sm:$0xff]  ;;  %v5984_v38 = vld [vmem:[%s8224_s2 + $0x10] sm:$0xff]  ;;  %p5609_p0 = scmp.ne.s32.totalorder %s3617_s9, %s5608_s10  ;;  %p5613_p1 = scmp.lt.s32.totalorder %s3617_s9, %s3617_s9 }
   0xf   :  { %4395 = vmatpush3.msra.mxu0 %v5785_v13  ;;  %4449 = vmatpush3.msra.mxu1 %v5790_v14  ;;  %v5991_v39 = vld [vmem:[%s8224_s2 + $0x8] sm:$0xff]  ;;  %v5998_v41 = vld [vmem:[%s8224_s2] sm:$0xff]  ;;  %p5614_p2 = scmp.lt.s32.totalorder %s5612_s11, %s5608_s10 }
  0x10   :  { %4396 = vmatprep.subr.mxu0 %v5780_v12  ;;  %4450 = vmatprep.subr.mxu1 %v8229_v17  ;;  %v89_v49 = vld [vmem:[%s8222_s0] sm:$0xff] }
  0x11   :  { %4397 = vmatpush3.msra.mxu0 %v5780_v12  ;;  %4451 = vmatpush3.msra.mxu1 %v5785_v13  ;;  %p5615_p3 = por %p5614_p2, %p5613_p1 }
  0x12   :  { %4398 = vmatprep.subr.mxu0 %v5763_v11  ;;  %168 = vxpose.xlu0.b32.cont [5/16] %v5704_v4, 128 }
  0x13   :  { %4399 = vmatpush3.msra.mxu0 %v5763_v11  ;;  %4452 = vmatprep.subr.mxu1 %v8229_v17  ;;  %p5616_p4 = pnand %p5615_p3, %p5609_p0 }
  0x14   :  { %4400 = vmatprep.subr.mxu0 %v5758_v10  ;;  %4453 = vmatpush3.msra.mxu1 %v5780_v12 }
  0x15   :  { %4401 = vmatpush3.msra.mxu0 %v5758_v10  ;;  %4454 = vmatprep.subr.mxu1 %v8229_v17 }
  0x16   :  { %4402 = vmatprep.subr.mxu0 %v5753_v9  ;;  %169 = vxpose.xlu0.b32.cont [6/16] %v5709_v5, 128 }
  0x17   :  { %4403 = vmatpush3.msra.mxu0 %v5753_v9  ;;  %4455 = vmatpush3.msra.mxu1 %v5763_v11 }
  0x18   :  { %4404 = vmatprep.subr.mxu0 %v5736_v8  ;;  %4456 = vmatprep.subr.mxu1 %v8229_v17 }
  0x19   :  { %4405 = vmatpush3.msra.mxu0 %v5736_v8  ;;  %4457 = vmatpush3.msra.mxu1 %v5758_v10 }
  0x1a   :  { %4406 = vmatprep.subr.mxu0 %v5731_v7  ;;  %170 = vxpose.xlu0.b32.cont [7/16] %v5726_v6, 128 }
  0x1b   :  { %4407 = vmatpush3.msra.mxu0 %v5731_v7  ;;  %4458 = vmatprep.subr.mxu1 %v8229_v17 }
  0x1c   :  { %4408 = vmatprep.subr.mxu0 %v5726_v6  ;;  %4459 = vmatpush3.msra.mxu1 %v5753_v9 }
  0x1d   :  { %4409 = vmatpush3.msra.mxu0 %v5726_v6  ;;  %4460 = vmatprep.subr.mxu1 %v8229_v17 }
  0x1e   :  { %4410 = vmatprep.subr.mxu0 %v5709_v5  ;;  %171 = vxpose.xlu0.b32.cont [8/16] %v5731_v7, 128 }
  0x1f   :  { %4411 = vmatpush3.msra.mxu0 %v5709_v5  ;;  %4461 = vmatpush3.msra.mxu1 %v5736_v8 }
  0x20   :  { %4412 = vmatprep.subr.mxu0 %v5704_v4  ;;  %4462 = vmatprep.subr.mxu1 %v8229_v17 }
  0x21   :  { %4413 = vmatpush3.msra.mxu0 %v5704_v4  ;;  %4463 = vmatpush3.msra.mxu1 %v5731_v7 }
  0x22   :  { %4414 = vmatprep.subr.mxu0 %v5699_v3  ;;  %172 = vxpose.xlu0.b32.cont [9/16] %v5736_v8, 128 }
  0x23   :  { %4415 = vmatpush3.msra.mxu0 %v5699_v3  ;;  %4464 = vmatprep.subr.mxu1 %v8229_v17 }
  0x24   :  { %4416 = vmatprep.subr.mxu0 %v5681_v2  ;;  %4465 = vmatpush3.msra.mxu1 %v5726_v6 }
  0x25   :  { %4417 = vmatpush3.msra.mxu0 %v5681_v2  ;;  %4466 = vmatprep.subr.mxu1 %v8229_v17 }
  0x26   :  { %4418 = vmatprep.subr.mxu0 %v5676_v1  ;;  %173 = vxpose.xlu0.b32.cont [10/16] %v5753_v9, 128 }
  0x27   :  { %4419 = vmatpush3.msra.mxu0 %v5676_v1  ;;  %4467 = vmatpush3.msra.mxu1 %v5709_v5 }
  0x28   :  { %4420 = vmatprep.subr.mxu0 %v5671_v0  ;;  %4468 = vmatprep.subr.mxu1 %v8229_v17 }
  0x29   :  { %4421 = vmatpush3.msra.mxu0 %v5671_v0  ;;  %4469 = vmatpush3.msra.mxu1 %v5704_v4 }
  0x2a   :  { %4481 = vmatprep.subr.mxu0 %v5854_v16  ;;  %174 = vxpose.xlu0.b32.cont [11/16] %v5758_v10, 128 }
  0x2b   :  { %4470 = vmatprep.subr.mxu1 %v8229_v17  ;;  %4478 = vmatprep.mubr.msk.f32.mxu1 %vm5631_vm0, %v8229_v17 }
  0x2c   :  { %4471 = vmatpush3.msra.mxu1 %v5699_v3 }
  0x2d   :  { %4472 = vmatprep.subr.mxu1 %v8229_v17 }
  0x2e   :  { %175 = vxpose.xlu0.b32.cont [12/16] %v5763_v11, 128  ;;  %4473 = vmatpush3.msra.mxu1 %v5681_v2 }
  0x2f   :  { %4474 = vmatprep.subr.mxu1 %v8229_v17 }
  0x30   :  { %4475 = vmatpush3.msra.mxu1 %v5676_v1 }
  0x31   :  { %4476 = vmatprep.subr.mxu1 %v8229_v17 }
  0x32   :  { %176 = vxpose.xlu0.b32.cont [13/16] %v5780_v12, 128  ;;  %4477 = vmatpush3.msra.mxu1 %v5671_v0 }
  0x33   :  { %4479 = vmatmul.mubr.f32.vlgmr.msra.gmra.mxu1 %v89_v49 }
  0x36   :  { %177 = vxpose.xlu0.b32.cont [14/16] %v5785_v13, 128 }
  0x3a   :  { %178 = vxpose.xlu0.b32.cont [15/16] %v5790_v14, 128 }
  0x3e   :  { %179 = vxpose.xlu0.b32.end [16/16] %v5808_v15, 128 }
  0x7e   :  { %v180_v18 = vpop.trf.xlu0 }
  0x7f   :  { %4422 = vmatprep.mubr.f32.mxu0 %v180_v18 }
  0x82   :  { %v181_v19 = vpop.trf.xlu0 }
  0x83   :  { %4423 = vmatmul.mubr.f32.vlgmr.msra.gmra.mxu0 %v181_v19 }
  0x84   :  { %4482 = vmatpush3.msra.mxu0 %v5854_v16 }
  0x85   :  { %4483 = vmatprep.subr.mxu0 %v5901_v20 }
  0x86   :  { %v182_v22 = vpop.trf.xlu0  ;;  %4484 = vmatpush3.msra.mxu0 %v5901_v20 }
  0x87   :  { %4425 = vmatprep.mubr.f32.mxu0 %v182_v22  ;;  %4485 = vmatprep.subr.mxu0 %v5907_v21  ;;  %v90_v22 = vld [vmem:[%s8222_s0 + $0x8] sm:$0xff] }
  0x88   :  { %4486 = vmatpush3.msra.mxu0 %v5907_v21 }
  0x89   :  { %4487 = vmatprep.subr.mxu0 %v5914_v23 }
  0x8a   :  { %v183_v25 = vpop.trf.xlu0  ;;  %4488 = vmatpush3.msra.mxu0 %v5914_v23 }
  0x8b   :  { %4426 = vmatmul.mubr.f32.gmra.mxu0 %v183_v25  ;;  %4489 = vmatprep.subr.mxu0 %v5921_v24 }
  0x8c   :  { %4490 = vmatpush3.msra.mxu0 %v5921_v24 }
  0x8d   :  { %4491 = vmatprep.subr.mxu0 %v5928_v26 }
  0x8e   :  { %v184_v28 = vpop.trf.xlu0  ;;  %4492 = vmatpush3.msra.mxu0 %v5928_v26 }
  0x8f   :  { %4428 = vmatprep.mubr.f32.mxu0 %v184_v28  ;;  %4493 = vmatprep.subr.mxu0 %v5935_v27 }
  0x90   :  { %4494 = vmatpush3.msra.mxu0 %v5935_v27 }
  0x91   :  { %4495 = vmatprep.subr.mxu0 %v5942_v29 }
  0x92   :  { %v185_v31 = vpop.trf.xlu0  ;;  %4496 = vmatpush3.msra.mxu0 %v5942_v29 }
  0x93   :  { %4429 = vmatmul.mubr.f32.gmra.mxu0 %v185_v31  ;;  %4497 = vmatprep.subr.mxu0 %v5949_v30 }
  0x94   :  { %4498 = vmatpush3.msra.mxu0 %v5949_v30 }
  0x95   :  { %4499 = vmatprep.subr.mxu0 %v5956_v32 }
  0x96   :  { %v186_v34 = vpop.trf.xlu0  ;;  %4500 = vmatpush3.msra.mxu0 %v5956_v32 }
  0x97   :  { %4431 = vmatprep.mubr.f32.mxu0 %v186_v34  ;;  %4501 = vmatprep.subr.mxu0 %v5963_v33 }
  0x98   :  { %4502 = vmatpush3.msra.mxu0 %v5963_v33 }
  0x99   :  { %4503 = vmatprep.subr.mxu0 %v5970_v35 }
  0x9a   :  { %v187_v37 = vpop.trf.xlu0  ;;  %4504 = vmatpush3.msra.mxu0 %v5970_v35 }
  0x9b   :  { %4432 = vmatmul.mubr.f32.gmra.mxu0 %v187_v37  ;;  %4505 = vmatprep.subr.mxu0 %v5977_v36 }
  0x9c   :  { %4506 = vmatpush3.msra.mxu0 %v5977_v36 }
  0x9d   :  { %4507 = vmatprep.subr.mxu0 %v5984_v38 }
  0x9e   :  { %v188_v40 = vpop.trf.xlu0  ;;  %4508 = vmatpush3.msra.mxu0 %v5984_v38 }
  0x9f   :  { %4434 = vmatprep.mubr.f32.mxu0 %v188_v40  ;;  %4509 = vmatprep.subr.mxu0 %v5991_v39 }
  0xa0   :  { %4510 = vmatpush3.msra.mxu0 %v5991_v39 }
  0xa1   :  { %4511 = vmatprep.subr.mxu0 %v5998_v41 }
  0xa2   :  { %v189_v42 = vpop.trf.xlu0  ;;  %4512 = vmatpush3.msra.mxu0 %v5998_v41 }
  0xa3   :  { %4435 = vmatmul.mubr.f32.gmra.mxu0 %v189_v42  ;;  %4593 = vmatprep.subr.mxu0 %v8229_v17 }
  0xa6   :  { %v190_v43 = vpop.trf.xlu0 }
  0xa7   :  { %4437 = vmatprep.mubr.f32.mxu0 %v190_v43 }
  0xaa   :  { %v191_v44 = vpop.trf.xlu0 }
  0xab   :  { %4438 = vmatmul.mubr.f32.gmra.mxu0 %v191_v44 }
  0xae   :  { %v192_v45 = vpop.trf.xlu0 }
  0xaf   :  { %4440 = vmatprep.mubr.f32.mxu0 %v192_v45 }
  0xb2   :  { %v193_v46 = vpop.trf.xlu0 }
  0xb3   :  { %4441 = vmatmul.mubr.f32.gmra.mxu0 %v193_v46 }
  0xb6   :  { %v194_v47 = vpop.trf.xlu0 }
  0xb7   :  { %4443 = vmatprep.mubr.f32.mxu0 %v194_v47 }
  0xba   :  { %v195_v48 = vpop.trf.xlu0 }
  0xbb   :  { %4444 = vmatmul.mubr.f32.gmra.mxu0 %v195_v48 }
  0xbc   :  { %4513 = vmatprep.mubr.f32.mxu0 %v5671_v0 }
  0xbf   :  { %4514 = vmatmul.mubr.f32.vlgmr.msra.gmra.mxu0 %v5676_v1 }
  0xc0   :  { %4516 = vmatprep.mubr.f32.mxu0 %v5681_v2 }
  0xc3   :  { %4517 = vmatmul.mubr.f32.gmra.mxu0 %v5699_v3 }
  0xc4   :  { %4519 = vmatprep.mubr.f32.mxu0 %v5704_v4 }
  0xc7   :  { %4520 = vmatmul.mubr.f32.gmra.mxu0 %v5709_v5 }
  0xc8   :  { %4522 = vmatprep.mubr.f32.mxu0 %v5726_v6 }
  0xcb   :  { %4523 = vmatmul.mubr.f32.gmra.mxu0 %v5731_v7 }
  0xcc   :  { %4525 = vmatprep.mubr.f32.mxu0 %v5736_v8 }
  0xcf   :  { %4526 = vmatmul.mubr.f32.gmra.mxu0 %v5753_v9 }
  0xd0   :  { %4528 = vmatprep.mubr.f32.mxu0 %v5758_v10 }
  0xd3   :  { %4529 = vmatmul.mubr.f32.gmra.mxu0 %v5763_v11 }
  0xd4   :  { %4531 = vmatprep.mubr.f32.mxu0 %v5780_v12 }
  0xd7   :  { %4532 = vmatmul.mubr.f32.gmra.mxu0 %v5785_v13 }
  0xd8   :  { %4534 = vmatprep.mubr.f32.mxu0 %v5790_v14 }
  0xdb   :  { %4535 = vmatmul.mubr.f32.gmra.mxu0 %v5808_v15 }
  0xdc   :  { %4625 = vmatprep.mubr.msk.f32.mxu0 %vm5631_vm0, %v8229_v17 }
  0xf3   :  { %v6239_v25 = vpop.f32.mrf.mxu1 }
  0xf5   :  { %v4480_v28 = vpop.f32.mrf.mxu1 }
 0x143   :  { %v6028_v50 = vpop.f32.mrf.mxu0 }
 0x145   :  { %v6030_v51 = vpop.f32.mrf.mxu0 }
 0x14b   :  { %v6032_v52 = vpop.f32.mrf.mxu0 }
 0x14d   :  { %v6034_v53 = vpop.f32.mrf.mxu0 }
 0x153   :  { %v6036_v54 = vpop.f32.mrf.mxu0 }
 0x155   :  { %v6038_v55 = vpop.f32.mrf.mxu0 }
 0x15b   :  { %v6040_v56 = vpop.f32.mrf.mxu0 }
 0x15d   :  { %v6042_v57 = vpop.f32.mrf.mxu0 }
 0x163   :  { %v6044_v58 = vpop.f32.mrf.mxu0 }
 0x165   :  { %v6046_v59 = vpop.f32.mrf.mxu0 }
 0x16b   :  { %v6048_v60 = vpop.f32.mrf.mxu0 }
 0x16d   :  { %v6050_v61 = vpop.f32.mrf.mxu0 }
 0x173   :  { %v6052_v62 = vpop.f32.mrf.mxu0 }
 0x175   :  { %v6054_v63 = vpop.f32.mrf.mxu0 }
 0x17b   :  { %v6056_v0 = vpop.f32.mrf.mxu0 }
 0x17d   :  { %v6058_v1 = vpop.f32.mrf.mxu0 }
 0x17f   :  { %v6060_v2 = vpop.f32.mrf.mxu0 }
 0x180   :  { %3631 = vst [vmem:[%s8225_s3 + $0x88] sm:$0xff] %v6060_v2 }
 0x181   :  { %v6066_v3 = vpop.f32.mrf.mxu0 }
 0x182   :  { %3630 = vst [vmem:[%s8225_s3 + $0x80] sm:$0xff] %v6066_v3  ;;  %590 = vxpose.xlu1.b32.start [1/16] %v6066_v3, 128 }
 0x183   :  { %v6073_v4 = vpop.f32.mrf.mxu0 }
 0x184   :  { %3633 = vst [vmem:[%s8225_s3 + $0x98] sm:$0xff] %v6073_v4 }
 0x185   :  { %v6079_v5 = vpop.f32.mrf.mxu0 }
 0x186   :  { %3632 = vst [vmem:[%s8225_s3 + $0x90] sm:$0xff] %v6079_v5  ;;  %591 = vxpose.xlu1.b32.cont [2/16] %v6060_v2, 128 }
 0x187   :  { %v6086_v6 = vpop.f32.mrf.mxu0 }
 0x188   :  { %3635 = vst [vmem:[%s8225_s3 + $0xa8] sm:$0xff] %v6086_v6 }
 0x189   :  { %v6092_v7 = vpop.f32.mrf.mxu0 }
 0x18a   :  { %3634 = vst [vmem:[%s8225_s3 + $0xa0] sm:$0xff] %v6092_v7  ;;  %592 = vxpose.xlu1.b32.cont [3/16] %v6079_v5, 128 }
 0x18b   :  { %v6099_v8 = vpop.f32.mrf.mxu0 }
 0x18c   :  { %3637 = vst [vmem:[%s8225_s3 + $0xb8] sm:$0xff] %v6099_v8 }
 0x18d   :  { %v6105_v9 = vpop.f32.mrf.mxu0 }
 0x18e   :  { %3636 = vst [vmem:[%s8225_s3 + $0xb0] sm:$0xff] %v6105_v9  ;;  %593 = vxpose.xlu1.b32.cont [4/16] %v6073_v4, 128 }
 0x18f   :  { %v6112_v10 = vpop.f32.mrf.mxu0 }
 0x190   :  { %3639 = vst [vmem:[%s8225_s3 + $0xc8] sm:$0xff] %v6112_v10 }
 0x191   :  { %v6118_v11 = vpop.f32.mrf.mxu0 }
 0x192   :  { %3638 = vst [vmem:[%s8225_s3 + $0xc0] sm:$0xff] %v6118_v11  ;;  %594 = vxpose.xlu1.b32.cont [5/16] %v6092_v7, 128 }
 0x193   :  { %v6125_v12 = vpop.f32.mrf.mxu0 }
 0x194   :  { %3641 = vst [vmem:[%s8225_s3 + $0xd8] sm:$0xff] %v6125_v12 }
 0x195   :  { %v6131_v13 = vpop.f32.mrf.mxu0 }
 0x196   :  { %3640 = vst [vmem:[%s8225_s3 + $0xd0] sm:$0xff] %v6131_v13  ;;  %595 = vxpose.xlu1.b32.cont [6/16] %v6086_v6, 128 }
 0x197   :  { %v6138_v14 = vpop.f32.mrf.mxu0 }
 0x198   :  { %3643 = vst [vmem:[%s8225_s3 + $0xe8] sm:$0xff] %v6138_v14 }
 0x199   :  { %v6144_v15 = vpop.f32.mrf.mxu0 }
 0x19a   :  { %3642 = vst [vmem:[%s8225_s3 + $0xe0] sm:$0xff] %v6144_v15  ;;  %596 = vxpose.xlu1.b32.cont [7/16] %v6105_v9, 128 }
 0x19b   :  { %v6151_v18 = vpop.f32.mrf.mxu0 }
 0x19c   :  { %3645 = vst [vmem:[%s8225_s3 + $0xf8] sm:$0xff] %v6151_v18  ;;  %4537 = vmatprep.subr.mxu1 %v6151_v18  ;;  %4594 = vmatpush3.msra.mxu0 %v6151_v18 }
 0x19d   :  { %v6159_v19 = vpop.f32.mrf.mxu0  ;;  %4538 = vmatpush3.msra.mxu1 %v6151_v18  ;;  %4595 = vmatprep.subr.mxu0 %v8229_v17 }
 0x19e   :  { %3644 = vst [vmem:[%s8225_s3 + $0xf0] sm:$0xff] %v6159_v19  ;;  %597 = vxpose.xlu1.b32.cont [8/16] %v6099_v8, 128  ;;  %4539 = vmatprep.subr.mxu1 %v6159_v19 }
 0x19f   :  { %4596 = vmatpush3.msra.mxu0 %v6159_v19  ;;  %4540 = vmatpush3.msra.mxu1 %v6159_v19 }
 0x1a0   :  { %4597 = vmatprep.subr.mxu0 %v8229_v17  ;;  %4541 = vmatprep.subr.mxu1 %v6138_v14 }
 0x1a1   :  { %4598 = vmatpush3.msra.mxu0 %v6138_v14  ;;  %4542 = vmatpush3.msra.mxu1 %v6138_v14 }
 0x1a2   :  { %4599 = vmatprep.subr.mxu0 %v8229_v17  ;;  %598 = vxpose.xlu1.b32.cont [9/16] %v6118_v11, 128 }
 0x1a3   :  { %4543 = vmatprep.subr.mxu1 %v6144_v15  ;;  %4600 = vmatpush3.msra.mxu0 %v6144_v15 }
 0x1a4   :  { %4544 = vmatpush3.msra.mxu1 %v6144_v15  ;;  %4601 = vmatprep.subr.mxu0 %v8229_v17 }
 0x1a5   :  { %4545 = vmatprep.subr.mxu1 %v6125_v12  ;;  %4602 = vmatpush3.msra.mxu0 %v6125_v12 }
 0x1a6   :  { %4546 = vmatpush3.msra.mxu1 %v6125_v12  ;;  %4603 = vmatprep.subr.mxu0 %v8229_v17 }
 0x1a7   :  { %599 = vxpose.xlu1.b32.cont [10/16] %v6112_v10, 128  ;;  %4547 = vmatprep.subr.mxu1 %v6131_v13 }
 0x1a8   :  { %4604 = vmatpush3.msra.mxu0 %v6131_v13  ;;  %4548 = vmatpush3.msra.mxu1 %v6131_v13 }
 0x1a9   :  { %4605 = vmatprep.subr.mxu0 %v8229_v17  ;;  %4549 = vmatprep.subr.mxu1 %v6112_v10 }
 0x1aa   :  { %4606 = vmatpush3.msra.mxu0 %v6112_v10  ;;  %4550 = vmatpush3.msra.mxu1 %v6112_v10 }
 0x1ab   :  { %4607 = vmatprep.subr.mxu0 %v8229_v17  ;;  %600 = vxpose.xlu1.b32.cont [11/16] %v6131_v13, 128 }
 0x1ac   :  { %4551 = vmatprep.subr.mxu1 %v6118_v11  ;;  %4608 = vmatpush3.msra.mxu0 %v6118_v11 }
 0x1ad   :  { %4552 = vmatpush3.msra.mxu1 %v6118_v11  ;;  %4609 = vmatprep.subr.mxu0 %v8229_v17 }
 0x1ae   :  { %4553 = vmatprep.subr.mxu1 %v6099_v8  ;;  %4610 = vmatpush3.msra.mxu0 %v6099_v8 }
 0x1af   :  { %4554 = vmatpush3.msra.mxu1 %v6099_v8  ;;  %4611 = vmatprep.subr.mxu0 %v8229_v17 }
 0x1b0   :  { %601 = vxpose.xlu1.b32.cont [12/16] %v6125_v12, 128  ;;  %4555 = vmatprep.subr.mxu1 %v6105_v9 }
 0x1b1   :  { %4612 = vmatpush3.msra.mxu0 %v6105_v9  ;;  %4556 = vmatpush3.msra.mxu1 %v6105_v9 }
 0x1b2   :  { %4613 = vmatprep.subr.mxu0 %v8229_v17  ;;  %4557 = vmatprep.subr.mxu1 %v6086_v6 }
 0x1b3   :  { %4614 = vmatpush3.msra.mxu0 %v6086_v6  ;;  %4558 = vmatpush3.msra.mxu1 %v6086_v6 }
 0x1b4   :  { %4615 = vmatprep.subr.mxu0 %v8229_v17  ;;  %602 = vxpose.xlu1.b32.cont [13/16] %v6144_v15, 128 }
 0x1b5   :  { %4559 = vmatprep.subr.mxu1 %v6092_v7  ;;  %4616 = vmatpush3.msra.mxu0 %v6092_v7 }
 0x1b6   :  { %4560 = vmatpush3.msra.mxu1 %v6092_v7  ;;  %4617 = vmatprep.subr.mxu0 %v8229_v17 }
 0x1b7   :  { %4561 = vmatprep.subr.mxu1 %v6073_v4  ;;  %4618 = vmatpush3.msra.mxu0 %v6073_v4 }
 0x1b8   :  { %4562 = vmatpush3.msra.mxu1 %v6073_v4  ;;  %4619 = vmatprep.subr.mxu0 %v8229_v17 }
 0x1b9   :  { %603 = vxpose.xlu1.b32.cont [14/16] %v6138_v14, 128  ;;  %4563 = vmatprep.subr.mxu1 %v6079_v5 }
 0x1ba   :  { %4620 = vmatpush3.msra.mxu0 %v6079_v5  ;;  %4564 = vmatpush3.msra.mxu1 %v6079_v5 }
 0x1bb   :  { %4621 = vmatprep.subr.mxu0 %v8229_v17  ;;  %4565 = vmatprep.subr.mxu1 %v6060_v2 }
 0x1bc   :  { %4622 = vmatpush3.msra.mxu0 %v6060_v2  ;;  %4566 = vmatpush3.msra.mxu1 %v6060_v2 }
 0x1bd   :  { %4623 = vmatprep.subr.mxu0 %v8229_v17  ;;  %604 = vxpose.xlu1.b32.cont [15/16] %v6159_v19, 128 }
 0x1be   :  { %4567 = vmatprep.subr.mxu1 %v6066_v3  ;;  %4624 = vmatpush3.msra.mxu0 %v6066_v3 }
 0x1bf   :  { %4568 = vmatpush3.msra.mxu1 %v6066_v3  ;;  %4626 = vmatmul.mubr.f32.vlgmr.msra.gmra.mxu0 %v90_v22 }
 0x1c0   :  { %4628 = vmatprep.subr.mxu1 %v5854_v16 }
 0x1c1   :  { %605 = vxpose.xlu1.b32.end [16/16] %v6151_v18, 128 }
 0x201   :  { %v606_v31 = vpop.trf.xlu1 }
 0x202   :  { %4569 = vmatprep.mubr.f32.mxu1 %v606_v31 }
 0x205   :  { %v607_v34 = vpop.trf.xlu1 }
 0x206   :  { %4570 = vmatmul.mubr.f32.vlgmr.msra.gmra.mxu1 %v607_v34 }
 0x207   :  { %4629 = vmatpush3.msra.mxu1 %v5854_v16 }
 0x208   :  { %4630 = vmatprep.subr.mxu1 %v5901_v20 }
 0x209   :  { %v608_v37 = vpop.trf.xlu1  ;;  %4631 = vmatpush3.msra.mxu1 %v5901_v20 }
 0x20a   :  { %4572 = vmatprep.mubr.f32.mxu1 %v608_v37  ;;  %4632 = vmatprep.subr.mxu1 %v5907_v21 }
 0x20b   :  { %4633 = vmatpush3.msra.mxu1 %v5907_v21 }
 0x20c   :  { %4634 = vmatprep.subr.mxu1 %v5914_v23 }
 0x20d   :  { %v609_v40 = vpop.trf.xlu1  ;;  %4635 = vmatpush3.msra.mxu1 %v5914_v23 }
 0x20e   :  { %4573 = vmatmul.mubr.f32.gmra.mxu1 %v609_v40  ;;  %4636 = vmatprep.subr.mxu1 %v5921_v24 }
 0x20f   :  { %4637 = vmatpush3.msra.mxu1 %v5921_v24 }
 0x210   :  { %4638 = vmatprep.subr.mxu1 %v5928_v26 }
 0x211   :  { %v610_v42 = vpop.trf.xlu1  ;;  %4639 = vmatpush3.msra.mxu1 %v5928_v26 }
 0x212   :  { %4575 = vmatprep.mubr.f32.mxu1 %v610_v42  ;;  %4640 = vmatprep.subr.mxu1 %v5935_v27 }
 0x213   :  { %4641 = vmatpush3.msra.mxu1 %v5935_v27 }
 0x214   :  { %4642 = vmatprep.subr.mxu1 %v5942_v29 }
 0x215   :  { %v611_v43 = vpop.trf.xlu1  ;;  %4643 = vmatpush3.msra.mxu1 %v5942_v29 }
 0x216   :  { %4576 = vmatmul.mubr.f32.gmra.mxu1 %v611_v43  ;;  %4644 = vmatprep.subr.mxu1 %v5949_v30 }
 0x217   :  { %4645 = vmatpush3.msra.mxu1 %v5949_v30 }
 0x218   :  { %4646 = vmatprep.subr.mxu1 %v5956_v32 }
 0x219   :  { %v612_v44 = vpop.trf.xlu1  ;;  %4647 = vmatpush3.msra.mxu1 %v5956_v32 }
 0x21a   :  { %4578 = vmatprep.mubr.f32.mxu1 %v612_v44  ;;  %4648 = vmatprep.subr.mxu1 %v5963_v33 }
 0x21b   :  { %4649 = vmatpush3.msra.mxu1 %v5963_v33 }
 0x21c   :  { %4650 = vmatprep.subr.mxu1 %v5970_v35 }
 0x21d   :  { %v613_v45 = vpop.trf.xlu1  ;;  %4651 = vmatpush3.msra.mxu1 %v5970_v35 }
 0x21e   :  { %4579 = vmatmul.mubr.f32.gmra.mxu1 %v613_v45  ;;  %4652 = vmatprep.subr.mxu1 %v5977_v36 }
 0x21f   :  { %4653 = vmatpush3.msra.mxu1 %v5977_v36 }
 0x220   :  { %4654 = vmatprep.subr.mxu1 %v5984_v38 }
 0x221   :  { %v614_v46 = vpop.trf.xlu1  ;;  %4655 = vmatpush3.msra.mxu1 %v5984_v38 }
 0x222   :  { %4581 = vmatprep.mubr.f32.mxu1 %v614_v46  ;;  %4656 = vmatprep.subr.mxu1 %v5991_v39 }
 0x223   :  { %4657 = vmatpush3.msra.mxu1 %v5991_v39 }
 0x224   :  { %4658 = vmatprep.subr.mxu1 %v5998_v41 }
 0x225   :  { %v615_v47 = vpop.trf.xlu1  ;;  %4659 = vmatpush3.msra.mxu1 %v5998_v41 }
 0x226   :  { %4582 = vmatmul.mubr.f32.gmra.mxu1 %v615_v47  ;;  %4740 = vmatprep.subr.mxu1 %v8229_v17 }
 0x229   :  { %v616_v48 = vpop.trf.xlu1 }
 0x22a   :  { %4584 = vmatprep.mubr.f32.mxu1 %v616_v48 }
 0x22d   :  { %v617_v49 = vpop.trf.xlu1 }
 0x22e   :  { %4585 = vmatmul.mubr.f32.gmra.mxu1 %v617_v49 }
 0x231   :  { %v618_v22 = vpop.trf.xlu1 }
 0x232   :  { %4587 = vmatprep.mubr.f32.mxu1 %v618_v22 }
 0x235   :  { %v619_v28 = vpop.trf.xlu1 }
 0x236   :  { %4588 = vmatmul.mubr.f32.gmra.mxu1 %v619_v28 }
 0x239   :  { %v620_v31 = vpop.trf.xlu1 }
 0x23a   :  { %4590 = vmatprep.mubr.f32.mxu1 %v620_v31 }
 0x23d   :  { %v621_v34 = vpop.trf.xlu1 }
 0x23e   :  { %4591 = vmatmul.mubr.f32.gmra.mxu1 %v621_v34 }
 0x23f   :  { %4660 = vmatprep.mubr.f32.mxu1 %v6066_v3 }
 0x242   :  { %4661 = vmatmul.mubr.f32.vlgmr.msra.gmra.mxu1 %v6060_v2 }
 0x243   :  { %4663 = vmatprep.mubr.f32.mxu1 %v6079_v5 }
 0x246   :  { %4664 = vmatmul.mubr.f32.gmra.mxu1 %v6073_v4 }
 0x247   :  { %4666 = vmatprep.mubr.f32.mxu1 %v6092_v7 }
 0x24a   :  { %4667 = vmatmul.mubr.f32.gmra.mxu1 %v6086_v6 }
 0x24b   :  { %4669 = vmatprep.mubr.f32.mxu1 %v6105_v9 }
 0x24e   :  { %4670 = vmatmul.mubr.f32.gmra.mxu1 %v6099_v8 }
 0x24f   :  { %4672 = vmatprep.mubr.f32.mxu1 %v6118_v11 }
 0x252   :  { %4673 = vmatmul.mubr.f32.gmra.mxu1 %v6112_v10 }
 0x253   :  { %4675 = vmatprep.mubr.f32.mxu1 %v6131_v13 }
 0x256   :  { %4676 = vmatmul.mubr.f32.gmra.mxu1 %v6125_v12 }
 0x257   :  { %4678 = vmatprep.mubr.f32.mxu1 %v6144_v15 }
 0x25a   :  { %4679 = vmatmul.mubr.f32.gmra.mxu1 %v6138_v14 }
 0x25b   :  { %4681 = vmatprep.mubr.f32.mxu1 %v6159_v19 }
 0x25e   :  { %4682 = vmatmul.mubr.f32.gmra.mxu1 %v6151_v18 }
 0x25f   :  { %4772 = vmatprep.mubr.msk.f32.mxu1 %vm5631_vm0, %v8229_v17 }
 0x27f   :  { %v849_v2 = vpop.f32.mrf.mxu0 }
 0x280   :  { %v6292_v3 = vadd.f32 %v849_v2, %v6239_v25 }
 0x281   :  { %v4627_v4 = vpop.f32.mrf.mxu0 }
 0x2c6   :  { %v4571_v5 = vpop.f32.mrf.mxu1 }
 0x2c7   :  { %v6295_v6 = vadd.f32 %v4571_v5, %v6028_v50 }
 0x2c8   :  { %v6297_v7 = vpop.f32.mrf.mxu1 }
 0x2ce   :  { %v4574_v8 = vpop.f32.mrf.mxu1 }
 0x2cf   :  { %v6300_v9 = vadd.f32 %v4574_v8, %v6032_v52 }
 0x2d0   :  { %v6302_v10 = vpop.f32.mrf.mxu1 }
 0x2d6   :  { %v4577_v11 = vpop.f32.mrf.mxu1 }
 0x2d7   :  { %v6305_v12 = vadd.f32 %v4577_v11, %v6036_v54  ;;  %v91_v11 = vld [vmem:[%s8222_s0 + $0x10] sm:$0xff] }
 0x2d8   :  { %v6307_v13 = vpop.f32.mrf.mxu1 }
 0x2de   :  { %v4580_v14 = vpop.f32.mrf.mxu1 }
 0x2df   :  { %v6310_v15 = vadd.f32 %v4580_v14, %v6040_v56 }
 0x2e0   :  { %v6312_v50 = vpop.f32.mrf.mxu1 }
 0x2e6   :  { %v4583_v18 = vpop.f32.mrf.mxu1 }
 0x2e7   :  { %v6315_v19 = vadd.f32 %v4583_v18, %v6044_v58 }
 0x2e8   :  { %v6317_v52 = vpop.f32.mrf.mxu1 }
 0x2ee   :  { %v4586_v25 = vpop.f32.mrf.mxu1 }
 0x2ef   :  { %v6320_v37 = vadd.f32 %v4586_v25, %v6048_v60 }
 0x2f0   :  { %v6322_v54 = vpop.f32.mrf.mxu1 }
 0x2f6   :  { %v4589_v40 = vpop.f32.mrf.mxu1 }
 0x2f7   :  { %v6325_v42 = vadd.f32 %v4589_v40, %v6052_v62 }
 0x2f8   :  { %v6327_v56 = vpop.f32.mrf.mxu1 }
 0x2fe   :  { %v4592_v43 = vpop.f32.mrf.mxu1 }
 0x2ff   :  { %v6330_v44 = vadd.f32 %v4592_v43, %v6056_v0 }
 0x300   :  { %v6332_v58 = vpop.f32.mrf.mxu1 }
 0x302   :  { %v6334_v45 = vpop.f32.mrf.mxu1 }
 0x303   :  { %3647 = vst [vmem:[%s8225_s3 + $0x108] sm:$0xff] %v6334_v45 }
 0x304   :  { %v6340_v60 = vpop.f32.mrf.mxu1 }
 0x305   :  { %3646 = vst [vmem:[%s8225_s3 + $0x100] sm:$0xff] %v6340_v60  ;;  %1016 = vxpose.xlu0.b32.start [1/16] %v6340_v60, 128 }
 0x306   :  { %v6347_v62 = vpop.f32.mrf.mxu1 }
 0x307   :  { %3649 = vst [vmem:[%s8225_s3 + $0x118] sm:$0xff] %v6347_v62 }
 0x308   :  { %v6353_v0 = vpop.f32.mrf.mxu1 }
 0x309   :  { %3648 = vst [vmem:[%s8225_s3 + $0x110] sm:$0xff] %v6353_v0  ;;  %1017 = vxpose.xlu0.b32.cont [2/16] %v6334_v45, 128 }
 0x30a   :  { %v6360_v46 = vpop.f32.mrf.mxu1 }
 0x30b   :  { %3651 = vst [vmem:[%s8225_s3 + $0x128] sm:$0xff] %v6360_v46 }
 0x30c   :  { %v6366_v47 = vpop.f32.mrf.mxu1 }
 0x30d   :  { %3650 = vst [vmem:[%s8225_s3 + $0x120] sm:$0xff] %v6366_v47  ;;  %1018 = vxpose.xlu0.b32.cont [3/16] %v6353_v0, 128 }
 0x30e   :  { %v6373_v48 = vpop.f32.mrf.mxu1 }
 0x30f   :  { %3653 = vst [vmem:[%s8225_s3 + $0x138] sm:$0xff] %v6373_v48 }
 0x310   :  { %v6379_v49 = vpop.f32.mrf.mxu1 }
 0x311   :  { %3652 = vst [vmem:[%s8225_s3 + $0x130] sm:$0xff] %v6379_v49  ;;  %1019 = vxpose.xlu0.b32.cont [4/16] %v6347_v62, 128 }
 0x312   :  { %v6386_v22 = vpop.f32.mrf.mxu1 }
 0x313   :  { %3655 = vst [vmem:[%s8225_s3 + $0x148] sm:$0xff] %v6386_v22 }
 0x314   :  { %v6392_v28 = vpop.f32.mrf.mxu1 }
 0x315   :  { %3654 = vst [vmem:[%s8225_s3 + $0x140] sm:$0xff] %v6392_v28  ;;  %1020 = vxpose.xlu0.b32.cont [5/16] %v6366_v47, 128 }
 0x316   :  { %v6399_v31 = vpop.f32.mrf.mxu1 }
 0x317   :  { %3657 = vst [vmem:[%s8225_s3 + $0x158] sm:$0xff] %v6399_v31 }
 0x318   :  { %v6405_v34 = vpop.f32.mrf.mxu1 }
 0x319   :  { %3656 = vst [vmem:[%s8225_s3 + $0x150] sm:$0xff] %v6405_v34  ;;  %1021 = vxpose.xlu0.b32.cont [6/16] %v6360_v46, 128 }
 0x31a   :  { %v6412_v2 = vpop.f32.mrf.mxu1 }
 0x31b   :  { %3659 = vst [vmem:[%s8225_s3 + $0x168] sm:$0xff] %v6412_v2 }
 0x31c   :  { %v6418_v4 = vpop.f32.mrf.mxu1 }
 0x31d   :  { %3658 = vst [vmem:[%s8225_s3 + $0x160] sm:$0xff] %v6418_v4  ;;  %1022 = vxpose.xlu0.b32.cont [7/16] %v6379_v49, 128 }
 0x31e   :  { %v6425_v5 = vpop.f32.mrf.mxu1 }
 0x31f   :  { %3661 = vst [vmem:[%s8225_s3 + $0x178] sm:$0xff] %v6425_v5  ;;  %4684 = vmatprep.subr.mxu0 %v6425_v5  ;;  %4741 = vmatpush3.msra.mxu1 %v6425_v5 }
 0x320   :  { %v6433_v8 = vpop.f32.mrf.mxu1  ;;  %4685 = vmatpush3.msra.mxu0 %v6425_v5  ;;  %4742 = vmatprep.subr.mxu1 %v8229_v17 }
 0x321   :  { %3660 = vst [vmem:[%s8225_s3 + $0x170] sm:$0xff] %v6433_v8  ;;  %1023 = vxpose.xlu0.b32.cont [8/16] %v6373_v48, 128  ;;  %4686 = vmatprep.subr.mxu0 %v6433_v8 }
 0x322   :  { %4743 = vmatpush3.msra.mxu1 %v6433_v8  ;;  %4687 = vmatpush3.msra.mxu0 %v6433_v8 }
 0x323   :  { %4744 = vmatprep.subr.mxu1 %v8229_v17  ;;  %4688 = vmatprep.subr.mxu0 %v6412_v2 }
 0x324   :  { %4745 = vmatpush3.msra.mxu1 %v6412_v2  ;;  %4689 = vmatpush3.msra.mxu0 %v6412_v2 }
 0x325   :  { %4746 = vmatprep.subr.mxu1 %v8229_v17  ;;  %1024 = vxpose.xlu0.b32.cont [9/16] %v6392_v28, 128 }
 0x326   :  { %4690 = vmatprep.subr.mxu0 %v6418_v4  ;;  %4747 = vmatpush3.msra.mxu1 %v6418_v4 }
 0x327   :  { %4691 = vmatpush3.msra.mxu0 %v6418_v4  ;;  %4748 = vmatprep.subr.mxu1 %v8229_v17 }
 0x328   :  { %4692 = vmatprep.subr.mxu0 %v6399_v31  ;;  %4749 = vmatpush3.msra.mxu1 %v6399_v31 }
 0x329   :  { %4693 = vmatpush3.msra.mxu0 %v6399_v31  ;;  %4750 = vmatprep.subr.mxu1 %v8229_v17 }
 0x32a   :  { %1025 = vxpose.xlu0.b32.cont [10/16] %v6386_v22, 128  ;;  %4694 = vmatprep.subr.mxu0 %v6405_v34 }
 0x32b   :  { %4751 = vmatpush3.msra.mxu1 %v6405_v34  ;;  %4695 = vmatpush3.msra.mxu0 %v6405_v34 }
 0x32c   :  { %4752 = vmatprep.subr.mxu1 %v8229_v17  ;;  %4696 = vmatprep.subr.mxu0 %v6386_v22 }
 0x32d   :  { %4753 = vmatpush3.msra.mxu1 %v6386_v22  ;;  %4697 = vmatpush3.msra.mxu0 %v6386_v22 }
 0x32e   :  { %4754 = vmatprep.subr.mxu1 %v8229_v17  ;;  %1026 = vxpose.xlu0.b32.cont [11/16] %v6405_v34, 128 }
 0x32f   :  { %4698 = vmatprep.subr.mxu0 %v6392_v28  ;;  %4755 = vmatpush3.msra.mxu1 %v6392_v28 }
 0x330   :  { %4699 = vmatpush3.msra.mxu0 %v6392_v28  ;;  %4756 = vmatprep.subr.mxu1 %v8229_v17 }
 0x331   :  { %4700 = vmatprep.subr.mxu0 %v6373_v48  ;;  %4757 = vmatpush3.msra.mxu1 %v6373_v48 }
 0x332   :  { %4701 = vmatpush3.msra.mxu0 %v6373_v48  ;;  %4758 = vmatprep.subr.mxu1 %v8229_v17 }
 0x333   :  { %1027 = vxpose.xlu0.b32.cont [12/16] %v6399_v31, 128  ;;  %4702 = vmatprep.subr.mxu0 %v6379_v49 }
 0x334   :  { %4759 = vmatpush3.msra.mxu1 %v6379_v49  ;;  %4703 = vmatpush3.msra.mxu0 %v6379_v49 }
 0x335   :  { %4760 = vmatprep.subr.mxu1 %v8229_v17  ;;  %4704 = vmatprep.subr.mxu0 %v6360_v46 }
 0x336   :  { %4761 = vmatpush3.msra.mxu1 %v6360_v46  ;;  %4705 = vmatpush3.msra.mxu0 %v6360_v46 }
 0x337   :  { %4762 = vmatprep.subr.mxu1 %v8229_v17  ;;  %1028 = vxpose.xlu0.b32.cont [13/16] %v6418_v4, 128 }
 0x338   :  { %4706 = vmatprep.subr.mxu0 %v6366_v47  ;;  %4763 = vmatpush3.msra.mxu1 %v6366_v47 }
 0x339   :  { %4707 = vmatpush3.msra.mxu0 %v6366_v47  ;;  %4764 = vmatprep.subr.mxu1 %v8229_v17 }
 0x33a   :  { %4708 = vmatprep.subr.mxu0 %v6347_v62  ;;  %4765 = vmatpush3.msra.mxu1 %v6347_v62 }
 0x33b   :  { %4709 = vmatpush3.msra.mxu0 %v6347_v62  ;;  %4766 = vmatprep.subr.mxu1 %v8229_v17 }
 0x33c   :  { %1029 = vxpose.xlu0.b32.cont [14/16] %v6412_v2, 128  ;;  %4710 = vmatprep.subr.mxu0 %v6353_v0 }
 0x33d   :  { %4767 = vmatpush3.msra.mxu1 %v6353_v0  ;;  %4711 = vmatpush3.msra.mxu0 %v6353_v0 }
 0x33e   :  { %4768 = vmatprep.subr.mxu1 %v8229_v17  ;;  %4712 = vmatprep.subr.mxu0 %v6334_v45 }
 0x33f   :  { %4769 = vmatpush3.msra.mxu1 %v6334_v45  ;;  %4713 = vmatpush3.msra.mxu0 %v6334_v45 }
 0x340   :  { %4770 = vmatprep.subr.mxu1 %v8229_v17  ;;  %1030 = vxpose.xlu0.b32.cont [15/16] %v6433_v8, 128 }
 0x341   :  { %4714 = vmatprep.subr.mxu0 %v6340_v60  ;;  %4771 = vmatpush3.msra.mxu1 %v6340_v60 }
 0x342   :  { %4715 = vmatpush3.msra.mxu0 %v6340_v60  ;;  %4773 = vmatmul.mubr.f32.vlgmr.msra.gmra.mxu1 %v91_v11 }
 0x343   :  { %4775 = vmatprep.subr.mxu0 %v5854_v16 }
 0x344   :  { %1031 = vxpose.xlu0.b32.end [16/16] %v6425_v5, 128 }
 0x384   :  { %v1032_v14 = vpop.trf.xlu0 }
 0x385   :  { %4716 = vmatprep.mubr.f32.mxu0 %v1032_v14 }
 0x388   :  { %v1033_v18 = vpop.trf.xlu0 }
 0x389   :  { %4717 = vmatmul.mubr.f32.vlgmr.msra.gmra.mxu0 %v1033_v18 }
 0x38a   :  { %4776 = vmatpush3.msra.mxu0 %v5854_v16 }
 0x38b   :  { %4777 = vmatprep.subr.mxu0 %v5901_v20 }
 0x38c   :  { %v1034_v25 = vpop.trf.xlu0  ;;  %4778 = vmatpush3.msra.mxu0 %v5901_v20 }
 0x38d   :  { %4719 = vmatprep.mubr.f32.mxu0 %v1034_v25  ;;  %4779 = vmatprep.subr.mxu0 %v5907_v21 }
 0x38e   :  { %4780 = vmatpush3.msra.mxu0 %v5907_v21 }
 0x38f   :  { %4781 = vmatprep.subr.mxu0 %v5914_v23 }
 0x390   :  { %v1035_v40 = vpop.trf.xlu0  ;;  %4782 = vmatpush3.msra.mxu0 %v5914_v23 }
 0x391   :  { %4720 = vmatmul.mubr.f32.gmra.mxu0 %v1035_v40  ;;  %4783 = vmatprep.subr.mxu0 %v5921_v24 }
 0x392   :  { %4784 = vmatpush3.msra.mxu0 %v5921_v24 }
 0x393   :  { %4785 = vmatprep.subr.mxu0 %v5928_v26 }
 0x394   :  { %v1036_v16 = vpop.trf.xlu0  ;;  %4786 = vmatpush3.msra.mxu0 %v5928_v26 }
 0x395   :  { %4722 = vmatprep.mubr.f32.mxu0 %v1036_v16  ;;  %4787 = vmatprep.subr.mxu0 %v5935_v27 }
 0x396   :  { %4788 = vmatpush3.msra.mxu0 %v5935_v27 }
 0x397   :  { %4789 = vmatprep.subr.mxu0 %v5942_v29 }
 0x398   :  { %v1037_v20 = vpop.trf.xlu0  ;;  %4790 = vmatpush3.msra.mxu0 %v5942_v29 }
 0x399   :  { %4723 = vmatmul.mubr.f32.gmra.mxu0 %v1037_v20  ;;  %4791 = vmatprep.subr.mxu0 %v5949_v30 }
 0x39a   :  { %4792 = vmatpush3.msra.mxu0 %v5949_v30 }
 0x39b   :  { %4793 = vmatprep.subr.mxu0 %v5956_v32 }
 0x39c   :  { %v1038_v21 = vpop.trf.xlu0  ;;  %4794 = vmatpush3.msra.mxu0 %v5956_v32 }
 0x39d   :  { %4725 = vmatprep.mubr.f32.mxu0 %v1038_v21  ;;  %4795 = vmatprep.subr.mxu0 %v5963_v33 }
 0x39e   :  { %4796 = vmatpush3.msra.mxu0 %v5963_v33 }
 0x39f   :  { %4797 = vmatprep.subr.mxu0 %v5970_v35 }
 0x3a0   :  { %v1039_v23 = vpop.trf.xlu0  ;;  %4798 = vmatpush3.msra.mxu0 %v5970_v35 }
 0x3a1   :  { %4726 = vmatmul.mubr.f32.gmra.mxu0 %v1039_v23  ;;  %4799 = vmatprep.subr.mxu0 %v5977_v36 }
 0x3a2   :  { %4800 = vmatpush3.msra.mxu0 %v5977_v36 }
 0x3a3   :  { %4801 = vmatprep.subr.mxu0 %v5984_v38 }
 0x3a4   :  { %v1040_v24 = vpop.trf.xlu0  ;;  %4802 = vmatpush3.msra.mxu0 %v5984_v38 }
 0x3a5   :  { %4728 = vmatprep.mubr.f32.mxu0 %v1040_v24  ;;  %4803 = vmatprep.subr.mxu0 %v5991_v39 }
 0x3a6   :  { %4804 = vmatpush3.msra.mxu0 %v5991_v39 }
 0x3a7   :  { %4805 = vmatprep.subr.mxu0 %v5998_v41 }
 0x3a8   :  { %v1041_v26 = vpop.trf.xlu0  ;;  %4806 = vmatpush3.msra.mxu0 %v5998_v41 }
 0x3a9   :  { %4729 = vmatmul.mubr.f32.gmra.mxu0 %v1041_v26  ;;  %4887 = vmatprep.subr.mxu0 %v8229_v17 }
 0x3ac   :  { %v1042_v27 = vpop.trf.xlu0 }
 0x3ad   :  { %4731 = vmatprep.mubr.f32.mxu0 %v1042_v27 }
 0x3b0   :  { %v1043_v29 = vpop.trf.xlu0 }
 0x3b1   :  { %4732 = vmatmul.mubr.f32.gmra.mxu0 %v1043_v29 }
 0x3b4   :  { %v1044_v30 = vpop.trf.xlu0 }
 0x3b5   :  { %4734 = vmatprep.mubr.f32.mxu0 %v1044_v30  ;;  %v92_v30 = vld [vmem:[%s8222_s0 + $0x18] sm:$0xff] }
 0x3b8   :  { %v1045_v32 = vpop.trf.xlu0 }
 0x3b9   :  { %4735 = vmatmul.mubr.f32.gmra.mxu0 %v1045_v32  ;;  %v6786_v32 = vld [vmem:[%s8224_s2 + $0x78] sm:$0xff] }
 0x3bc   :  { %v1046_v33 = vpop.trf.xlu0 }
 0x3bd   :  { %4737 = vmatprep.mubr.f32.mxu0 %v1046_v33 }
 0x3c0   :  { %v1047_v35 = vpop.trf.xlu0 }
 0x3c1   :  { %4738 = vmatmul.mubr.f32.gmra.mxu0 %v1047_v35 }
 0x3c2   :  { %4807 = vmatprep.mubr.f32.mxu0 %v6340_v60 }
 0x3c5   :  { %4808 = vmatmul.mubr.f32.vlgmr.msra.gmra.mxu0 %v6334_v45 }
 0x3c6   :  { %4810 = vmatprep.mubr.f32.mxu0 %v6353_v0 }
 0x3c9   :  { %4811 = vmatmul.mubr.f32.gmra.mxu0 %v6347_v62 }
 0x3ca   :  { %4813 = vmatprep.mubr.f32.mxu0 %v6366_v47 }
 0x3cd   :  { %4814 = vmatmul.mubr.f32.gmra.mxu0 %v6360_v46 }
 0x3ce   :  { %4816 = vmatprep.mubr.f32.mxu0 %v6379_v49 }
 0x3d1   :  { %4817 = vmatmul.mubr.f32.gmra.mxu0 %v6373_v48 }
 0x3d2   :  { %4819 = vmatprep.mubr.f32.mxu0 %v6392_v28 }
 0x3d5   :  { %4820 = vmatmul.mubr.f32.gmra.mxu0 %v6386_v22 }
 0x3d6   :  { %4822 = vmatprep.mubr.f32.mxu0 %v6405_v34 }
 0x3d9   :  { %4823 = vmatmul.mubr.f32.gmra.mxu0 %v6399_v31 }
 0x3da   :  { %4825 = vmatprep.mubr.f32.mxu0 %v6418_v4 }
 0x3dd   :  { %4826 = vmatmul.mubr.f32.gmra.mxu0 %v6412_v2 }
 0x3de   :  { %4828 = vmatprep.mubr.f32.mxu0 %v6433_v8 }
 0x3e1   :  { %4829 = vmatmul.mubr.f32.gmra.mxu0 %v6425_v5 }
 0x3e2   :  { %4919 = vmatprep.mubr.msk.f32.mxu0 %vm5631_vm0, %v8229_v17 }
 0x402   :  { %v1275_v36 = vpop.f32.mrf.mxu1 }
 0x403   :  { %v6564_v38 = vadd.f32 %v1275_v36, %v6292_v3  ;;  %v6794_v36 = vld [vmem:[%s8224_s2 + $0x70] sm:$0xff] }
 0x404   :  { %v4774_v39 = vpop.f32.mrf.mxu1 }
 0x449   :  { %v4718_v41 = vpop.f32.mrf.mxu0 }
 0x44a   :  { %v6567_v43 = vadd.f32 %v4718_v41, %v6295_v6  ;;  %v6801_v41 = vld [vmem:[%s8224_s2 + $0x68] sm:$0xff] }
 0x44b   :  { %v6569_v45 = vpop.f32.mrf.mxu0 }
 0x451   :  { %v4721_v60 = vpop.f32.mrf.mxu0 }
 0x452   :  { %v6572_v62 = vadd.f32 %v4721_v60, %v6300_v9  ;;  %v6808_v60 = vld [vmem:[%s8224_s2 + $0x60] sm:$0xff] }
 0x453   :  { %v6574_v0 = vpop.f32.mrf.mxu0 }
 0x459   :  { %v4724_v46 = vpop.f32.mrf.mxu0 }
 0x45a   :  { %v6577_v47 = vadd.f32 %v4724_v46, %v6305_v12 }
 0x45b   :  { %v6579_v48 = vpop.f32.mrf.mxu0 }
 0x461   :  { %v4727_v3 = vpop.f32.mrf.mxu0 }
 0x462   :  { %v6582_v49 = vadd.f32 %v4727_v3, %v6310_v15  ;;  %v6815_v3 = vld [vmem:[%s8224_s2 + $0x58] sm:$0xff] }
 0x463   :  { %v6584_v6 = vpop.f32.mrf.mxu0 }
 0x469   :  { %v4730_v22 = vpop.f32.mrf.mxu0 }
 0x46a   :  { %v6587_v28 = vadd.f32 %v4730_v22, %v6315_v19  ;;  %v6822_v22 = vld [vmem:[%s8224_s2 + $0x50] sm:$0xff] }
 0x46b   :  { %v6589_v9 = vpop.f32.mrf.mxu0 }
 0x471   :  { %v4733_v31 = vpop.f32.mrf.mxu0 }
 0x472   :  { %v6592_v34 = vadd.f32 %v4733_v31, %v6320_v37 }
 0x473   :  { %v6594_v12 = vpop.f32.mrf.mxu0 }
 0x479   :  { %v4736_v2 = vpop.f32.mrf.mxu0 }
 0x47a   :  { %v6597_v4 = vadd.f32 %v4736_v2, %v6325_v42  ;;  %v6829_v2 = vld [vmem:[%s8224_s2 + $0x48] sm:$0xff] }
 0x47b   :  { %v6599_v15 = vpop.f32.mrf.mxu0  ;;  %8249 = vst [vmem:[#allocation7_spill] sm:$0xff] %v6829_v2 }
 0x481   :  { %v4739_v5 = vpop.f32.mrf.mxu0 }
 0x482   :  { %v6602_v8 = vadd.f32 %v4739_v5, %v6330_v44  ;;  %v6836_v5 = vld [vmem:[%s8224_s2 + $0x40] sm:$0xff] }
 0x483   :  { %v6604_v19 = vpop.f32.mrf.mxu0  ;;  %8250 = vst [vmem:[#allocation8_spill] sm:$0xff] %v6836_v5 }
 0x485   :  { %v6606_v11 = vpop.f32.mrf.mxu0 }
 0x486   :  { %3663 = vst [vmem:[%s8225_s3 + $0x188] sm:$0xff] %v6606_v11 }
 0x487   :  { %v6612_v37 = vpop.f32.mrf.mxu0 }
 0x488   :  { %3662 = vst [vmem:[%s8225_s3 + $0x180] sm:$0xff] %v6612_v37  ;;  %1442 = vxpose.xlu1.b32.start [1/16] %v6612_v37, 128 }
 0x489   :  { %v6619_v42 = vpop.f32.mrf.mxu0 }
 0x48a   :  { %3665 = vst [vmem:[%s8225_s3 + $0x198] sm:$0xff] %v6619_v42 }
 0x48b   :  { %v6625_v44 = vpop.f32.mrf.mxu0 }
 0x48c   :  { %3664 = vst [vmem:[%s8225_s3 + $0x190] sm:$0xff] %v6625_v44  ;;  %1443 = vxpose.xlu1.b32.cont [2/16] %v6606_v11, 128 }
 0x48d   :  { %v6632_v14 = vpop.f32.mrf.mxu0 }
 0x48e   :  { %3667 = vst [vmem:[%s8225_s3 + $0x1a8] sm:$0xff] %v6632_v14 }
 0x48f   :  { %v6638_v18 = vpop.f32.mrf.mxu0 }
 0x490   :  { %3666 = vst [vmem:[%s8225_s3 + $0x1a0] sm:$0xff] %v6638_v18  ;;  %1444 = vxpose.xlu1.b32.cont [3/16] %v6625_v44, 128 }
 0x491   :  { %v6645_v25 = vpop.f32.mrf.mxu0 }
 0x492   :  { %3669 = vst [vmem:[%s8225_s3 + $0x1b8] sm:$0xff] %v6645_v25 }
 0x493   :  { %v6651_v40 = vpop.f32.mrf.mxu0 }
 0x494   :  { %3668 = vst [vmem:[%s8225_s3 + $0x1b0] sm:$0xff] %v6651_v40  ;;  %1445 = vxpose.xlu1.b32.cont [4/16] %v6619_v42, 128 }
 0x495   :  { %v6658_v16 = vpop.f32.mrf.mxu0 }
 0x496   :  { %3671 = vst [vmem:[%s8225_s3 + $0x1c8] sm:$0xff] %v6658_v16 }
 0x497   :  { %v6664_v20 = vpop.f32.mrf.mxu0 }
 0x498   :  { %3670 = vst [vmem:[%s8225_s3 + $0x1c0] sm:$0xff] %v6664_v20  ;;  %1446 = vxpose.xlu1.b32.cont [5/16] %v6638_v18, 128 }
 0x499   :  { %v6671_v21 = vpop.f32.mrf.mxu0 }
 0x49a   :  { %3673 = vst [vmem:[%s8225_s3 + $0x1d8] sm:$0xff] %v6671_v21 }
 0x49b   :  { %v6677_v23 = vpop.f32.mrf.mxu0 }
 0x49c   :  { %3672 = vst [vmem:[%s8225_s3 + $0x1d0] sm:$0xff] %v6677_v23  ;;  %1447 = vxpose.xlu1.b32.cont [6/16] %v6632_v14, 128 }
 0x49d   :  { %v6684_v24 = vpop.f32.mrf.mxu0 }
 0x49e   :  { %3675 = vst [vmem:[%s8225_s3 + $0x1e8] sm:$0xff] %v6684_v24 }
 0x49f   :  { %v6690_v26 = vpop.f32.mrf.mxu0 }
 0x4a0   :  { %3674 = vst [vmem:[%s8225_s3 + $0x1e0] sm:$0xff] %v6690_v26  ;;  %1448 = vxpose.xlu1.b32.cont [7/16] %v6651_v40, 128 }
 0x4a1   :  { %v6697_v27 = vpop.f32.mrf.mxu0 }
 0x4a2   :  { %3677 = vst [vmem:[%s8225_s3 + $0x1f8] sm:$0xff] %v6697_v27  ;;  %4831 = vmatprep.subr.mxu1 %v6697_v27  ;;  %4888 = vmatpush3.msra.mxu0 %v6697_v27 }
 0x4a3   :  { %v6705_v29 = vpop.f32.mrf.mxu0  ;;  %4832 = vmatpush3.msra.mxu1 %v6697_v27  ;;  %4889 = vmatprep.subr.mxu0 %v8229_v17 }
 0x4a4   :  { %3676 = vst [vmem:[%s8225_s3 + $0x1f0] sm:$0xff] %v6705_v29  ;;  %1449 = vxpose.xlu1.b32.cont [8/16] %v6645_v25, 128  ;;  %4833 = vmatprep.subr.mxu1 %v6705_v29 }
 0x4a5   :  { %4890 = vmatpush3.msra.mxu0 %v6705_v29  ;;  %4834 = vmatpush3.msra.mxu1 %v6705_v29 }
 0x4a6   :  { %4891 = vmatprep.subr.mxu0 %v8229_v17  ;;  %4835 = vmatprep.subr.mxu1 %v6684_v24 }
 0x4a7   :  { %4892 = vmatpush3.msra.mxu0 %v6684_v24  ;;  %4836 = vmatpush3.msra.mxu1 %v6684_v24 }
 0x4a8   :  { %4893 = vmatprep.subr.mxu0 %v8229_v17  ;;  %1450 = vxpose.xlu1.b32.cont [9/16] %v6664_v20, 128 }
 0x4a9   :  { %4837 = vmatprep.subr.mxu1 %v6690_v26  ;;  %4894 = vmatpush3.msra.mxu0 %v6690_v26 }
 0x4aa   :  { %4838 = vmatpush3.msra.mxu1 %v6690_v26  ;;  %4895 = vmatprep.subr.mxu0 %v8229_v17 }
 0x4ab   :  { %4839 = vmatprep.subr.mxu1 %v6671_v21  ;;  %4896 = vmatpush3.msra.mxu0 %v6671_v21 }
 0x4ac   :  { %4840 = vmatpush3.msra.mxu1 %v6671_v21  ;;  %4897 = vmatprep.subr.mxu0 %v8229_v17 }
 0x4ad   :  { %1451 = vxpose.xlu1.b32.cont [10/16] %v6658_v16, 128  ;;  %4841 = vmatprep.subr.mxu1 %v6677_v23 }
 0x4ae   :  { %4898 = vmatpush3.msra.mxu0 %v6677_v23  ;;  %4842 = vmatpush3.msra.mxu1 %v6677_v23 }
 0x4af   :  { %4899 = vmatprep.subr.mxu0 %v8229_v17  ;;  %4843 = vmatprep.subr.mxu1 %v6658_v16 }
 0x4b0   :  { %4900 = vmatpush3.msra.mxu0 %v6658_v16  ;;  %4844 = vmatpush3.msra.mxu1 %v6658_v16 }
 0x4b1   :  { %4901 = vmatprep.subr.mxu0 %v8229_v17  ;;  %1452 = vxpose.xlu1.b32.cont [11/16] %v6677_v23, 128 }
 0x4b2   :  { %4845 = vmatprep.subr.mxu1 %v6664_v20  ;;  %4902 = vmatpush3.msra.mxu0 %v6664_v20 }
 0x4b3   :  { %4846 = vmatpush3.msra.mxu1 %v6664_v20  ;;  %4903 = vmatprep.subr.mxu0 %v8229_v17 }
 0x4b4   :  { %4847 = vmatprep.subr.mxu1 %v6645_v25  ;;  %4904 = vmatpush3.msra.mxu0 %v6645_v25 }
 0x4b5   :  { %4848 = vmatpush3.msra.mxu1 %v6645_v25  ;;  %4905 = vmatprep.subr.mxu0 %v8229_v17 }
 0x4b6   :  { %1453 = vxpose.xlu1.b32.cont [12/16] %v6671_v21, 128  ;;  %4849 = vmatprep.subr.mxu1 %v6651_v40 }
 0x4b7   :  { %4906 = vmatpush3.msra.mxu0 %v6651_v40  ;;  %4850 = vmatpush3.msra.mxu1 %v6651_v40 }
 0x4b8   :  { %4907 = vmatprep.subr.mxu0 %v8229_v17  ;;  %4851 = vmatprep.subr.mxu1 %v6632_v14 }
 0x4b9   :  { %4908 = vmatpush3.msra.mxu0 %v6632_v14  ;;  %4852 = vmatpush3.msra.mxu1 %v6632_v14 }
 0x4ba   :  { %4909 = vmatprep.subr.mxu0 %v8229_v17  ;;  %1454 = vxpose.xlu1.b32.cont [13/16] %v6690_v26, 128 }
 0x4bb   :  { %4853 = vmatprep.subr.mxu1 %v6638_v18  ;;  %4910 = vmatpush3.msra.mxu0 %v6638_v18 }
 0x4bc   :  { %4854 = vmatpush3.msra.mxu1 %v6638_v18  ;;  %4911 = vmatprep.subr.mxu0 %v8229_v17 }
 0x4bd   :  { %4855 = vmatprep.subr.mxu1 %v6619_v42  ;;  %4912 = vmatpush3.msra.mxu0 %v6619_v42 }
 0x4be   :  { %4856 = vmatpush3.msra.mxu1 %v6619_v42  ;;  %4913 = vmatprep.subr.mxu0 %v8229_v17 }
 0x4bf   :  { %1455 = vxpose.xlu1.b32.cont [14/16] %v6684_v24, 128  ;;  %4857 = vmatprep.subr.mxu1 %v6625_v44 }
 0x4c0   :  { %4914 = vmatpush3.msra.mxu0 %v6625_v44  ;;  %4858 = vmatpush3.msra.mxu1 %v6625_v44 }
 0x4c1   :  { %4915 = vmatprep.subr.mxu0 %v8229_v17  ;;  %4859 = vmatprep.subr.mxu1 %v6606_v11 }
 0x4c2   :  { %4916 = vmatpush3.msra.mxu0 %v6606_v11  ;;  %4860 = vmatpush3.msra.mxu1 %v6606_v11 }
 0x4c3   :  { %4917 = vmatprep.subr.mxu0 %v8229_v17  ;;  %1456 = vxpose.xlu1.b32.cont [15/16] %v6705_v29, 128  ;;  %v6878_v17 = vld [vmem:[%s8224_s2 + $0x10] sm:$0xff] }
 0x4c4   :  { %4861 = vmatprep.subr.mxu1 %v6612_v37  ;;  %4918 = vmatpush3.msra.mxu0 %v6612_v37  ;;  %8256 = vst [vmem:[#allocation14_spill] sm:$0xff] %v6878_v17 }
 0x4c5   :  { %4862 = vmatpush3.msra.mxu1 %v6612_v37  ;;  %4920 = vmatmul.mubr.f32.vlgmr.msra.gmra.mxu0 %v92_v30 }
 0x4c6   :  { %4922 = vmatprep.subr.mxu1 %v6786_v32 }
 0x4c7   :  { %1457 = vxpose.xlu1.b32.end [16/16] %v6697_v27, 128 }
 0x507   :  { %v1458_v33 = vpop.trf.xlu1 }
 0x508   :  { %4863 = vmatprep.mubr.f32.mxu1 %v1458_v33  ;;  %v6843_v33 = vld [vmem:[%s8224_s2 + $0x38] sm:$0xff] }
 0x509   :  { %8251 = vst [vmem:[#allocation9_spill] sm:$0xff] %v6843_v33 }
 0x50b   :  { %v1459_v35 = vpop.trf.xlu1 }
 0x50c   :  { %4864 = vmatmul.mubr.f32.vlgmr.msra.gmra.mxu1 %v1459_v35  ;;  %v6850_v35 = vld [vmem:[%s8224_s2 + $0x30] sm:$0xff] }
 0x50d   :  { %4923 = vmatpush3.msra.mxu1 %v6786_v32  ;;  %8252 = vst [vmem:[#allocation10_spill] sm:$0xff] %v6850_v35 }
 0x50e   :  { %4924 = vmatprep.subr.mxu1 %v6794_v36 }
 0x50f   :  { %v1460_v39 = vpop.trf.xlu1  ;;  %4925 = vmatpush3.msra.mxu1 %v6794_v36 }
 0x510   :  { %4866 = vmatprep.mubr.f32.mxu1 %v1460_v39  ;;  %4926 = vmatprep.subr.mxu1 %v6801_v41 }
 0x511   :  { %4927 = vmatpush3.msra.mxu1 %v6801_v41 }
 0x512   :  { %4928 = vmatprep.subr.mxu1 %v6808_v60 }
 0x513   :  { %v1461_v46 = vpop.trf.xlu1  ;;  %4929 = vmatpush3.msra.mxu1 %v6808_v60 }
 0x514   :  { %4867 = vmatmul.mubr.f32.gmra.mxu1 %v1461_v46  ;;  %4930 = vmatprep.subr.mxu1 %v6815_v3  ;;  %v6857_v46 = vld [vmem:[%s8224_s2 + $0x28] sm:$0xff] }
 0x515   :  { %4931 = vmatpush3.msra.mxu1 %v6815_v3  ;;  %8253 = vst [vmem:[#allocation11_spill] sm:$0xff] %v6857_v46 }
 0x516   :  { %4932 = vmatprep.subr.mxu1 %v6822_v22 }
 0x517   :  { %v1462_v31 = vpop.trf.xlu1  ;;  %4933 = vmatpush3.msra.mxu1 %v6822_v22 }
 0x518   :  { %4869 = vmatprep.mubr.f32.mxu1 %v1462_v31  ;;  %4934 = vmatprep.subr.mxu1 %v6829_v2  ;;  %v6864_v31 = vld [vmem:[%s8224_s2 + $0x20] sm:$0xff] }
 0x519   :  { %4935 = vmatpush3.msra.mxu1 %v6829_v2  ;;  %8254 = vst [vmem:[#allocation12_spill] sm:$0xff] %v6864_v31 }
 0x51a   :  { %4936 = vmatprep.subr.mxu1 %v6836_v5 }
 0x51b   :  { %v1463_v30 = vpop.trf.xlu1  ;;  %4937 = vmatpush3.msra.mxu1 %v6836_v5 }
 0x51c   :  { %4870 = vmatmul.mubr.f32.gmra.mxu1 %v1463_v30  ;;  %4938 = vmatprep.subr.mxu1 %v6843_v33 }
 0x51d   :  { %4939 = vmatpush3.msra.mxu1 %v6843_v33 }
 0x51e   :  { %4940 = vmatprep.subr.mxu1 %v6850_v35 }
 0x51f   :  { %v1464_v39 = vpop.trf.xlu1  ;;  %4941 = vmatpush3.msra.mxu1 %v6850_v35 }
 0x520   :  { %4872 = vmatprep.mubr.f32.mxu1 %v1464_v39  ;;  %4942 = vmatprep.subr.mxu1 %v6857_v46  ;;  %v6871_v39 = vld [vmem:[%s8224_s2 + $0x18] sm:$0xff] }
 0x521   :  { %4943 = vmatpush3.msra.mxu1 %v6857_v46  ;;  %8255 = vst [vmem:[#allocation13_spill] sm:$0xff] %v6871_v39 }
 0x522   :  { %4944 = vmatprep.subr.mxu1 %v6864_v31 }
 0x523   :  { %v1465_v30 = vpop.trf.xlu1  ;;  %4945 = vmatpush3.msra.mxu1 %v6864_v31 }
 0x524   :  { %4873 = vmatmul.mubr.f32.gmra.mxu1 %v1465_v30  ;;  %4946 = vmatprep.subr.mxu1 %v6871_v39  ;;  %v6885_v30 = vld [vmem:[%s8224_s2 + $0x8] sm:$0xff] }
 0x525   :  { %4947 = vmatpush3.msra.mxu1 %v6871_v39  ;;  %8257 = vst [vmem:[#allocation15_spill] sm:$0xff] %v6885_v30  ;;  %v6892_v39 = vld [vmem:[%s8224_s2] sm:$0xff] }
 0x526   :  { %4948 = vmatprep.subr.mxu1 %v6878_v17 }
 0x527   :  { %v1466_v46 = vpop.trf.xlu1  ;;  %4949 = vmatpush3.msra.mxu1 %v6878_v17 }
 0x528   :  { %4875 = vmatprep.mubr.f32.mxu1 %v1466_v46  ;;  %4950 = vmatprep.subr.mxu1 %v6885_v30  ;;  %v8258_v46 = vmov 0.0  }
 0x529   :  { %4951 = vmatpush3.msra.mxu1 %v6885_v30 }
 0x52a   :  { %4952 = vmatprep.subr.mxu1 %v6892_v39 }
 0x52b   :  { %v1467_v31 = vpop.trf.xlu1  ;;  %4953 = vmatpush3.msra.mxu1 %v6892_v39 }
 0x52c   :  { %4876 = vmatmul.mubr.f32.gmra.mxu1 %v1467_v31  ;;  %5034 = vmatprep.subr.mxu1 %v8258_v46 }
 0x52f   :  { %v1468_v17 = vpop.trf.xlu1 }
 0x530   :  { %4878 = vmatprep.mubr.f32.mxu1 %v1468_v17 }
 0x533   :  { %v1469_v35 = vpop.trf.xlu1 }
 0x534   :  { %4879 = vmatmul.mubr.f32.gmra.mxu1 %v1469_v35 }
 0x537   :  { %v1470_v33 = vpop.trf.xlu1 }
 0x538   :  { %4881 = vmatprep.mubr.f32.mxu1 %v1470_v33 }
 0x53b   :  { %v1471_v30 = vpop.trf.xlu1 }
 0x53c   :  { %4882 = vmatmul.mubr.f32.gmra.mxu1 %v1471_v30 }
 0x53f   :  { %v1472_v5 = vpop.trf.xlu1 }
 0x540   :  { %4884 = vmatprep.mubr.f32.mxu1 %v1472_v5 }
 0x543   :  { %v1473_v2 = vpop.trf.xlu1 }
 0x544   :  { %4885 = vmatmul.mubr.f32.gmra.mxu1 %v1473_v2 }
 0x545   :  { %4954 = vmatprep.mubr.f32.mxu1 %v6612_v37 }
 0x548   :  { %4955 = vmatmul.mubr.f32.vlgmr.msra.gmra.mxu1 %v6606_v11 }
 0x549   :  { %4957 = vmatprep.mubr.f32.mxu1 %v6625_v44 }
 0x54c   :  { %4958 = vmatmul.mubr.f32.gmra.mxu1 %v6619_v42  ;;  %v767_v42 = vadd.f32 %v6297_v7, %v6030_v51  ;;  %v771_v7 = vadd.f32 %v6307_v13, %v6038_v55  ;;  %v775_v13 = vadd.f32 %v6317_v52, %v6046_v59  ;;  %v779_v52 = vadd.f32 %v6327_v56, %v6054_v63 }
 0x54d   :  { %4960 = vmatprep.mubr.f32.mxu1 %v6638_v18 }
 0x550   :  { %4961 = vmatmul.mubr.f32.gmra.mxu1 %v6632_v14  ;;  %v1193_v14 = vadd.f32 %v6569_v45, %v767_v42  ;;  %v1197_v45 = vadd.f32 %v6579_v48, %v771_v7  ;;  %v1201_v48 = vadd.f32 %v6589_v9, %v775_v13  ;;  %v1205_v9 = vadd.f32 %v6599_v15, %v779_v52  ;;  %v8260_v13 = vld [vmem:[#allocation8_spill] sm:$0xff]  ;;  %v8265_v52 = vld [vmem:[#allocation13_spill] sm:$0xff] }
 0x551   :  { %4963 = vmatprep.mubr.f32.mxu1 %v6651_v40 }
 0x554   :  { %4964 = vmatmul.mubr.f32.gmra.mxu1 %v6645_v25 }
 0x555   :  { %4966 = vmatprep.mubr.f32.mxu1 %v6664_v20 }
 0x558   :  { %4967 = vmatmul.mubr.f32.gmra.mxu1 %v6658_v16  ;;  %v769_v16 = vadd.f32 %v6302_v10, %v6034_v53  ;;  %v773_v10 = vadd.f32 %v6312_v50, %v6042_v57  ;;  %v777_v50 = vadd.f32 %v6322_v54, %v6050_v61  ;;  %v781_v54 = vadd.f32 %v6332_v58, %v6058_v1 }
 0x559   :  { %4969 = vmatprep.mubr.f32.mxu1 %v6677_v23 }
 0x55c   :  { %4970 = vmatmul.mubr.f32.gmra.mxu1 %v6671_v21 }
 0x55d   :  { %4972 = vmatprep.mubr.f32.mxu1 %v6690_v26 }
 0x560   :  { %4973 = vmatmul.mubr.f32.gmra.mxu1 %v6684_v24 }
 0x561   :  { %4975 = vmatprep.mubr.f32.mxu1 %v6705_v29 }
 0x564   :  { %4976 = vmatmul.mubr.f32.gmra.mxu1 %v6697_v27 }
 0x565   :  { %5066 = vmatprep.mubr.msk.f32.mxu1 %vm5631_vm0, %v8258_v46 }
 0x585   :  { %v1701_v17 = vpop.f32.mrf.mxu0 }
 0x586   :  { %v6916_v11 = vadd.f32 %v1701_v17, %v6564_v38  ;;  %v1195_v38 = vadd.f32 %v6574_v0, %v769_v16  ;;  %v1199_v0 = vadd.f32 %v6584_v6, %v773_v10  ;;  %v1203_v6 = vadd.f32 %v6594_v12, %v777_v50 }
 0x587   :  { %v4921_v37 = vpop.f32.mrf.mxu0  ;;  %v1207_v12 = vadd.f32 %v6604_v19, %v781_v54 }
 0x5cc   :  { %v4865_v44 = vpop.f32.mrf.mxu1 }
 0x5cd   :  { %v6922_v18 = vadd.f32 %v4865_v44, %v6567_v43 }
 0x5ce   :  { %v1540_v25 = vpop.f32.mrf.mxu1 }
 0x5cf   :  { %v6924_v40 = vadd.f32 %v1540_v25, %v1193_v14 }
 0x5d4   :  { %v4868_v20 = vpop.f32.mrf.mxu1 }
 0x5d5   :  { %v6930_v21 = vadd.f32 %v4868_v20, %v6572_v62 }
 0x5d6   :  { %v1550_v23 = vpop.f32.mrf.mxu1 }
 0x5d7   :  { %v6932_v51 = vadd.f32 %v1550_v23, %v1195_v38 }
 0x5dc   :  { %v4871_v43 = vpop.f32.mrf.mxu1 }
 0x5dd   :  { %v6938_v24 = vadd.f32 %v4871_v43, %v6577_v47  ;;  %v93_v43 = vld [vmem:[%s8222_s0 + $0x20] sm:$0xff] }
 0x5de   :  { %v1560_v26 = vpop.f32.mrf.mxu1 }
 0x5df   :  { %v6940_v53 = vadd.f32 %v1560_v26, %v1197_v45 }
 0x5e4   :  { %v4874_v62 = vpop.f32.mrf.mxu1 }
 0x5e5   :  { %v6946_v27 = vadd.f32 %v4874_v62, %v6582_v49 }
 0x5e6   :  { %v1570_v29 = vpop.f32.mrf.mxu1 }
 0x5e7   :  { %v6948_v55 = vadd.f32 %v1570_v29, %v1199_v0  ;;  %v8259_v29 = vld [vmem:[#allocation7_spill] sm:$0xff] }
 0x5ec   :  { %v4877_v47 = vpop.f32.mrf.mxu1 }
 0x5ed   :  { %v6954_v2 = vadd.f32 %v4877_v47, %v6587_v28 }
 0x5ee   :  { %v1580_v5 = vpop.f32.mrf.mxu1 }
 0x5ef   :  { %v6956_v57 = vadd.f32 %v1580_v5, %v1201_v48  ;;  %v8261_v48 = vld [vmem:[#allocation9_spill] sm:$0xff]  ;;  %v8262_v5 = vld [vmem:[#allocation10_spill] sm:$0xff] }
 0x5f4   :  { %v4880_v49 = vpop.f32.mrf.mxu1 }
 0x5f5   :  { %v6962_v33 = vadd.f32 %v4880_v49, %v6592_v34  ;;  %v8263_v49 = vld [vmem:[#allocation11_spill] sm:$0xff] }
 0x5f6   :  { %v1590_v35 = vpop.f32.mrf.mxu1 }
 0x5f7   :  { %v6964_v59 = vadd.f32 %v1590_v35, %v1203_v6  ;;  %v8264_v6 = vld [vmem:[#allocation12_spill] sm:$0xff] }
 0x5fc   :  { %v4883_v28 = vpop.f32.mrf.mxu1 }
 0x5fd   :  { %v6970_v31 = vadd.f32 %v4883_v28, %v6597_v4  ;;  %v8266_v28 = vld [vmem:[#allocation14_spill] sm:$0xff] }
 0x5fe   :  { %v1600_v30 = vpop.f32.mrf.mxu1 }
 0x5ff   :  { %v6972_v61 = vadd.f32 %v1600_v30, %v1205_v9  ;;  %v8267_v30 = vld [vmem:[#allocation15_spill] sm:$0xff] }
 0x604   :  { %v4886_v34 = vpop.f32.mrf.mxu1 }
 0x605   :  { %v6978_v17 = vadd.f32 %v4886_v34, %v6602_v8 }
 0x606   :  { %v1610_v37 = vpop.f32.mrf.mxu1 }
 0x607   :  { %v6980_v63 = vadd.f32 %v1610_v37, %v1207_v12 }
 0x608   :  { %v6982_v56 = vpop.f32.mrf.mxu1 }
 0x609   :  { %3679 = vst [vmem:[%s8225_s3 + $0x208] sm:$0xff] %v6982_v56 }
 0x60a   :  { %v6988_v4 = vpop.f32.mrf.mxu1 }
 0x60b   :  { %3678 = vst [vmem:[%s8225_s3 + $0x200] sm:$0xff] %v6988_v4  ;;  %1868 = vxpose.xlu0.b32.start [1/16] %v6988_v4, 128 }
 0x60c   :  { %v6995_v1 = vpop.f32.mrf.mxu1 }
 0x60d   :  { %3681 = vst [vmem:[%s8225_s3 + $0x218] sm:$0xff] %v6995_v1 }
 0x60e   :  { %v7001_v58 = vpop.f32.mrf.mxu1 }
 0x60f   :  { %3680 = vst [vmem:[%s8225_s3 + $0x210] sm:$0xff] %v7001_v58  ;;  %1869 = vxpose.xlu0.b32.cont [2/16] %v6982_v56, 128 }
 0x610   :  { %v7008_v15 = vpop.f32.mrf.mxu1 }
 0x611   :  { %3683 = vst [vmem:[%s8225_s3 + $0x228] sm:$0xff] %v7008_v15 }
 0x612   :  { %v7014_v8 = vpop.f32.mrf.mxu1 }
 0x613   :  { %3682 = vst [vmem:[%s8225_s3 + $0x220] sm:$0xff] %v7014_v8  ;;  %1870 = vxpose.xlu0.b32.cont [3/16] %v7001_v58, 128 }
 0x614   :  { %v7021_v19 = vpop.f32.mrf.mxu1 }
 0x615   :  { %3685 = vst [vmem:[%s8225_s3 + $0x238] sm:$0xff] %v7021_v19 }
 0x616   :  { %v7027_v42 = vpop.f32.mrf.mxu1 }
 0x617   :  { %3684 = vst [vmem:[%s8225_s3 + $0x230] sm:$0xff] %v7027_v42  ;;  %1871 = vxpose.xlu0.b32.cont [4/16] %v6995_v1, 128 }
 0x618   :  { %v7034_v44 = vpop.f32.mrf.mxu1 }
 0x619   :  { %3687 = vst [vmem:[%s8225_s3 + $0x248] sm:$0xff] %v7034_v44 }
 0x61a   :  { %v7040_v14 = vpop.f32.mrf.mxu1 }
 0x61b   :  { %3686 = vst [vmem:[%s8225_s3 + $0x240] sm:$0xff] %v7040_v14  ;;  %1872 = vxpose.xlu0.b32.cont [5/16] %v7014_v8, 128 }
 0x61c   :  { %v7047_v25 = vpop.f32.mrf.mxu1 }
 0x61d   :  { %3689 = vst [vmem:[%s8225_s3 + $0x258] sm:$0xff] %v7047_v25 }
 0x61e   :  { %v7053_v16 = vpop.f32.mrf.mxu1 }
 0x61f   :  { %3688 = vst [vmem:[%s8225_s3 + $0x250] sm:$0xff] %v7053_v16  ;;  %1873 = vxpose.xlu0.b32.cont [6/16] %v7008_v15, 128 }
 0x620   :  { %v7060_v20 = vpop.f32.mrf.mxu1 }
 0x621   :  { %3691 = vst [vmem:[%s8225_s3 + $0x268] sm:$0xff] %v7060_v20 }
 0x622   :  { %v7066_v38 = vpop.f32.mrf.mxu1 }
 0x623   :  { %3690 = vst [vmem:[%s8225_s3 + $0x260] sm:$0xff] %v7066_v38  ;;  %1874 = vxpose.xlu0.b32.cont [7/16] %v7027_v42, 128 }
 0x624   :  { %v7073_v23 = vpop.f32.mrf.mxu1 }
 0x625   :  { %3693 = vst [vmem:[%s8225_s3 + $0x278] sm:$0xff] %v7073_v23  ;;  %4978 = vmatprep.subr.mxu0 %v7073_v23  ;;  %5035 = vmatpush3.msra.mxu1 %v7073_v23 }
 0x626   :  { %v7081_v7 = vpop.f32.mrf.mxu1  ;;  %4979 = vmatpush3.msra.mxu0 %v7073_v23  ;;  %5036 = vmatprep.subr.mxu1 %v8258_v46 }
 0x627   :  { %3692 = vst [vmem:[%s8225_s3 + $0x270] sm:$0xff] %v7081_v7  ;;  %1875 = vxpose.xlu0.b32.cont [8/16] %v7021_v19, 128  ;;  %4980 = vmatprep.subr.mxu0 %v7081_v7 }
 0x628   :  { %5037 = vmatpush3.msra.mxu1 %v7081_v7  ;;  %4981 = vmatpush3.msra.mxu0 %v7081_v7 }
 0x629   :  { %5038 = vmatprep.subr.mxu1 %v8258_v46  ;;  %4982 = vmatprep.subr.mxu0 %v7060_v20 }
 0x62a   :  { %5039 = vmatpush3.msra.mxu1 %v7060_v20  ;;  %4983 = vmatpush3.msra.mxu0 %v7060_v20 }
 0x62b   :  { %5040 = vmatprep.subr.mxu1 %v8258_v46  ;;  %1876 = vxpose.xlu0.b32.cont [9/16] %v7040_v14, 128 }
 0x62c   :  { %4984 = vmatprep.subr.mxu0 %v7066_v38  ;;  %5041 = vmatpush3.msra.mxu1 %v7066_v38 }
 0x62d   :  { %4985 = vmatpush3.msra.mxu0 %v7066_v38  ;;  %5042 = vmatprep.subr.mxu1 %v8258_v46 }
 0x62e   :  { %4986 = vmatprep.subr.mxu0 %v7047_v25  ;;  %5043 = vmatpush3.msra.mxu1 %v7047_v25 }
 0x62f   :  { %4987 = vmatpush3.msra.mxu0 %v7047_v25  ;;  %5044 = vmatprep.subr.mxu1 %v8258_v46 }
 0x630   :  { %1877 = vxpose.xlu0.b32.cont [10/16] %v7034_v44, 128  ;;  %4988 = vmatprep.subr.mxu0 %v7053_v16 }
 0x631   :  { %5045 = vmatpush3.msra.mxu1 %v7053_v16  ;;  %4989 = vmatpush3.msra.mxu0 %v7053_v16 }
 0x632   :  { %5046 = vmatprep.subr.mxu1 %v8258_v46  ;;  %4990 = vmatprep.subr.mxu0 %v7034_v44 }
 0x633   :  { %5047 = vmatpush3.msra.mxu1 %v7034_v44  ;;  %4991 = vmatpush3.msra.mxu0 %v7034_v44 }
 0x634   :  { %5048 = vmatprep.subr.mxu1 %v8258_v46  ;;  %1878 = vxpose.xlu0.b32.cont [11/16] %v7053_v16, 128 }
 0x635   :  { %4992 = vmatprep.subr.mxu0 %v7040_v14  ;;  %5049 = vmatpush3.msra.mxu1 %v7040_v14 }
 0x636   :  { %4993 = vmatpush3.msra.mxu0 %v7040_v14  ;;  %5050 = vmatprep.subr.mxu1 %v8258_v46 }
 0x637   :  { %4994 = vmatprep.subr.mxu0 %v7021_v19  ;;  %5051 = vmatpush3.msra.mxu1 %v7021_v19 }
 0x638   :  { %4995 = vmatpush3.msra.mxu0 %v7021_v19  ;;  %5052 = vmatprep.subr.mxu1 %v8258_v46 }
 0x639   :  { %1879 = vxpose.xlu0.b32.cont [12/16] %v7047_v25, 128  ;;  %4996 = vmatprep.subr.mxu0 %v7027_v42 }
 0x63a   :  { %5053 = vmatpush3.msra.mxu1 %v7027_v42  ;;  %4997 = vmatpush3.msra.mxu0 %v7027_v42 }
 0x63b   :  { %5054 = vmatprep.subr.mxu1 %v8258_v46  ;;  %4998 = vmatprep.subr.mxu0 %v7008_v15 }
 0x63c   :  { %5055 = vmatpush3.msra.mxu1 %v7008_v15  ;;  %4999 = vmatpush3.msra.mxu0 %v7008_v15 }
 0x63d   :  { %5056 = vmatprep.subr.mxu1 %v8258_v46  ;;  %1880 = vxpose.xlu0.b32.cont [13/16] %v7066_v38, 128 }
 0x63e   :  { %5000 = vmatprep.subr.mxu0 %v7014_v8  ;;  %5057 = vmatpush3.msra.mxu1 %v7014_v8 }
 0x63f   :  { %5001 = vmatpush3.msra.mxu0 %v7014_v8  ;;  %5058 = vmatprep.subr.mxu1 %v8258_v46 }
 0x640   :  { %5002 = vmatprep.subr.mxu0 %v6995_v1  ;;  %5059 = vmatpush3.msra.mxu1 %v6995_v1 }
 0x641   :  { %5003 = vmatpush3.msra.mxu0 %v6995_v1  ;;  %5060 = vmatprep.subr.mxu1 %v8258_v46 }
 0x642   :  { %1881 = vxpose.xlu0.b32.cont [14/16] %v7060_v20, 128  ;;  %5004 = vmatprep.subr.mxu0 %v7001_v58 }
 0x643   :  { %5061 = vmatpush3.msra.mxu1 %v7001_v58  ;;  %5005 = vmatpush3.msra.mxu0 %v7001_v58 }
 0x644   :  { %5062 = vmatprep.subr.mxu1 %v8258_v46  ;;  %5006 = vmatprep.subr.mxu0 %v6982_v56 }
 0x645   :  { %5063 = vmatpush3.msra.mxu1 %v6982_v56  ;;  %5007 = vmatpush3.msra.mxu0 %v6982_v56 }
 0x646   :  { %5064 = vmatprep.subr.mxu1 %v8258_v46  ;;  %1882 = vxpose.xlu0.b32.cont [15/16] %v7081_v7, 128 }
 0x647   :  { %5008 = vmatprep.subr.mxu0 %v6988_v4  ;;  %5065 = vmatpush3.msra.mxu1 %v6988_v4 }
 0x648   :  { %5009 = vmatpush3.msra.mxu0 %v6988_v4  ;;  %5067 = vmatmul.mubr.f32.vlgmr.msra.gmra.mxu1 %v93_v43 }
 0x649   :  { %5069 = vmatprep.subr.mxu0 %v6786_v32 }
 0x64a   :  { %1883 = vxpose.xlu0.b32.end [16/16] %v7073_v23, 128 }
 0x68a   :  { %v1884_v45 = vpop.trf.xlu0 }
 0x68b   :  { %5010 = vmatprep.mubr.f32.mxu0 %v1884_v45 }
 0x68e   :  { %v1885_v26 = vpop.trf.xlu0 }
 0x68f   :  { %5011 = vmatmul.mubr.f32.vlgmr.msra.gmra.mxu0 %v1885_v26 }
 0x690   :  { %5070 = vmatpush3.msra.mxu0 %v6786_v32 }
 0x691   :  { %5071 = vmatprep.subr.mxu0 %v6794_v36 }
 0x692   :  { %v1886_v10 = vpop.trf.xlu0  ;;  %5072 = vmatpush3.msra.mxu0 %v6794_v36 }
 0x693   :  { %5013 = vmatprep.mubr.f32.mxu0 %v1886_v10  ;;  %5073 = vmatprep.subr.mxu0 %v6801_v41 }
 0x694   :  { %5074 = vmatpush3.msra.mxu0 %v6801_v41 }
 0x695   :  { %5075 = vmatprep.subr.mxu0 %v6808_v60 }
 0x696   :  { %v1887_v62 = vpop.trf.xlu0  ;;  %5076 = vmatpush3.msra.mxu0 %v6808_v60 }
 0x697   :  { %5014 = vmatmul.mubr.f32.gmra.mxu0 %v1887_v62  ;;  %5077 = vmatprep.subr.mxu0 %v6815_v3 }
 0x698   :  { %5078 = vmatpush3.msra.mxu0 %v6815_v3 }
 0x699   :  { %5079 = vmatprep.subr.mxu0 %v6822_v22 }
 0x69a   :  { %v1888_v0 = vpop.trf.xlu0  ;;  %5080 = vmatpush3.msra.mxu0 %v6822_v22 }
 0x69b   :  { %5016 = vmatprep.mubr.f32.mxu0 %v1888_v0  ;;  %5081 = vmatprep.subr.mxu0 %v8259_v29 }
 0x69c   :  { %5082 = vmatpush3.msra.mxu0 %v8259_v29 }
 0x69d   :  { %5083 = vmatprep.subr.mxu0 %v8260_v13 }
 0x69e   :  { %v1889_v47 = vpop.trf.xlu0  ;;  %5084 = vmatpush3.msra.mxu0 %v8260_v13 }
 0x69f   :  { %5017 = vmatmul.mubr.f32.gmra.mxu0 %v1889_v47  ;;  %5085 = vmatprep.subr.mxu0 %v8261_v48 }
 0x6a0   :  { %5086 = vmatpush3.msra.mxu0 %v8261_v48 }
 0x6a1   :  { %5087 = vmatprep.subr.mxu0 %v8262_v5 }
 0x6a2   :  { %v1890_v50 = vpop.trf.xlu0  ;;  %5088 = vmatpush3.msra.mxu0 %v8262_v5 }
 0x6a3   :  { %5019 = vmatprep.mubr.f32.mxu0 %v1890_v50  ;;  %5089 = vmatprep.subr.mxu0 %v8263_v49 }
 0x6a4   :  { %5090 = vmatpush3.msra.mxu0 %v8263_v49 }
 0x6a5   :  { %5091 = vmatprep.subr.mxu0 %v8264_v6 }
 0x6a6   :  { %v1891_v35 = vpop.trf.xlu0  ;;  %5092 = vmatpush3.msra.mxu0 %v8264_v6 }
 0x6a7   :  { %5020 = vmatmul.mubr.f32.gmra.mxu0 %v1891_v35  ;;  %5093 = vmatprep.subr.mxu0 %v8265_v52 }
 0x6a8   :  { %5094 = vmatpush3.msra.mxu0 %v8265_v52 }
 0x6a9   :  { %5095 = vmatprep.subr.mxu0 %v8266_v28 }
 0x6aa   :  { %v1892_v9 = vpop.trf.xlu0  ;;  %5096 = vmatpush3.msra.mxu0 %v8266_v28 }
 0x6ab   :  { %5022 = vmatprep.mubr.f32.mxu0 %v1892_v9  ;;  %5097 = vmatprep.subr.mxu0 %v8267_v30 }
 0x6ac   :  { %5098 = vmatpush3.msra.mxu0 %v8267_v30 }
 0x6ad   :  { %5099 = vmatprep.subr.mxu0 %v6892_v39 }
 0x6ae   :  { %v1893_v54 = vpop.trf.xlu0  ;;  %5100 = vmatpush3.msra.mxu0 %v6892_v39 }
 0x6af   :  { %5023 = vmatmul.mubr.f32.gmra.mxu0 %v1893_v54  ;;  %5181 = vmatprep.subr.mxu0 %v8258_v46 }
 0x6b2   :  { %v1894_v34 = vpop.trf.xlu0 }
 0x6b3   :  { %5025 = vmatprep.mubr.f32.mxu0 %v1894_v34 }
 0x6b6   :  { %v1895_v12 = vpop.trf.xlu0 }
 0x6b7   :  { %5026 = vmatmul.mubr.f32.gmra.mxu0 %v1895_v12 }
 0x6ba   :  { %v1896_v37 = vpop.trf.xlu0 }
 0x6bb   :  { %5028 = vmatprep.mubr.f32.mxu0 %v1896_v37 }
 0x6be   :  { %v1897_v43 = vpop.trf.xlu0 }
 0x6bf   :  { %5029 = vmatmul.mubr.f32.gmra.mxu0 %v1897_v43 }
 0x6c2   :  { %v1898_v45 = vpop.trf.xlu0 }
 0x6c3   :  { %5031 = vmatprep.mubr.f32.mxu0 %v1898_v45 }
 0x6c6   :  { %v1899_v26 = vpop.trf.xlu0 }
 0x6c7   :  { %5032 = vmatmul.mubr.f32.gmra.mxu0 %v1899_v26 }
 0x6c8   :  { %5101 = vmatprep.mubr.f32.mxu0 %v6988_v4 }
 0x6cb   :  { %5102 = vmatmul.mubr.f32.vlgmr.msra.gmra.mxu0 %v6982_v56 }
 0x6cc   :  { %5104 = vmatprep.mubr.f32.mxu0 %v7001_v58 }
 0x6cf   :  { %5105 = vmatmul.mubr.f32.gmra.mxu0 %v6995_v1 }
 0x6d0   :  { %5107 = vmatprep.mubr.f32.mxu0 %v7014_v8 }
 0x6d3   :  { %5108 = vmatmul.mubr.f32.gmra.mxu0 %v7008_v15 }
 0x6d4   :  { %5110 = vmatprep.mubr.f32.mxu0 %v7027_v42 }
 0x6d7   :  { %5111 = vmatmul.mubr.f32.gmra.mxu0 %v7021_v19 }
 0x6d8   :  { %5113 = vmatprep.mubr.f32.mxu0 %v7040_v14 }
 0x6db   :  { %5114 = vmatmul.mubr.f32.gmra.mxu0 %v7034_v44 }
 0x6dc   :  { %5116 = vmatprep.mubr.f32.mxu0 %v7053_v16 }
 0x6df   :  { %5117 = vmatmul.mubr.f32.gmra.mxu0 %v7047_v25 }
 0x6e0   :  { %5119 = vmatprep.mubr.f32.mxu0 %v7066_v38 }
 0x6e3   :  { %5120 = vmatmul.mubr.f32.gmra.mxu0 %v7060_v20 }
 0x6e4   :  { %5122 = vmatprep.mubr.f32.mxu0 %v7081_v7 }
 0x6e7   :  { %5123 = vmatmul.mubr.f32.gmra.mxu0 %v7073_v23 }
 0x6e8   :  { %5213 = vmatprep.mubr.msk.f32.mxu0 %vm5631_vm0, %v8258_v46 }
 0x708   :  { %v2127_v56 = vpop.f32.mrf.mxu1 }
 0x709   :  { %v7212_v4 = vadd.f32 %v2127_v56, %v6916_v11 }
 0x70a   :  { %v5068_v1 = vpop.f32.mrf.mxu1 }
 0x74f   :  { %v5012_v58 = vpop.f32.mrf.mxu0 }
 0x750   :  { %v7215_v15 = vadd.f32 %v5012_v58, %v6922_v18 }
 0x751   :  { %v1966_v8 = vpop.f32.mrf.mxu0 }
 0x752   :  { %v7218_v19 = vadd.f32 %v1966_v8, %v6924_v40 }
 0x757   :  { %v5015_v42 = vpop.f32.mrf.mxu0 }
 0x758   :  { %v7221_v44 = vadd.f32 %v5015_v42, %v6930_v21  ;;  %v7434_v42 = vld [vmem:[%s8222_s0 + $0x28] sm:$0xff] }
 0x759   :  { %v1976_v14 = vpop.f32.mrf.mxu0 }
 0x75a   :  { %v7224_v25 = vadd.f32 %v1976_v14, %v6932_v51 }
 0x75f   :  { %v5018_v16 = vpop.f32.mrf.mxu0 }
 0x760   :  { %v7227_v11 = vadd.f32 %v5018_v16, %v6938_v24 }
 0x761   :  { %v1986_v20 = vpop.f32.mrf.mxu0 }
 0x762   :  { %v7230_v18 = vadd.f32 %v1986_v20, %v6940_v53 }
 0x767   :  { %v5021_v38 = vpop.f32.mrf.mxu0 }
 0x768   :  { %v7233_v40 = vadd.f32 %v5021_v38, %v6946_v27 }
 0x769   :  { %v1996_v23 = vpop.f32.mrf.mxu0 }
 0x76a   :  { %v7236_v21 = vadd.f32 %v1996_v23, %v6948_v55 }
 0x76f   :  { %v5024_v7 = vpop.f32.mrf.mxu0 }
 0x770   :  { %v7239_v51 = vadd.f32 %v5024_v7, %v6954_v2 }
 0x771   :  { %v2006_v10 = vpop.f32.mrf.mxu0 }
 0x772   :  { %v7242_v24 = vadd.f32 %v2006_v10, %v6956_v57 }
 0x777   :  { %v5027_v62 = vpop.f32.mrf.mxu0 }
 0x778   :  { %v7245_v53 = vadd.f32 %v5027_v62, %v6962_v33 }
 0x779   :  { %v2016_v0 = vpop.f32.mrf.mxu0 }
 0x77a   :  { %v7248_v27 = vadd.f32 %v2016_v0, %v6964_v59 }
 0x77f   :  { %v5030_v47 = vpop.f32.mrf.mxu0 }
 0x780   :  { %v7251_v55 = vadd.f32 %v5030_v47, %v6970_v31 }
 0x781   :  { %v2026_v50 = vpop.f32.mrf.mxu0 }
 0x782   :  { %v7254_v2 = vadd.f32 %v2026_v50, %v6972_v61 }
 0x787   :  { %v5033_v35 = vpop.f32.mrf.mxu0 }
 0x788   :  { %v7257_v57 = vadd.f32 %v5033_v35, %v6978_v17 }
 0x789   :  { %v2036_v9 = vpop.f32.mrf.mxu0 }
 0x78a   :  { %v7260_v33 = vadd.f32 %v2036_v9, %v6980_v63 }
 0x78b   :  { %v7262_v54 = vpop.f32.mrf.mxu0 }
 0x78c   :  { %3695 = vst [vmem:[%s8225_s3 + $0x288] sm:$0xff] %v7262_v54 }
 0x78d   :  { %v7268_v59 = vpop.f32.mrf.mxu0 }
 0x78e   :  { %3694 = vst [vmem:[%s8225_s3 + $0x280] sm:$0xff] %v7268_v59  ;;  %2294 = vxpose.xlu1.b32.start [1/16] %v7268_v59, 128 }
 0x78f   :  { %v7275_v31 = vpop.f32.mrf.mxu0 }
 0x790   :  { %3697 = vst [vmem:[%s8225_s3 + $0x298] sm:$0xff] %v7275_v31 }
 0x791   :  { %v7281_v61 = vpop.f32.mrf.mxu0 }
 0x792   :  { %3696 = vst [vmem:[%s8225_s3 + $0x290] sm:$0xff] %v7281_v61  ;;  %2295 = vxpose.xlu1.b32.cont [2/16] %v7262_v54, 128 }
 0x793   :  { %v7288_v17 = vpop.f32.mrf.mxu0 }
 0x794   :  { %3699 = vst [vmem:[%s8225_s3 + $0x2a8] sm:$0xff] %v7288_v17 }
 0x795   :  { %v7294_v63 = vpop.f32.mrf.mxu0 }
 0x796   :  { %3698 = vst [vmem:[%s8225_s3 + $0x2a0] sm:$0xff] %v7294_v63  ;;  %2296 = vxpose.xlu1.b32.cont [3/16] %v7281_v61, 128 }
 0x797   :  { %v7301_v34 = vpop.f32.mrf.mxu0 }
 0x798   :  { %3701 = vst [vmem:[%s8225_s3 + $0x2b8] sm:$0xff] %v7301_v34 }
 0x799   :  { %v7307_v12 = vpop.f32.mrf.mxu0 }
 0x79a   :  { %3700 = vst [vmem:[%s8225_s3 + $0x2b0] sm:$0xff] %v7307_v12  ;;  %2297 = vxpose.xlu1.b32.cont [4/16] %v7275_v31, 128 }
 0x79b   :  { %v7314_v37 = vpop.f32.mrf.mxu0 }
 0x79c   :  { %3703 = vst [vmem:[%s8225_s3 + $0x2c8] sm:$0xff] %v7314_v37 }
 0x79d   :  { %v7320_v43 = vpop.f32.mrf.mxu0 }
 0x79e   :  { %3702 = vst [vmem:[%s8225_s3 + $0x2c0] sm:$0xff] %v7320_v43  ;;  %2298 = vxpose.xlu1.b32.cont [5/16] %v7294_v63, 128 }
 0x79f   :  { %v7327_v45 = vpop.f32.mrf.mxu0 }
 0x7a0   :  { %3705 = vst [vmem:[%s8225_s3 + $0x2d8] sm:$0xff] %v7327_v45 }
 0x7a1   :  { %v7333_v26 = vpop.f32.mrf.mxu0 }
 0x7a2   :  { %3704 = vst [vmem:[%s8225_s3 + $0x2d0] sm:$0xff] %v7333_v26  ;;  %2299 = vxpose.xlu1.b32.cont [6/16] %v7288_v17, 128 }
 0x7a3   :  { %v7340_v56 = vpop.f32.mrf.mxu0 }
 0x7a4   :  { %3707 = vst [vmem:[%s8225_s3 + $0x2e8] sm:$0xff] %v7340_v56 }
 0x7a5   :  { %v7346_v1 = vpop.f32.mrf.mxu0 }
 0x7a6   :  { %3706 = vst [vmem:[%s8225_s3 + $0x2e0] sm:$0xff] %v7346_v1  ;;  %2300 = vxpose.xlu1.b32.cont [7/16] %v7307_v12, 128 }
 0x7a7   :  { %v7353_v58 = vpop.f32.mrf.mxu0 }
 0x7a8   :  { %3709 = vst [vmem:[%s8225_s3 + $0x2f8] sm:$0xff] %v7353_v58  ;;  %5125 = vmatprep.subr.mxu1 %v7353_v58  ;;  %5182 = vmatpush3.msra.mxu0 %v7353_v58 }
 0x7a9   :  { %v7361_v8 = vpop.f32.mrf.mxu0  ;;  %5126 = vmatpush3.msra.mxu1 %v7353_v58  ;;  %5183 = vmatprep.subr.mxu0 %v8258_v46 }
 0x7aa   :  { %3708 = vst [vmem:[%s8225_s3 + $0x2f0] sm:$0xff] %v7361_v8  ;;  %2301 = vxpose.xlu1.b32.cont [8/16] %v7301_v34, 128  ;;  %5127 = vmatprep.subr.mxu1 %v7361_v8 }
 0x7ab   :  { %5184 = vmatpush3.msra.mxu0 %v7361_v8  ;;  %5128 = vmatpush3.msra.mxu1 %v7361_v8 }
 0x7ac   :  { %5185 = vmatprep.subr.mxu0 %v8258_v46  ;;  %5129 = vmatprep.subr.mxu1 %v7340_v56 }
 0x7ad   :  { %5186 = vmatpush3.msra.mxu0 %v7340_v56  ;;  %5130 = vmatpush3.msra.mxu1 %v7340_v56 }
 0x7ae   :  { %5187 = vmatprep.subr.mxu0 %v8258_v46  ;;  %2302 = vxpose.xlu1.b32.cont [9/16] %v7320_v43, 128 }
 0x7af   :  { %5131 = vmatprep.subr.mxu1 %v7346_v1  ;;  %5188 = vmatpush3.msra.mxu0 %v7346_v1 }
 0x7b0   :  { %5132 = vmatpush3.msra.mxu1 %v7346_v1  ;;  %5189 = vmatprep.subr.mxu0 %v8258_v46 }
 0x7b1   :  { %5133 = vmatprep.subr.mxu1 %v7327_v45  ;;  %5190 = vmatpush3.msra.mxu0 %v7327_v45 }
 0x7b2   :  { %5134 = vmatpush3.msra.mxu1 %v7327_v45  ;;  %5191 = vmatprep.subr.mxu0 %v8258_v46 }
 0x7b3   :  { %2303 = vxpose.xlu1.b32.cont [10/16] %v7314_v37, 128  ;;  %5135 = vmatprep.subr.mxu1 %v7333_v26 }
 0x7b4   :  { %5192 = vmatpush3.msra.mxu0 %v7333_v26  ;;  %5136 = vmatpush3.msra.mxu1 %v7333_v26 }
 0x7b5   :  { %5193 = vmatprep.subr.mxu0 %v8258_v46  ;;  %5137 = vmatprep.subr.mxu1 %v7314_v37 }
 0x7b6   :  { %5194 = vmatpush3.msra.mxu0 %v7314_v37  ;;  %5138 = vmatpush3.msra.mxu1 %v7314_v37 }
 0x7b7   :  { %5195 = vmatprep.subr.mxu0 %v8258_v46  ;;  %2304 = vxpose.xlu1.b32.cont [11/16] %v7333_v26, 128 }
 0x7b8   :  { %5139 = vmatprep.subr.mxu1 %v7320_v43  ;;  %5196 = vmatpush3.msra.mxu0 %v7320_v43 }
 0x7b9   :  { %5140 = vmatpush3.msra.mxu1 %v7320_v43  ;;  %5197 = vmatprep.subr.mxu0 %v8258_v46 }
 0x7ba   :  { %5141 = vmatprep.subr.mxu1 %v7301_v34  ;;  %5198 = vmatpush3.msra.mxu0 %v7301_v34 }
 0x7bb   :  { %5142 = vmatpush3.msra.mxu1 %v7301_v34  ;;  %5199 = vmatprep.subr.mxu0 %v8258_v46 }
 0x7bc   :  { %2305 = vxpose.xlu1.b32.cont [12/16] %v7327_v45, 128  ;;  %5143 = vmatprep.subr.mxu1 %v7307_v12 }
 0x7bd   :  { %5200 = vmatpush3.msra.mxu0 %v7307_v12  ;;  %5144 = vmatpush3.msra.mxu1 %v7307_v12 }
 0x7be   :  { %5201 = vmatprep.subr.mxu0 %v8258_v46  ;;  %5145 = vmatprep.subr.mxu1 %v7288_v17 }
 0x7bf   :  { %5202 = vmatpush3.msra.mxu0 %v7288_v17  ;;  %5146 = vmatpush3.msra.mxu1 %v7288_v17 }
 0x7c0   :  { %5203 = vmatprep.subr.mxu0 %v8258_v46  ;;  %2306 = vxpose.xlu1.b32.cont [13/16] %v7346_v1, 128 }
 0x7c1   :  { %5147 = vmatprep.subr.mxu1 %v7294_v63  ;;  %5204 = vmatpush3.msra.mxu0 %v7294_v63 }
 0x7c2   :  { %5148 = vmatpush3.msra.mxu1 %v7294_v63  ;;  %5205 = vmatprep.subr.mxu0 %v8258_v46 }
 0x7c3   :  { %5149 = vmatprep.subr.mxu1 %v7275_v31  ;;  %5206 = vmatpush3.msra.mxu0 %v7275_v31 }
 0x7c4   :  { %5150 = vmatpush3.msra.mxu1 %v7275_v31  ;;  %5207 = vmatprep.subr.mxu0 %v8258_v46 }
 0x7c5   :  { %2307 = vxpose.xlu1.b32.cont [14/16] %v7340_v56, 128  ;;  %5151 = vmatprep.subr.mxu1 %v7281_v61 }
 0x7c6   :  { %5208 = vmatpush3.msra.mxu0 %v7281_v61  ;;  %5152 = vmatpush3.msra.mxu1 %v7281_v61 }
 0x7c7   :  { %5209 = vmatprep.subr.mxu0 %v8258_v46  ;;  %5153 = vmatprep.subr.mxu1 %v7262_v54 }
 0x7c8   :  { %5210 = vmatpush3.msra.mxu0 %v7262_v54  ;;  %5154 = vmatpush3.msra.mxu1 %v7262_v54 }
 0x7c9   :  { %5211 = vmatprep.subr.mxu0 %v8258_v46  ;;  %2308 = vxpose.xlu1.b32.cont [15/16] %v7361_v8, 128 }
 0x7ca   :  { %5155 = vmatprep.subr.mxu1 %v7268_v59  ;;  %5212 = vmatpush3.msra.mxu0 %v7268_v59 }
 0x7cb   :  { %5156 = vmatpush3.msra.mxu1 %v7268_v59  ;;  %5214 = vmatmul.mubr.f32.vlgmr.msra.gmra.mxu0 %v7434_v42 }
 0x7cc   :  { %5216 = vmatprep.subr.mxu1 %v6786_v32 }
 0x7cd   :  { %2309 = vxpose.xlu1.b32.end [16/16] %v7353_v58, 128 }
 0x80d   :  { %v2310_v14 = vpop.trf.xlu1 }
 0x80e   :  { %5157 = vmatprep.mubr.f32.mxu1 %v2310_v14 }
 0x811   :  { %v2311_v16 = vpop.trf.xlu1 }
 0x812   :  { %5158 = vmatmul.mubr.f32.vlgmr.msra.gmra.mxu1 %v2311_v16 }
 0x813   :  { %5217 = vmatpush3.msra.mxu1 %v6786_v32 }
 0x814   :  { %5218 = vmatprep.subr.mxu1 %v6794_v36 }
 0x815   :  { %v2312_v20 = vpop.trf.xlu1  ;;  %5219 = vmatpush3.msra.mxu1 %v6794_v36 }
 0x816   :  { %5160 = vmatprep.mubr.f32.mxu1 %v2312_v20  ;;  %5220 = vmatprep.subr.mxu1 %v6801_v41 }
 0x817   :  { %5221 = vmatpush3.msra.mxu1 %v6801_v41 }
 0x818   :  { %5222 = vmatprep.subr.mxu1 %v6808_v60 }
 0x819   :  { %v2313_v38 = vpop.trf.xlu1  ;;  %5223 = vmatpush3.msra.mxu1 %v6808_v60 }
 0x81a   :  { %5161 = vmatmul.mubr.f32.gmra.mxu1 %v2313_v38  ;;  %5224 = vmatprep.subr.mxu1 %v6815_v3 }
 0x81b   :  { %5225 = vmatpush3.msra.mxu1 %v6815_v3 }
 0x81c   :  { %5226 = vmatprep.subr.mxu1 %v6822_v22 }
 0x81d   :  { %v2314_v32 = vpop.trf.xlu1  ;;  %5227 = vmatpush3.msra.mxu1 %v6822_v22 }
 0x81e   :  { %5163 = vmatprep.mubr.f32.mxu1 %v2314_v32  ;;  %5228 = vmatprep.subr.mxu1 %v8259_v29 }
 0x81f   :  { %5229 = vmatpush3.msra.mxu1 %v8259_v29 }
 0x820   :  { %5230 = vmatprep.subr.mxu1 %v8260_v13 }
 0x821   :  { %v2315_v36 = vpop.trf.xlu1  ;;  %5231 = vmatpush3.msra.mxu1 %v8260_v13 }
 0x822   :  { %5164 = vmatmul.mubr.f32.gmra.mxu1 %v2315_v36  ;;  %5232 = vmatprep.subr.mxu1 %v8261_v48  ;;  %v7717_v36 = vld [vmem:[%s8222_s0 + $0x30] sm:$0xff] }
 0x823   :  { %5233 = vmatpush3.msra.mxu1 %v8261_v48 }
 0x824   :  { %5234 = vmatprep.subr.mxu1 %v8262_v5 }
 0x825   :  { %v2316_v41 = vpop.trf.xlu1  ;;  %5235 = vmatpush3.msra.mxu1 %v8262_v5 }
 0x826   :  { %5166 = vmatprep.mubr.f32.mxu1 %v2316_v41  ;;  %5236 = vmatprep.subr.mxu1 %v8263_v49  ;;  %v7728_v41 = vld [vmem:[%s8224_s2 + $0x78] sm:$0xff] }
 0x827   :  { %5237 = vmatpush3.msra.mxu1 %v8263_v49 }
 0x828   :  { %5238 = vmatprep.subr.mxu1 %v8264_v6 }
 0x829   :  { %v2317_v60 = vpop.trf.xlu1  ;;  %5239 = vmatpush3.msra.mxu1 %v8264_v6 }
 0x82a   :  { %5167 = vmatmul.mubr.f32.gmra.mxu1 %v2317_v60  ;;  %5240 = vmatprep.subr.mxu1 %v8265_v52 }
 0x82b   :  { %5241 = vmatpush3.msra.mxu1 %v8265_v52 }
 0x82c   :  { %5242 = vmatprep.subr.mxu1 %v8266_v28 }
 0x82d   :  { %v2318_v3 = vpop.trf.xlu1  ;;  %5243 = vmatpush3.msra.mxu1 %v8266_v28 }
 0x82e   :  { %5169 = vmatprep.mubr.f32.mxu1 %v2318_v3  ;;  %5244 = vmatprep.subr.mxu1 %v8267_v30 }
 0x82f   :  { %5245 = vmatpush3.msra.mxu1 %v8267_v30 }
 0x830   :  { %5246 = vmatprep.subr.mxu1 %v6892_v39 }
 0x831   :  { %v2319_v22 = vpop.trf.xlu1  ;;  %5247 = vmatpush3.msra.mxu1 %v6892_v39 }
 0x832   :  { %5170 = vmatmul.mubr.f32.gmra.mxu1 %v2319_v22  ;;  %5328 = vmatprep.subr.mxu1 %v8258_v46  ;;  %v7736_v22 = vld [vmem:[%s8224_s2 + $0x70] sm:$0xff] }
 0x835   :  { %v2320_v29 = vpop.trf.xlu1 }
 0x836   :  { %5172 = vmatprep.mubr.f32.mxu1 %v2320_v29 }
 0x839   :  { %v2321_v13 = vpop.trf.xlu1 }
 0x83a   :  { %5173 = vmatmul.mubr.f32.gmra.mxu1 %v2321_v13  ;;  %v7743_v13 = vld [vmem:[%s8224_s2 + $0x68] sm:$0xff] }
 0x83d   :  { %v2322_v48 = vpop.trf.xlu1 }
 0x83e   :  { %5175 = vmatprep.mubr.f32.mxu1 %v2322_v48  ;;  %v7750_v48 = vld [vmem:[%s8224_s2 + $0x60] sm:$0xff] }
 0x841   :  { %v2323_v5 = vpop.trf.xlu1 }
 0x842   :  { %5176 = vmatmul.mubr.f32.gmra.mxu1 %v2323_v5 }
 0x845   :  { %v2324_v49 = vpop.trf.xlu1 }
 0x846   :  { %5178 = vmatprep.mubr.f32.mxu1 %v2324_v49  ;;  %v7757_v49 = vld [vmem:[%s8224_s2 + $0x58] sm:$0xff] }
 0x849   :  { %v2325_v6 = vpop.trf.xlu1 }
 0x84a   :  { %5179 = vmatmul.mubr.f32.gmra.mxu1 %v2325_v6  ;;  %v7764_v6 = vld [vmem:[%s8224_s2 + $0x50] sm:$0xff] }
 0x84b   :  { %5248 = vmatprep.mubr.f32.mxu1 %v7268_v59 }
 0x84e   :  { %5249 = vmatmul.mubr.f32.vlgmr.msra.gmra.mxu1 %v7262_v54 }
 0x84f   :  { %5251 = vmatprep.mubr.f32.mxu1 %v7281_v61 }
 0x852   :  { %5252 = vmatmul.mubr.f32.gmra.mxu1 %v7275_v31 }
 0x853   :  { %5254 = vmatprep.mubr.f32.mxu1 %v7294_v63 }
 0x856   :  { %5255 = vmatmul.mubr.f32.gmra.mxu1 %v7288_v17 }
 0x857   :  { %5257 = vmatprep.mubr.f32.mxu1 %v7307_v12 }
 0x85a   :  { %5258 = vmatmul.mubr.f32.gmra.mxu1 %v7301_v34 }
 0x85b   :  { %5260 = vmatprep.mubr.f32.mxu1 %v7320_v43 }
 0x85e   :  { %5261 = vmatmul.mubr.f32.gmra.mxu1 %v7314_v37 }
 0x85f   :  { %5263 = vmatprep.mubr.f32.mxu1 %v7333_v26 }
 0x862   :  { %5264 = vmatmul.mubr.f32.gmra.mxu1 %v7327_v45 }
 0x863   :  { %5266 = vmatprep.mubr.f32.mxu1 %v7346_v1 }
 0x866   :  { %5267 = vmatmul.mubr.f32.gmra.mxu1 %v7340_v56 }
 0x867   :  { %5269 = vmatprep.mubr.f32.mxu1 %v7361_v8 }
 0x86a   :  { %5270 = vmatmul.mubr.f32.gmra.mxu1 %v7353_v58 }
 0x86b   :  { %5360 = vmatprep.mubr.msk.f32.mxu1 %vm5631_vm0, %v8258_v46 }
 0x88b   :  { %v2553_v39 = vpop.f32.mrf.mxu0 }
 0x88c   :  { %v7495_v52 = vadd.f32 %v2553_v39, %v7212_v4 }
 0x88d   :  { %v5215_v28 = vpop.f32.mrf.mxu0 }
 0x88e   :  { %v7771_v28 = vld [vmem:[%s8224_s2 + $0x48] sm:$0xff] }
 0x8d2   :  { %v5159_v30 = vpop.f32.mrf.mxu1 }
 0x8d3   :  { %v7498_v23 = vadd.f32 %v5159_v30, %v7215_v15  ;;  %v7778_v30 = vld [vmem:[%s8224_s2 + $0x40] sm:$0xff] }
 0x8d4   :  { %v2392_v7 = vpop.f32.mrf.mxu1 }
 0x8d5   :  { %v7501_v10 = vadd.f32 %v2392_v7, %v7218_v19 }
 0x8da   :  { %v5162_v62 = vpop.f32.mrf.mxu1 }
 0x8db   :  { %v7504_v0 = vadd.f32 %v5162_v62, %v7221_v44  ;;  %v7785_v62 = vld [vmem:[%s8224_s2 + $0x38] sm:$0xff] }
 0x8dc   :  { %v2402_v47 = vpop.f32.mrf.mxu1 }
 0x8dd   :  { %v7507_v50 = vadd.f32 %v2402_v47, %v7224_v25  ;;  %v7792_v47 = vld [vmem:[%s8224_s2 + $0x30] sm:$0xff] }
 0x8e2   :  { %v5165_v35 = vpop.f32.mrf.mxu1 }
 0x8e3   :  { %v7510_v4 = vadd.f32 %v5165_v35, %v7227_v11 }
 0x8e4   :  { %v2412_v9 = vpop.f32.mrf.mxu1 }
 0x8e5   :  { %v7513_v15 = vadd.f32 %v2412_v9, %v7230_v18  ;;  %v7799_v9 = vld [vmem:[%s8224_s2 + $0x28] sm:$0xff] }
 0x8ea   :  { %v5168_v54 = vpop.f32.mrf.mxu1 }
 0x8eb   :  { %v7516_v19 = vadd.f32 %v5168_v54, %v7233_v40  ;;  %v7806_v54 = vld [vmem:[%s8224_s2 + $0x20] sm:$0xff] }
 0x8ec   :  { %v2422_v59 = vpop.f32.mrf.mxu1 }
 0x8ed   :  { %v7519_v44 = vadd.f32 %v2422_v59, %v7236_v21 }
 0x8f2   :  { %v5171_v31 = vpop.f32.mrf.mxu1 }
 0x8f3   :  { %v7522_v25 = vadd.f32 %v5171_v31, %v7239_v51  ;;  %v7813_v31 = vld [vmem:[%s8224_s2 + $0x18] sm:$0xff] }
 0x8f4   :  { %v2432_v61 = vpop.f32.mrf.mxu1 }
 0x8f5   :  { %v7525_v11 = vadd.f32 %v2432_v61, %v7242_v24  ;;  %v7820_v61 = vld [vmem:[%s8224_s2 + $0x10] sm:$0xff] }
 0x8fa   :  { %v5174_v17 = vpop.f32.mrf.mxu1 }
 0x8fb   :  { %v7528_v18 = vadd.f32 %v5174_v17, %v7245_v53 }
 0x8fc   :  { %v2442_v63 = vpop.f32.mrf.mxu1 }
 0x8fd   :  { %v7531_v40 = vadd.f32 %v2442_v63, %v7248_v27  ;;  %v7827_v63 = vld [vmem:[%s8224_s2 + $0x8] sm:$0xff] }
 0x902   :  { %v5177_v34 = vpop.f32.mrf.mxu1 }
 0x903   :  { %v7534_v21 = vadd.f32 %v5177_v34, %v7251_v55  ;;  %v7834_v34 = vld [vmem:[%s8224_s2] sm:$0xff] }
 0x904   :  { %v2452_v12 = vpop.f32.mrf.mxu1 }
 0x905   :  { %v7537_v51 = vadd.f32 %v2452_v12, %v7254_v2 }
 0x90a   :  { %v5180_v37 = vpop.f32.mrf.mxu1 }
 0x90b   :  { %v7540_v24 = vadd.f32 %v5180_v37, %v7257_v57 }
 0x90c   :  { %v2462_v43 = vpop.f32.mrf.mxu1 }
 0x90d   :  { %v7543_v53 = vadd.f32 %v2462_v43, %v7260_v33 }
 0x90e   :  { %v7545_v45 = vpop.f32.mrf.mxu1 }
 0x90f   :  { %3711 = vst [vmem:[%s8225_s3 + $0x308] sm:$0xff] %v7545_v45 }
 0x910   :  { %v7551_v27 = vpop.f32.mrf.mxu1 }
 0x911   :  { %3710 = vst [vmem:[%s8225_s3 + $0x300] sm:$0xff] %v7551_v27  ;;  %2720 = vxpose.xlu0.b32.start [1/16] %v7551_v27, 128 }
 0x912   :  { %v7558_v55 = vpop.f32.mrf.mxu1 }
 0x913   :  { %3713 = vst [vmem:[%s8225_s3 + $0x318] sm:$0xff] %v7558_v55 }
 0x914   :  { %v7564_v2 = vpop.f32.mrf.mxu1 }
 0x915   :  { %3712 = vst [vmem:[%s8225_s3 + $0x310] sm:$0xff] %v7564_v2  ;;  %2721 = vxpose.xlu0.b32.cont [2/16] %v7545_v45, 128 }
 0x916   :  { %v7571_v57 = vpop.f32.mrf.mxu1 }
 0x917   :  { %3715 = vst [vmem:[%s8225_s3 + $0x328] sm:$0xff] %v7571_v57 }
 0x918   :  { %v7577_v33 = vpop.f32.mrf.mxu1 }
 0x919   :  { %3714 = vst [vmem:[%s8225_s3 + $0x320] sm:$0xff] %v7577_v33  ;;  %2722 = vxpose.xlu0.b32.cont [3/16] %v7564_v2, 128 }
 0x91a   :  { %v7584_v26 = vpop.f32.mrf.mxu1 }
 0x91b   :  { %3717 = vst [vmem:[%s8225_s3 + $0x338] sm:$0xff] %v7584_v26 }
 0x91c   :  { %v7590_v56 = vpop.f32.mrf.mxu1 }
 0x91d   :  { %3716 = vst [vmem:[%s8225_s3 + $0x330] sm:$0xff] %v7590_v56  ;;  %2723 = vxpose.xlu0.b32.cont [4/16] %v7558_v55, 128 }
 0x91e   :  { %v7597_v1 = vpop.f32.mrf.mxu1 }
 0x91f   :  { %3719 = vst [vmem:[%s8225_s3 + $0x348] sm:$0xff] %v7597_v1 }
 0x920   :  { %v7603_v58 = vpop.f32.mrf.mxu1 }
 0x921   :  { %3718 = vst [vmem:[%s8225_s3 + $0x340] sm:$0xff] %v7603_v58  ;;  %2724 = vxpose.xlu0.b32.cont [5/16] %v7577_v33, 128 }
 0x922   :  { %v7610_v8 = vpop.f32.mrf.mxu1 }
 0x923   :  { %3721 = vst [vmem:[%s8225_s3 + $0x358] sm:$0xff] %v7610_v8 }
 0x924   :  { %v7616_v14 = vpop.f32.mrf.mxu1 }
 0x925   :  { %3720 = vst [vmem:[%s8225_s3 + $0x350] sm:$0xff] %v7616_v14  ;;  %2725 = vxpose.xlu0.b32.cont [6/16] %v7571_v57, 128 }
 0x926   :  { %v7623_v16 = vpop.f32.mrf.mxu1 }
 0x927   :  { %3723 = vst [vmem:[%s8225_s3 + $0x368] sm:$0xff] %v7623_v16 }
 0x928   :  { %v7629_v20 = vpop.f32.mrf.mxu1 }
 0x929   :  { %3722 = vst [vmem:[%s8225_s3 + $0x360] sm:$0xff] %v7629_v20  ;;  %2726 = vxpose.xlu0.b32.cont [7/16] %v7590_v56, 128 }
 0x92a   :  { %v7636_v38 = vpop.f32.mrf.mxu1 }
 0x92b   :  { %3725 = vst [vmem:[%s8225_s3 + $0x378] sm:$0xff] %v7636_v38  ;;  %5272 = vmatprep.subr.mxu0 %v7636_v38  ;;  %5329 = vmatpush3.msra.mxu1 %v7636_v38 }
 0x92c   :  { %v7644_v32 = vpop.f32.mrf.mxu1  ;;  %5273 = vmatpush3.msra.mxu0 %v7636_v38  ;;  %5330 = vmatprep.subr.mxu1 %v8258_v46 }
 0x92d   :  { %3724 = vst [vmem:[%s8225_s3 + $0x370] sm:$0xff] %v7644_v32  ;;  %2727 = vxpose.xlu0.b32.cont [8/16] %v7584_v26, 128  ;;  %5274 = vmatprep.subr.mxu0 %v7644_v32 }
 0x92e   :  { %5331 = vmatpush3.msra.mxu1 %v7644_v32  ;;  %5275 = vmatpush3.msra.mxu0 %v7644_v32 }
 0x92f   :  { %5332 = vmatprep.subr.mxu1 %v8258_v46  ;;  %5276 = vmatprep.subr.mxu0 %v7623_v16 }
 0x930   :  { %5333 = vmatpush3.msra.mxu1 %v7623_v16  ;;  %5277 = vmatpush3.msra.mxu0 %v7623_v16 }
 0x931   :  { %5334 = vmatprep.subr.mxu1 %v8258_v46  ;;  %2728 = vxpose.xlu0.b32.cont [9/16] %v7603_v58, 128 }
 0x932   :  { %5278 = vmatprep.subr.mxu0 %v7629_v20  ;;  %5335 = vmatpush3.msra.mxu1 %v7629_v20 }
 0x933   :  { %5279 = vmatpush3.msra.mxu0 %v7629_v20  ;;  %5336 = vmatprep.subr.mxu1 %v8258_v46 }
 0x934   :  { %5280 = vmatprep.subr.mxu0 %v7610_v8  ;;  %5337 = vmatpush3.msra.mxu1 %v7610_v8 }
 0x935   :  { %5281 = vmatpush3.msra.mxu0 %v7610_v8  ;;  %5338 = vmatprep.subr.mxu1 %v8258_v46 }
 0x936   :  { %2729 = vxpose.xlu0.b32.cont [10/16] %v7597_v1, 128  ;;  %5282 = vmatprep.subr.mxu0 %v7616_v14 }
 0x937   :  { %5339 = vmatpush3.msra.mxu1 %v7616_v14  ;;  %5283 = vmatpush3.msra.mxu0 %v7616_v14 }
 0x938   :  { %5340 = vmatprep.subr.mxu1 %v8258_v46  ;;  %5284 = vmatprep.subr.mxu0 %v7597_v1 }
 0x939   :  { %5341 = vmatpush3.msra.mxu1 %v7597_v1  ;;  %5285 = vmatpush3.msra.mxu0 %v7597_v1 }
 0x93a   :  { %5342 = vmatprep.subr.mxu1 %v8258_v46  ;;  %2730 = vxpose.xlu0.b32.cont [11/16] %v7616_v14, 128 }
 0x93b   :  { %5286 = vmatprep.subr.mxu0 %v7603_v58  ;;  %5343 = vmatpush3.msra.mxu1 %v7603_v58 }
 0x93c   :  { %5287 = vmatpush3.msra.mxu0 %v7603_v58  ;;  %5344 = vmatprep.subr.mxu1 %v8258_v46 }
 0x93d   :  { %5288 = vmatprep.subr.mxu0 %v7584_v26  ;;  %5345 = vmatpush3.msra.mxu1 %v7584_v26 }
 0x93e   :  { %5289 = vmatpush3.msra.mxu0 %v7584_v26  ;;  %5346 = vmatprep.subr.mxu1 %v8258_v46 }
 0x93f   :  { %2731 = vxpose.xlu0.b32.cont [12/16] %v7610_v8, 128  ;;  %5290 = vmatprep.subr.mxu0 %v7590_v56 }
 0x940   :  { %5347 = vmatpush3.msra.mxu1 %v7590_v56  ;;  %5291 = vmatpush3.msra.mxu0 %v7590_v56 }
 0x941   :  { %5348 = vmatprep.subr.mxu1 %v8258_v46  ;;  %5292 = vmatprep.subr.mxu0 %v7571_v57 }
 0x942   :  { %5349 = vmatpush3.msra.mxu1 %v7571_v57  ;;  %5293 = vmatpush3.msra.mxu0 %v7571_v57 }
 0x943   :  { %5350 = vmatprep.subr.mxu1 %v8258_v46  ;;  %2732 = vxpose.xlu0.b32.cont [13/16] %v7629_v20, 128 }
 0x944   :  { %5294 = vmatprep.subr.mxu0 %v7577_v33  ;;  %5351 = vmatpush3.msra.mxu1 %v7577_v33 }
 0x945   :  { %5295 = vmatpush3.msra.mxu0 %v7577_v33  ;;  %5352 = vmatprep.subr.mxu1 %v8258_v46 }
 0x946   :  { %5296 = vmatprep.subr.mxu0 %v7558_v55  ;;  %5353 = vmatpush3.msra.mxu1 %v7558_v55 }
 0x947   :  { %5297 = vmatpush3.msra.mxu0 %v7558_v55  ;;  %5354 = vmatprep.subr.mxu1 %v8258_v46 }
 0x948   :  { %2733 = vxpose.xlu0.b32.cont [14/16] %v7623_v16, 128  ;;  %5298 = vmatprep.subr.mxu0 %v7564_v2 }
 0x949   :  { %5355 = vmatpush3.msra.mxu1 %v7564_v2  ;;  %5299 = vmatpush3.msra.mxu0 %v7564_v2 }
 0x94a   :  { %5356 = vmatprep.subr.mxu1 %v8258_v46  ;;  %5300 = vmatprep.subr.mxu0 %v7545_v45 }
 0x94b   :  { %5357 = vmatpush3.msra.mxu1 %v7545_v45  ;;  %5301 = vmatpush3.msra.mxu0 %v7545_v45 }
 0x94c   :  { %5358 = vmatprep.subr.mxu1 %v8258_v46  ;;  %2734 = vxpose.xlu0.b32.cont [15/16] %v7644_v32, 128 }
 0x94d   :  { %5302 = vmatprep.subr.mxu0 %v7551_v27  ;;  %5359 = vmatpush3.msra.mxu1 %v7551_v27 }
 0x94e   :  { %5303 = vmatpush3.msra.mxu0 %v7551_v27  ;;  %5361 = vmatmul.mubr.f32.vlgmr.msra.gmra.mxu1 %v7717_v36 }
 0x94f   :  { %5363 = vmatprep.subr.mxu0 %v7728_v41 }
 0x950   :  { %2735 = vxpose.xlu0.b32.end [16/16] %v7636_v38, 128 }
 0x990   :  { %v2736_v60 = vpop.trf.xlu0 }
 0x991   :  { %5304 = vmatprep.mubr.f32.mxu0 %v2736_v60 }
 0x994   :  { %v2737_v3 = vpop.trf.xlu0 }
 0x995   :  { %5305 = vmatmul.mubr.f32.vlgmr.msra.gmra.mxu0 %v2737_v3 }
 0x996   :  { %5364 = vmatpush3.msra.mxu0 %v7728_v41 }
 0x997   :  { %5365 = vmatprep.subr.mxu0 %v7736_v22 }
 0x998   :  { %v2738_v29 = vpop.trf.xlu0  ;;  %5366 = vmatpush3.msra.mxu0 %v7736_v22 }
 0x999   :  { %5307 = vmatprep.mubr.f32.mxu0 %v2738_v29  ;;  %5367 = vmatprep.subr.mxu0 %v7743_v13 }
 0x99a   :  { %5368 = vmatpush3.msra.mxu0 %v7743_v13 }
 0x99b   :  { %5369 = vmatprep.subr.mxu0 %v7750_v48 }
 0x99c   :  { %v2739_v5 = vpop.trf.xlu0  ;;  %5370 = vmatpush3.msra.mxu0 %v7750_v48 }
 0x99d   :  { %5308 = vmatmul.mubr.f32.gmra.mxu0 %v2739_v5  ;;  %5371 = vmatprep.subr.mxu0 %v7757_v49 }
 0x99e   :  { %5372 = vmatpush3.msra.mxu0 %v7757_v49 }
 0x99f   :  { %5373 = vmatprep.subr.mxu0 %v7764_v6 }
 0x9a0   :  { %v2740_v39 = vpop.trf.xlu0  ;;  %5374 = vmatpush3.msra.mxu0 %v7764_v6 }
 0x9a1   :  { %5310 = vmatprep.mubr.f32.mxu0 %v2740_v39  ;;  %5375 = vmatprep.subr.mxu0 %v7771_v28 }
 0x9a2   :  { %5376 = vmatpush3.msra.mxu0 %v7771_v28 }
 0x9a3   :  { %5377 = vmatprep.subr.mxu0 %v7778_v30 }
 0x9a4   :  { %v2741_v7 = vpop.trf.xlu0  ;;  %5378 = vmatpush3.msra.mxu0 %v7778_v30 }
 0x9a5   :  { %5311 = vmatmul.mubr.f32.gmra.mxu0 %v2741_v7  ;;  %5379 = vmatprep.subr.mxu0 %v7785_v62 }
 0x9a6   :  { %5380 = vmatpush3.msra.mxu0 %v7785_v62 }
 0x9a7   :  { %5381 = vmatprep.subr.mxu0 %v7792_v47 }
 0x9a8   :  { %v2742_v35 = vpop.trf.xlu0  ;;  %5382 = vmatpush3.msra.mxu0 %v7792_v47 }
 0x9a9   :  { %5313 = vmatprep.mubr.f32.mxu0 %v2742_v35  ;;  %5383 = vmatprep.subr.mxu0 %v7799_v9 }
 0x9aa   :  { %5384 = vmatpush3.msra.mxu0 %v7799_v9 }
 0x9ab   :  { %5385 = vmatprep.subr.mxu0 %v7806_v54 }
 0x9ac   :  { %v2743_v59 = vpop.trf.xlu0  ;;  %5386 = vmatpush3.msra.mxu0 %v7806_v54 }
 0x9ad   :  { %5314 = vmatmul.mubr.f32.gmra.mxu0 %v2743_v59  ;;  %5387 = vmatprep.subr.mxu0 %v7813_v31 }
 0x9ae   :  { %5388 = vmatpush3.msra.mxu0 %v7813_v31 }
 0x9af   :  { %5389 = vmatprep.subr.mxu0 %v7820_v61 }
 0x9b0   :  { %v2744_v17 = vpop.trf.xlu0  ;;  %5390 = vmatpush3.msra.mxu0 %v7820_v61 }
 0x9b1   :  { %5316 = vmatprep.mubr.f32.mxu0 %v2744_v17  ;;  %5391 = vmatprep.subr.mxu0 %v7827_v63 }
 0x9b2   :  { %5392 = vmatpush3.msra.mxu0 %v7827_v63 }
 0x9b3   :  { %5393 = vmatprep.subr.mxu0 %v7834_v34 }
 0x9b4   :  { %v2745_v12 = vpop.trf.xlu0  ;;  %5394 = vmatpush3.msra.mxu0 %v7834_v34 }
 0x9b5   :  { %5317 = vmatmul.mubr.f32.gmra.mxu0 %v2745_v12  ;;  %5475 = vmatprep.subr.mxu0 %v8258_v46 }
 0x9b8   :  { %v2746_v37 = vpop.trf.xlu0 }
 0x9b9   :  { %5319 = vmatprep.mubr.f32.mxu0 %v2746_v37 }
 0x9bc   :  { %v2747_v43 = vpop.trf.xlu0 }
 0x9bd   :  { %5320 = vmatmul.mubr.f32.gmra.mxu0 %v2747_v43 }
 0x9c0   :  { %v2748_v60 = vpop.trf.xlu0 }
 0x9c1   :  { %5322 = vmatprep.mubr.f32.mxu0 %v2748_v60 }
 0x9c4   :  { %v2749_v3 = vpop.trf.xlu0 }
 0x9c5   :  { %5323 = vmatmul.mubr.f32.gmra.mxu0 %v2749_v3 }
 0x9c8   :  { %v2750_v29 = vpop.trf.xlu0 }
 0x9c9   :  { %5325 = vmatprep.mubr.f32.mxu0 %v2750_v29 }
 0x9cc   :  { %v2751_v5 = vpop.trf.xlu0 }
 0x9cd   :  { %5326 = vmatmul.mubr.f32.gmra.mxu0 %v2751_v5 }
 0x9ce   :  { %5395 = vmatprep.mubr.f32.mxu0 %v7551_v27 }
 0x9d1   :  { %5396 = vmatmul.mubr.f32.vlgmr.msra.gmra.mxu0 %v7545_v45 }
 0x9d2   :  { %5398 = vmatprep.mubr.f32.mxu0 %v7564_v2 }
 0x9d5   :  { %5399 = vmatmul.mubr.f32.gmra.mxu0 %v7558_v55 }
 0x9d6   :  { %5401 = vmatprep.mubr.f32.mxu0 %v7577_v33 }
 0x9d9   :  { %5402 = vmatmul.mubr.f32.gmra.mxu0 %v7571_v57 }
 0x9da   :  { %5404 = vmatprep.mubr.f32.mxu0 %v7590_v56 }
 0x9dd   :  { %5405 = vmatmul.mubr.f32.gmra.mxu0 %v7584_v26 }
 0x9de   :  { %5407 = vmatprep.mubr.f32.mxu0 %v7603_v58 }
 0x9e1   :  { %5408 = vmatmul.mubr.f32.gmra.mxu0 %v7597_v1 }
 0x9e2   :  { %5410 = vmatprep.mubr.f32.mxu0 %v7616_v14 }
 0x9e5   :  { %5411 = vmatmul.mubr.f32.gmra.mxu0 %v7610_v8 }
 0x9e6   :  { %5413 = vmatprep.mubr.f32.mxu0 %v7629_v20 }
 0x9e9   :  { %5414 = vmatmul.mubr.f32.gmra.mxu0 %v7623_v16 }
 0x9ea   :  { %5416 = vmatprep.mubr.f32.mxu0 %v7644_v32 }
 0x9ed   :  { %5417 = vmatmul.mubr.f32.gmra.mxu0 %v7636_v38 }
 0x9ee   :  { %5507 = vmatprep.mubr.msk.f32.mxu0 %vm5631_vm0, %v8258_v46 }
 0xa0e   :  { %v2979_v45 = vpop.f32.mrf.mxu1 }
 0xa0f   :  { %v7858_v27 = vadd.f32 %v2979_v45, %v7495_v52 }
 0xa10   :  { %v5362_v55 = vpop.f32.mrf.mxu1 }
 0xa55   :  { %v5306_v2 = vpop.f32.mrf.mxu0 }
 0xa56   :  { %v7861_v57 = vadd.f32 %v5306_v2, %v7498_v23 }
 0xa57   :  { %v2818_v33 = vpop.f32.mrf.mxu0 }
 0xa58   :  { %v7864_v26 = vadd.f32 %v2818_v33, %v7501_v10 }
 0xa5d   :  { %v5309_v56 = vpop.f32.mrf.mxu0 }
 0xa5e   :  { %v7867_v1 = vadd.f32 %v5309_v56, %v7504_v0 }
 0xa5f   :  { %v2828_v58 = vpop.f32.mrf.mxu0 }
 0xa60   :  { %v7870_v8 = vadd.f32 %v2828_v58, %v7507_v50 }
 0xa65   :  { %v5312_v14 = vpop.f32.mrf.mxu0 }
 0xa66   :  { %v7873_v52 = vadd.f32 %v5312_v14, %v7510_v4  ;;  %v5603_v14 = vld [vmem:[%s8222_s0] sm:$0xff] }
 0xa67   :  { %v2838_v16 = vpop.f32.mrf.mxu0 }
 0xa68   :  { %v7876_v23 = vadd.f32 %v2838_v16, %v7513_v15  ;;  %v98_v16 = vand.u32 2147483647, %v5603_v14 }
 0xa6d   :  { %v5315_v20 = vpop.f32.mrf.mxu0 }
 0xa6e   :  { %v7879_v10 = vadd.f32 %v5315_v20, %v7516_v19  ;;  %v5604_v20 = vld [vmem:[%s8222_s0 + $0x8] sm:$0xff] }
 0xa6f   :  { %v2848_v38 = vpop.f32.mrf.mxu0 }
 0xa70   :  { %v7882_v0 = vadd.f32 %v2848_v38, %v7519_v44  ;;  %v99_v38 = vand.u32 2147483647, %v5604_v20  ;;  %v103_v20 = vand.u32 2147483647, %v7434_v42 }
 0xa75   :  { %v5318_v32 = vpop.f32.mrf.mxu0 }
 0xa76   :  { %v7885_v50 = vadd.f32 %v5318_v32, %v7522_v25  ;;  %v106_v32 = vadd.f32 %v99_v38, %v98_v16  ;;  %v104_v38 = vand.u32 2147483647, %v7717_v36 }
 0xa77   :  { %v2858_v39 = vpop.f32.mrf.mxu0 }
 0xa78   :  { %v7888_v4 = vadd.f32 %v2858_v39, %v7525_v11  ;;  %v5605_v39 = vld [vmem:[%s8222_s0 + $0x10] sm:$0xff] }
 0xa7d   :  { %v5321_v7 = vpop.f32.mrf.mxu0 }
 0xa7e   :  { %v7891_v15 = vadd.f32 %v5321_v7, %v7528_v18  ;;  %v100_v7 = vand.u32 2147483647, %v5605_v39 }
 0xa7f   :  { %v2868_v35 = vpop.f32.mrf.mxu0 }
 0xa80   :  { %v7894_v19 = vadd.f32 %v2868_v35, %v7531_v40  ;;  %v96_v35 = vld [vmem:[%s8222_s0 + $0x38] sm:$0xff] }
 0xa81   :  { %v105_v39 = vand.u32 2147483647, %v96_v35 }
 0xa85   :  { %v5324_v59 = vpop.f32.mrf.mxu0 }
 0xa86   :  { %v7897_v44 = vadd.f32 %v5324_v59, %v7534_v21  ;;  %v107_v59 = vadd.f32 %v106_v32, %v100_v7 }
 0xa87   :  { %v2878_v17 = vpop.f32.mrf.mxu0 }
 0xa88   :  { %v7900_v25 = vadd.f32 %v2878_v17, %v7537_v51  ;;  %v5606_v17 = vld [vmem:[%s8222_s0 + $0x18] sm:$0xff] }
 0xa8d   :  { %v5327_v12 = vpop.f32.mrf.mxu0 }
 0xa8e   :  { %v7903_v11 = vadd.f32 %v5327_v12, %v7540_v24  ;;  %v101_v12 = vand.u32 2147483647, %v5606_v17 }
 0xa8f   :  { %v2888_v37 = vpop.f32.mrf.mxu0 }
 0xa90   :  { %8268 = vst [vmem:[#allocation7_spill] sm:$0xff] %v7903_v11  ;;  %v7906_v18 = vadd.f32 %v2888_v37, %v7543_v53  ;;  %v5607_v37 = vld [vmem:[%s8222_s0 + $0x20] sm:$0xff] }
 0xa91   :  { %v7908_v43 = vpop.f32.mrf.mxu0  ;;  %v102_v14 = vand.u32 2147483647, %v5607_v37 }
 0xa92   :  { %8269 = vst [vmem:[#allocation8_spill] sm:$0xff] %v7906_v18  ;;  %3727 = vst [vmem:[%s8225_s3 + $0x388] sm:$0xff] %v7908_v43 }
 0xa93   :  { %v7914_v40 = vpop.f32.mrf.mxu0 }
 0xa94   :  { %3726 = vst [vmem:[%s8225_s3 + $0x380] sm:$0xff] %v7914_v40  ;;  %3146 = vxpose.xlu1.b32.start [1/16] %v7914_v40, 128 }
 0xa95   :  { %v7921_v21 = vpop.f32.mrf.mxu0 }
 0xa96   :  { %3729 = vst [vmem:[%s8225_s3 + $0x398] sm:$0xff] %v7921_v21 }
 0xa97   :  { %v7927_v51 = vpop.f32.mrf.mxu0 }
 0xa98   :  { %3728 = vst [vmem:[%s8225_s3 + $0x390] sm:$0xff] %v7927_v51  ;;  %3147 = vxpose.xlu1.b32.cont [2/16] %v7908_v43, 128 }
 0xa99   :  { %v7934_v24 = vpop.f32.mrf.mxu0 }
 0xa9a   :  { %3731 = vst [vmem:[%s8225_s3 + $0x3a8] sm:$0xff] %v7934_v24 }
 0xa9b   :  { %v7940_v53 = vpop.f32.mrf.mxu0 }
 0xa9c   :  { %3730 = vst [vmem:[%s8225_s3 + $0x3a0] sm:$0xff] %v7940_v53  ;;  %3148 = vxpose.xlu1.b32.cont [3/16] %v7927_v51, 128 }
 0xa9d   :  { %v7947_v60 = vpop.f32.mrf.mxu0 }
 0xa9e   :  { %3733 = vst [vmem:[%s8225_s3 + $0x3b8] sm:$0xff] %v7947_v60 }
 0xa9f   :  { %v7953_v3 = vpop.f32.mrf.mxu0 }
 0xaa0   :  { %3732 = vst [vmem:[%s8225_s3 + $0x3b0] sm:$0xff] %v7953_v3  ;;  %3149 = vxpose.xlu1.b32.cont [4/16] %v7921_v21, 128 }
 0xaa1   :  { %v7960_v29 = vpop.f32.mrf.mxu0 }
 0xaa2   :  { %3735 = vst [vmem:[%s8225_s3 + $0x3c8] sm:$0xff] %v7960_v29 }
 0xaa3   :  { %v7966_v5 = vpop.f32.mrf.mxu0 }
 0xaa4   :  { %3734 = vst [vmem:[%s8225_s3 + $0x3c0] sm:$0xff] %v7966_v5  ;;  %3150 = vxpose.xlu1.b32.cont [5/16] %v7940_v53, 128 }
 0xaa5   :  { %v7973_v45 = vpop.f32.mrf.mxu0 }
 0xaa6   :  { %3737 = vst [vmem:[%s8225_s3 + $0x3d8] sm:$0xff] %v7973_v45 }
 0xaa7   :  { %v7979_v55 = vpop.f32.mrf.mxu0 }
 0xaa8   :  { %3736 = vst [vmem:[%s8225_s3 + $0x3d0] sm:$0xff] %v7979_v55  ;;  %3151 = vxpose.xlu1.b32.cont [6/16] %v7934_v24, 128 }
 0xaa9   :  { %v7986_v2 = vpop.f32.mrf.mxu0 }
 0xaaa   :  { %3739 = vst [vmem:[%s8225_s3 + $0x3e8] sm:$0xff] %v7986_v2 }
 0xaab   :  { %v7992_v33 = vpop.f32.mrf.mxu0 }
 0xaac   :  { %3738 = vst [vmem:[%s8225_s3 + $0x3e0] sm:$0xff] %v7992_v33  ;;  %3152 = vxpose.xlu1.b32.cont [7/16] %v7953_v3, 128 }
 0xaad   :  { %v7999_v56 = vpop.f32.mrf.mxu0 }
 0xaae   :  { %3741 = vst [vmem:[%s8225_s3 + $0x3f8] sm:$0xff] %v7999_v56  ;;  %5419 = vmatprep.subr.mxu1 %v7999_v56  ;;  %5476 = vmatpush3.msra.mxu0 %v7999_v56 }
 0xaaf   :  { %v8007_v58 = vpop.f32.mrf.mxu0  ;;  %5420 = vmatpush3.msra.mxu1 %v7999_v56  ;;  %5477 = vmatprep.subr.mxu0 %v8258_v46 }
 0xab0   :  { %3740 = vst [vmem:[%s8225_s3 + $0x3f0] sm:$0xff] %v8007_v58  ;;  %3153 = vxpose.xlu1.b32.cont [8/16] %v7947_v60, 128  ;;  %5421 = vmatprep.subr.mxu1 %v8007_v58 }
 0xab1   :  { %5478 = vmatpush3.msra.mxu0 %v8007_v58  ;;  %5422 = vmatpush3.msra.mxu1 %v8007_v58 }
 0xab2   :  { %5479 = vmatprep.subr.mxu0 %v8258_v46  ;;  %5423 = vmatprep.subr.mxu1 %v7986_v2 }
 0xab3   :  { %5480 = vmatpush3.msra.mxu0 %v7986_v2  ;;  %5424 = vmatpush3.msra.mxu1 %v7986_v2 }
 0xab4   :  { %5481 = vmatprep.subr.mxu0 %v8258_v46  ;;  %3154 = vxpose.xlu1.b32.cont [9/16] %v7966_v5, 128 }
 0xab5   :  { %5425 = vmatprep.subr.mxu1 %v7992_v33  ;;  %5482 = vmatpush3.msra.mxu0 %v7992_v33 }
 0xab6   :  { %5426 = vmatpush3.msra.mxu1 %v7992_v33  ;;  %5483 = vmatprep.subr.mxu0 %v8258_v46 }
 0xab7   :  { %5427 = vmatprep.subr.mxu1 %v7973_v45  ;;  %5484 = vmatpush3.msra.mxu0 %v7973_v45 }
 0xab8   :  { %5428 = vmatpush3.msra.mxu1 %v7973_v45  ;;  %5485 = vmatprep.subr.mxu0 %v8258_v46 }
 0xab9   :  { %3155 = vxpose.xlu1.b32.cont [10/16] %v7960_v29, 128  ;;  %5429 = vmatprep.subr.mxu1 %v7979_v55 }
 0xaba   :  { %5486 = vmatpush3.msra.mxu0 %v7979_v55  ;;  %5430 = vmatpush3.msra.mxu1 %v7979_v55 }
 0xabb   :  { %5487 = vmatprep.subr.mxu0 %v8258_v46  ;;  %5431 = vmatprep.subr.mxu1 %v7960_v29 }
 0xabc   :  { %5488 = vmatpush3.msra.mxu0 %v7960_v29  ;;  %5432 = vmatpush3.msra.mxu1 %v7960_v29 }
 0xabd   :  { %5489 = vmatprep.subr.mxu0 %v8258_v46  ;;  %3156 = vxpose.xlu1.b32.cont [11/16] %v7979_v55, 128 }
 0xabe   :  { %5433 = vmatprep.subr.mxu1 %v7966_v5  ;;  %5490 = vmatpush3.msra.mxu0 %v7966_v5 }
 0xabf   :  { %5434 = vmatpush3.msra.mxu1 %v7966_v5  ;;  %5491 = vmatprep.subr.mxu0 %v8258_v46 }
 0xac0   :  { %5435 = vmatprep.subr.mxu1 %v7947_v60  ;;  %5492 = vmatpush3.msra.mxu0 %v7947_v60 }
 0xac1   :  { %5436 = vmatpush3.msra.mxu1 %v7947_v60  ;;  %5493 = vmatprep.subr.mxu0 %v8258_v46 }
 0xac2   :  { %3157 = vxpose.xlu1.b32.cont [12/16] %v7973_v45, 128  ;;  %5437 = vmatprep.subr.mxu1 %v7953_v3 }
 0xac3   :  { %5494 = vmatpush3.msra.mxu0 %v7953_v3  ;;  %5438 = vmatpush3.msra.mxu1 %v7953_v3 }
 0xac4   :  { %5495 = vmatprep.subr.mxu0 %v8258_v46  ;;  %5439 = vmatprep.subr.mxu1 %v7934_v24 }
 0xac5   :  { %5496 = vmatpush3.msra.mxu0 %v7934_v24  ;;  %5440 = vmatpush3.msra.mxu1 %v7934_v24 }
 0xac6   :  { %5497 = vmatprep.subr.mxu0 %v8258_v46  ;;  %3158 = vxpose.xlu1.b32.cont [13/16] %v7992_v33, 128 }
 0xac7   :  { %5441 = vmatprep.subr.mxu1 %v7940_v53  ;;  %5498 = vmatpush3.msra.mxu0 %v7940_v53 }
 0xac8   :  { %5442 = vmatpush3.msra.mxu1 %v7940_v53  ;;  %5499 = vmatprep.subr.mxu0 %v8258_v46 }
 0xac9   :  { %5443 = vmatprep.subr.mxu1 %v7921_v21  ;;  %5500 = vmatpush3.msra.mxu0 %v7921_v21 }
 0xaca   :  { %5444 = vmatpush3.msra.mxu1 %v7921_v21  ;;  %5501 = vmatprep.subr.mxu0 %v8258_v46 }
 0xacb   :  { %3159 = vxpose.xlu1.b32.cont [14/16] %v7986_v2, 128  ;;  %5445 = vmatprep.subr.mxu1 %v7927_v51 }
 0xacc   :  { %5502 = vmatpush3.msra.mxu0 %v7927_v51  ;;  %5446 = vmatpush3.msra.mxu1 %v7927_v51 }
 0xacd   :  { %5503 = vmatprep.subr.mxu0 %v8258_v46  ;;  %5447 = vmatprep.subr.mxu1 %v7908_v43 }
 0xace   :  { %5504 = vmatpush3.msra.mxu0 %v7908_v43  ;;  %5448 = vmatpush3.msra.mxu1 %v7908_v43 }
 0xacf   :  { %5505 = vmatprep.subr.mxu0 %v8258_v46  ;;  %3160 = vxpose.xlu1.b32.cont [15/16] %v8007_v58, 128  ;;  %v108_v46 = vadd.f32 %v107_v59, %v101_v12 }
 0xad0   :  { %5449 = vmatprep.subr.mxu1 %v7914_v40  ;;  %5506 = vmatpush3.msra.mxu0 %v7914_v40 }
 0xad1   :  { %5450 = vmatpush3.msra.mxu1 %v7914_v40  ;;  %5508 = vmatmul.mubr.f32.vlgmr.msra.gmra.mxu0 %v96_v35  ;;  %v109_v16 = vadd.f32 %v108_v46, %v102_v14 }
 0xad2   :  { %5510 = vmatprep.subr.mxu1 %v7728_v41 }
 0xad3   :  { %3161 = vxpose.xlu1.b32.end [16/16] %v7999_v56, 128  ;;  %v110_v32 = vadd.f32 %v109_v16, %v103_v20 }
 0xad5   :  { %v111_v7 = vadd.f32 %v110_v32, %v104_v38 }
 0xad7   :  { %v112_v17 = vadd.f32 %v111_v7, %v105_v39 }
 0xad9   :  { %3592 = vadd.xlane.f32.xlu0 %v112_v17 }
 0xb13   :  { %v3162_v18 = vpop.trf.xlu1 }
 0xb14   :  { %5451 = vmatprep.mubr.f32.mxu1 %v3162_v18 }
 0xb17   :  { %v3163_v11 = vpop.trf.xlu1 }
 0xb18   :  { %5452 = vmatmul.mubr.f32.vlgmr.msra.gmra.mxu1 %v3163_v11 }
 0xb19   :  { %5511 = vmatpush3.msra.mxu1 %v7728_v41 }
 0xb1a   :  { %5512 = vmatprep.subr.mxu1 %v7736_v22 }
 0xb1b   :  { %v3164_v59 = vpop.trf.xlu1  ;;  %5513 = vmatpush3.msra.mxu1 %v7736_v22 }
 0xb1c   :  { %5454 = vmatprep.mubr.f32.mxu1 %v3164_v59  ;;  %5514 = vmatprep.subr.mxu1 %v7743_v13 }
 0xb1d   :  { %5515 = vmatpush3.msra.mxu1 %v7743_v13 }
 0xb1e   :  { %5516 = vmatprep.subr.mxu1 %v7750_v48 }
 0xb1f   :  { %v3165_v42 = vpop.trf.xlu1  ;;  %5517 = vmatpush3.msra.mxu1 %v7750_v48 }
 0xb20   :  { %5455 = vmatmul.mubr.f32.gmra.mxu1 %v3165_v42  ;;  %5518 = vmatprep.subr.mxu1 %v7757_v49 }
 0xb21   :  { %5519 = vmatpush3.msra.mxu1 %v7757_v49 }
 0xb22   :  { %5520 = vmatprep.subr.mxu1 %v7764_v6 }
 0xb23   :  { %v3166_v36 = vpop.trf.xlu1  ;;  %5521 = vmatpush3.msra.mxu1 %v7764_v6 }
 0xb24   :  { %5457 = vmatprep.mubr.f32.mxu1 %v3166_v36  ;;  %5522 = vmatprep.subr.mxu1 %v7771_v28 }
 0xb25   :  { %5523 = vmatpush3.msra.mxu1 %v7771_v28 }
 0xb26   :  { %5524 = vmatprep.subr.mxu1 %v7778_v30 }
 0xb27   :  { %v3167_v41 = vpop.trf.xlu1  ;;  %5525 = vmatpush3.msra.mxu1 %v7778_v30 }
 0xb28   :  { %5458 = vmatmul.mubr.f32.gmra.mxu1 %v3167_v41  ;;  %5526 = vmatprep.subr.mxu1 %v7785_v62 }
 0xb29   :  { %5527 = vmatpush3.msra.mxu1 %v7785_v62 }
 0xb2a   :  { %5528 = vmatprep.subr.mxu1 %v7792_v47 }
 0xb2b   :  { %v3168_v22 = vpop.trf.xlu1  ;;  %5529 = vmatpush3.msra.mxu1 %v7792_v47 }
 0xb2c   :  { %5460 = vmatprep.mubr.f32.mxu1 %v3168_v22  ;;  %5530 = vmatprep.subr.mxu1 %v7799_v9 }
 0xb2d   :  { %5531 = vmatpush3.msra.mxu1 %v7799_v9 }
 0xb2e   :  { %5532 = vmatprep.subr.mxu1 %v7806_v54 }
 0xb2f   :  { %v3169_v13 = vpop.trf.xlu1  ;;  %5533 = vmatpush3.msra.mxu1 %v7806_v54 }
 0xb30   :  { %5461 = vmatmul.mubr.f32.gmra.mxu1 %v3169_v13  ;;  %5534 = vmatprep.subr.mxu1 %v7813_v31 }
 0xb31   :  { %5535 = vmatpush3.msra.mxu1 %v7813_v31 }
 0xb32   :  { %5536 = vmatprep.subr.mxu1 %v7820_v61 }
 0xb33   :  { %v3170_v48 = vpop.trf.xlu1  ;;  %5537 = vmatpush3.msra.mxu1 %v7820_v61 }
 0xb34   :  { %5463 = vmatprep.mubr.f32.mxu1 %v3170_v48  ;;  %5538 = vmatprep.subr.mxu1 %v7827_v63 }
 0xb35   :  { %5539 = vmatpush3.msra.mxu1 %v7827_v63 }
 0xb36   :  { %5540 = vmatprep.subr.mxu1 %v7834_v34 }
 0xb37   :  { %v3171_v49 = vpop.trf.xlu1  ;;  %5541 = vmatpush3.msra.mxu1 %v7834_v34 }
 0xb38   :  { %5464 = vmatmul.mubr.f32.gmra.mxu1 %v3171_v49 }
 0xb3b   :  { %v3172_v6 = vpop.trf.xlu1 }
 0xb3c   :  { %5466 = vmatprep.mubr.f32.mxu1 %v3172_v6 }
 0xb3f   :  { %v3173_v28 = vpop.trf.xlu1 }
 0xb40   :  { %5467 = vmatmul.mubr.f32.gmra.mxu1 %v3173_v28 }
 0xb43   :  { %v3174_v30 = vpop.trf.xlu1 }
 0xb44   :  { %5469 = vmatprep.mubr.f32.mxu1 %v3174_v30 }
 0xb47   :  { %v3175_v62 = vpop.trf.xlu1 }
 0xb48   :  { %5470 = vmatmul.mubr.f32.gmra.mxu1 %v3175_v62 }
 0xb4b   :  { %v3176_v47 = vpop.trf.xlu1 }
 0xb4c   :  { %5472 = vmatprep.mubr.f32.mxu1 %v3176_v47 }
 0xb4f   :  { %v3177_v9 = vpop.trf.xlu1 }
 0xb50   :  { %5473 = vmatmul.mubr.f32.gmra.mxu1 %v3177_v9 }
 0xb51   :  { %5542 = vmatprep.mubr.f32.mxu1 %v7914_v40 }
 0xb54   :  { %5543 = vmatmul.mubr.f32.vlgmr.msra.gmra.mxu1 %v7908_v43 }
 0xb55   :  { %5545 = vmatprep.mubr.f32.mxu1 %v7927_v51 }
 0xb58   :  { %5546 = vmatmul.mubr.f32.gmra.mxu1 %v7921_v21 }
 0xb59   :  { %5548 = vmatprep.mubr.f32.mxu1 %v7940_v53 }
 0xb5c   :  { %5549 = vmatmul.mubr.f32.gmra.mxu1 %v7934_v24 }
 0xb5d   :  { %5551 = vmatprep.mubr.f32.mxu1 %v7953_v3 }
 0xb60   :  { %5552 = vmatmul.mubr.f32.gmra.mxu1 %v7947_v60 }
 0xb61   :  { %5554 = vmatprep.mubr.f32.mxu1 %v7966_v5 }
 0xb62   :  { %v3593_v54 = vpop.xlane.xlu0 %3592 }
 0xb63   :  { %v3594_v31 = vrot.slane %v3593_v54, 4 }
 0xb64   :  { %5555 = vmatmul.mubr.f32.gmra.mxu1 %v7960_v29 }
 0xb65   :  { %5557 = vmatprep.mubr.f32.mxu1 %v7979_v55  ;;  %v3595_v61 = vadd.f32 %v3594_v31, %v3593_v54 }
 0xb67   :  { %v3596_v63 = vrot.slane %v3595_v61, 2 }
 0xb68   :  { %5558 = vmatmul.mubr.f32.gmra.mxu1 %v7973_v45 }
 0xb69   :  { %5560 = vmatprep.mubr.f32.mxu1 %v7992_v33  ;;  %v3597_v34 = vadd.f32 %v3596_v63, %v3595_v61 }
 0xb6b   :  { %v3598_v11 = vrot.slane %v3597_v34, 1 }
 0xb6c   :  { %5561 = vmatmul.mubr.f32.gmra.mxu1 %v7986_v2 }
 0xb6d   :  { %5563 = vmatprep.mubr.f32.mxu1 %v8007_v58  ;;  %v3599_v18 = vadd.f32 %v3598_v11, %v3597_v34 }
 0xb6f   :  { %5566 = vpush %v3599_v18 }
 0xb70   :  { %5564 = vmatmul.mubr.f32.gmra.mxu1 %v7999_v56 }
 0xb91   :  { %v3405_v43 = vpop.f32.mrf.mxu0 }
 0xb92   :  { %v3409_v40 = vadd.f32 %v3405_v43, %v7858_v27 }
 0xb93   :  { %v5509_v21 = vpop.f32.mrf.mxu0 }
 0xb94   :  { %3587 = vst [vmem:[%s8227_s5] sm:$0xff] %v3409_v40 }
 0xba0   :  { %s5567_s7 = spop %5566 }
 0xba1   :  { %v3601_v51 = vstv %s5567_s7 }
 0xba2   :  { %3603 = vst.msk [vmem:[#allocation4] sm:$0x1] %vm3602_vm1, %v3601_v51 }
 0xba3   :  { %5619 = shalt.err (!%p5616_p4)
}
 0xba4   :  { %3619 = dma.vmem_to_hbm [thread:$0]  %s3617_s9, 16, %s8228_s6, [#allocation5]  }
 0xbd8   :  { %v5453_v27 = vpop.f32.mrf.mxu1 }
 0xbd9   :  { %v3324_v24 = vadd.f32 %v5453_v27, %v7861_v57 }
 0xbda   :  { %v3244_v53 = vpop.f32.mrf.mxu1 }
 0xbdb   :  { %3572 = vst [vmem:[%s8226_s4 + $0x8] sm:$0xff] %v3324_v24  ;;  %v3323_v60 = vadd.f32 %v3244_v53, %v7864_v26 }
 0xbdd   :  { %3571 = vst [vmem:[%s8226_s4] sm:$0xff] %v3323_v60 }
 0xbe0   :  { %v5456_v3 = vpop.f32.mrf.mxu1 }
 0xbe1   :  { %v3326_v29 = vadd.f32 %v5456_v3, %v7867_v1 }
 0xbe2   :  { %v3254_v5 = vpop.f32.mrf.mxu1 }
 0xbe3   :  { %3574 = vst [vmem:[%s8226_s4 + $0x18] sm:$0xff] %v3326_v29  ;;  %v3325_v57 = vadd.f32 %v3254_v5, %v7870_v8 }
 0xbe5   :  { %3573 = vst [vmem:[%s8226_s4 + $0x10] sm:$0xff] %v3325_v57 }
 0xbe8   :  { %v5459_v45 = vpop.f32.mrf.mxu1 }
 0xbe9   :  { %v3328_v26 = vadd.f32 %v5459_v45, %v7873_v52 }
 0xbea   :  { %v3264_v55 = vpop.f32.mrf.mxu1 }
 0xbeb   :  { %3576 = vst [vmem:[%s8226_s4 + $0x28] sm:$0xff] %v3328_v26  ;;  %v3327_v1 = vadd.f32 %v3264_v55, %v7876_v23 }
 0xbed   :  { %3575 = vst [vmem:[%s8226_s4 + $0x20] sm:$0xff] %v3327_v1 }
 0xbf0   :  { %v5462_v2 = vpop.f32.mrf.mxu1 }
 0xbf1   :  { %v3330_v8 = vadd.f32 %v5462_v2, %v7879_v10 }
 0xbf2   :  { %v3274_v33 = vpop.f32.mrf.mxu1 }
 0xbf3   :  { %3578 = vst [vmem:[%s8226_s4 + $0x38] sm:$0xff] %v3330_v8  ;;  %v3329_v52 = vadd.f32 %v3274_v33, %v7882_v0 }
 0xbf5   :  { %3577 = vst [vmem:[%s8226_s4 + $0x30] sm:$0xff] %v3329_v52 }
 0xbf8   :  { %v5465_v56 = vpop.f32.mrf.mxu1 }
 0xbf9   :  { %v3332_v23 = vadd.f32 %v5465_v56, %v7885_v50 }
 0xbfa   :  { %v3284_v58 = vpop.f32.mrf.mxu1 }
 0xbfb   :  { %3580 = vst [vmem:[%s8226_s4 + $0x48] sm:$0xff] %v3332_v23  ;;  %v3331_v10 = vadd.f32 %v3284_v58, %v7888_v4 }
 0xbfd   :  { %3579 = vst [vmem:[%s8226_s4 + $0x40] sm:$0xff] %v3331_v10 }
 0xc00   :  { %v5468_v35 = vpop.f32.mrf.mxu1 }
 0xc01   :  { %v3334_v0 = vadd.f32 %v5468_v35, %v7891_v15 }
 0xc02   :  { %v3294_v12 = vpop.f32.mrf.mxu1 }
 0xc03   :  { %3582 = vst [vmem:[%s8226_s4 + $0x58] sm:$0xff] %v3334_v0  ;;  %v3333_v50 = vadd.f32 %v3294_v12, %v7894_v19  ;;  %v8270_v19 = vld [vmem:[#allocation7_spill] sm:$0xff] }
 0xc05   :  { %3581 = vst [vmem:[%s8226_s4 + $0x50] sm:$0xff] %v3333_v50 }
 0xc08   :  { %v5471_v46 = vpop.f32.mrf.mxu1 }
 0xc09   :  { %v3336_v4 = vadd.f32 %v5471_v46, %v7897_v44  ;;  %v8271_v44 = vld [vmem:[#allocation8_spill] sm:$0xff] }
 0xc0a   :  { %v3304_v37 = vpop.f32.mrf.mxu1 }
 0xc0b   :  { %3584 = vst [vmem:[%s8226_s4 + $0x68] sm:$0xff] %v3336_v4  ;;  %v3335_v15 = vadd.f32 %v3304_v37, %v7900_v25 }
 0xc0d   :  { %3583 = vst [vmem:[%s8226_s4 + $0x60] sm:$0xff] %v3335_v15 }
 0xc10   :  { %v5474_v14 = vpop.f32.mrf.mxu1 }
 0xc11   :  { %v3338_v16 = vadd.f32 %v5474_v14, %v8270_v19 }
 0xc12   :  { %v3314_v20 = vpop.f32.mrf.mxu1 }
 0xc13   :  { %3586 = vst [vmem:[%s8226_s4 + $0x78] sm:$0xff] %v3338_v16  ;;  %v3337_v38 = vadd.f32 %v3314_v20, %v8271_v44 }
 0xc14   :  { %v5544_v32 = vpop.f32.mrf.mxu1 }
 0xc15   :  { %3585 = vst [vmem:[%s8226_s4 + $0x70] sm:$0xff] %v3337_v38 }
 0xc16   :  { %v3476_v25 = vpop.f32.mrf.mxu1 }
 0xc18   :  { %v5547_v39 = vpop.f32.mrf.mxu1 }
 0xc1a   :  { %v3486_v7 = vpop.f32.mrf.mxu1 }
 0xc1c   :  { %v5550_v17 = vpop.f32.mrf.mxu1 }
 0xc1e   :  { %v3496_v59 = vpop.f32.mrf.mxu1 }
 0xc20   :  { %v5553_v42 = vpop.f32.mrf.mxu1 }
 0xc22   :  { %v3506_v36 = vpop.f32.mrf.mxu1 }
 0xc24   :  { %v5556_v41 = vpop.f32.mrf.mxu1 }
 0xc26   :  { %v3516_v22 = vpop.f32.mrf.mxu1 }
 0xc28   :  { %v5559_v13 = vpop.f32.mrf.mxu1 }
 0xc2a   :  { %v3526_v48 = vpop.f32.mrf.mxu1 }
 0xc2c   :  { %v5562_v49 = vpop.f32.mrf.mxu1 }
 0xc2e   :  { %v3536_v6 = vpop.f32.mrf.mxu1 }
 0xc30   :  { %v5565_v28 = vpop.f32.mrf.mxu1 }
 0xc32   :  { %v3546_v30 = vpop.f32.mrf.mxu1 }
 0xc33   :  { %5628 = dma.done.wait [#allocation5], 16  }
 0xc34   :  { %5629 = vsyncadd [#allocation5], 4294967280 }
 0xc35   :  { %3629 = vsyncpa [#allocation5], 1 }

</bundles_post_ra>
